<compile_context>
chip_gen: v5e
topology: v5e:2x2
jax: 0.10.0
libtpu: 0.0.40
codegen_flags: <defaults>
</compile_context>

<pallas_src>
import functools
import math

import jax
import jax.numpy as jnp
import numpy as np
from jax import lax
from jax.experimental import pallas as pl
from jax.experimental.pallas import tpu as pltpu

EPS = 1e-5
LANE = 128                      # TPU lane width; channel padding target
CONV_DTYPE = jnp.bfloat16       # MXU operand dtype (accumulation stays f32)


def _round_up(x, m):
    return (x + m - 1) // m * m


# ----------------------------------------------------------------------------
# Fused conv (+ optional input BN+ReLU, + optional residual) + BN partial stats
# ----------------------------------------------------------------------------
def _make_conv_kernel(*, th, w_sz, kh_sz, kw_sz, apply_affine, add_residual, n_h):
    def kernel(*refs):
        it = iter(refs)
        x_ref = next(it)                               # (1, H, W, Cin_p)
        w_ref = next(it)                               # (KH, KW, Cin_p, Cout_p) bf16
        sb_ref = next(it) if apply_affine else None    # (2, Cin_p) f32 folded BN
        r_ref = next(it) if add_residual else None     # (1, TH, W, Cout_p)
        t_ref = next(it)                               # (1, TH, W, Cout_p) f32
        stats_ref = next(it)                           # (1, 1, 2, Cout_p) f32
        xs_ref = next(it)                              # VMEM (TH+2, W+2, Cin_p) bf16
        acc_ref = next(it)                             # VMEM (TH*W, Cout_p) f32

        i = pl.program_id(1)

        # -- build the zero-padded (and optionally activated) input tile in VMEM
        xs_ref[...] = jnp.zeros_like(xs_ref)

        def put_rows(dst_row, src_row, nrows):
            v = x_ref[0, pl.ds(src_row, nrows), :, :]
            if apply_affine:   # producer's BN+ReLU fused into the load path
                v = v.astype(jnp.float32) * sb_ref[0:1, :] + sb_ref[1:2, :]
                v = jnp.maximum(v, 0.0)
            xs_ref[dst_row:dst_row + nrows, 1:w_sz + 1, :] = v.astype(xs_ref.dtype)

        put_rows(1, i * th, th)                        # tile body

        @pl.when(i > 0)
        def _():
            put_rows(0, i * th - 1, 1)                 # top halo row

        @pl.when(i < n_h - 1)
        def _():
            put_rows(th + 1, (i + 1) * th, 1)          # bottom halo row

        # -- 3x3 conv: KH*KW shifted (TH*W, Cin_p) x (Cin_p, Cout_p) MXU matmuls
        acc_ref[...] = jnp.zeros_like(acc_ref)
        for kh in range(kh_sz):
            for kw in range(kw_sz):
                patch = xs_ref[kh:kh + th, kw:kw + w_sz, :]
                patch = patch.reshape(th * w_sz, patch.shape[-1])
                acc_ref[...] += jnp.dot(patch, w_ref[kh, kw],
                                        preferred_element_type=jnp.float32)

        acc = acc_ref[...]
        if add_residual:       # residual fused into the epilogue (f32)
            acc = acc + r_ref[0].reshape(acc.shape).astype(jnp.float32)

        # -- epilogue: per-channel partial BN statistics + raw output store
        stats_ref[0, 0, 0:1, :] = jnp.sum(acc, axis=0, keepdims=True)
        stats_ref[0, 0, 1:2, :] = jnp.sum(acc * acc, axis=0, keepdims=True)
        t_ref[0] = acc.reshape(t_ref.shape[1:]).astype(t_ref.dtype)

    return kernel


def _conv_bn_stats(x, w, scale_bias=None, residual=None, *, th):
    """x: (N,H,W,Cin_p), w: (KH,KW,Cin_p,Cout_p) bf16.
    Returns (raw conv (+residual) output f32, per-tile [sum, sumsq] stats)."""
    n, h, wd, cpi = x.shape
    kh, kw, _, cpo = w.shape
    n_h = h // th

    kernel = _make_conv_kernel(
        th=th, w_sz=wd, kh_sz=kh, kw_sz=kw,
        apply_affine=scale_bias is not None,
        add_residual=residual is not None, n_h=n_h)

    in_specs = [
        pl.BlockSpec((1, h, wd, cpi), lambda nn, ii: (nn, 0, 0, 0)),       # resident per image
        pl.BlockSpec((kh, kw, cpi, cpo), lambda nn, ii: (0, 0, 0, 0)),     # weights resident
    ]
    args = [x, w]
    if scale_bias is not None:
        in_specs.append(pl.BlockSpec((2, cpi), lambda nn, ii: (0, 0)))
        args.append(scale_bias)
    if residual is not None:
        in_specs.append(pl.BlockSpec((1, th, wd, cpo), lambda nn, ii: (nn, ii, 0, 0)))
        args.append(residual)

    out_shape = (
        jax.ShapeDtypeStruct((n, h, wd, cpo), jnp.float32),
        jax.ShapeDtypeStruct((n, n_h, 2, cpo), jnp.float32),
    )
    out_specs = (
        pl.BlockSpec((1, th, wd, cpo), lambda nn, ii: (nn, ii, 0, 0)),
        pl.BlockSpec((1, 1, 2, cpo), lambda nn, ii: (nn, ii, 0, 0)),
    )

    return pl.pallas_call(
        kernel,
        out_shape=out_shape,
        grid=(n, n_h),
        in_specs=in_specs,
        out_specs=out_specs,
        scratch_shapes=[
            pltpu.VMEM((th + 2, wd + 2, cpi), CONV_DTYPE),    # padded, activated tile
            pltpu.VMEM((th * wd, cpo), jnp.float32),          # f32 accumulator
        ],
        compiler_params=pltpu.CompilerParams(
            dimension_semantics=("parallel", "parallel")),
    )(*args)


# ----------------------------------------------------------------------------
# Tiled, lane-dense elementwise scale*x + bias -> ReLU (final BN2 apply)
# ----------------------------------------------------------------------------
def _affine_relu_kernel(t_ref, sb_ref, o_ref):
    y = t_ref[...] * sb_ref[0:1, :] + sb_ref[1:2, :]
    o_ref[...] = jnp.maximum(y, 0.0).astype(o_ref.dtype)


def _affine_relu(t, scale_bias, *, row_tile=256):
    n, h, w, c = t.shape
    rows = n * h * w
    tr = row_tile if rows % row_tile == 0 else rows
    t2 = t.reshape(rows, c)                                  # lane axis = 128
    out = pl.pallas_call(
        _affine_relu_kernel,
        out_shape=jax.ShapeDtypeStruct((rows, c), jnp.float32),
        grid=(rows // tr,),
        in_specs=[pl.BlockSpec((tr, c), lambda r: (r, 0)),
                  pl.BlockSpec((2, c), lambda r: (0, 0))],
        out_specs=pl.BlockSpec((tr, c), lambda r: (r, 0)),
        compiler_params=pltpu.CompilerParams(dimension_semantics=("parallel",)),
    )(t2, scale_bias)
    return out.reshape(n, h, w, c)


def _fold_bn_stats(stats, gamma_p, beta_p, count):
    """stats: (N, HT, 2, C) partial [sum, sumsq] -> folded (scale, bias)."""
    s = jnp.sum(stats, axis=(0, 1))                          # (2, C)
    mean = s[0] / count
    var = s[1] / count - mean * mean                         # biased (PyTorch BN norm)
    scale = gamma_p * lax.rsqrt(var + EPS)
    bias = beta_p - mean * scale
    return jnp.stack([scale, bias], axis=0).astype(jnp.float32)


# ----------------------------------------------------------------------------
# BasicBlock forward (Pallas) and a numerics-matched pure-JAX reference.
# ----------------------------------------------------------------------------
@functools.partial(jax.jit, static_argnames=("in_ch", "out_ch"))
def basic_block_forward(x_nchw, params, *, in_ch, out_ch):
    n, _, h, w = x_nchw.shape
    cpi = _round_up(in_ch, LANE)
    cpo = _round_up(out_ch, LANE)

    # NCHW -> NHWC with channels padded to the 128-lane width.  In a full
    # ResUNet this padded layout would be carried between blocks (one-time
    # layout plumbing, not a per-block cost).
    x = jnp.transpose(x_nchw, (0, 2, 3, 1))
    x = jnp.pad(x, ((0, 0), (0, 0), (0, 0), (0, cpi - in_ch)))
    xq = x.astype(CONV_DTYPE)                                # bf16 conv operands

    w1 = jnp.pad(params["w1"], ((0, 0), (0, 0), (0, cpi - in_ch), (0, cpo - out_ch)))
    w2 = jnp.pad(params["w2"], ((0, 0), (0, 0), (0, cpo - out_ch), (0, cpo - out_ch)))
    w1q, w2q = w1.astype(CONV_DTYPE), w2.astype(CONV_DTYPE)
    g1 = jnp.pad(params["g1"], (0, cpo - out_ch))
    b1 = jnp.pad(params["b1"], (0, cpo - out_ch))
    g2 = jnp.pad(params["g2"], (0, cpo - out_ch))
    b2 = jnp.pad(params["b2"], (0, cpo - out_ch))

    th = math.gcd(h, 8)          # row-tile height (halo handled in VMEM)
    count = n * h * w

    # conv1 + BN1 partial stats (fused epilogue)
    t1, stats1 = _conv_bn_stats(xq, w1q, th=th)
    sb1 = _fold_bn_stats(stats1, g1, b1, count)

    # conv2 with BN1+ReLU fused into its load path, residual fused into its
    # epilogue when in_ch == out_ch, BN2 partial stats fused as well.
    residual = xq if in_ch == out_ch else None
    t2, stats2 = _conv_bn_stats(t1, w2q, scale_bias=sb1, residual=residual, th=th)
    sb2 = _fold_bn_stats(stats2, g2, b2, count)

    # final BN2 + ReLU: tiled, lane-dense elementwise pass
    out = _affine_relu(t2, sb2)
    return jnp.transpose(out[..., :out_ch], (0, 3, 1, 2))    # back to NCHW


def basic_block_reference(x_nchw, params, *, in_ch, out_ch):
    """Pure-JAX reference mirroring the kernel's bf16 matmul-operand rounding."""
    def q(v):
        return v.astype(CONV_DTYPE).astype(jnp.float32)

    def conv(x, w_hwio):
        w_oihw = jnp.transpose(w_hwio, (3, 2, 0, 1))
        return lax.conv_general_dilated(
            x, w_oihw, (1, 1), "SAME",
            dimension_numbers=("NCHW", "OIHW", "NCHW"),
            preferred_element_type=jnp.float32)

    def fold(t, g, b):
        mean = jnp.mean(t, axis=(0, 2, 3))
        var = jnp.var(t, axis=(0, 2, 3))
        scale = g * lax.rsqrt(var + EPS)
        bias = b - mean * scale
        return scale.reshape(1, -1, 1, 1), bias.reshape(1, -1, 1, 1)

    xq = q(x_nchw)
    t1 = conv(xq, q(params["w1"]))
    s1, c1 = fold(t1, params["g1"], params["b1"])
    a1 = jax.nn.relu(t1 * s1 + c1)
    t2 = conv(q(a1), q(params["w2"]))
    if in_ch == out_ch:
        t2 = t2 + xq
    s2, c2 = fold(t2, params["g2"], params["b2"])
    return jax.nn.relu(t2 * s2 + c2)


def make_params(key, in_ch, out_ch, k=(3, 3)):
    k1, k2, k3, k4, k5, k6 = jax.random.split(key, 6)
    kh, kw = k
    return {
        # conv weights stored HWIO (KH, KW, Cin, Cout)
        "w1": 0.1 * jax.random.normal(k1, (kh, kw, in_ch, out_ch), jnp.float32),
        "w2": 0.1 * jax.random.normal(k2, (kh, kw, out_ch, out_ch), jnp.float32),
        "g1": 1.0 + 0.1 * jax.random.normal(k3, (out_ch,), jnp.float32),
        "b1": 0.1 * jax.random.normal(k4, (out_ch,), jnp.float32),
        "g2": 1.0 + 0.1 * jax.random.normal(k5, (out_ch,), jnp.float32),
        "b2": 0.1 * jax.random.normal(k6, (out_ch,), jnp.float32),
    }


if __name__ == "__main__":
    key = jax.random.PRNGKey(0)
    kx, kp1, kp2 = jax.random.split(key, 3)

    N, H, W = 2, 16, 16
    x = jax.random.normal(kx, (N, 4, H, W), jnp.float32)     # NCHW like PyTorch

    # bf16 matmul operands (f32 accumulation) -> slightly relaxed tolerance.
    TOL = dict(rtol=1e-2, atol=1e-2)

    # Case 1: in_channels == out_channels -> residual branch exercised.
    p1 = make_params(kp1, 4, 4)
    y1 = jax.block_until_ready(basic_block_forward(x, p1, in_ch=4, out_ch=4))
    r1 = basic_block_reference(x, p1, in_ch=4, out_ch=4)
    np.testing.assert_allclose(np.asarray(y1), np.asarray(r1), **TOL)

    # Case 2: in_channels != out_channels -> plain branch.
    p2 = make_params(kp2, 4, 8)
    y2 = jax.block_until_ready(basic_block_forward(x, p2, in_ch=4, out_ch=8))
    r2 = basic_block_reference(x, p2, in_ch=4, out_ch=8)
    np.testing.assert_allclose(np.asarray(y2), np.asarray(r2), **TOL)

    print("KERNEL_OK")
</pallas_src>

<mosaic_0001>
module attributes {stable_mosaic.version = 11 : i64} {
  func.func @kernel(%arg0: i32, %arg1: i32, %arg2: memref<1x16x16x128xbf16, #tpu.memory_space<vmem>>, %arg3: memref<3x3x128x128xbf16, #tpu.memory_space<vmem>>, %arg4: memref<1x8x16x128xf32, #tpu.memory_space<vmem>>, %arg5: memref<1x1x2x128xf32, #tpu.memory_space<vmem>>, %arg6: memref<10x18x128xbf16, #tpu.memory_space<vmem>>, %arg7: memref<128x128xf32, #tpu.memory_space<vmem>>) attributes {dimension_semantics = [#tpu.dimension_semantics<parallel>, #tpu.dimension_semantics<parallel>], iteration_bounds = array<i64: 2, 2>, scalar_prefetch = 0 : i64, scratch_operands = 2 : i64, tpu.core_type = #tpu.core_type<tc>, window_params = [{transform_indices = @transform_0, window_bounds = array<i64: 1, 16, 16, 128>}, {pipeline_mode = #tpu.pipeline_mode<synchronous>, transform_indices = @transform_1, window_bounds = array<i64: 3, 3, 128, 128>}, {transform_indices = @transform_2, window_bounds = array<i64: 1, 8, 16, 128>}, {transform_indices = @transform_3, window_bounds = array<i64: 1, 1, 2, 128>}]} {
    %cst = arith.constant 0.000000e+00 : bf16
    %0 = vector.broadcast %cst : bf16 to vector<10x18x128xbf16>
    %c0 = arith.constant 0 : index
    %c0_0 = arith.constant 0 : index
    %c0_1 = arith.constant 0 : index
    %1 = vector.load %arg6[%c0, %c0_0, %c0_1] : memref<10x18x128xbf16, #tpu.memory_space<vmem>>, vector<10x18x128xbf16>
    tpu.vector_store %arg6[%c0, %c0_0, %c0_1], %0 {strides = array<i32>} : memref<10x18x128xbf16, #tpu.memory_space<vmem>>, vector<10x18x128xbf16>,
    %c8_i32 = arith.constant 8 : i32
    %2 = arith.muli %arg1, %c8_i32 : i32
    %c0_2 = arith.constant 0 : index
    %3 = arith.index_cast %2 : i32 to index
    %c0_3 = arith.constant 0 : index
    %c0_4 = arith.constant 0 : index
    %4 = vector.load %arg2[%c0_2, %3, %c0_3, %c0_4] : memref<1x16x16x128xbf16, #tpu.memory_space<vmem>>, vector<1x8x16x128xbf16>
    %5 = vector.shape_cast %4 : vector<1x8x16x128xbf16> to vector<8x16x128xbf16>
    %c1 = arith.constant 1 : index
    %c1_5 = arith.constant 1 : index
    %c0_6 = arith.constant 0 : index
    %6 = vector.load %arg6[%c1, %c1_5, %c0_6] : memref<10x18x128xbf16, #tpu.memory_space<vmem>>, vector<8x16x128xbf16>
    tpu.vector_store %arg6[%c1, %c1_5, %c0_6], %5 {strides = array<i32>} : memref<10x18x128xbf16, #tpu.memory_space<vmem>>, vector<8x16x128xbf16>,
    %c0_i32 = arith.constant 0 : i32
    %7 = arith.cmpi sgt, %arg1, %c0_i32 : i32
    %8 = arith.extui %7 : i1 to i32
    %c0_i32_7 = arith.constant 0 : i32
    %9 = arith.cmpi ne, %8, %c0_i32_7 : i32
    scf.if %9 {
      %c8_i32_135 = arith.constant 8 : i32
      %103 = arith.muli %arg1, %c8_i32_135 : i32
      %c1_i32_136 = arith.constant 1 : i32
      %104 = arith.subi %103, %c1_i32_136 : i32
      %c0_137 = arith.constant 0 : index
      %105 = arith.index_cast %104 : i32 to index
      %c0_138 = arith.constant 0 : index
      %c0_139 = arith.constant 0 : index
      %106 = vector.load %arg2[%c0_137, %105, %c0_138, %c0_139] : memref<1x16x16x128xbf16, #tpu.memory_space<vmem>>, vector<1x1x16x128xbf16>
      %107 = vector.shape_cast %106 : vector<1x1x16x128xbf16> to vector<1x16x128xbf16>
      %c0_140 = arith.constant 0 : index
      %c1_141 = arith.constant 1 : index
      %c0_142 = arith.constant 0 : index
      %108 = vector.load %arg6[%c0_140, %c1_141, %c0_142] : memref<10x18x128xbf16, #tpu.memory_space<vmem>>, vector<1x16x128xbf16>
      tpu.vector_store %arg6[%c0_140, %c1_141, %c0_142], %107 {strides = array<i32>} : memref<10x18x128xbf16, #tpu.memory_space<vmem>>, vector<1x16x128xbf16>,
    } else {
    }
    %c1_i32 = arith.constant 1 : i32
    %10 = arith.cmpi slt, %arg1, %c1_i32 : i32
    %11 = arith.extui %10 : i1 to i32
    %c0_i32_8 = arith.constant 0 : i32
    %12 = arith.cmpi ne, %11, %c0_i32_8 : i32
    scf.if %12 {
      %c1_i32_135 = arith.constant 1 : i32
      %103 = arith.addi %arg1, %c1_i32_135 : i32
      %c8_i32_136 = arith.constant 8 : i32
      %104 = arith.muli %103, %c8_i32_136 : i32
      %c0_137 = arith.constant 0 : index
      %105 = arith.index_cast %104 : i32 to index
      %c0_138 = arith.constant 0 : index
      %c0_139 = arith.constant 0 : index
      %106 = vector.load %arg2[%c0_137, %105, %c0_138, %c0_139] : memref<1x16x16x128xbf16, #tpu.memory_space<vmem>>, vector<1x1x16x128xbf16>
      %107 = vector.shape_cast %106 : vector<1x1x16x128xbf16> to vector<1x16x128xbf16>
      %c9 = arith.constant 9 : index
      %c1_140 = arith.constant 1 : index
      %c0_141 = arith.constant 0 : index
      %108 = vector.load %arg6[%c9, %c1_140, %c0_141] : memref<10x18x128xbf16, #tpu.memory_space<vmem>>, vector<1x16x128xbf16>
      tpu.vector_store %arg6[%c9, %c1_140, %c0_141], %107 {strides = array<i32>} : memref<10x18x128xbf16, #tpu.memory_space<vmem>>, vector<1x16x128xbf16>,
    } else {
    }
    %cst_9 = arith.constant 0.000000e+00 : f32
    %13 = vector.broadcast %cst_9 : f32 to vector<128x128xf32>
    %c0_10 = arith.constant 0 : index
    %c0_11 = arith.constant 0 : index
    %14 = vector.load %arg7[%c0_10, %c0_11] : memref<128x128xf32, #tpu.memory_space<vmem>>, vector<128x128xf32>
    tpu.vector_store %arg7[%c0_10, %c0_11], %13 {strides = array<i32>} : memref<128x128xf32, #tpu.memory_space<vmem>>, vector<128x128xf32>,
    %c0_12 = arith.constant 0 : index
    %c0_13 = arith.constant 0 : index
    %c0_14 = arith.constant 0 : index
    %15 = vector.load %arg6[%c0_12, %c0_13, %c0_14] : memref<10x18x128xbf16, #tpu.memory_space<vmem>>, vector<8x16x128xbf16>
    %16 = vector.shape_cast %15 : vector<8x16x128xbf16> to vector<128x128xbf16>
    %c0_15 = arith.constant 0 : index
    %c0_16 = arith.constant 0 : index
    %17 = vector.load %arg7[%c0_15, %c0_16] : memref<128x128xf32, #tpu.memory_space<vmem>>, vector<128x128xf32>
    %c0_17 = arith.constant 0 : index
    %c0_18 = arith.constant 0 : index
    %c0_19 = arith.constant 0 : index
    %c0_20 = arith.constant 0 : index
    %18 = vector.load %arg3[%c0_17, %c0_18, %c0_19, %c0_20] : memref<3x3x128x128xbf16, #tpu.memory_space<vmem>>, vector<1x1x128x128xbf16>
    %19 = vector.shape_cast %18 : vector<1x1x128x128xbf16> to vector<128x128xbf16>
    %cst_21 = arith.constant dense<0.000000e+00> : vector<128x128xf32>
    %20 = tpu.matmul %16, %19, %cst_21 {dimension_numbers = #tpu.dot_dimension_numbers<[1], [0], [0], [1], [0, 0, 1, 1], [], []>} : vector<128x128xbf16>, vector<128x128xbf16>, vector<128x128xf32> -> vector<128x128xf32>
    %21 = arith.addf %17, %20 : vector<128x128xf32>
    %c0_22 = arith.constant 0 : index
    %c0_23 = arith.constant 0 : index
    %22 = vector.load %arg7[%c0_22, %c0_23] : memref<128x128xf32, #tpu.memory_space<vmem>>, vector<128x128xf32>
    tpu.vector_store %arg7[%c0_22, %c0_23], %21 {strides = array<i32>} : memref<128x128xf32, #tpu.memory_space<vmem>>, vector<128x128xf32>,
    %c0_24 = arith.constant 0 : index
    %c1_25 = arith.constant 1 : index
    %c0_26 = arith.constant 0 : index
    %23 = vector.load %arg6[%c0_24, %c1_25, %c0_26] : memref<10x18x128xbf16, #tpu.memory_space<vmem>>, vector<8x16x128xbf16>
    %24 = vector.shape_cast %23 : vector<8x16x128xbf16> to vector<128x128xbf16>
    %c0_27 = arith.constant 0 : index
    %c0_28 = arith.constant 0 : index
    %25 = vector.load %arg7[%c0_27, %c0_28] : memref<128x128xf32, #tpu.memory_space<vmem>>, vector<128x128xf32>
    %c0_29 = arith.constant 0 : index
    %c1_30 = arith.constant 1 : index
    %c0_31 = arith.constant 0 : index
    %c0_32 = arith.constant 0 : index
    %26 = vector.load %arg3[%c0_29, %c1_30, %c0_31, %c0_32] : memref<3x3x128x128xbf16, #tpu.memory_space<vmem>>, vector<1x1x128x128xbf16>
    %27 = vector.shape_cast %26 : vector<1x1x128x128xbf16> to vector<128x128xbf16>
    %cst_33 = arith.constant dense<0.000000e+00> : vector<128x128xf32>
    %28 = tpu.matmul %24, %27, %cst_33 {dimension_numbers = #tpu.dot_dimension_numbers<[1], [0], [0], [1], [0, 0, 1, 1], [], []>} : vector<128x128xbf16>, vector<128x128xbf16>, vector<128x128xf32> -> vector<128x128xf32>
    %29 = arith.addf %25, %28 : vector<128x128xf32>
    %c0_34 = arith.constant 0 : index
    %c0_35 = arith.constant 0 : index
    %30 = vector.load %arg7[%c0_34, %c0_35] : memref<128x128xf32, #tpu.memory_space<vmem>>, vector<128x128xf32>
    tpu.vector_store %arg7[%c0_34, %c0_35], %29 {strides = array<i32>} : memref<128x128xf32, #tpu.memory_space<vmem>>, vector<128x128xf32>,
    %c0_36 = arith.constant 0 : index
    %c2 = arith.constant 2 : index
    %c0_37 = arith.constant 0 : index
    %31 = vector.load %arg6[%c0_36, %c2, %c0_37] : memref<10x18x128xbf16, #tpu.memory_space<vmem>>, vector<8x16x128xbf16>
    %32 = vector.shape_cast %31 : vector<8x16x128xbf16> to vector<128x128xbf16>
    %c0_38 = arith.constant 0 : index
    %c0_39 = arith.constant 0 : index
    %33 = vector.load %arg7[%c0_38, %c0_39] : memref<128x128xf32, #tpu.memory_space<vmem>>, vector<128x128xf32>
    %c0_40 = arith.constant 0 : index
    %c2_41 = arith.constant 2 : index
    %c0_42 = arith.constant 0 : index
    %c0_43 = arith.constant 0 : index
    %34 = vector.load %arg3[%c0_40, %c2_41, %c0_42, %c0_43] : memref<3x3x128x128xbf16, #tpu.memory_space<vmem>>, vector<1x1x128x128xbf16>
    %35 = vector.shape_cast %34 : vector<1x1x128x128xbf16> to vector<128x128xbf16>
    %cst_44 = arith.constant dense<0.000000e+00> : vector<128x128xf32>
    %36 = tpu.matmul %32, %35, %cst_44 {dimension_numbers = #tpu.dot_dimension_numbers<[1], [0], [0], [1], [0, 0, 1, 1], [], []>} : vector<128x128xbf16>, vector<128x128xbf16>, vector<128x128xf32> -> vector<128x128xf32>
    %37 = arith.addf %33, %36 : vector<128x128xf32>
    %c0_45 = arith.constant 0 : index
    %c0_46 = arith.constant 0 : index
    %38 = vector.load %arg7[%c0_45, %c0_46] : memref<128x128xf32, #tpu.memory_space<vmem>>, vector<128x128xf32>
    tpu.vector_store %arg7[%c0_45, %c0_46], %37 {strides = array<i32>} : memref<128x128xf32, #tpu.memory_space<vmem>>, vector<128x128xf32>,
    %c1_47 = arith.constant 1 : index
    %c0_48 = arith.constant 0 : index
    %c0_49 = arith.constant 0 : index
    %39 = vector.load %arg6[%c1_47, %c0_48, %c0_49] : memref<10x18x128xbf16, #tpu.memory_space<vmem>>, vector<8x16x128xbf16>
    %40 = vector.shape_cast %39 : vector<8x16x128xbf16> to vector<128x128xbf16>
    %c0_50 = arith.constant 0 : index
    %c0_51 = arith.constant 0 : index
    %41 = vector.load %arg7[%c0_50, %c0_51] : memref<128x128xf32, #tpu.memory_space<vmem>>, vector<128x128xf32>
    %c1_52 = arith.constant 1 : index
    %c0_53 = arith.constant 0 : index
    %c0_54 = arith.constant 0 : index
    %c0_55 = arith.constant 0 : index
    %42 = vector.load %arg3[%c1_52, %c0_53, %c0_54, %c0_55] : memref<3x3x128x128xbf16, #tpu.memory_space<vmem>>, vector<1x1x128x128xbf16>
    %43 = vector.shape_cast %42 : vector<1x1x128x128xbf16> to vector<128x128xbf16>
    %cst_56 = arith.constant dense<0.000000e+00> : vector<128x128xf32>
    %44 = tpu.matmul %40, %43, %cst_56 {dimension_numbers = #tpu.dot_dimension_numbers<[1], [0], [0], [1], [0, 0, 1, 1], [], []>} : vector<128x128xbf16>, vector<128x128xbf16>, vector<128x128xf32> -> vector<128x128xf32>
    %45 = arith.addf %41, %44 : vector<128x128xf32>
    %c0_57 = arith.constant 0 : index
    %c0_58 = arith.constant 0 : index
    %46 = vector.load %arg7[%c0_57, %c0_58] : memref<128x128xf32, #tpu.memory_space<vmem>>, vector<128x128xf32>
    tpu.vector_store %arg7[%c0_57, %c0_58], %45 {strides = array<i32>} : memref<128x128xf32, #tpu.memory_space<vmem>>, vector<128x128xf32>,
    %c1_59 = arith.constant 1 : index
    %c1_60 = arith.constant 1 : index
    %c0_61 = arith.constant 0 : index
    %47 = vector.load %arg6[%c1_59, %c1_60, %c0_61] : memref<10x18x128xbf16, #tpu.memory_space<vmem>>, vector<8x16x128xbf16>
    %48 = vector.shape_cast %47 : vector<8x16x128xbf16> to vector<128x128xbf16>
    %c0_62 = arith.constant 0 : index
    %c0_63 = arith.constant 0 : index
    %49 = vector.load %arg7[%c0_62, %c0_63] : memref<128x128xf32, #tpu.memory_space<vmem>>, vector<128x128xf32>
    %c1_64 = arith.constant 1 : index
    %c1_65 = arith.constant 1 : index
    %c0_66 = arith.constant 0 : index
    %c0_67 = arith.constant 0 : index
    %50 = vector.load %arg3[%c1_64, %c1_65, %c0_66, %c0_67] : memref<3x3x128x128xbf16, #tpu.memory_space<vmem>>, vector<1x1x128x128xbf16>
    %51 = vector.shape_cast %50 : vector<1x1x128x128xbf16> to vector<128x128xbf16>
    %cst_68 = arith.constant dense<0.000000e+00> : vector<128x128xf32>
    %52 = tpu.matmul %48, %51, %cst_68 {dimension_numbers = #tpu.dot_dimension_numbers<[1], [0], [0], [1], [0, 0, 1, 1], [], []>} : vector<128x128xbf16>, vector<128x128xbf16>, vector<128x128xf32> -> vector<128x128xf32>
    %53 = arith.addf %49, %52 : vector<128x128xf32>
    %c0_69 = arith.constant 0 : index
    %c0_70 = arith.constant 0 : index
    %54 = vector.load %arg7[%c0_69, %c0_70] : memref<128x128xf32, #tpu.memory_space<vmem>>, vector<128x128xf32>
    tpu.vector_store %arg7[%c0_69, %c0_70], %53 {strides = array<i32>} : memref<128x128xf32, #tpu.memory_space<vmem>>, vector<128x128xf32>,
    %c1_71 = arith.constant 1 : index
    %c2_72 = arith.constant 2 : index
    %c0_73 = arith.constant 0 : index
    %55 = vector.load %arg6[%c1_71, %c2_72, %c0_73] : memref<10x18x128xbf16, #tpu.memory_space<vmem>>, vector<8x16x128xbf16>
    %56 = vector.shape_cast %55 : vector<8x16x128xbf16> to vector<128x128xbf16>
    %c0_74 = arith.constant 0 : index
    %c0_75 = arith.constant 0 : index
    %57 = vector.load %arg7[%c0_74, %c0_75] : memref<128x128xf32, #tpu.memory_space<vmem>>, vector<128x128xf32>
    %c1_76 = arith.constant 1 : index
    %c2_77 = arith.constant 2 : index
    %c0_78 = arith.constant 0 : index
    %c0_79 = arith.constant 0 : index
    %58 = vector.load %arg3[%c1_76, %c2_77, %c0_78, %c0_79] : memref<3x3x128x128xbf16, #tpu.memory_space<vmem>>, vector<1x1x128x128xbf16>
    %59 = vector.shape_cast %58 : vector<1x1x128x128xbf16> to vector<128x128xbf16>
    %cst_80 = arith.constant dense<0.000000e+00> : vector<128x128xf32>
    %60 = tpu.matmul %56, %59, %cst_80 {dimension_numbers = #tpu.dot_dimension_numbers<[1], [0], [0], [1], [0, 0, 1, 1], [], []>} : vector<128x128xbf16>, vector<128x128xbf16>, vector<128x128xf32> -> vector<128x128xf32>
    %61 = arith.addf %57, %60 : vector<128x128xf32>
    %c0_81 = arith.constant 0 : index
    %c0_82 = arith.constant 0 : index
    %62 = vector.load %arg7[%c0_81, %c0_82] : memref<128x128xf32, #tpu.memory_space<vmem>>, vector<128x128xf32>
    tpu.vector_store %arg7[%c0_81, %c0_82], %61 {strides = array<i32>} : memref<128x128xf32, #tpu.memory_space<vmem>>, vector<128x128xf32>,
    %c2_83 = arith.constant 2 : index
    %c0_84 = arith.constant 0 : index
    %c0_85 = arith.constant 0 : index
    %63 = vector.load %arg6[%c2_83, %c0_84, %c0_85] : memref<10x18x128xbf16, #tpu.memory_space<vmem>>, vector<8x16x128xbf16>
    %64 = vector.shape_cast %63 : vector<8x16x128xbf16> to vector<128x128xbf16>
    %c0_86 = arith.constant 0 : index
    %c0_87 = arith.constant 0 : index
    %65 = vector.load %arg7[%c0_86, %c0_87] : memref<128x128xf32, #tpu.memory_space<vmem>>, vector<128x128xf32>
    %c2_88 = arith.constant 2 : index
    %c0_89 = arith.constant 0 : index
    %c0_90 = arith.constant 0 : index
    %c0_91 = arith.constant 0 : index
    %66 = vector.load %arg3[%c2_88, %c0_89, %c0_90, %c0_91] : memref<3x3x128x128xbf16, #tpu.memory_space<vmem>>, vector<1x1x128x128xbf16>
    %67 = vector.shape_cast %66 : vector<1x1x128x128xbf16> to vector<128x128xbf16>
    %cst_92 = arith.constant dense<0.000000e+00> : vector<128x128xf32>
    %68 = tpu.matmul %64, %67, %cst_92 {dimension_numbers = #tpu.dot_dimension_numbers<[1], [0], [0], [1], [0, 0, 1, 1], [], []>} : vector<128x128xbf16>, vector<128x128xbf16>, vector<128x128xf32> -> vector<128x128xf32>
    %69 = arith.addf %65, %68 : vector<128x128xf32>
    %c0_93 = arith.constant 0 : index
    %c0_94 = arith.constant 0 : index
    %70 = vector.load %arg7[%c0_93, %c0_94] : memref<128x128xf32, #tpu.memory_space<vmem>>, vector<128x128xf32>
    tpu.vector_store %arg7[%c0_93, %c0_94], %69 {strides = array<i32>} : memref<128x128xf32, #tpu.memory_space<vmem>>, vector<128x128xf32>,
    %c2_95 = arith.constant 2 : index
    %c1_96 = arith.constant 1 : index
    %c0_97 = arith.constant 0 : index
    %71 = vector.load %arg6[%c2_95, %c1_96, %c0_97] : memref<10x18x128xbf16, #tpu.memory_space<vmem>>, vector<8x16x128xbf16>
    %72 = vector.shape_cast %71 : vector<8x16x128xbf16> to vector<128x128xbf16>
    %c0_98 = arith.constant 0 : index
    %c0_99 = arith.constant 0 : index
    %73 = vector.load %arg7[%c0_98, %c0_99] : memref<128x128xf32, #tpu.memory_space<vmem>>, vector<128x128xf32>
    %c2_100 = arith.constant 2 : index
    %c1_101 = arith.constant 1 : index
    %c0_102 = arith.constant 0 : index
    %c0_103 = arith.constant 0 : index
    %74 = vector.load %arg3[%c2_100, %c1_101, %c0_102, %c0_103] : memref<3x3x128x128xbf16, #tpu.memory_space<vmem>>, vector<1x1x128x128xbf16>
    %75 = vector.shape_cast %74 : vector<1x1x128x128xbf16> to vector<128x128xbf16>
    %cst_104 = arith.constant dense<0.000000e+00> : vector<128x128xf32>
    %76 = tpu.matmul %72, %75, %cst_104 {dimension_numbers = #tpu.dot_dimension_numbers<[1], [0], [0], [1], [0, 0, 1, 1], [], []>} : vector<128x128xbf16>, vector<128x128xbf16>, vector<128x128xf32> -> vector<128x128xf32>
    %77 = arith.addf %73, %76 : vector<128x128xf32>
    %c0_105 = arith.constant 0 : index
    %c0_106 = arith.constant 0 : index
    %78 = vector.load %arg7[%c0_105, %c0_106] : memref<128x128xf32, #tpu.memory_space<vmem>>, vector<128x128xf32>
    tpu.vector_store %arg7[%c0_105, %c0_106], %77 {strides = array<i32>} : memref<128x128xf32, #tpu.memory_space<vmem>>, vector<128x128xf32>,
    %c2_107 = arith.constant 2 : index
    %c2_108 = arith.constant 2 : index
    %c0_109 = arith.constant 0 : index
    %79 = vector.load %arg6[%c2_107, %c2_108, %c0_109] : memref<10x18x128xbf16, #tpu.memory_space<vmem>>, vector<8x16x128xbf16>
    %80 = vector.shape_cast %79 : vector<8x16x128xbf16> to vector<128x128xbf16>
    %c0_110 = arith.constant 0 : index
    %c0_111 = arith.constant 0 : index
    %81 = vector.load %arg7[%c0_110, %c0_111] : memref<128x128xf32, #tpu.memory_space<vmem>>, vector<128x128xf32>
    %c2_112 = arith.constant 2 : index
    %c2_113 = arith.constant 2 : index
    %c0_114 = arith.constant 0 : index
    %c0_115 = arith.constant 0 : index
    %82 = vector.load %arg3[%c2_112, %c2_113, %c0_114, %c0_115] : memref<3x3x128x128xbf16, #tpu.memory_space<vmem>>, vector<1x1x128x128xbf16>
    %83 = vector.shape_cast %82 : vector<1x1x128x128xbf16> to vector<128x128xbf16>
    %cst_116 = arith.constant dense<0.000000e+00> : vector<128x128xf32>
    %84 = tpu.matmul %80, %83, %cst_116 {dimension_numbers = #tpu.dot_dimension_numbers<[1], [0], [0], [1], [0, 0, 1, 1], [], []>} : vector<128x128xbf16>, vector<128x128xbf16>, vector<128x128xf32> -> vector<128x128xf32>
    %85 = arith.addf %81, %84 : vector<128x128xf32>
    %c0_117 = arith.constant 0 : index
    %c0_118 = arith.constant 0 : index
    %86 = vector.load %arg7[%c0_117, %c0_118] : memref<128x128xf32, #tpu.memory_space<vmem>>, vector<128x128xf32>
    tpu.vector_store %arg7[%c0_117, %c0_118], %85 {strides = array<i32>} : memref<128x128xf32, #tpu.memory_space<vmem>>, vector<128x128xf32>,
    %c0_119 = arith.constant 0 : index
    %c0_120 = arith.constant 0 : index
    %87 = vector.load %arg7[%c0_119, %c0_120] : memref<128x128xf32, #tpu.memory_space<vmem>>, vector<128x128xf32>
    %cst_121 = arith.constant dense<0.000000e+00> : vector<128xf32>
    %88 = vector.multi_reduction <add>, %87, %cst_121 [0] : vector<128x128xf32> to vector<128xf32>
    %89 = vector.shape_cast %88 : vector<128xf32> to vector<1x128xf32>
    %c0_122 = arith.constant 0 : index
    %c0_123 = arith.constant 0 : index
    %c0_124 = arith.constant 0 : index
    %c0_125 = arith.constant 0 : index
    %90 = vector.load %arg5[%c0_122, %c0_123, %c0_124, %c0_125] : memref<1x1x2x128xf32, #tpu.memory_space<vmem>>, vector<1x1x1x128xf32>
    %91 = vector.shape_cast %90 : vector<1x1x1x128xf32> to vector<1x128xf32>
    %92 = vector.shape_cast %89 : vector<1x128xf32> to vector<1x1x1x128xf32>
    tpu.vector_store %arg5[%c0_122, %c0_123, %c0_124, %c0_125], %92 {strides = array<i32>} : memref<1x1x2x128xf32, #tpu.memory_space<vmem>>, vector<1x1x1x128xf32>,
    %93 = arith.mulf %87, %87 : vector<128x128xf32>
    %cst_126 = arith.constant dense<0.000000e+00> : vector<128xf32>
    %94 = vector.multi_reduction <add>, %93, %cst_126 [0] : vector<128x128xf32> to vector<128xf32>
    %95 = vector.shape_cast %94 : vector<128xf32> to vector<1x128xf32>
    %c0_127 = arith.constant 0 : index
    %c0_128 = arith.constant 0 : index
    %c1_129 = arith.constant 1 : index
    %c0_130 = arith.constant 0 : index
    %96 = vector.load %arg5[%c0_127, %c0_128, %c1_129, %c0_130] : memref<1x1x2x128xf32, #tpu.memory_space<vmem>>, vector<1x1x1x128xf32>
    %97 = vector.shape_cast %96 : vector<1x1x1x128xf32> to vector<1x128xf32>
    %98 = vector.shape_cast %95 : vector<1x128xf32> to vector<1x1x1x128xf32>
    tpu.vector_store %arg5[%c0_127, %c0_128, %c1_129, %c0_130], %98 {strides = array<i32>} : memref<1x1x2x128xf32, #tpu.memory_space<vmem>>, vector<1x1x1x128xf32>,
    %99 = vector.shape_cast %87 : vector<128x128xf32> to vector<8x16x128xf32>
    %c0_131 = arith.constant 0 : index
    %c0_132 = arith.constant 0 : index
    %c0_133 = arith.constant 0 : index
    %c0_134 = arith.constant 0 : index
    %100 = vector.load %arg4[%c0_131, %c0_132, %c0_133, %c0_134] : memref<1x8x16x128xf32, #tpu.memory_space<vmem>>, vector<1x8x16x128xf32>
    %101 = vector.shape_cast %100 : vector<1x8x16x128xf32> to vector<8x16x128xf32>
    %102 = vector.shape_cast %99 : vector<8x16x128xf32> to vector<1x8x16x128xf32>
    tpu.vector_store %arg4[%c0_131, %c0_132, %c0_133, %c0_134], %102 {strides = array<i32>} : memref<1x8x16x128xf32, #tpu.memory_space<vmem>>, vector<1x8x16x128xf32>,
    return
  }
  func.func @transform_0(%arg0: i32, %arg1: i32) -> (i32, i32, i32, i32) {
    %c0_i32 = arith.constant 0 : i32
    %c0_i32_0 = arith.constant 0 : i32
    %c0_i32_1 = arith.constant 0 : i32
    %c0_i32_2 = arith.constant 0 : i32
    return %arg0, %c0_i32, %c0_i32_0, %c0_i32_1 : i32, i32, i32, i32
  }
  func.func @transform_1(%arg0: i32, %arg1: i32) -> (i32, i32, i32, i32) {
    %c0_i32 = arith.constant 0 : i32
    %c0_i32_0 = arith.constant 0 : i32
    %c0_i32_1 = arith.constant 0 : i32
    %c0_i32_2 = arith.constant 0 : i32
    %c0_i32_3 = arith.constant 0 : i32
    return %c0_i32, %c0_i32_0, %c0_i32_1, %c0_i32_2 : i32, i32, i32, i32
  }
  func.func @transform_2(%arg0: i32, %arg1: i32) -> (i32, i32, i32, i32) {
    %c0_i32 = arith.constant 0 : i32
    %c0_i32_0 = arith.constant 0 : i32
    %c0_i32_1 = arith.constant 0 : i32
    return %arg0, %arg1, %c0_i32, %c0_i32_0 : i32, i32, i32, i32
  }
  func.func @transform_3(%arg0: i32, %arg1: i32) -> (i32, i32, i32, i32) {
    %c0_i32 = arith.constant 0 : i32
    %c0_i32_0 = arith.constant 0 : i32
    %c0_i32_1 = arith.constant 0 : i32
    return %arg0, %arg1, %c0_i32, %c0_i32_0 : i32, i32, i32, i32
  }
}

module attributes {stable_mosaic.version = 11 : i64} {
  func.func @kernel(%arg0: i32, %arg1: i32, %arg2: memref<1x16x16x128xf32, #tpu.memory_space<vmem>>, %arg3: memref<3x3x128x128xbf16, #tpu.memory_space<vmem>>, %arg4: memref<2x128xf32, #tpu.memory_space<vmem>>, %arg5: memref<1x8x16x128xbf16, #tpu.memory_space<vmem>>, %arg6: memref<1x8x16x128xf32, #tpu.memory_space<vmem>>, %arg7: memref<1x1x2x128xf32, #tpu.memory_space<vmem>>, %arg8: memref<10x18x128xbf16, #tpu.memory_space<vmem>>, %arg9: memref<128x128xf32, #tpu.memory_space<vmem>>) attributes {dimension_semantics = [#tpu.dimension_semantics<parallel>, #tpu.dimension_semantics<parallel>], iteration_bounds = array<i64: 2, 2>, scalar_prefetch = 0 : i64, scratch_operands = 2 : i64, tpu.core_type = #tpu.core_type<tc>, window_params = [{transform_indices = @transform_0, window_bounds = array<i64: 1, 16, 16, 128>}, {pipeline_mode = #tpu.pipeline_mode<synchronous>, transform_indices = @transform_1, window_bounds = array<i64: 3, 3, 128, 128>}, {pipeline_mode = #tpu.pipeline_mode<synchronous>, transform_indices = @transform_2, window_bounds = array<i64: 2, 128>}, {transform_indices = @transform_3, window_bounds = array<i64: 1, 8, 16, 128>}, {transform_indices = @transform_4, window_bounds = array<i64: 1, 8, 16, 128>}, {transform_indices = @transform_5, window_bounds = array<i64: 1, 1, 2, 128>}]} {
    %cst = arith.constant 0.000000e+00 : bf16
    %0 = vector.broadcast %cst : bf16 to vector<10x18x128xbf16>
    %c0 = arith.constant 0 : index
    %c0_0 = arith.constant 0 : index
    %c0_1 = arith.constant 0 : index
    %1 = vector.load %arg8[%c0, %c0_0, %c0_1] : memref<10x18x128xbf16, #tpu.memory_space<vmem>>, vector<10x18x128xbf16>
    tpu.vector_store %arg8[%c0, %c0_0, %c0_1], %0 {strides = array<i32>} : memref<10x18x128xbf16, #tpu.memory_space<vmem>>, vector<10x18x128xbf16>,
    %c8_i32 = arith.constant 8 : i32
    %2 = arith.muli %arg1, %c8_i32 : i32
    %c0_2 = arith.constant 0 : index
    %3 = arith.index_cast %2 : i32 to index
    %c0_3 = arith.constant 0 : index
    %c0_4 = arith.constant 0 : index
    %4 = vector.load %arg2[%c0_2, %3, %c0_3, %c0_4] : memref<1x16x16x128xf32, #tpu.memory_space<vmem>>, vector<1x8x16x128xf32>
    %5 = vector.shape_cast %4 : vector<1x8x16x128xf32> to vector<8x16x128xf32>
    %c0_5 = arith.constant 0 : index
    %c0_6 = arith.constant 0 : index
    %6 = vector.load %arg4[%c0_5, %c0_6] : memref<2x128xf32, #tpu.memory_space<vmem>>, vector<1x128xf32>
    %7 = vector.shape_cast %6 : vector<1x128xf32> to vector<1x1x128xf32>
    %8 = vector.broadcast %7 : vector<1x1x128xf32> to vector<8x16x128xf32>
    %9 = arith.mulf %5, %8 : vector<8x16x128xf32>
    %c1 = arith.constant 1 : index
    %c0_7 = arith.constant 0 : index
    %10 = vector.load %arg4[%c1, %c0_7] : memref<2x128xf32, #tpu.memory_space<vmem>>, vector<1x128xf32>
    %11 = vector.shape_cast %10 : vector<1x128xf32> to vector<1x1x128xf32>
    %12 = vector.broadcast %11 : vector<1x1x128xf32> to vector<8x16x128xf32>
    %13 = arith.addf %9, %12 : vector<8x16x128xf32>
    %cst_8 = arith.constant 0.000000e+00 : f32
    %14 = vector.broadcast %cst_8 : f32 to vector<8x16x128xf32>
    %15 = arith.maximumf %13, %14 : vector<8x16x128xf32>
    %16 = arith.truncf %15 : vector<8x16x128xf32> to vector<8x16x128xbf16>
    %c1_9 = arith.constant 1 : index
    %c1_10 = arith.constant 1 : index
    %c0_11 = arith.constant 0 : index
    %17 = vector.load %arg8[%c1_9, %c1_10, %c0_11] : memref<10x18x128xbf16, #tpu.memory_space<vmem>>, vector<8x16x128xbf16>
    tpu.vector_store %arg8[%c1_9, %c1_10, %c0_11], %16 {strides = array<i32>} : memref<10x18x128xbf16, #tpu.memory_space<vmem>>, vector<8x16x128xbf16>,
    %c0_i32 = arith.constant 0 : i32
    %18 = arith.cmpi sgt, %arg1, %c0_i32 : i32
    %19 = arith.extui %18 : i1 to i32
    %c0_i32_12 = arith.constant 0 : i32
    %20 = arith.cmpi ne, %19, %c0_i32_12 : i32
    scf.if %20 {
      %c8_i32_144 = arith.constant 8 : i32
      %119 = arith.muli %arg1, %c8_i32_144 : i32
      %c1_i32_145 = arith.constant 1 : i32
      %120 = arith.subi %119, %c1_i32_145 : i32
      %c0_146 = arith.constant 0 : index
      %121 = arith.index_cast %120 : i32 to index
      %c0_147 = arith.constant 0 : index
      %c0_148 = arith.constant 0 : index
      %122 = vector.load %arg2[%c0_146, %121, %c0_147, %c0_148] : memref<1x16x16x128xf32, #tpu.memory_space<vmem>>, vector<1x1x16x128xf32>
      %123 = vector.shape_cast %122 : vector<1x1x16x128xf32> to vector<1x16x128xf32>
      %c0_149 = arith.constant 0 : index
      %c0_150 = arith.constant 0 : index
      %124 = vector.load %arg4[%c0_149, %c0_150] : memref<2x128xf32, #tpu.memory_space<vmem>>, vector<1x128xf32>
      %125 = vector.shape_cast %124 : vector<1x128xf32> to vector<1x1x128xf32>
      %126 = vector.broadcast %125 : vector<1x1x128xf32> to vector<1x16x128xf32>
      %127 = arith.mulf %123, %126 : vector<1x16x128xf32>
      %c1_151 = arith.constant 1 : index
      %c0_152 = arith.constant 0 : index
      %128 = vector.load %arg4[%c1_151, %c0_152] : memref<2x128xf32, #tpu.memory_space<vmem>>, vector<1x128xf32>
      %129 = vector.shape_cast %128 : vector<1x128xf32> to vector<1x1x128xf32>
      %130 = vector.broadcast %129 : vector<1x1x128xf32> to vector<1x16x128xf32>
      %131 = arith.addf %127, %130 : vector<1x16x128xf32>
      %cst_153 = arith.constant 0.000000e+00 : f32
      %132 = vector.broadcast %cst_153 : f32 to vector<1x16x128xf32>
      %133 = arith.maximumf %131, %132 : vector<1x16x128xf32>
      %134 = arith.truncf %133 : vector<1x16x128xf32> to vector<1x16x128xbf16>
      %c0_154 = arith.constant 0 : index
      %c1_155 = arith.constant 1 : index
      %c0_156 = arith.constant 0 : index
      %135 = vector.load %arg8[%c0_154, %c1_155, %c0_156] : memref<10x18x128xbf16, #tpu.memory_space<vmem>>, vector<1x16x128xbf16>
      tpu.vector_store %arg8[%c0_154, %c1_155, %c0_156], %134 {strides = array<i32>} : memref<10x18x128xbf16, #tpu.memory_space<vmem>>, vector<1x16x128xbf16>,
    } else {
    }
    %c1_i32 = arith.constant 1 : i32
    %21 = arith.cmpi slt, %arg1, %c1_i32 : i32
    %22 = arith.extui %21 : i1 to i32
    %c0_i32_13 = arith.constant 0 : i32
    %23 = arith.cmpi ne, %22, %c0_i32_13 : i32
    scf.if %23 {
      %c1_i32_144 = arith.constant 1 : i32
      %119 = arith.addi %arg1, %c1_i32_144 : i32
      %c8_i32_145 = arith.constant 8 : i32
      %120 = arith.muli %119, %c8_i32_145 : i32
      %c0_146 = arith.constant 0 : index
      %121 = arith.index_cast %120 : i32 to index
      %c0_147 = arith.constant 0 : index
      %c0_148 = arith.constant 0 : index
      %122 = vector.load %arg2[%c0_146, %121, %c0_147, %c0_148] : memref<1x16x16x128xf32, #tpu.memory_space<vmem>>, vector<1x1x16x128xf32>
      %123 = vector.shape_cast %122 : vector<1x1x16x128xf32> to vector<1x16x128xf32>
      %c0_149 = arith.constant 0 : index
      %c0_150 = arith.constant 0 : index
      %124 = vector.load %arg4[%c0_149, %c0_150] : memref<2x128xf32, #tpu.memory_space<vmem>>, vector<1x128xf32>
      %125 = vector.shape_cast %124 : vector<1x128xf32> to vector<1x1x128xf32>
      %126 = vector.broadcast %125 : vector<1x1x128xf32> to vector<1x16x128xf32>
      %127 = arith.mulf %123, %126 : vector<1x16x128xf32>
      %c1_151 = arith.constant 1 : index
      %c0_152 = arith.constant 0 : index
      %128 = vector.load %arg4[%c1_151, %c0_152] : memref<2x128xf32, #tpu.memory_space<vmem>>, vector<1x128xf32>
      %129 = vector.shape_cast %128 : vector<1x128xf32> to vector<1x1x128xf32>
      %130 = vector.broadcast %129 : vector<1x1x128xf32> to vector<1x16x128xf32>
      %131 = arith.addf %127, %130 : vector<1x16x128xf32>
      %cst_153 = arith.constant 0.000000e+00 : f32
      %132 = vector.broadcast %cst_153 : f32 to vector<1x16x128xf32>
      %133 = arith.maximumf %131, %132 : vector<1x16x128xf32>
      %134 = arith.truncf %133 : vector<1x16x128xf32> to vector<1x16x128xbf16>
      %c9 = arith.constant 9 : index
      %c1_154 = arith.constant 1 : index
      %c0_155 = arith.constant 0 : index
      %135 = vector.load %arg8[%c9, %c1_154, %c0_155] : memref<10x18x128xbf16, #tpu.memory_space<vmem>>, vector<1x16x128xbf16>
      tpu.vector_store %arg8[%c9, %c1_154, %c0_155], %134 {strides = array<i32>} : memref<10x18x128xbf16, #tpu.memory_space<vmem>>, vector<1x16x128xbf16>,
    } else {
    }
    %cst_14 = arith.constant 0.000000e+00 : f32
    %24 = vector.broadcast %cst_14 : f32 to vector<128x128xf32>
    %c0_15 = arith.constant 0 : index
    %c0_16 = arith.constant 0 : index
    %25 = vector.load %arg9[%c0_15, %c0_16] : memref<128x128xf32, #tpu.memory_space<vmem>>, vector<128x128xf32>
    tpu.vector_store %arg9[%c0_15, %c0_16], %24 {strides = array<i32>} : memref<128x128xf32, #tpu.memory_space<vmem>>, vector<128x128xf32>,
    %c0_17 = arith.constant 0 : index
    %c0_18 = arith.constant 0 : index
    %c0_19 = arith.constant 0 : index
    %26 = vector.load %arg8[%c0_17, %c0_18, %c0_19] : memref<10x18x128xbf16, #tpu.memory_space<vmem>>, vector<8x16x128xbf16>
    %27 = vector.shape_cast %26 : vector<8x16x128xbf16> to vector<128x128xbf16>
    %c0_20 = arith.constant 0 : index
    %c0_21 = arith.constant 0 : index
    %28 = vector.load %arg9[%c0_20, %c0_21] : memref<128x128xf32, #tpu.memory_space<vmem>>, vector<128x128xf32>
    %c0_22 = arith.constant 0 : index
    %c0_23 = arith.constant 0 : index
    %c0_24 = arith.constant 0 : index
    %c0_25 = arith.constant 0 : index
    %29 = vector.load %arg3[%c0_22, %c0_23, %c0_24, %c0_25] : memref<3x3x128x128xbf16, #tpu.memory_space<vmem>>, vector<1x1x128x128xbf16>
    %30 = vector.shape_cast %29 : vector<1x1x128x128xbf16> to vector<128x128xbf16>
    %cst_26 = arith.constant dense<0.000000e+00> : vector<128x128xf32>
    %31 = tpu.matmul %27, %30, %cst_26 {dimension_numbers = #tpu.dot_dimension_numbers<[1], [0], [0], [1], [0, 0, 1, 1], [], []>} : vector<128x128xbf16>, vector<128x128xbf16>, vector<128x128xf32> -> vector<128x128xf32>
    %32 = arith.addf %28, %31 : vector<128x128xf32>
    %c0_27 = arith.constant 0 : index
    %c0_28 = arith.constant 0 : index
    %33 = vector.load %arg9[%c0_27, %c0_28] : memref<128x128xf32, #tpu.memory_space<vmem>>, vector<128x128xf32>
    tpu.vector_store %arg9[%c0_27, %c0_28], %32 {strides = array<i32>} : memref<128x128xf32, #tpu.memory_space<vmem>>, vector<128x128xf32>,
    %c0_29 = arith.constant 0 : index
    %c1_30 = arith.constant 1 : index
    %c0_31 = arith.constant 0 : index
    %34 = vector.load %arg8[%c0_29, %c1_30, %c0_31] : memref<10x18x128xbf16, #tpu.memory_space<vmem>>, vector<8x16x128xbf16>
    %35 = vector.shape_cast %34 : vector<8x16x128xbf16> to vector<128x128xbf16>
    %c0_32 = arith.constant 0 : index
    %c0_33 = arith.constant 0 : index
    %36 = vector.load %arg9[%c0_32, %c0_33] : memref<128x128xf32, #tpu.memory_space<vmem>>, vector<128x128xf32>
    %c0_34 = arith.constant 0 : index
    %c1_35 = arith.constant 1 : index
    %c0_36 = arith.constant 0 : index
    %c0_37 = arith.constant 0 : index
    %37 = vector.load %arg3[%c0_34, %c1_35, %c0_36, %c0_37] : memref<3x3x128x128xbf16, #tpu.memory_space<vmem>>, vector<1x1x128x128xbf16>
    %38 = vector.shape_cast %37 : vector<1x1x128x128xbf16> to vector<128x128xbf16>
    %cst_38 = arith.constant dense<0.000000e+00> : vector<128x128xf32>
    %39 = tpu.matmul %35, %38, %cst_38 {dimension_numbers = #tpu.dot_dimension_numbers<[1], [0], [0], [1], [0, 0, 1, 1], [], []>} : vector<128x128xbf16>, vector<128x128xbf16>, vector<128x128xf32> -> vector<128x128xf32>
    %40 = arith.addf %36, %39 : vector<128x128xf32>
    %c0_39 = arith.constant 0 : index
    %c0_40 = arith.constant 0 : index
    %41 = vector.load %arg9[%c0_39, %c0_40] : memref<128x128xf32, #tpu.memory_space<vmem>>, vector<128x128xf32>
    tpu.vector_store %arg9[%c0_39, %c0_40], %40 {strides = array<i32>} : memref<128x128xf32, #tpu.memory_space<vmem>>, vector<128x128xf32>,
    %c0_41 = arith.constant 0 : index
    %c2 = arith.constant 2 : index
    %c0_42 = arith.constant 0 : index
    %42 = vector.load %arg8[%c0_41, %c2, %c0_42] : memref<10x18x128xbf16, #tpu.memory_space<vmem>>, vector<8x16x128xbf16>
    %43 = vector.shape_cast %42 : vector<8x16x128xbf16> to vector<128x128xbf16>
    %c0_43 = arith.constant 0 : index
    %c0_44 = arith.constant 0 : index
    %44 = vector.load %arg9[%c0_43, %c0_44] : memref<128x128xf32, #tpu.memory_space<vmem>>, vector<128x128xf32>
    %c0_45 = arith.constant 0 : index
    %c2_46 = arith.constant 2 : index
    %c0_47 = arith.constant 0 : index
    %c0_48 = arith.constant 0 : index
    %45 = vector.load %arg3[%c0_45, %c2_46, %c0_47, %c0_48] : memref<3x3x128x128xbf16, #tpu.memory_space<vmem>>, vector<1x1x128x128xbf16>
    %46 = vector.shape_cast %45 : vector<1x1x128x128xbf16> to vector<128x128xbf16>
    %cst_49 = arith.constant dense<0.000000e+00> : vector<128x128xf32>
    %47 = tpu.matmul %43, %46, %cst_49 {dimension_numbers = #tpu.dot_dimension_numbers<[1], [0], [0], [1], [0, 0, 1, 1], [], []>} : vector<128x128xbf16>, vector<128x128xbf16>, vector<128x128xf32> -> vector<128x128xf32>
    %48 = arith.addf %44, %47 : vector<128x128xf32>
    %c0_50 = arith.constant 0 : index
    %c0_51 = arith.constant 0 : index
    %49 = vector.load %arg9[%c0_50, %c0_51] : memref<128x128xf32, #tpu.memory_space<vmem>>, vector<128x128xf32>
    tpu.vector_store %arg9[%c0_50, %c0_51], %48 {strides = array<i32>} : memref<128x128xf32, #tpu.memory_space<vmem>>, vector<128x128xf32>,
    %c1_52 = arith.constant 1 : index
    %c0_53 = arith.constant 0 : index
    %c0_54 = arith.constant 0 : index
    %50 = vector.load %arg8[%c1_52, %c0_53, %c0_54] : memref<10x18x128xbf16, #tpu.memory_space<vmem>>, vector<8x16x128xbf16>
    %51 = vector.shape_cast %50 : vector<8x16x128xbf16> to vector<128x128xbf16>
    %c0_55 = arith.constant 0 : index
    %c0_56 = arith.constant 0 : index
    %52 = vector.load %arg9[%c0_55, %c0_56] : memref<128x128xf32, #tpu.memory_space<vmem>>, vector<128x128xf32>
    %c1_57 = arith.constant 1 : index
    %c0_58 = arith.constant 0 : index
    %c0_59 = arith.constant 0 : index
    %c0_60 = arith.constant 0 : index
    %53 = vector.load %arg3[%c1_57, %c0_58, %c0_59, %c0_60] : memref<3x3x128x128xbf16, #tpu.memory_space<vmem>>, vector<1x1x128x128xbf16>
    %54 = vector.shape_cast %53 : vector<1x1x128x128xbf16> to vector<128x128xbf16>
    %cst_61 = arith.constant dense<0.000000e+00> : vector<128x128xf32>
    %55 = tpu.matmul %51, %54, %cst_61 {dimension_numbers = #tpu.dot_dimension_numbers<[1], [0], [0], [1], [0, 0, 1, 1], [], []>} : vector<128x128xbf16>, vector<128x128xbf16>, vector<128x128xf32> -> vector<128x128xf32>
    %56 = arith.addf %52, %55 : vector<128x128xf32>
    %c0_62 = arith.constant 0 : index
    %c0_63 = arith.constant 0 : index
    %57 = vector.load %arg9[%c0_62, %c0_63] : memref<128x128xf32, #tpu.memory_space<vmem>>, vector<128x128xf32>
    tpu.vector_store %arg9[%c0_62, %c0_63], %56 {strides = array<i32>} : memref<128x128xf32, #tpu.memory_space<vmem>>, vector<128x128xf32>,
    %c1_64 = arith.constant 1 : index
    %c1_65 = arith.constant 1 : index
    %c0_66 = arith.constant 0 : index
    %58 = vector.load %arg8[%c1_64, %c1_65, %c0_66] : memref<10x18x128xbf16, #tpu.memory_space<vmem>>, vector<8x16x128xbf16>
    %59 = vector.shape_cast %58 : vector<8x16x128xbf16> to vector<128x128xbf16>
    %c0_67 = arith.constant 0 : index
    %c0_68 = arith.constant 0 : index
    %60 = vector.load %arg9[%c0_67, %c0_68] : memref<128x128xf32, #tpu.memory_space<vmem>>, vector<128x128xf32>
    %c1_69 = arith.constant 1 : index
    %c1_70 = arith.constant 1 : index
    %c0_71 = arith.constant 0 : index
    %c0_72 = arith.constant 0 : index
    %61 = vector.load %arg3[%c1_69, %c1_70, %c0_71, %c0_72] : memref<3x3x128x128xbf16, #tpu.memory_space<vmem>>, vector<1x1x128x128xbf16>
    %62 = vector.shape_cast %61 : vector<1x1x128x128xbf16> to vector<128x128xbf16>
    %cst_73 = arith.constant dense<0.000000e+00> : vector<128x128xf32>
    %63 = tpu.matmul %59, %62, %cst_73 {dimension_numbers = #tpu.dot_dimension_numbers<[1], [0], [0], [1], [0, 0, 1, 1], [], []>} : vector<128x128xbf16>, vector<128x128xbf16>, vector<128x128xf32> -> vector<128x128xf32>
    %64 = arith.addf %60, %63 : vector<128x128xf32>
    %c0_74 = arith.constant 0 : index
    %c0_75 = arith.constant 0 : index
    %65 = vector.load %arg9[%c0_74, %c0_75] : memref<128x128xf32, #tpu.memory_space<vmem>>, vector<128x128xf32>
    tpu.vector_store %arg9[%c0_74, %c0_75], %64 {strides = array<i32>} : memref<128x128xf32, #tpu.memory_space<vmem>>, vector<128x128xf32>,
    %c1_76 = arith.constant 1 : index
    %c2_77 = arith.constant 2 : index
    %c0_78 = arith.constant 0 : index
    %66 = vector.load %arg8[%c1_76, %c2_77, %c0_78] : memref<10x18x128xbf16, #tpu.memory_space<vmem>>, vector<8x16x128xbf16>
    %67 = vector.shape_cast %66 : vector<8x16x128xbf16> to vector<128x128xbf16>
    %c0_79 = arith.constant 0 : index
    %c0_80 = arith.constant 0 : index
    %68 = vector.load %arg9[%c0_79, %c0_80] : memref<128x128xf32, #tpu.memory_space<vmem>>, vector<128x128xf32>
    %c1_81 = arith.constant 1 : index
    %c2_82 = arith.constant 2 : index
    %c0_83 = arith.constant 0 : index
    %c0_84 = arith.constant 0 : index
    %69 = vector.load %arg3[%c1_81, %c2_82, %c0_83, %c0_84] : memref<3x3x128x128xbf16, #tpu.memory_space<vmem>>, vector<1x1x128x128xbf16>
    %70 = vector.shape_cast %69 : vector<1x1x128x128xbf16> to vector<128x128xbf16>
    %cst_85 = arith.constant dense<0.000000e+00> : vector<128x128xf32>
    %71 = tpu.matmul %67, %70, %cst_85 {dimension_numbers = #tpu.dot_dimension_numbers<[1], [0], [0], [1], [0, 0, 1, 1], [], []>} : vector<128x128xbf16>, vector<128x128xbf16>, vector<128x128xf32> -> vector<128x128xf32>
    %72 = arith.addf %68, %71 : vector<128x128xf32>
    %c0_86 = arith.constant 0 : index
    %c0_87 = arith.constant 0 : index
    %73 = vector.load %arg9[%c0_86, %c0_87] : memref<128x128xf32, #tpu.memory_space<vmem>>, vector<128x128xf32>
    tpu.vector_store %arg9[%c0_86, %c0_87], %72 {strides = array<i32>} : memref<128x128xf32, #tpu.memory_space<vmem>>, vector<128x128xf32>,
    %c2_88 = arith.constant 2 : index
    %c0_89 = arith.constant 0 : index
    %c0_90 = arith.constant 0 : index
    %74 = vector.load %arg8[%c2_88, %c0_89, %c0_90] : memref<10x18x128xbf16, #tpu.memory_space<vmem>>, vector<8x16x128xbf16>
    %75 = vector.shape_cast %74 : vector<8x16x128xbf16> to vector<128x128xbf16>
    %c0_91 = arith.constant 0 : index
    %c0_92 = arith.constant 0 : index
    %76 = vector.load %arg9[%c0_91, %c0_92] : memref<128x128xf32, #tpu.memory_space<vmem>>, vector<128x128xf32>
    %c2_93 = arith.constant 2 : index
    %c0_94 = arith.constant 0 : index
    %c0_95 = arith.constant 0 : index
    %c0_96 = arith.constant 0 : index
    %77 = vector.load %arg3[%c2_93, %c0_94, %c0_95, %c0_96] : memref<3x3x128x128xbf16, #tpu.memory_space<vmem>>, vector<1x1x128x128xbf16>
    %78 = vector.shape_cast %77 : vector<1x1x128x128xbf16> to vector<128x128xbf16>
    %cst_97 = arith.constant dense<0.000000e+00> : vector<128x128xf32>
    %79 = tpu.matmul %75, %78, %cst_97 {dimension_numbers = #tpu.dot_dimension_numbers<[1], [0], [0], [1], [0, 0, 1, 1], [], []>} : vector<128x128xbf16>, vector<128x128xbf16>, vector<128x128xf32> -> vector<128x128xf32>
    %80 = arith.addf %76, %79 : vector<128x128xf32>
    %c0_98 = arith.constant 0 : index
    %c0_99 = arith.constant 0 : index
    %81 = vector.load %arg9[%c0_98, %c0_99] : memref<128x128xf32, #tpu.memory_space<vmem>>, vector<128x128xf32>
    tpu.vector_store %arg9[%c0_98, %c0_99], %80 {strides = array<i32>} : memref<128x128xf32, #tpu.memory_space<vmem>>, vector<128x128xf32>,
    %c2_100 = arith.constant 2 : index
    %c1_101 = arith.constant 1 : index
    %c0_102 = arith.constant 0 : index
    %82 = vector.load %arg8[%c2_100, %c1_101, %c0_102] : memref<10x18x128xbf16, #tpu.memory_space<vmem>>, vector<8x16x128xbf16>
    %83 = vector.shape_cast %82 : vector<8x16x128xbf16> to vector<128x128xbf16>
    %c0_103 = arith.constant 0 : index
    %c0_104 = arith.constant 0 : index
    %84 = vector.load %arg9[%c0_103, %c0_104] : memref<128x128xf32, #tpu.memory_space<vmem>>, vector<128x128xf32>
    %c2_105 = arith.constant 2 : index
    %c1_106 = arith.constant 1 : index
    %c0_107 = arith.constant 0 : index
    %c0_108 = arith.constant 0 : index
    %85 = vector.load %arg3[%c2_105, %c1_106, %c0_107, %c0_108] : memref<3x3x128x128xbf16, #tpu.memory_space<vmem>>, vector<1x1x128x128xbf16>
    %86 = vector.shape_cast %85 : vector<1x1x128x128xbf16> to vector<128x128xbf16>
    %cst_109 = arith.constant dense<0.000000e+00> : vector<128x128xf32>
    %87 = tpu.matmul %83, %86, %cst_109 {dimension_numbers = #tpu.dot_dimension_numbers<[1], [0], [0], [1], [0, 0, 1, 1], [], []>} : vector<128x128xbf16>, vector<128x128xbf16>, vector<128x128xf32> -> vector<128x128xf32>
    %88 = arith.addf %84, %87 : vector<128x128xf32>
    %c0_110 = arith.constant 0 : index
    %c0_111 = arith.constant 0 : index
    %89 = vector.load %arg9[%c0_110, %c0_111] : memref<128x128xf32, #tpu.memory_space<vmem>>, vector<128x128xf32>
    tpu.vector_store %arg9[%c0_110, %c0_111], %88 {strides = array<i32>} : memref<128x128xf32, #tpu.memory_space<vmem>>, vector<128x128xf32>,
    %c2_112 = arith.constant 2 : index
    %c2_113 = arith.constant 2 : index
    %c0_114 = arith.constant 0 : index
    %90 = vector.load %arg8[%c2_112, %c2_113, %c0_114] : memref<10x18x128xbf16, #tpu.memory_space<vmem>>, vector<8x16x128xbf16>
    %91 = vector.shape_cast %90 : vector<8x16x128xbf16> to vector<128x128xbf16>
    %c0_115 = arith.constant 0 : index
    %c0_116 = arith.constant 0 : index
    %92 = vector.load %arg9[%c0_115, %c0_116] : memref<128x128xf32, #tpu.memory_space<vmem>>, vector<128x128xf32>
    %c2_117 = arith.constant 2 : index
    %c2_118 = arith.constant 2 : index
    %c0_119 = arith.constant 0 : index
    %c0_120 = arith.constant 0 : index
    %93 = vector.load %arg3[%c2_117, %c2_118, %c0_119, %c0_120] : memref<3x3x128x128xbf16, #tpu.memory_space<vmem>>, vector<1x1x128x128xbf16>
    %94 = vector.shape_cast %93 : vector<1x1x128x128xbf16> to vector<128x128xbf16>
    %cst_121 = arith.constant dense<0.000000e+00> : vector<128x128xf32>
    %95 = tpu.matmul %91, %94, %cst_121 {dimension_numbers = #tpu.dot_dimension_numbers<[1], [0], [0], [1], [0, 0, 1, 1], [], []>} : vector<128x128xbf16>, vector<128x128xbf16>, vector<128x128xf32> -> vector<128x128xf32>
    %96 = arith.addf %92, %95 : vector<128x128xf32>
    %c0_122 = arith.constant 0 : index
    %c0_123 = arith.constant 0 : index
    %97 = vector.load %arg9[%c0_122, %c0_123] : memref<128x128xf32, #tpu.memory_space<vmem>>, vector<128x128xf32>
    tpu.vector_store %arg9[%c0_122, %c0_123], %96 {strides = array<i32>} : memref<128x128xf32, #tpu.memory_space<vmem>>, vector<128x128xf32>,
    %c0_124 = arith.constant 0 : index
    %c0_125 = arith.constant 0 : index
    %98 = vector.load %arg9[%c0_124, %c0_125] : memref<128x128xf32, #tpu.memory_space<vmem>>, vector<128x128xf32>
    %c0_126 = arith.constant 0 : index
    %c0_127 = arith.constant 0 : index
    %c0_128 = arith.constant 0 : index
    %c0_129 = arith.constant 0 : index
    %99 = vector.load %arg5[%c0_126, %c0_127, %c0_128, %c0_129] : memref<1x8x16x128xbf16, #tpu.memory_space<vmem>>, vector<1x8x16x128xbf16>
    %100 = vector.shape_cast %99 : vector<1x8x16x128xbf16> to vector<8x16x128xbf16>
    %101 = vector.shape_cast %100 : vector<8x16x128xbf16> to vector<128x128xbf16>
    %102 = arith.extf %101 : vector<128x128xbf16> to vector<128x128xf32>
    %103 = arith.addf %98, %102 : vector<128x128xf32>
    %cst_130 = arith.constant dense<0.000000e+00> : vector<128xf32>
    %104 = vector.multi_reduction <add>, %103, %cst_130 [0] : vector<128x128xf32> to vector<128xf32>
    %105 = vector.shape_cast %104 : vector<128xf32> to vector<1x128xf32>
    %c0_131 = arith.constant 0 : index
    %c0_132 = arith.constant 0 : index
    %c0_133 = arith.constant 0 : index
    %c0_134 = arith.constant 0 : index
    %106 = vector.load %arg7[%c0_131, %c0_132, %c0_133, %c0_134] : memref<1x1x2x128xf32, #tpu.memory_space<vmem>>, vector<1x1x1x128xf32>
    %107 = vector.shape_cast %106 : vector<1x1x1x128xf32> to vector<1x128xf32>
    %108 = vector.shape_cast %105 : vector<1x128xf32> to vector<1x1x1x128xf32>
    tpu.vector_store %arg7[%c0_131, %c0_132, %c0_133, %c0_134], %108 {strides = array<i32>} : memref<1x1x2x128xf32, #tpu.memory_space<vmem>>, vector<1x1x1x128xf32>,
    %109 = arith.mulf %103, %103 : vector<128x128xf32>
    %cst_135 = arith.constant dense<0.000000e+00> : vector<128xf32>
    %110 = vector.multi_reduction <add>, %109, %cst_135 [0] : vector<128x128xf32> to vector<128xf32>
    %111 = vector.shape_cast %110 : vector<128xf32> to vector<1x128xf32>
    %c0_136 = arith.constant 0 : index
    %c0_137 = arith.constant 0 : index
    %c1_138 = arith.constant 1 : index
    %c0_139 = arith.constant 0 : index
    %112 = vector.load %arg7[%c0_136, %c0_137, %c1_138, %c0_139] : memref<1x1x2x128xf32, #tpu.memory_space<vmem>>, vector<1x1x1x128xf32>
    %113 = vector.shape_cast %112 : vector<1x1x1x128xf32> to vector<1x128xf32>
    %114 = vector.shape_cast %111 : vector<1x128xf32> to vector<1x1x1x128xf32>
    tpu.vector_store %arg7[%c0_136, %c0_137, %c1_138, %c0_139], %114 {strides = array<i32>} : memref<1x1x2x128xf32, #tpu.memory_space<vmem>>, vector<1x1x1x128xf32>,
    %115 = vector.shape_cast %103 : vector<128x128xf32> to vector<8x16x128xf32>
    %c0_140 = arith.constant 0 : index
    %c0_141 = arith.constant 0 : index
    %c0_142 = arith.constant 0 : index
    %c0_143 = arith.constant 0 : index
    %116 = vector.load %arg6[%c0_140, %c0_141, %c0_142, %c0_143] : memref<1x8x16x128xf32, #tpu.memory_space<vmem>>, vector<1x8x16x128xf32>
    %117 = vector.shape_cast %116 : vector<1x8x16x128xf32> to vector<8x16x128xf32>
    %118 = vector.shape_cast %115 : vector<8x16x128xf32> to vector<1x8x16x128xf32>
    tpu.vector_store %arg6[%c0_140, %c0_141, %c0_142, %c0_143], %118 {strides = array<i32>} : memref<1x8x16x128xf32, #tpu.memory_space<vmem>>, vector<1x8x16x128xf32>,
    return
  }
  func.func @transform_0(%arg0: i32, %arg1: i32) -> (i32, i32, i32, i32) {
    %c0_i32 = arith.constant 0 : i32
    %c0_i32_0 = arith.constant 0 : i32
    %c0_i32_1 = arith.constant 0 : i32
    %c0_i32_2 = arith.constant 0 : i32
    return %arg0, %c0_i32, %c0_i32_0, %c0_i32_1 : i32, i32, i32, i32
  }
  func.func @transform_1(%arg0: i32, %arg1: i32) -> (i32, i32, i32, i32) {
    %c0_i32 = arith.constant 0 : i32
    %c0_i32_0 = arith.constant 0 : i32
    %c0_i32_1 = arith.constant 0 : i32
    %c0_i32_2 = arith.constant 0 : i32
    %c0_i32_3 = arith.constant 0 : i32
    return %c0_i32, %c0_i32_0, %c0_i32_1, %c0_i32_2 : i32, i32, i32, i32
  }
  func.func @transform_2(%arg0: i32, %arg1: i32) -> (i32, i32) {
    %c0_i32 = arith.constant 0 : i32
    %c0_i32_0 = arith.constant 0 : i32
    %c0_i32_1 = arith.constant 0 : i32
    return %c0_i32, %c0_i32_0 : i32, i32
  }
  func.func @transform_3(%arg0: i32, %arg1: i32) -> (i32, i32, i32, i32) {
    %c0_i32 = arith.constant 0 : i32
    %c0_i32_0 = arith.constant 0 : i32
    %c0_i32_1 = arith.constant 0 : i32
    return %arg0, %arg1, %c0_i32, %c0_i32_0 : i32, i32, i32, i32
  }
  func.func @transform_4(%arg0: i32, %arg1: i32) -> (i32, i32, i32, i32) {
    %c0_i32 = arith.constant 0 : i32
    %c0_i32_0 = arith.constant 0 : i32
    %c0_i32_1 = arith.constant 0 : i32
    return %arg0, %arg1, %c0_i32, %c0_i32_0 : i32, i32, i32, i32
  }
  func.func @transform_5(%arg0: i32, %arg1: i32) -> (i32, i32, i32, i32) {
    %c0_i32 = arith.constant 0 : i32
    %c0_i32_0 = arith.constant 0 : i32
    %c0_i32_1 = arith.constant 0 : i32
    return %arg0, %arg1, %c0_i32, %c0_i32_0 : i32, i32, i32, i32
  }
}

module attributes {stable_mosaic.version = 11 : i64} {
  func.func @_affine_relu_kernel(%arg0: i32, %arg1: memref<256x128xf32, #tpu.memory_space<vmem>>, %arg2: memref<2x128xf32, #tpu.memory_space<vmem>>, %arg3: memref<256x128xf32, #tpu.memory_space<vmem>>) attributes {dimension_semantics = [#tpu.dimension_semantics<parallel>], iteration_bounds = array<i64: 2>, scalar_prefetch = 0 : i64, scratch_operands = 0 : i64, tpu.core_type = #tpu.core_type<tc>, window_params = [{transform_indices = @transform_0, window_bounds = array<i64: 256, 128>}, {pipeline_mode = #tpu.pipeline_mode<synchronous>, transform_indices = @transform_1, window_bounds = array<i64: 2, 128>}, {transform_indices = @transform_2, window_bounds = array<i64: 256, 128>}]} {
    %c0 = arith.constant 0 : index
    %c0_0 = arith.constant 0 : index
    %0 = vector.load %arg1[%c0, %c0_0] : memref<256x128xf32, #tpu.memory_space<vmem>>, vector<256x128xf32>
    %c0_1 = arith.constant 0 : index
    %c0_2 = arith.constant 0 : index
    %1 = vector.load %arg2[%c0_1, %c0_2] : memref<2x128xf32, #tpu.memory_space<vmem>>, vector<1x128xf32>
    %2 = vector.broadcast %1 : vector<1x128xf32> to vector<256x128xf32>
    %3 = arith.mulf %0, %2 : vector<256x128xf32>
    %c1 = arith.constant 1 : index
    %c0_3 = arith.constant 0 : index
    %4 = vector.load %arg2[%c1, %c0_3] : memref<2x128xf32, #tpu.memory_space<vmem>>, vector<1x128xf32>
    %5 = vector.broadcast %4 : vector<1x128xf32> to vector<256x128xf32>
    %6 = arith.addf %3, %5 : vector<256x128xf32>
    %cst = arith.constant 0.000000e+00 : f32
    %7 = vector.broadcast %cst : f32 to vector<256x128xf32>
    %8 = arith.maximumf %6, %7 : vector<256x128xf32>
    %c0_4 = arith.constant 0 : index
    %c0_5 = arith.constant 0 : index
    %9 = vector.load %arg3[%c0_4, %c0_5] : memref<256x128xf32, #tpu.memory_space<vmem>>, vector<256x128xf32>
    tpu.vector_store %arg3[%c0_4, %c0_5], %8 {strides = array<i32>} : memref<256x128xf32, #tpu.memory_space<vmem>>, vector<256x128xf32>,
    return
  }
  func.func @transform_0(%arg0: i32) -> (i32, i32) {
    %c0_i32 = arith.constant 0 : i32
    %c0_i32_0 = arith.constant 0 : i32
    return %arg0, %c0_i32 : i32, i32
  }
  func.func @transform_1(%arg0: i32) -> (i32, i32) {
    %c0_i32 = arith.constant 0 : i32
    %c0_i32_0 = arith.constant 0 : i32
    %c0_i32_1 = arith.constant 0 : i32
    return %c0_i32, %c0_i32_0 : i32, i32
  }
  func.func @transform_2(%arg0: i32) -> (i32, i32) {
    %c0_i32 = arith.constant 0 : i32
    %c0_i32_0 = arith.constant 0 : i32
    return %arg0, %c0_i32 : i32, i32
  }
}

</mosaic_0001>

<bundles_post_ra>
// kernel: basic_block_forward.5
= control target key start
LH: loop header
LB: loop body
LE: loop exit
PB: predicated region body
PF: predicated region fallthrough
CT: control target
= control target key end

     0   :  { %s411_s9 = smov 0   ;;  %s570_s0 = inlined_call_operand.vmem [shape: f32[512,128], index: 0, kind: input, shape index: {}]   ;;  %s571_s1 = inlined_call_operand.vmem [shape: f32[2,128], index: 1, kind: input, shape index: {}]   ;;  %s572_s2 = inlined_call_operand.vmem [shape: f32[512,128], index: 2, kind: output, shape index: {}]  }
   0x1 LB: > { %s367_s10 = sadd.s32 4294967295, %s394_s9   ;;  %p371_p0 = scmp.ge.s32.totalorder %s394_s9, 1  ;;  %s394_s9 = sphi %s411_s9, %s12_s9  }
   0x2   : > { %p113_p1 = scmp.lt.s32.totalorder %s394_s9, 3 }
   0x4   : > { %p114_p2 = pnand %p371_p0, %p113_p1 }
   0x5   : > { %s372_s11 = sshll.u32 (!%p114_p2), %s367_s10, 5 }
   0x6   : > { %117 = sbr.rel (%p114_p2) target bundleno = 53 (0x35), region = 28  ;;  %p136_p3 = scmp.lt.s32.totalorder (!%p114_p2), %s372_s11, 63 }
   0xb   : > { %s574_s11 = smov (!%p136_p3, %s372_s11), 63  ;;  %v422_v0 = vld [vmem:[%s571_s1] ss:$0 sm:$0xff]  ;;  %v432_v1 = vld [vmem:[%s571_s1 + $0x1] ss:$0 sm:$0xff] }
   0xc   : > { %s373_s14 = sshll.u32 %s574_s11, 3 }
   0xd   : > { %s427_s17 = scalar_lea.vmem %s570_s0, %s373_s14  ;;  %s455_s22 = scalar_lea.vmem %s572_s2, %s373_s14 }
   0xe   : > { %v147_v2 = vld [vmem:[%s427_s17] sm:$0xff]  ;;  %v148_v3 = vld [vmem:[%s427_s17 + $0x8] sm:$0xff]  ;;  %v149_v4 = vld [vmem:[%s427_s17 + $0x10] sm:$0xff] }
   0xf   : > { %v181_v5 = vmul.f32 %v422_v0, %v147_v2  ;;  %v182_v6 = vmul.f32 %v422_v0, %v148_v3  ;;  %v183_v7 = vmul.f32 %v422_v0, %v149_v4  ;;  %v150_v8 = vld [vmem:[%s427_s17 + $0x18] sm:$0xff]  ;;  %v151_v9 = vld [vmem:[%s427_s17 + $0x20] sm:$0xff]  ;;  %v152_v10 = vld [vmem:[%s427_s17 + $0x28] sm:$0xff] }
  0x10   : > { %v184_v11 = vmul.f32 %v422_v0, %v150_v8  ;;  %v185_v12 = vmul.f32 %v422_v0, %v151_v9  ;;  %v186_v13 = vmul.f32 %v422_v0, %v152_v10  ;;  %v153_v14 = vld [vmem:[%s427_s17 + $0x30] sm:$0xff]  ;;  %v154_v15 = vld [vmem:[%s427_s17 + $0x38] sm:$0xff]  ;;  %v155_v24 = vld [vmem:[%s427_s17 + $0x40] sm:$0xff] }
  0x11   : > { %v215_v16 = vadd.f32 %v432_v1, %v181_v5  ;;  %v216_v17 = vadd.f32 %v432_v1, %v182_v6  ;;  %v217_v18 = vadd.f32 %v432_v1, %v183_v7  ;;  %v187_v19 = vmul.f32 %v422_v0, %v153_v14  ;;  %v156_v25 = vld [vmem:[%s427_s17 + $0x48] sm:$0xff]  ;;  %v157_v26 = vld [vmem:[%s427_s17 + $0x50] sm:$0xff]  ;;  %v158_v31 = vld [vmem:[%s427_s17 + $0x58] sm:$0xff] }
  0x12   : > { %v218_v20 = vadd.f32 %v432_v1, %v184_v11  ;;  %v219_v21 = vadd.f32 %v432_v1, %v185_v12  ;;  %v220_v22 = vadd.f32 %v432_v1, %v186_v13  ;;  %v188_v23 = vmul.f32 %v422_v0, %v154_v15  ;;  %v159_v32 = vld [vmem:[%s427_s17 + $0x60] sm:$0xff]  ;;  %v160_v33 = vld [vmem:[%s427_s17 + $0x68] sm:$0xff]  ;;  %v161_v37 = vld [vmem:[%s427_s17 + $0x70] sm:$0xff] }
  0x13   : > { %v247_v27 = vmax.f32 %v215_v16, 0.0  ;;  %v248_v28 = vmax.f32 %v216_v17, 0.0  ;;  %v249_v29 = vmax.f32 %v217_v18, 0.0  ;;  %v221_v30 = vadd.f32 %v432_v1, %v187_v19  ;;  %v162_v42 = vld [vmem:[%s427_s17 + $0x78] sm:$0xff]  ;;  %v163_v54 = vld [vmem:[%s427_s17 + $0x80] sm:$0xff]  ;;  %v164_v55 = vld [vmem:[%s427_s17 + $0x88] sm:$0xff] }
  0x14   : > { %v250_v34 = vmax.f32 %v218_v20, 0.0  ;;  %v251_v35 = vmax.f32 %v219_v21, 0.0  ;;  %v222_v36 = vadd.f32 %v432_v1, %v188_v23  ;;  %v252_v38 = vmax.f32 %v220_v22, 0.0  ;;  %v165_v56 = vld [vmem:[%s427_s17 + $0x90] sm:$0xff]  ;;  %v166_v59 = vld [vmem:[%s427_s17 + $0x98] sm:$0xff]  ;;  %v167_v63 = vld [vmem:[%s427_s17 + $0xa0] sm:$0xff] }
  0x15   : > { %279 = vst [vmem:[%s455_s22] sm:$0xff] %v247_v27  ;;  %v189_v39 = vmul.f32 %v422_v0, %v155_v24  ;;  %v190_v40 = vmul.f32 %v422_v0, %v156_v25  ;;  %v191_v41 = vmul.f32 %v422_v0, %v157_v26  ;;  %v253_v43 = vmax.f32 %v221_v30, 0.0  ;;  %v168_v6 = vld [vmem:[%s427_s17 + $0xa8] sm:$0xff]  ;;  %v169_v10 = vld [vmem:[%s427_s17 + $0xb0] sm:$0xff]  ;;  %v170_v14 = vld [vmem:[%s427_s17 + $0xb8] sm:$0xff] }
  0x16   : > { %280 = vst [vmem:[%s455_s22 + $0x8] sm:$0xff] %v248_v28  ;;  %v192_v44 = vmul.f32 %v422_v0, %v158_v31  ;;  %v193_v45 = vmul.f32 %v422_v0, %v159_v32  ;;  %v194_v46 = vmul.f32 %v422_v0, %v160_v33  ;;  %v195_v50 = vmul.f32 %v422_v0, %v161_v37  ;;  %v171_v18 = vld [vmem:[%s427_s17 + $0xc0] sm:$0xff]  ;;  %v172_v22 = vld [vmem:[%s427_s17 + $0xc8] sm:$0xff]  ;;  %v173_v26 = vld [vmem:[%s427_s17 + $0xd0] sm:$0xff] }
  0x17   : > { %281 = vst [vmem:[%s455_s22 + $0x10] sm:$0xff] %v249_v29  ;;  %v223_v47 = vadd.f32 %v432_v1, %v189_v39  ;;  %v224_v48 = vadd.f32 %v432_v1, %v190_v40  ;;  %v225_v49 = vadd.f32 %v432_v1, %v191_v41  ;;  %v254_v51 = vmax.f32 %v222_v36, 0.0  ;;  %v174_v30 = vld [vmem:[%s427_s17 + $0xd8] sm:$0xff] }
  0x18   : > { %282 = vst [vmem:[%s455_s22 + $0x18] sm:$0xff] %v250_v34  ;;  %v226_v52 = vadd.f32 %v432_v1, %v192_v44  ;;  %v196_v53 = vmul.f32 %v422_v0, %v162_v42  ;;  %v227_v58 = vadd.f32 %v432_v1, %v193_v45  ;;  %v228_v62 = vadd.f32 %v432_v1, %v194_v46  ;;  %v175_v34 = vld [vmem:[%s427_s17 + $0xe0] sm:$0xff]  ;;  %v177_v42 = vld [vmem:[%s427_s17 + $0xf0] sm:$0xff]  ;;  %v178_v46 = vld [vmem:[%s427_s17 + $0xf8] sm:$0xff] }
  0x19   : > { %283 = vst [vmem:[%s455_s22 + $0x20] sm:$0xff] %v251_v35  ;;  %v255_v57 = vmax.f32 %v223_v47, 0.0  ;;  %v256_v60 = vmax.f32 %v224_v48, 0.0  ;;  %v257_v61 = vmax.f32 %v225_v49, 0.0  ;;  %v229_v2 = vadd.f32 %v432_v1, %v195_v50 }
  0x1a   : > { %284 = vst [vmem:[%s455_s22 + $0x28] sm:$0xff] %v252_v38  ;;  %v197_v3 = vmul.f32 %v422_v0, %v163_v54  ;;  %v198_v4 = vmul.f32 %v422_v0, %v164_v55  ;;  %v199_v5 = vmul.f32 %v422_v0, %v165_v56  ;;  %v258_v7 = vmax.f32 %v226_v52, 0.0  ;;  %v176_v38 = vld [vmem:[%s427_s17 + $0xe8] sm:$0xff] }
  0x1b   : > { %285 = vst [vmem:[%s455_s22 + $0x30] sm:$0xff] %v253_v43  ;;  %v230_v8 = vadd.f32 %v432_v1, %v196_v53  ;;  %v200_v9 = vmul.f32 %v422_v0, %v166_v59  ;;  %v259_v11 = vmax.f32 %v227_v58, 0.0  ;;  %v201_v13 = vmul.f32 %v422_v0, %v167_v63 }
  0x1c   : > { %286 = vst [vmem:[%s455_s22 + $0x38] sm:$0xff] %v254_v51  ;;  %v231_v12 = vadd.f32 %v432_v1, %v197_v3  ;;  %v260_v15 = vmax.f32 %v228_v62, 0.0  ;;  %v232_v16 = vadd.f32 %v432_v1, %v198_v4  ;;  %v202_v17 = vmul.f32 %v422_v0, %v168_v6 }
  0x1d   : > { %287 = vst [vmem:[%s455_s22 + $0x40] sm:$0xff] %v255_v57  ;;  %v261_v19 = vmax.f32 %v229_v2, 0.0  ;;  %v233_v20 = vadd.f32 %v432_v1, %v199_v5  ;;  %v203_v21 = vmul.f32 %v422_v0, %v169_v10  ;;  %v262_v23 = vmax.f32 %v230_v8, 0.0 }
  0x1e   : > { %288 = vst [vmem:[%s455_s22 + $0x48] sm:$0xff] %v256_v60  ;;  %v234_v24 = vadd.f32 %v432_v1, %v200_v9  ;;  %v204_v25 = vmul.f32 %v422_v0, %v170_v14  ;;  %v263_v27 = vmax.f32 %v231_v12, 0.0  ;;  %v235_v28 = vadd.f32 %v432_v1, %v201_v13 }
  0x1f   : > { %289 = vst [vmem:[%s455_s22 + $0x50] sm:$0xff] %v257_v61  ;;  %v205_v29 = vmul.f32 %v422_v0, %v171_v18  ;;  %v264_v31 = vmax.f32 %v232_v16, 0.0  ;;  %v236_v32 = vadd.f32 %v432_v1, %v202_v17  ;;  %v206_v33 = vmul.f32 %v422_v0, %v172_v22 }
  0x20   : > { %290 = vst [vmem:[%s455_s22 + $0x58] sm:$0xff] %v258_v7  ;;  %v265_v35 = vmax.f32 %v233_v20, 0.0  ;;  %v237_v36 = vadd.f32 %v432_v1, %v203_v21  ;;  %v207_v37 = vmul.f32 %v422_v0, %v173_v26  ;;  %v266_v39 = vmax.f32 %v234_v24, 0.0 }
  0x21   : > { %291 = vst [vmem:[%s455_s22 + $0x60] sm:$0xff] %v259_v11  ;;  %v238_v40 = vadd.f32 %v432_v1, %v204_v25  ;;  %v208_v41 = vmul.f32 %v422_v0, %v174_v30  ;;  %v267_v43 = vmax.f32 %v235_v28, 0.0  ;;  %v239_v44 = vadd.f32 %v432_v1, %v205_v29 }
  0x22   : > { %292 = vst [vmem:[%s455_s22 + $0x68] sm:$0xff] %v260_v15  ;;  %v209_v45 = vmul.f32 %v422_v0, %v175_v34  ;;  %v268_v47 = vmax.f32 %v236_v32, 0.0  ;;  %v240_v48 = vadd.f32 %v432_v1, %v206_v33  ;;  %v210_v49 = vmul.f32 %v422_v0, %v176_v38 }
  0x23   : > { %293 = vst [vmem:[%s455_s22 + $0x70] sm:$0xff] %v261_v19  ;;  %v269_v50 = vmax.f32 %v237_v36, 0.0  ;;  %v241_v51 = vadd.f32 %v432_v1, %v207_v37  ;;  %v211_v52 = vmul.f32 %v422_v0, %v177_v42  ;;  %v270_v53 = vmax.f32 %v238_v40, 0.0 }
  0x24   : > { %294 = vst [vmem:[%s455_s22 + $0x78] sm:$0xff] %v262_v23  ;;  %v242_v54 = vadd.f32 %v432_v1, %v208_v41  ;;  %v212_v55 = vmul.f32 %v422_v0, %v178_v46  ;;  %v271_v56 = vmax.f32 %v239_v44, 0.0  ;;  %v243_v57 = vadd.f32 %v432_v1, %v209_v45 }
  0x25   : > { %295 = vst [vmem:[%s455_s22 + $0x80] sm:$0xff] %v263_v27  ;;  %v272_v58 = vmax.f32 %v240_v48, 0.0  ;;  %v244_v59 = vadd.f32 %v432_v1, %v210_v49  ;;  %v273_v60 = vmax.f32 %v241_v51, 0.0  ;;  %v245_v61 = vadd.f32 %v432_v1, %v211_v52 }
  0x26   : > { %296 = vst [vmem:[%s455_s22 + $0x88] sm:$0xff] %v264_v31  ;;  %v274_v0 = vmax.f32 %v242_v54, 0.0  ;;  %v246_v62 = vadd.f32 %v432_v1, %v212_v55  ;;  %v275_v63 = vmax.f32 %v243_v57, 0.0 }
  0x27   : > { %297 = vst [vmem:[%s455_s22 + $0x90] sm:$0xff] %v265_v35  ;;  %v276_v2 = vmax.f32 %v244_v59, 0.0  ;;  %v277_v3 = vmax.f32 %v245_v61, 0.0 }
  0x28   : > { %298 = vst [vmem:[%s455_s22 + $0x98] sm:$0xff] %v266_v39  ;;  %v278_v4 = vmax.f32 %v246_v62, 0.0 }
  0x29   : > { %299 = vst [vmem:[%s455_s22 + $0xa0] sm:$0xff] %v267_v43 }
  0x2a   : > { %300 = vst [vmem:[%s455_s22 + $0xa8] sm:$0xff] %v268_v47 }
  0x2b   : > { %301 = vst [vmem:[%s455_s22 + $0xb0] sm:$0xff] %v269_v50 }
  0x2c   : > { %302 = vst [vmem:[%s455_s22 + $0xb8] sm:$0xff] %v270_v53 }
  0x2d   : > { %303 = vst [vmem:[%s455_s22 + $0xc0] sm:$0xff] %v271_v56 }
  0x2e   : > { %304 = vst [vmem:[%s455_s22 + $0xc8] sm:$0xff] %v272_v58 }
  0x2f   : > { %305 = vst [vmem:[%s455_s22 + $0xd0] sm:$0xff] %v273_v60 }
  0x30   : > { %306 = vst [vmem:[%s455_s22 + $0xd8] sm:$0xff] %v274_v0 }
  0x31   : > { %307 = vst [vmem:[%s455_s22 + $0xe0] sm:$0xff] %v275_v63 }
  0x32   : > { %308 = vst [vmem:[%s455_s22 + $0xe8] sm:$0xff] %v276_v2 }
  0x33   : > { %309 = vst [vmem:[%s455_s22 + $0xf0] sm:$0xff] %v277_v3 }
  0x34   : > { %310 = vst [vmem:[%s455_s22 + $0xf8] sm:$0xff] %v278_v4 }
  0x35 PF: > { %s12_s9 = sadd.s32 1, %s394_s9  }
  0x36   : > { %p9_p4 = scmp.ge.s32.totalorder %s12_s9, 4  }
  0x38   :  { %11 = sbr.rel (!%p9_p4) target bundleno = 1 (0x1), region = 58 }

// kernel: basic_block_forward.3
= control target key start
LH: loop header
LB: loop body
LE: loop exit
PB: predicated region body
PF: predicated region fallthrough
CT: control target
= control target key end

     0   :  { %s4417_s12 = smov 0   ;;  %s4419_s13 = smov 0   ;;  %s5238_s0 = inlined_call_operand.vmem [shape: bf16[2,16,16,128], index: 0, kind: input, shape index: {}]   ;;  %s5239_s1 = inlined_call_operand.vmem [shape: bf16[3,3,128,128], index: 1, kind: input, shape index: {}]   ;;  %s5240_s2 = inlined_call_operand.vmem [shape: f32[2,16,16,128], index: 2, kind: output, shape index: {0}]   ;;  %s5241_s3 = inlined_call_operand.vmem [shape: f32[2,2,2,128], index: 3, kind: output, shape index: {1}]  }
   0x1   :  { %s4421_s14 = smov 0   ;;  %s4423_s15 = smov 0  }
   0x2   :  { %s4425_s16 = smov 0  }
   0x3 LB: > { %s23_s17 = sadd.s32 1, %s4386_s14  ;;  %s26_s18 = sadd.s32 1, %s4390_s15  ;;  %s4394_s16 = sphi %s4425_s16, %s14_s16   ;;  %s4390_s15 = sphi %s4423_s15, %s5255_s15   ;;  %s4386_s14 = sphi %s4421_s14, %s5254_s14   ;;  %s4382_s13 = sphi %s4419_s13, %s5253_s13   ;;  %s4378_s12 = sphi %s4417_s12, %s5252_s12  }
   0x4   : > { %p24_p0 = scmp.ge.s32.totalorder %s23_s17, 2  ;;  %p3633_p1 = scmp.ge.s32.totalorder %s4394_s16, 1 }
   0x5   : > { %p156_p2 = scmp.lt.s32.totalorder %s4394_s16, 5 }
   0x6   : > { %s5257_s17 = smov (%p24_p0, %s23_s17), 0  ;;  %s5259_s18 = smov (!%p24_p0, %s26_s18), %s4390_s15 }
   0x7   : > { %p157_p3 = pnand %p3633_p1, %p156_p2  ;;  %p28_p4 = scmp.ge.s32.totalorder %s5259_s18, 2 }
   0x8   : > { %p193_p5 = scmp.lt.s32.totalorder (!%p157_p3), %s4382_s13, 1  ;;  %s4450_s19 = sshll.u32 (!%p157_p3), %s4378_s12, 3 }
   0x9   : > { %s5261_s18 = smov (%p28_p4, %s5259_s18), 0  ;;  %160 = sbr.rel (%p157_p3) target bundleno = 565 (0x235), region = 28 }
   0xa   : > { %p201_p6 = scmp.lt.s32.totalorder (!%p157_p3), %s4450_s19, 15  ;;  %p211_p7 = scmp.lt.s32.totalorder (!%p157_p3), %s4378_s12, 1 }
   0xb   : > { %s4193_s30 = sshll.u32 (!%p157_p3), %s4378_s12, 6  ;;  %p3645_p8 = scmp.le.s32.totalorder (!%p157_p3), %s4378_s12, 0 }
   0xe   : > { %v4396_v0 = vmov 0   ;;  %s5263_s13 = smov (!%p193_p5, %s4382_s13), 1  ;;  %vm433_vm0 = vsmask.f32 7938  ;;  %vm432_vm1 = vcmask 1043456   ;;  %vm439_vm4 = vcmask 1040384  }
   0xf   : > { %221 = vst [vmem:[#allocation2 + $0xc] sm:$0xf] %v4396_v0  ;;  %s202_s20 = scalar_select %p201_p6, %s4450_s19, 15  ;;  %vm268_vm2 = vsmask.f32 256  ;;  %vm4510_vm5 = vmand %vm432_vm1, %vm433_vm0 }
  0x10   : > { %218 = vst [vmem:[#allocation2] sm:$0xf] %v4396_v0  ;;  %s4191_s21 = sshll.u32 %s5263_s13, 7  ;;  %s3638_s22 = sshll.u32 %s5263_s13, 5  ;;  %vm269_vm3 = vsmask.f32 4368  ;;  %vm4525_vm7 = vmand %vm439_vm4, %vm268_vm2 }
  0x11   : > { %219 = vst [vmem:[#allocation2 + $0x4] sm:$0xf] %v4396_v0  ;;  %s4463_s25 = scalar_lea.vmem %s5238_s0, %s4191_s21  ;;  %s3637_s26 = sshll.u32 %s202_s20, 1  ;;  %vm4518_vm6 = vmor %vm268_vm2, %vm269_vm3 }
  0x12   : > { %220 = vst [vmem:[#allocation2 + $0x8] sm:$0x1] %v4396_v0  ;;  %s205_s27 = sadd.s32 %s3638_s22, %s3637_s26  ;;  %s3640_s28 = sshll.u32 %s5263_s13, 1 }
  0x13   : > { %222 = vst [vmem:[#allocation2 + $0x10] sm:$0xf] %v4396_v0  ;;  %s3639_s29 = sshll.u32 %s205_s27, 3  ;;  %s4475_s7 = scalar_lea.vmem %s4463_s25, %s4193_s30 }
  0x14   : > { %223 = vst [vmem:[#allocation2 + $0x14] sm:$0x1] %v4396_v0  ;;  %s4472_s6 = scalar_lea.vmem %s5240_s2, %s3639_s29  ;;  %v252_v1 = vld [vmem:[%s4475_s7] sm:$0xf]  ;;  %v253_v3 = vld [vmem:[%s4475_s7 + $0x4] sm:$0xf] }
  0x15   : > { %224 = vst [vmem:[#allocation2 + $0x18] sm:$0xf] %v4396_v0  ;;  %s212_s8 = scalar_select %p211_p7, %s4378_s12, 1  ;;  %v272_v2 = vshrl.u32 %v252_v1, 16  ;;  %v254_v4 = vld [vmem:[%s4475_s7 + $0x8] sm:$0xf] }
  0x16   : > { %225 = vst [vmem:[#allocation2 + $0x1c] sm:$0xf] %v4396_v0  ;;  %v255_v5 = vld [vmem:[%s4475_s7 + $0xc] sm:$0xf]  ;;  %v280_v6 = vshrl.u32 %v253_v3, 16  ;;  %v289_v7 = vshrl.u32 %v254_v4, 16 }
  0x17   : > { %226 = vst [vmem:[#allocation2 + $0x20] sm:$0x1] %v4396_v0  ;;  %s214_s9 = sadd.s32 %s3640_s28, %s212_s8  ;;  %v274_v8 = vrot.slane %v272_v2, 7  ;;  %v275_v9 = vshll.u32 %v252_v1, 16  ;;  %v297_v10 = vshrl.u32 %v255_v5, 16  ;;  %v283_v14 = vshll.u32 %v253_v3, 16 }
  0x18   : > { %227 = vst [vmem:[#allocation2 + $0x24] sm:$0xf] %v4396_v0  ;;  %s3641_s10 = sshll.u32 %s214_s9, 1  ;;  %v256_v11 = vld [vmem:[%s4475_s7 + $0x10] sm:$0xf]  ;;  %v282_v13 = vrot.slane %v280_v6, 7 }
  0x19   : > { %228 = vst [vmem:[#allocation2 + $0x28] sm:$0xf] %v4396_v0  ;;  %s4489_s20 = scalar_lea.vmem %s5241_s3, %s3641_s10  ;;  %v257_v12 = vld [vmem:[%s4475_s7 + $0x14] sm:$0xf]  ;;  %v291_v15 = vrot.slane %v289_v7, 7  ;;  %v306_v17 = vshrl.u32 %v256_v11, 16  ;;  %v277_v20 = vor.u32 %v275_v9, %v274_v8 }
  0x1a   : > { %229 = vst [vmem:[#allocation2 + $0x2c] sm:$0x1] %v4396_v0  ;;  %v435_v16 = vld [vmem:[#allocation2 + $0xc] sm:$0xf]  ;;  %v314_v18 = vshrl.u32 %v257_v12, 16  ;;  %v292_v21 = vshll.u32 %v254_v4, 16  ;;  %v285_v30 = vor.u32 %v283_v14, %v282_v13 }
  0x1b   : > { %230 = vst [vmem:[#allocation2 + $0x30] sm:$0xf] %v4396_v0  ;;  %v258_v19 = vld [vmem:[%s4475_s7 + $0x18] sm:$0xf]  ;;  %v299_v22 = vrot.slane %v297_v10, 7  ;;  %v300_v23 = vshll.u32 %v255_v5, 16  ;;  %v436_v40 = vsel %vm4510_vm5, %v277_v20, %v435_v16 }
  0x1c   : > { %231 = vst [vmem:[#allocation2 + $0x34] sm:$0xf] %v4396_v0  ;;  %v278_v25 = vrot.slane %v274_v8, 4  ;;  %v441_v26 = vld [vmem:[#allocation2 + $0x14] sm:$0x1]  ;;  %v323_v27 = vshrl.u32 %v258_v19, 16  ;;  %v294_v41 = vor.u32 %v292_v21, %v291_v15 }
  0x1d   : > { %232 = vst [vmem:[#allocation2 + $0x38] sm:$0x1] %v4396_v0  ;;  %v259_v28 = vld [vmem:[%s4475_s7 + $0x1c] sm:$0xf]  ;;  %v287_v31 = vrot.slane %v282_v13, 4  ;;  %v295_v32 = vrot.slane %v291_v15, 4  ;;  %v302_v42 = vor.u32 %v300_v23, %v299_v22 }
  0x1e   : > { %233 = vst [vmem:[#allocation2 + $0x3c] sm:$0xf] %v4396_v0  ;;  %v331_v33 = vshrl.u32 %v259_v28, 16  ;;  %v444_v35 = vld [vmem:[#allocation2 + $0x18] sm:$0xf]  ;;  %v308_v36 = vrot.slane %v306_v17, 7  ;;  %v286_v49 = vsel %vm4518_vm6, %v278_v25, %v285_v30 }
  0x1f   : > { %234 = vst [vmem:[#allocation2 + $0x40] sm:$0xf] %v4396_v0  ;;  %v309_v37 = vshll.u32 %v256_v11, 16  ;;  %v316_v38 = vrot.slane %v314_v18, 7  ;;  %v317_v39 = vshll.u32 %v257_v12, 16  ;;  %v304_v45 = vrot.slane %v299_v22, 4 }
  0x20   : > { %235 = vst [vmem:[#allocation2 + $0x44] sm:$0x1] %v4396_v0  ;;  %v448_v43 = vld [vmem:[#allocation2 + $0x20] sm:$0x1]  ;;  %v325_v46 = vrot.slane %v323_v27, 7  ;;  %v326_v47 = vshll.u32 %v258_v19, 16  ;;  %v442_v50 = vsel %vm4525_vm7, %v287_v31, %v441_v26  ;;  %v445_v59 = vsel %vm4510_vm5, %v294_v41, %v444_v35 }
  0x21   : > { %236 = vst [vmem:[#allocation2 + $0x48] sm:$0xf] %v4396_v0  ;;  %v260_v44 = vld [vmem:[%s4475_s7 + $0x20] sm:$0xf]  ;;  %v333_v51 = vrot.slane %v331_v33, 7  ;;  %v334_v52 = vshll.u32 %v259_v28, 16  ;;  %v311_v54 = vor.u32 %v309_v37, %v308_v36  ;;  %v319_v57 = vor.u32 %v317_v39, %v316_v38 }
  0x22   : > { %237 = vst [vmem:[#allocation2 + $0x4c] sm:$0xf] %v4396_v0  ;;  %v340_v48 = vshrl.u32 %v260_v44, 16  ;;  %v261_v53 = vld [vmem:[%s4475_s7 + $0x24] sm:$0xf]  ;;  %v312_v56 = vrot.slane %v308_v36, 4  ;;  %v303_v60 = vsel %vm4518_vm6, %v295_v32, %v302_v42  ;;  %v328_v3 = vor.u32 %v326_v47, %v325_v46 }
  0x23   : > { %238 = vst [vmem:[#allocation2 + $0x50] sm:$0x1] %v4396_v0  ;;  %v451_v55 = vld [vmem:[#allocation2 + $0x24] sm:$0xf]  ;;  %v348_v58 = vshrl.u32 %v261_v53, 16  ;;  %v343_v1 = vshll.u32 %v260_v44, 16  ;;  %v336_v6 = vor.u32 %v334_v52, %v333_v51 }
  0x24   : > { %239 = vst [vmem:[#allocation2 + $0x54] sm:$0xf] %v4396_v0  ;;  %v455_v61 = vld [vmem:[#allocation2 + $0x2c] sm:$0x1]  ;;  %v458_v62 = vld [vmem:[#allocation2 + $0x30] sm:$0xf]  ;;  %v452_v10 = vsel %vm4510_vm5, %v311_v54, %v451_v55  ;;  %v320_v11 = vsel %vm4518_vm6, %v312_v56, %v319_v57 }
  0x25   : > { %240 = vst [vmem:[#allocation2 + $0x58] sm:$0xf] %v4396_v0  ;;  %v342_v63 = vrot.slane %v340_v48, 7  ;;  %v321_v2 = vrot.slane %v316_v38, 4  ;;  %v329_v4 = vrot.slane %v325_v46, 4  ;;  %v350_v7 = vrot.slane %v348_v58, 7 }
  0x26   : > { %241 = vst [vmem:[#allocation2 + $0x5c] sm:$0x1] %v4396_v0  ;;  %v262_v5 = vld [vmem:[%s4475_s7 + $0x28] sm:$0xf]  ;;  %v351_v8 = vshll.u32 %v261_v53, 16  ;;  %v338_v15 = vrot.slane %v333_v51, 4  ;;  %v459_v20 = vsel %vm4510_vm5, %v328_v3, %v458_v62 }
  0x27   : > { %242 = vst [vmem:[#allocation2 + $0x60] sm:$0xf] %v4396_v0  ;;  %v357_v9 = vshrl.u32 %v262_v5, 16  ;;  %v462_v12 = vld [vmem:[#allocation2 + $0x38] sm:$0x1]  ;;  %v360_v13 = vshll.u32 %v262_v5, 16  ;;  %v345_v16 = vor.u32 %v343_v1, %v342_v63  ;;  %v456_v19 = vsel %vm4525_vm7, %v321_v2, %v455_v61 }
  0x28   : > { %243 = vst [vmem:[#allocation2 + $0x64] sm:$0xf] %v4396_v0  ;;  %v263_v14 = vld [vmem:[%s4475_s7 + $0x2c] sm:$0xf]  ;;  %v465_v21 = vld [vmem:[#allocation2 + $0x3c] sm:$0xf]  ;;  %v337_v23 = vsel %vm4518_vm6, %v329_v4, %v336_v6  ;;  %v353_v26 = vor.u32 %v351_v8, %v350_v7  ;;  %v463_v37 = vsel %vm4525_vm7, %v338_v15, %v462_v12 }
  0x29   : > { %244 = vst [vmem:[#allocation2 + $0x68] sm:$0x1] %v4396_v0  ;;  %v359_v17 = vrot.slane %v357_v9, 7  ;;  %v365_v18 = vshrl.u32 %v263_v14, 16  ;;  %v368_v22 = vshll.u32 %v263_v14, 16  ;;  %v346_v25 = vrot.slane %v342_v63, 4 }
  0x2a   : > { %245 = vst [vmem:[#allocation2 + $0x6c] sm:$0xf] %v4396_v0  ;;  %v355_v27 = vrot.slane %v350_v7, 4  ;;  %v469_v28 = vld [vmem:[#allocation2 + $0x44] sm:$0x1]  ;;  %v466_v38 = vsel %vm4510_vm5, %v345_v16, %v465_v21  ;;  %s3646_s21 = sadd.s32 (!%p3645_p8), 4294967295, %s4450_s19 }
  0x2b   : > { %246 = vst [vmem:[#allocation2 + $0x70] sm:$0xf] %v4396_v0  ;;  %v472_v30 = vld [vmem:[#allocation2 + $0x48] sm:$0xf]  ;;  %v264_v31 = vld [vmem:[%s4475_s7 + $0x30] sm:$0xf]  ;;  %v362_v32 = vor.u32 %v360_v13, %v359_v17 }
  0x2c   : > { %247 = vst [vmem:[#allocation2 + $0x74] sm:$0x1] %v4396_v0  ;;  %v449_v0 = vsel %vm4525_vm7, %v304_v45, %v448_v43  ;;  %v367_v33 = vrot.slane %v365_v18, 7  ;;  %v374_v35 = vshrl.u32 %v264_v31, 16  ;;  %v377_v36 = vshll.u32 %v264_v31, 16  ;;  %s4194_s22 = sshll.u32 (!%p3645_p8), %s3646_s21, 3 }
  0x2d   : > { %437 = vst [vmem:[#allocation2 + $0xc] sm:$0xf] %v436_v40  ;;  %v363_v39 = vrot.slane %v359_v17, 4  ;;  %v265_v40 = vld [vmem:[%s4475_s7 + $0x34] sm:$0xf]  ;;  %v354_v45 = vsel %vm4518_vm6, %v346_v25, %v353_v26  ;;  %v470_v48 = vsel %vm4525_vm7, %v355_v27, %v469_v28  ;;  %s500_s23 = scalar_lea.vmem (!%p3645_p8), %s4463_s25, %s4194_s22 }
  0x2e   : > { %438 = vst [vmem:[#allocation2 + $0x10] sm:$0xf] %v286_v49  ;;  %v370_v41 = vor.u32 %v368_v22, %v367_v33  ;;  %v372_v42 = vrot.slane %v367_v33, 4  ;;  %v376_v43 = vrot.slane %v374_v35, 7  ;;  %v382_v44 = vshrl.u32 %v265_v40, 16 }
  0x2f   : > { %443 = vst [vmem:[#allocation2 + $0x14] sm:$0x1] %v442_v50  ;;  %v476_v46 = vld [vmem:[#allocation2 + $0x50] sm:$0x1]  ;;  %v385_v47 = vshll.u32 %v265_v40, 16  ;;  %v473_v49 = vsel %vm4510_vm5, %v362_v32, %v472_v30 }
  0x30   : > { %446 = vst [vmem:[#allocation2 + $0x18] sm:$0xf] %v445_v59  ;;  %v379_v50 = vor.u32 %v377_v36, %v376_v43  ;;  %v479_v51 = vld [vmem:[#allocation2 + $0x54] sm:$0xf]  ;;  %v266_v52 = vld [vmem:[%s4475_s7 + $0x38] sm:$0xf]  ;;  %v371_v57 = vsel %vm4518_vm6, %v363_v39, %v370_v41  ;;  %v477_v58 = vsel %vm4525_vm7, %v372_v42, %v476_v46 }
  0x31   : > { %447 = vst [vmem:[#allocation2 + $0x1c] sm:$0xf] %v303_v60  ;;  %v380_v53 = vrot.slane %v376_v43, 4  ;;  %v384_v54 = vrot.slane %v382_v44, 7  ;;  %v391_v55 = vshrl.u32 %v266_v52, 16  ;;  %v394_v56 = vshll.u32 %v266_v52, 16 }
  0x32   : > { %450 = vst [vmem:[#allocation2 + $0x20] sm:$0x1] %v449_v0  ;;  %v483_v59 = vld [vmem:[#allocation2 + $0x5c] sm:$0x1]  ;;  %v480_v0 = vsel %vm4510_vm5, %v379_v50, %v479_v51  ;;  %v486_v2 = vld [vmem:[#allocation2 + $0x60] sm:$0xf] }
  0x33   : > { %453 = vst [vmem:[#allocation2 + $0x24] sm:$0xf] %v452_v10  ;;  %v267_v60 = vld [vmem:[%s4475_s7 + $0x3c] sm:$0xf]  ;;  %v387_v61 = vor.u32 %v385_v47, %v384_v54  ;;  %v389_v62 = vrot.slane %v384_v54, 4  ;;  %v393_v63 = vrot.slane %v391_v55, 7 }
  0x34   : > { %454 = vst [vmem:[#allocation2 + $0x28] sm:$0xf] %v320_v11  ;;  %v399_v1 = vshrl.u32 %v267_v60, 16  ;;  %v402_v3 = vshll.u32 %v267_v60, 16  ;;  %v490_v10 = vld [vmem:[#allocation2 + $0x68] sm:$0x1] }
  0x35   : > { %457 = vst [vmem:[#allocation2 + $0x2c] sm:$0x1] %v456_v19  ;;  %v388_v4 = vsel %vm4518_vm6, %v380_v53, %v387_v61  ;;  %v396_v5 = vor.u32 %v394_v56, %v393_v63  ;;  %v484_v6 = vsel %vm4525_vm7, %v389_v62, %v483_v59  ;;  %v397_v7 = vrot.slane %v393_v63, 4 }
  0x36   : > { %460 = vst [vmem:[#allocation2 + $0x30] sm:$0xf] %v459_v20  ;;  %v401_v8 = vrot.slane %v399_v1, 7 }
  0x37   : > { %461 = vst [vmem:[#allocation2 + $0x34] sm:$0xf] %v337_v23  ;;  %v487_v9 = vsel %vm4510_vm5, %v396_v5, %v486_v2 }
  0x38   : > { %464 = vst [vmem:[#allocation2 + $0x38] sm:$0x1] %v463_v37  ;;  %v404_v11 = vor.u32 %v402_v3, %v401_v8  ;;  %v406_v12 = vrot.slane %v401_v8, 4 }
  0x39   : > { %467 = vst [vmem:[#allocation2 + $0x3c] sm:$0xf] %v466_v38 }
  0x3a   : > { %468 = vst [vmem:[#allocation2 + $0x40] sm:$0xf] %v354_v45  ;;  %v405_v13 = vsel %vm4518_vm6, %v397_v7, %v404_v11  ;;  %v491_v14 = vsel %vm4525_vm7, %v406_v12, %v490_v10 }
  0x3b   : > { %471 = vst [vmem:[#allocation2 + $0x44] sm:$0x1] %v470_v48 }
  0x3c   : > { %474 = vst [vmem:[#allocation2 + $0x48] sm:$0xf] %v473_v49 }
  0x3d   : > { %475 = vst [vmem:[#allocation2 + $0x4c] sm:$0xf] %v371_v57 }
  0x3e   : > { %478 = vst [vmem:[#allocation2 + $0x50] sm:$0x1] %v477_v58 }
  0x3f   : > { %481 = vst [vmem:[#allocation2 + $0x54] sm:$0xf] %v480_v0 }
  0x40   : > { %482 = vst [vmem:[#allocation2 + $0x58] sm:$0xf] %v388_v4  ;;  %496 = sbr.rel (%p3645_p8) target bundleno = 80 (0x50), region = 32 }
  0x41   : > { %485 = vst [vmem:[#allocation2 + $0x5c] sm:$0x1] %v484_v6 }
  0x42   : > { %488 = vst [vmem:[#allocation2 + $0x60] sm:$0xf] %v487_v9 }
  0x43   : > { %489 = vst [vmem:[#allocation2 + $0x64] sm:$0xf] %v405_v13 }
  0x44   : > { %492 = vst [vmem:[#allocation2 + $0x68] sm:$0x1] %v491_v14 }
  0x45   : > { %v501_v15 = vld [vmem:[%s500_s23] sm:$0xf]  ;;  %v502_v16 = vld [vmem:[%s500_s23 + $0x4] sm:$0xf]  ;;  %v527_v25 = vld [vmem:[#allocation2 + $0x8] sm:$0x1] }
  0x46   : > { %v504_v17 = vshrl.u32 %v501_v15, 16  ;;  %v507_v18 = vshll.u32 %v501_v15, 16  ;;  %v512_v19 = vshrl.u32 %v502_v16, 16  ;;  %v515_v20 = vshll.u32 %v502_v16, 16  ;;  %v523_v23 = vld [vmem:[#allocation2] sm:$0xf] }
  0x48   : > { %v506_v21 = vrot.slane %v504_v17, 7  ;;  %v514_v22 = vrot.slane %v512_v19, 7 }
  0x4a   : > { %v509_v26 = vor.u32 %v507_v18, %v506_v21  ;;  %v510_v27 = vrot.slane %v506_v21, 4  ;;  %v517_v28 = vor.u32 %v515_v20, %v514_v22  ;;  %v519_v30 = vrot.slane %v514_v22, 4 }
  0x4c   : > { %v524_v31 = vsel %vm4510_vm5, %v509_v26, %v523_v23  ;;  %v518_v32 = vsel %vm4518_vm6, %v510_v27, %v517_v28  ;;  %v528_v33 = vsel %vm4525_vm7, %v519_v30, %v527_v25 }
  0x4d   : > { %525 = vst [vmem:[#allocation2] sm:$0xf] %v524_v31 }
  0x4e   : > { %526 = vst [vmem:[#allocation2 + $0x4] sm:$0xf] %v518_v32 }
  0x4f   : > { %529 = vst [vmem:[#allocation2 + $0x8] sm:$0x1] %v528_v33 }
  0x50 PF: > { %p3649_p9 = scmp.ge.s32.totalorder %s4378_s12, 1 }
  0x52   : > { %533 = sbr.rel (%p3649_p9) target bundleno = 98 (0x62), region = 36 }
  0x57   : > { %v3651_v35 = vld [vmem:[%s4475_s7 + $0x40] sm:$0xf]  ;;  %v3652_v36 = vld [vmem:[%s4475_s7 + $0x44] sm:$0xf]  ;;  %v562_v43 = vld [vmem:[#allocation2 + $0x6c] sm:$0xf] }
  0x58   : > { %v542_v37 = vshrl.u32 %v3651_v35, 16  ;;  %v545_v38 = vshll.u32 %v3651_v35, 16  ;;  %v550_v39 = vshrl.u32 %v3652_v36, 16  ;;  %v553_v40 = vshll.u32 %v3652_v36, 16  ;;  %v566_v44 = vld [vmem:[#allocation2 + $0x74] sm:$0x1] }
  0x5a   : > { %v544_v41 = vrot.slane %v542_v37, 7  ;;  %v552_v42 = vrot.slane %v550_v39, 7 }
  0x5c   : > { %v547_v45 = vor.u32 %v545_v38, %v544_v41  ;;  %v548_v46 = vrot.slane %v544_v41, 4  ;;  %v555_v47 = vor.u32 %v553_v40, %v552_v42  ;;  %v557_v48 = vrot.slane %v552_v42, 4 }
  0x5e   : > { %v563_v49 = vsel %vm4510_vm5, %v547_v45, %v562_v43  ;;  %v556_v50 = vsel %vm4518_vm6, %v548_v46, %v555_v47  ;;  %v567_v51 = vsel %vm4525_vm7, %v557_v48, %v566_v44 }
  0x5f   : > { %564 = vst [vmem:[#allocation2 + $0x6c] sm:$0xf] %v563_v49 }
  0x60   : > { %565 = vst [vmem:[#allocation2 + $0x70] sm:$0xf] %v556_v50 }
  0x61   : > { %568 = vst [vmem:[#allocation2 + $0x74] sm:$0x1] %v567_v51 }
  0x62 PF: > { %v4210_v52 = vld [vmem:[%s5239_s1 + $0x38] sm:$0xff]  ;;  %v4209_v24 = vld [vmem:[%s5239_s1 + $0x30] sm:$0xff]  ;;  %v4208_v29 = vld [vmem:[%s5239_s1 + $0x28] sm:$0xff]  ;;  %vm834_vm8 = vsmask.f32 3328  ;;  %vm1271_vm10 = vcmask 1042432  }
  0x63   : > { %4291 = vmatpush.bf16.msra.mxu1 %v4210_v52  ;;  %4292 = vmatpush.bf16.msra.mxu2 %v4210_v52  ;;  %v4207_v34 = vld [vmem:[%s5239_s1 + $0x20] sm:$0xff]  ;;  %v4206_v53 = vld [vmem:[%s5239_s1 + $0x18] sm:$0xff]  ;;  %v4205_v54 = vld [vmem:[%s5239_s1 + $0x10] sm:$0xff]  ;;  %vm835_vm9 = vsmask.f32 7440  ;;  %vm1272_vm11 = vcmask 1046532  }
  0x64   : > { %4293 = vmatpush.bf16.msra.mxu3 %v4210_v52  ;;  %729 = vmatpush.bf16.msra.mxu0 %v4210_v52  ;;  %v4204_v55 = vld [vmem:[%s5239_s1 + $0x8] sm:$0xff]  ;;  %v4203_v56 = vld [vmem:[%s5239_s1] sm:$0xff]  ;;  %v4226_v57 = vld [vmem:[%s5239_s1 + $0xb8] sm:$0xff] }
  0x65   : > { %v4218_v58 = vld [vmem:[%s5239_s1 + $0x78] sm:$0xff]  ;;  %v4199_v60 = vld [vmem:[#allocation2 + $0x30] sm:$0xff]  ;;  %v4201_v61 = vld [vmem:[#allocation2 + $0x48] sm:$0xff] }
  0x66   : > { %v4197_v59 = vld [vmem:[#allocation2 + $0x18] sm:$0xff]  ;;  %v4195_v62 = vld [vmem:[#allocation2] sm:$0xff]  ;;  %v4225_v0 = vld [vmem:[%s5239_s1 + $0xb0] sm:$0xff] }
  0x67   : > { %4294 = vmatpush.bf16.msra.mxu1 %v4209_v24  ;;  %4295 = vmatpush.bf16.msra.mxu2 %v4209_v24  ;;  %v4242_v63 = vld [vmem:[%s5239_s1 + $0xf8] sm:$0xff]  ;;  %v4217_v2 = vld [vmem:[%s5239_s1 + $0x70] sm:$0xff]  ;;  %v810_v3 = vld [vmem:[#allocation2] sm:$0xf] }
  0x68   : > { %4296 = vmatpush.bf16.msra.mxu3 %v4209_v24  ;;  %730 = vmatpush.bf16.msra.mxu0 %v4209_v24  ;;  %v4250_v1 = vld [vmem:[%s5239_s1 + $0x138] sm:$0xff]  ;;  %v811_v4 = vld [vmem:[#allocation2 + $0x4] sm:$0xf]  ;;  %v1750_v5 = vld [vmem:[#allocation2 + $0xc] sm:$0xf]  ;;  %v838_v8 = vshrl.u32 %v810_v3, 16 }
  0x69   : > { %v4241_v6 = vld [vmem:[%s5239_s1 + $0xf0] sm:$0xff]  ;;  %v841_v9 = vshll.u32 %v810_v3, 16  ;;  %v847_v10 = vshll.u32 %v811_v4, 16  ;;  %v851_v11 = vshrl.u32 %v811_v4, 16  ;;  %v4224_v13 = vld [vmem:[%s5239_s1 + $0xa8] sm:$0xff]  ;;  %v1775_v15 = vshrl.u32 %v1750_v5, 16  ;;  %vm4708_vm12 = vmor %vm834_vm8, %vm835_vm9 }
  0x6a   : > { %v4249_v7 = vld [vmem:[%s5239_s1 + $0x130] sm:$0xff]  ;;  %v4216_v14 = vld [vmem:[%s5239_s1 + $0x68] sm:$0xff]  ;;  %v1778_v16 = vshll.u32 %v1750_v5, 16  ;;  %v840_v21 = vrot.slane %v838_v8, 4  ;;  %v4223_v26 = vld [vmem:[%s5239_s1 + $0xa0] sm:$0xff] }
  0x6b   : > { %4297 = vmatpush.bf16.msra.mxu1 %v4208_v29  ;;  %4298 = vmatpush.bf16.msra.mxu2 %v4208_v29  ;;  %v1751_v12 = vld [vmem:[#allocation2 + $0x10] sm:$0xf]  ;;  %v4240_v19 = vld [vmem:[%s5239_s1 + $0xe8] sm:$0xff]  ;;  %v843_v22 = vrot.slane %v841_v9, 5  ;;  %v4667_v23 = vrot.slane %v847_v10, 5  ;;  %v853_v25 = vrot.slane %v851_v11, 4  ;;  %vm4714_vm13 = vmor %vm1271_vm10, %vm1272_vm11 }
  0x6c   : > { %4299 = vmatpush.bf16.msra.mxu3 %v4208_v29  ;;  %731 = vmatpush.bf16.msra.mxu0 %v4208_v29  ;;  %v1784_v17 = vshll.u32 %v1751_v12, 16  ;;  %v1788_v18 = vshrl.u32 %v1751_v12, 16  ;;  %v4248_v20 = vld [vmem:[%s5239_s1 + $0x128] sm:$0xff]  ;;  %v4215_v27 = vld [vmem:[%s5239_s1 + $0x60] sm:$0xff]  ;;  %v1777_v30 = vrot.slane %v1775_v15, 4  ;;  %v1780_v31 = vrot.slane %v1778_v16, 5 }
  0x6d   : > { %v812_v28 = vld [vmem:[#allocation2 + $0x8] sm:$0x1]  ;;  %v4675_v32 = vld [vmem:[#allocation2 + $0x4] sm:$0xf]  ;;  %v4200_v39 = vld [vmem:[#allocation2 + $0x3c] sm:$0xff]  ;;  %v844_v40 = vor.u32 %v843_v22, %v840_v21  ;;  %v854_v41 = vor.u32 %v853_v25, %v4667_v23 }
  0x6e   : > { %v4239_v33 = vld [vmem:[%s5239_s1 + $0xe0] sm:$0xff]  ;;  %v4683_v36 = vrot.slane %v1784_v17, 5  ;;  %v1790_v37 = vrot.slane %v1788_v18, 4  ;;  %v857_v42 = vshll.u32 %v812_v28, 16  ;;  %v1752_v43 = vld [vmem:[#allocation2 + $0x14] sm:$0x1]  ;;  %v1781_v48 = vor.u32 %v1780_v31, %v1777_v30 }
  0x6f   : > { %4300 = vmatpush.bf16.msra.mxu1 %v4207_v34  ;;  %4301 = vmatpush.bf16.msra.mxu2 %v4207_v34  ;;  %v4247_v35 = vld [vmem:[%s5239_s1 + $0x120] sm:$0xff]  ;;  %v4222_v44 = vld [vmem:[%s5239_s1 + $0x98] sm:$0xff]  ;;  %v1276_v47 = vrot.slane %v4675_v32, 5  ;;  %v1225_v49 = vld [vmem:[#allocation2 + $0x8] sm:$0x1]  ;;  %v1794_v24 = vshll.u32 %v1752_v43, 16 }
  0x70   : > { %4302 = vmatpush.bf16.msra.mxu3 %v4207_v34  ;;  %732 = vmatpush.bf16.msra.mxu0 %v4207_v34  ;;  %v4198_v38 = vld [vmem:[#allocation2 + $0x24] sm:$0xff]  ;;  %v4214_v45 = vld [vmem:[%s5239_s1 + $0x58] sm:$0xff]  ;;  %v1223_v46 = vld [vmem:[#allocation2] sm:$0xe]  ;;  %v1791_v52 = vor.u32 %v1790_v37, %v4683_v36 }
  0x71   : > { %v4202_v50 = vld [vmem:[#allocation2 + $0x54] sm:$0xff]  ;;  %v4196_v51 = vld [vmem:[#allocation2 + $0xc] sm:$0xff]  ;;  %v1754_v9 = vld [vmem:[#allocation2 + $0x1c] sm:$0xf] }
  0x72   : > { %v4238_v29 = vld [vmem:[%s5239_s1 + $0xd8] sm:$0xff]  ;;  %v814_v3 = vld [vmem:[#allocation2 + $0x10] sm:$0xf]  ;;  %v4220_v10 = vld [vmem:[%s5239_s1 + $0x88] sm:$0xff]  ;;  %v1808_v22 = vshll.u32 %v1754_v9, 16 }
  0x73   : > { %4303 = vmatpush.bf16.msra.mxu1 %v4206_v53  ;;  %4304 = vmatpush.bf16.msra.mxu2 %v4206_v53  ;;  %v4246_v34 = vld [vmem:[%s5239_s1 + $0x118] sm:$0xff]  ;;  %v4237_v5 = vld [vmem:[%s5239_s1 + $0xd0] sm:$0xff]  ;;  %v4212_v11 = vld [vmem:[%s5239_s1 + $0x48] sm:$0xff]  ;;  %v871_v17 = vshll.u32 %v814_v3, 16  ;;  %v875_v18 = vshrl.u32 %v814_v3, 16 }
  0x74   : > { %4305 = vmatpush.bf16.msra.mxu3 %v4206_v53  ;;  %733 = vmatpush.bf16.msra.mxu0 %v4206_v53  ;;  %v845_v53 = vrot.slane %v844_v40, 4  ;;  %v1753_v4 = vld [vmem:[#allocation2 + $0x18] sm:$0xf]  ;;  %v4236_v25 = vld [vmem:[%s5239_s1 + $0xc8] sm:$0xff]  ;;  %v4219_v30 = vld [vmem:[%s5239_s1 + $0x80] sm:$0xff] }
  0x75   : > { %v1802_v21 = vshll.u32 %v1753_v4, 16  ;;  %v4211_v31 = vld [vmem:[%s5239_s1 + $0x40] sm:$0xff]  ;;  %v815_v40 = vld [vmem:[#allocation2 + $0x14] sm:$0x1]  ;;  %v877_v43 = vrot.slane %v875_v18, 4 }
  0x76   : > { %v4281_v3 = vld [vmem:[%s5239_s1 + $0x1f0] sm:$0xff]  ;;  %v1757_v18 = vld [vmem:[#allocation2 + $0x28] sm:$0xf] }
  0x77   : > { %4306 = vmatpush.bf16.msra.mxu1 %v4205_v54  ;;  %4307 = vmatpush.bf16.msra.mxu2 %v4205_v54 }
  0x78   : > { %4308 = vmatpush.bf16.msra.mxu3 %v4205_v54  ;;  %734 = vmatpush.bf16.msra.mxu0 %v4205_v54  ;;  %v855_v54 = vrot.slane %v854_v41, 4 }
  0x7b   : > { %4309 = vmatpush.bf16.msra.mxu1 %v4204_v55  ;;  %4310 = vmatpush.bf16.msra.mxu2 %v4204_v55 }
  0x7c   : > { %4311 = vmatpush.bf16.msra.mxu3 %v4204_v55  ;;  %735 = vmatpush.bf16.msra.mxu0 %v4204_v55  ;;  %v859_v55 = vrot.slane %v857_v42, 5  ;;  %v4762_v42 = vrot.slane %v871_v17, 5 }
  0x7e   : > { %v860_v8 = vsel %vm4708_vm12, %v855_v54, %v859_v55  ;;  %v878_v55 = vor.u32 %v877_v43, %v4762_v42 }
  0x7f   : > { %4312 = vmatpush.bf16.msra.mxu1 %v4203_v56  ;;  %4313 = vmatpush.bf16.msra.mxu2 %v4203_v56  ;;  %v1063_v28 = vunpack.c.l.b16 %v860_v8  ;;  %v817_v8 = vld [vmem:[#allocation2 + $0x1c] sm:$0xf] }
  0x80   : > { %4314 = vmatpush.bf16.msra.mxu3 %v4203_v56  ;;  %736 = vmatpush.bf16.msra.mxu0 %v4203_v56  ;;  %v4221_v56 = vld [vmem:[%s5239_s1 + $0x90] sm:$0xff] }
  0x82   : > { %747 = vmatmul.bf16.vlgmr.msra.gmra.mxu1 %v4197_v59  ;;  %757 = vmatmul.bf16.vlgmr.msra.gmra.mxu2 %v4199_v60  ;;  %v3765_v59 = vrot.slane %v1223_v46, 9  ;;  %v1278_v60 = vrot.slane %v1276_v47, 4  ;;  %v1804_v46 = vrot.slane %v1802_v21, 5  ;;  %v895_v21 = vshll.u32 %v817_v8, 16 }
  0x83   : > { %1443 = vmatpush.bf16.msrb.mxu2 %v4226_v57  ;;  %1142 = vmatpush.bf16.msrb.mxu1 %v4218_v58  ;;  %v4213_v57 = vld [vmem:[%s5239_s1 + $0x50] sm:$0xff] }
  0x84   : > { %767 = vmatmul.bf16.vlgmr.msra.gmra.mxu3 %v4201_v61  ;;  %737 = vmatmul.bf16.vlgmr.msra.gmra.mxu0 %v4195_v62  ;;  %v1279_v61 = vrot.slane %v1225_v49, 5  ;;  %v1782_v62 = vrot.slane %v1781_v48, 4  ;;  %v1277_v12 = vsel %vm4714_vm13, %v3765_v59, %v1276_v47  ;;  %v4766_v47 = vrot.slane %v1808_v22, 5  ;;  %v4235_v49 = vld [vmem:[%s5239_s1 + $0xc0] sm:$0xff] }
  0x85   : > { %1669 = vmatpush.bf16.msrb.mxu3 %v4242_v63  ;;  %2079 = vmatpush.bf16.msrb.mxu0 %v4250_v1  ;;  %v813_v1 = vld [vmem:[#allocation2 + $0xc] sm:$0xf]  ;;  %v1363_v32 = vunpack.c.l.b16 %v1277_v12  ;;  %v899_v22 = vshrl.u32 %v817_v8, 16 }
  0x86   : > { %v862_v15 = vshrl.u32 %v813_v1, 16  ;;  %v865_v16 = vshll.u32 %v813_v1, 16 }
  0x87   : > { %1444 = vmatpush.bf16.msrb.mxu2 %v4225_v0  ;;  %1143 = vmatpush.bf16.msrb.mxu1 %v4217_v2  ;;  %v1792_v0 = vrot.slane %v1791_v52, 4  ;;  %v1796_v2 = vrot.slane %v1794_v24, 5  ;;  %v4282_v24 = vld [vmem:[%s5239_s1 + $0x1f8] sm:$0xff]  ;;  %v901_v43 = vrot.slane %v899_v22, 4  ;;  %v4255_v22 = vld [vmem:[%s5239_s1 + $0x160] sm:$0xff] }
  0x88   : > { %v864_v37 = vrot.slane %v862_v15, 4  ;;  %v867_v41 = vrot.slane %v865_v16, 5 }
  0x89   : > { %1670 = vmatpush.bf16.msrb.mxu3 %v4241_v6  ;;  %2080 = vmatpush.bf16.msrb.mxu0 %v4249_v7  ;;  %v4245_v6 = vld [vmem:[%s5239_s1 + $0x110] sm:$0xff]  ;;  %v850_v7 = vsel %vm4708_vm12, %v845_v53, %v4667_v23  ;;  %v1812_v23 = vshrl.u32 %v1754_v9, 16 }
  0x8a   : > { %v868_v54 = vor.u32 %v867_v41, %v864_v37 }
  0x8b   : > { %1445 = vmatpush.bf16.msrb.mxu2 %v4224_v13  ;;  %1144 = vmatpush.bf16.msrb.mxu1 %v4216_v14  ;;  %v1280_v13 = vsel %vm4714_vm13, %v1278_v60, %v1279_v61  ;;  %v1787_v14 = vsel %vm4708_vm12, %v1782_v62, %v4683_v36  ;;  %v1814_v48 = vrot.slane %v1812_v23, 4  ;;  %v1226_v60 = vld [vmem:[#allocation2 + $0xc] sm:$0xe]  ;;  %v1228_v61 = vld [vmem:[#allocation2 + $0x14] sm:$0x1] }
  0x8c   : > { %v1999_v36 = vunpack.c.l.b16 %v1787_v14  ;;  %v869_v9 = vrot.slane %v868_v54, 4  ;;  %v1286_v14 = vrot.slane %v1228_v61, 5  ;;  %v4272_v23 = vld [vmem:[%s5239_s1 + $0x1a8] sm:$0xff] }
  0x8d   : > { %1671 = vmatpush.bf16.msrb.mxu3 %v4240_v19  ;;  %2081 = vmatpush.bf16.msrb.mxu0 %v4248_v20  ;;  %v1799_v19 = vshrl.u32 %v1753_v4, 16  ;;  %v1797_v20 = vsel %vm4708_vm12, %v1792_v0, %v1796_v2  ;;  %v1815_v1 = vor.u32 %v1814_v48, %v4766_v47  ;;  %v4273_v2 = vld [vmem:[%s5239_s1 + $0x1b0] sm:$0xff] }
  0x8e   : > { %v4257_v4 = vld [vmem:[%s5239_s1 + $0x170] sm:$0xff] }
  0x8f   : > { %1446 = vmatpush.bf16.msrb.mxu2 %v4223_v26  ;;  %1145 = vmatpush.bf16.msrb.mxu1 %v4215_v27  ;;  %v4244_v26 = vld [vmem:[%s5239_s1 + $0x108] sm:$0xff]  ;;  %v1062_v27 = vunpack.c.l.b16 %v850_v7  ;;  %v816_v7 = vld [vmem:[#allocation2 + $0x18] sm:$0xf]  ;;  %v1816_v16 = vrot.slane %v1815_v1, 4  ;;  %v1231_v1 = vld [vmem:[#allocation2 + $0x20] sm:$0x1] }
  0x91   : > { %1672 = vmatpush.bf16.msrb.mxu3 %v4239_v33  ;;  %2082 = vmatpush.bf16.msrb.mxu0 %v4247_v35  ;;  %v1364_v33 = vunpack.c.l.b16 %v1280_v13  ;;  %v4274_v35 = vld [vmem:[%s5239_s1 + $0x1b8] sm:$0xff]  ;;  %v1078_v52 = vpack.c.b16 %v1063_v28, %v1062_v27  ;;  %v1756_v13 = vld [vmem:[#allocation2 + $0x24] sm:$0xf]  ;;  %v4280_v28 = vld [vmem:[%s5239_s1 + $0x1e8] sm:$0xff] }
  0x92   : > { %752 = vmatmul.bf16.gmra.mxu1 %v4198_v38  ;;  %762 = vmatmul.bf16.gmra.mxu2 %v4200_v39  ;;  %v2000_v38 = vunpack.c.l.b16 %v1797_v20  ;;  %v4258_v39 = vld [vmem:[%s5239_s1 + $0x178] sm:$0xff]  ;;  %v889_v20 = vshll.u32 %v816_v7, 16  ;;  %v1826_v27 = vshll.u32 %v1756_v13, 16 }
  0x93   : > { %1447 = vmatpush.bf16.msrb.mxu2 %v4222_v44  ;;  %1146 = vmatpush.bf16.msrb.mxu1 %v4214_v45  ;;  %v4764_v44 = vld [vmem:[#allocation2 + $0x10] sm:$0xf]  ;;  %v1801_v45 = vrot.slane %v1799_v19, 4  ;;  %v1379_v53 = vpack.c.b16 %v1364_v33, %v1363_v32  ;;  %v886_v19 = vshrl.u32 %v816_v7, 16  ;;  %v1832_v33 = vshll.u32 %v1757_v18, 16 }
  0x94   : > { %772 = vmatmul.bf16.gmra.mxu3 %v4202_v50  ;;  %742 = vmatmul.bf16.gmra.mxu0 %v4196_v51  ;;  %v4243_v50 = vld [vmem:[%s5239_s1 + $0x100] sm:$0xff]  ;;  %v2015_v59 = vpack.c.b16 %v2000_v38, %v1999_v36  ;;  %v891_v41 = vrot.slane %v889_v20, 5 }
  0x95   : > { %1673 = vmatpush.bf16.msrb.mxu3 %v4238_v29  ;;  %2083 = vmatpush.bf16.msrb.mxu0 %v4246_v34  ;;  %v1755_v51 = vld [vmem:[#allocation2 + $0x20] sm:$0x1]  ;;  %v4290_v29 = vld [vmem:[%s5239_s1 + $0x238] sm:$0xff]  ;;  %v881_v34 = vshll.u32 %v815_v40, 16  ;;  %v1805_v62 = vor.u32 %v1804_v46, %v1801_v45  ;;  %v888_v40 = vrot.slane %v886_v19, 4 }
  0x96   : > { %v1818_v0 = vshll.u32 %v1755_v51, 16  ;;  %v818_v46 = vld [vmem:[#allocation2 + $0x20] sm:$0x1] }
  0x97   : > { %1448 = vmatpush.bf16.msrb.mxu2 %v4221_v56  ;;  %1147 = vmatpush.bf16.msrb.mxu1 %v4213_v57  ;;  %v1283_v56 = vrot.slane %v4764_v44, 5  ;;  %v4227_v57 = vld [vmem:[#allocation2 + $0xc] sm:$0xff]  ;;  %v1806_v15 = vrot.slane %v1805_v62, 4  ;;  %v892_v54 = vor.u32 %v891_v41, %v888_v40  ;;  %v1229_v62 = vld [vmem:[#allocation2 + $0x18] sm:$0xe]  ;;  %v4271_v20 = vld [vmem:[%s5239_s1 + $0x1a0] sm:$0xff] }
  0x98   : > { %v1820_v17 = vrot.slane %v1818_v0, 5 }
  0x99   : > { %1674 = vmatpush.bf16.msrb.mxu3 %v4237_v5  ;;  %2084 = vmatpush.bf16.msrb.mxu0 %v4245_v6  ;;  %v883_v5 = vrot.slane %v881_v34, 5  ;;  %v4289_v6 = vld [vmem:[%s5239_s1 + $0x230] sm:$0xff]  ;;  %v1285_v12 = vrot.slane %v1283_v56, 4  ;;  %v1811_v38 = vsel %vm4708_vm12, %v1806_v15, %v4766_v47  ;;  %v1230_v47 = vld [vmem:[#allocation2 + $0x1c] sm:$0xf] }
  0x9b   : > { %1449 = vmatpush.bf16.msrb.mxu2 %v4220_v10  ;;  %1148 = vmatpush.bf16.msrb.mxu1 %v4212_v11  ;;  %v879_v10 = vrot.slane %v878_v55, 4  ;;  %v3766_v11 = vrot.slane %v1226_v60, 9  ;;  %v1287_v37 = vsel %vm4714_vm13, %v1285_v12, %v1286_v14  ;;  %v1293_v12 = vrot.slane %v1231_v1, 5  ;;  %v4229_v1 = vld [vmem:[#allocation2 + $0x24] sm:$0xff] }
  0x9c   : > { %v1366_v51 = vunpack.c.l.b16 %v1287_v37  ;;  %v821_v37 = vld [vmem:[#allocation2 + $0x2c] sm:$0x1] }
  0x9d   : > { %1675 = vmatpush.bf16.msrb.mxu3 %v4236_v25  ;;  %2085 = vmatpush.bf16.msrb.mxu0 %v4244_v26  ;;  %v4256_v25 = vld [vmem:[%s5239_s1 + $0x168] sm:$0xff]  ;;  %v1823_v26 = vshrl.u32 %v1756_v13, 16  ;;  %v884_v32 = vsel %vm4708_vm12, %v879_v10, %v883_v5  ;;  %v1284_v36 = vsel %vm4714_vm13, %v3766_v11, %v1283_v56  ;;  %v905_v56 = vshll.u32 %v818_v46, 16  ;;  %v819_v5 = vld [vmem:[#allocation2 + $0x24] sm:$0xf] }
  0x9e   : > { %v1065_v45 = vunpack.c.l.b16 %v884_v32  ;;  %v3767_v10 = vrot.slane %v1229_v62, 9  ;;  %v1234_v62 = vld [vmem:[#allocation2 + $0x2c] sm:$0x1] }
  0x9f   : > { %1450 = vmatpush.bf16.msrb.mxu2 %v4219_v30  ;;  %1149 = vmatpush.bf16.msrb.mxu1 %v4211_v31  ;;  %v4288_v30 = vld [vmem:[%s5239_s1 + $0x228] sm:$0xff]  ;;  %v874_v31 = vsel %vm4708_vm12, %v869_v9, %v4762_v42  ;;  %v4821_v42 = vrot.slane %v895_v21, 5  ;;  %v1825_v48 = vrot.slane %v1823_v26, 4  ;;  %v907_v8 = vrot.slane %v905_v56, 5  ;;  %v4279_v21 = vld [vmem:[%s5239_s1 + $0x1e0] sm:$0xff] }
  0xa0   : > { %v1064_v44 = vunpack.c.l.b16 %v874_v31  ;;  %v820_v9 = vld [vmem:[#allocation2 + $0x28] sm:$0xf]  ;;  %v4287_v26 = vld [vmem:[%s5239_s1 + $0x220] sm:$0xff]  ;;  %v1760_v31 = vld [vmem:[#allocation2 + $0x34] sm:$0xf] }
  0xa1   : > { %1676 = vmatpush.bf16.msrb.mxu3 %v4235_v49  ;;  %2086 = vmatpush.bf16.msrb.mxu0 %v4243_v50  ;;  %v1828_v49 = vrot.slane %v1826_v27, 5  ;;  %v1365_v50 = vunpack.c.l.b16 %v1284_v36  ;;  %v902_v55 = vor.u32 %v901_v43, %v4821_v42  ;;  %v923_v19 = vshrl.u32 %v820_v9, 16  ;;  %v1761_v56 = vld [vmem:[#allocation2 + $0x38] sm:$0x1] }
  0xa2   : > { %1150 = vmatmul.bf16.vlgmr.msrb.gmra.mxu1 %v1078_v52  ;;  %1451 = vmatmul.bf16.vlgmr.msrb.gmra.mxu2 %v1379_v53  ;;  %v4823_v52 = vrot.slane %v1832_v33, 5  ;;  %v1758_v53 = vld [vmem:[#allocation2 + $0x2c] sm:$0x1]  ;;  %v1079_v60 = vpack.c.b16 %v1065_v45, %v1064_v44  ;;  %v1860_v43 = vshrl.u32 %v1760_v31, 16 }
  0xa3   : > { %2604 = vmatpush.bf16.msra.mxu2 %v4274_v35  ;;  %2377 = vmatpush.bf16.msra.mxu1 %v4258_v39  ;;  %v1836_v35 = vshrl.u32 %v1757_v18, 16  ;;  %v1821_v39 = vsel %vm4708_vm12, %v1816_v16, %v1820_v17  ;;  %v1380_v61 = vpack.c.b16 %v1366_v51, %v1365_v50  ;;  %v903_v7 = vrot.slane %v902_v55, 4 }
  0xa4   : > { %1677 = vmatmul.bf16.vlgmr.msrb.gmra.mxu3 %v4227_v57  ;;  %2087 = vmatmul.bf16.vlgmr.msrb.gmra.mxu0 %v2015_v59  ;;  %v2002_v34 = vunpack.c.l.b16 %v1821_v39  ;;  %v1290_v57 = vrot.slane %v1230_v47, 5  ;;  %v1829_v59 = vor.u32 %v1828_v49, %v1825_v48  ;;  %v910_v16 = vshrl.u32 %v819_v5, 16  ;;  %v1233_v47 = vld [vmem:[#allocation2 + $0x28] sm:$0xf] }
  0xa5   : > { %3014 = vmatpush.bf16.msra.mxu3 %v4282_v24  ;;  %3312 = vmatpush.bf16.msra.mxu0 %v4290_v29  ;;  %v1838_v24 = vrot.slane %v1836_v35, 4  ;;  %v2001_v29 = vunpack.c.l.b16 %v1811_v38  ;;  %v913_v17 = vshll.u32 %v819_v5, 16  ;;  %v919_v18 = vshll.u32 %v820_v9, 16 }
  0xa6   : > { %v1292_v11 = vrot.slane %v1290_v57, 4  ;;  %v1830_v13 = vrot.slane %v1829_v59, 4  ;;  %v908_v27 = vsel %vm4708_vm12, %v903_v7, %v907_v8  ;;  %v912_v35 = vrot.slane %v910_v16, 4 }
  0xa7   : > { %2605 = vmatpush.bf16.msra.mxu2 %v4273_v2  ;;  %2378 = vmatpush.bf16.msra.mxu1 %v4257_v4  ;;  %v1839_v0 = vor.u32 %v1838_v24, %v4823_v52  ;;  %v1842_v2 = vshll.u32 %v1758_v53, 16  ;;  %v2016_v4 = vpack.c.b16 %v2002_v34, %v2001_v29  ;;  %v915_v36 = vrot.slane %v913_v17, 5  ;;  %v4270_v17 = vld [vmem:[%s5239_s1 + $0x198] sm:$0xff] }
  0xa8   : > { %v1835_v32 = vsel %vm4708_vm12, %v1830_v13, %v4823_v52  ;;  %v4853_v38 = vrot.slane %v919_v18, 5  ;;  %v925_v39 = vrot.slane %v923_v19, 4  ;;  %v1067_v45 = vunpack.c.l.b16 %v908_v27  ;;  %v1763_v13 = vld [vmem:[#allocation2 + $0x40] sm:$0xf]  ;;  %v4278_v18 = vld [vmem:[%s5239_s1 + $0x1d8] sm:$0xff] }
  0xa9   : > { %3015 = vmatpush.bf16.msra.mxu3 %v4281_v3  ;;  %3313 = vmatpush.bf16.msra.mxu0 %v4289_v6  ;;  %v4228_v3 = vld [vmem:[#allocation2 + $0x18] sm:$0xff]  ;;  %v893_v6 = vrot.slane %v892_v54, 4  ;;  %v1840_v14 = vrot.slane %v1839_v0, 4  ;;  %v1844_v15 = vrot.slane %v1842_v2, 5  ;;  %v2003_v49 = vunpack.c.l.b16 %v1835_v32 }
  0xaa   : > { %v929_v51 = vshll.u32 %v821_v37, 16  ;;  %v916_v52 = vor.u32 %v915_v36, %v912_v35  ;;  %v926_v24 = vor.u32 %v925_v39, %v4853_v38  ;;  %v1862_v54 = vrot.slane %v1860_v43, 4  ;;  %v4254_v19 = vld [vmem:[%s5239_s1 + $0x158] sm:$0xff] }
  0xab   : > { %2606 = vmatpush.bf16.msra.mxu2 %v4272_v23  ;;  %2379 = vmatpush.bf16.msra.mxu1 %v4256_v25  ;;  %v898_v23 = vsel %vm4708_vm12, %v893_v6, %v4821_v42  ;;  %v1759_v25 = vld [vmem:[#allocation2 + $0x30] sm:$0xf]  ;;  %v1845_v33 = vsel %vm4708_vm12, %v1840_v14, %v1844_v15  ;;  %v1856_v42 = vshll.u32 %v1760_v31, 16  ;;  %v1297_v55 = vrot.slane %v1233_v47, 5 }
  0xac   : > { %v1847_v40 = vshrl.u32 %v1759_v25, 16  ;;  %v1850_v41 = vshll.u32 %v1759_v25, 16  ;;  %v1066_v44 = vunpack.c.l.b16 %v898_v23  ;;  %v2004_v50 = vunpack.c.l.b16 %v1845_v33  ;;  %v4286_v25 = vld [vmem:[%s5239_s1 + $0x218] sm:$0xff] }
  0xad   : > { %3016 = vmatpush.bf16.msra.mxu3 %v4280_v28  ;;  %3314 = vmatpush.bf16.msra.mxu0 %v4288_v30  ;;  %v1291_v28 = vsel %vm4714_vm13, %v3767_v10, %v1290_v57  ;;  %v1294_v30 = vsel %vm4714_vm13, %v1292_v11, %v1293_v12  ;;  %v4856_v53 = vrot.slane %v1856_v42, 5  ;;  %v917_v0 = vrot.slane %v916_v52, 4  ;;  %v822_v10 = vld [vmem:[#allocation2 + $0x30] sm:$0xf]  ;;  %v823_v11 = vld [vmem:[#allocation2 + $0x34] sm:$0xf] }
  0xae   : > { %v1367_v46 = vunpack.c.l.b16 %v1291_v28  ;;  %v1368_v48 = vunpack.c.l.b16 %v1294_v30  ;;  %v1849_v29 = vrot.slane %v1847_v40, 4  ;;  %v1852_v34 = vrot.slane %v1850_v41, 5  ;;  %v1762_v12 = vld [vmem:[#allocation2 + $0x3c] sm:$0xf] }
  0xaf   : > { %2607 = vmatpush.bf16.msra.mxu2 %v4271_v20  ;;  %2380 = vmatpush.bf16.msra.mxu1 %v4255_v22  ;;  %v1080_v57 = vpack.c.b16 %v1067_v45, %v1066_v44  ;;  %v927_v2 = vrot.slane %v926_v24, 4  ;;  %v1863_v5 = vor.u32 %v1862_v54, %v4856_v53  ;;  %v1866_v6 = vshll.u32 %v1761_v56, 16  ;;  %v824_v44 = vld [vmem:[#allocation2 + $0x38] sm:$0x1] }
  0xb0   : > { %v1381_v59 = vpack.c.b16 %v1368_v48, %v1367_v46  ;;  %v1299_v8 = vrot.slane %v1297_v55, 4  ;;  %v1300_v9 = vrot.slane %v1234_v62, 5  ;;  %v922_v14 = vsel %vm4708_vm12, %v917_v0, %v4853_v38  ;;  %v1236_v48 = vld [vmem:[#allocation2 + $0x34] sm:$0xf] }
  0xb1   : > { %3017 = vmatpush.bf16.msra.mxu3 %v4279_v21  ;;  %3315 = vmatpush.bf16.msra.mxu0 %v4287_v26  ;;  %v1864_v20 = vrot.slane %v1863_v5, 4  ;;  %v1868_v21 = vrot.slane %v1866_v6, 5  ;;  %v934_v22 = vshrl.u32 %v822_v10, 16  ;;  %v937_v23 = vshll.u32 %v822_v10, 16  ;;  %v4230_v0 = vld [vmem:[#allocation2 + $0x30] sm:$0xff] }
  0xb2   : > { %1155 = vmatmul.bf16.gmra.mxu1 %v1079_v60  ;;  %1456 = vmatmul.bf16.gmra.mxu2 %v1380_v61  ;;  %v2017_v60 = vpack.c.b16 %v2004_v50, %v2003_v49  ;;  %v1232_v61 = vld [vmem:[#allocation2 + $0x24] sm:$0xe]  ;;  %v1301_v27 = vsel %vm4714_vm13, %v1299_v8, %v1300_v9  ;;  %v943_v28 = vshll.u32 %v823_v11, 16  ;;  %v947_v30 = vshrl.u32 %v823_v11, 16  ;;  %v826_v6 = vld [vmem:[#allocation2 + $0x40] sm:$0xf] }
  0xb3   : > { %v3768_v7 = vrot.slane %v1232_v61, 9  ;;  %2608 = vmatpush.bf16.msra.mxu2 %v4270_v17  ;;  %v1871_v31 = vshrl.u32 %v1762_v12, 16  ;;  %v1874_v32 = vshll.u32 %v1762_v12, 16  ;;  %v1880_v33 = vshll.u32 %v1763_v13, 16  ;;  %2381 = vmatpush.bf16.msra.mxu1 %v4254_v19  ;;  %v4277_v19 = vld [vmem:[%s5239_s1 + $0x1d0] sm:$0xff] }
  0xb4   : > { %1682 = vmatmul.bf16.gmra.mxu3 %v4228_v3  ;;  %2092 = vmatmul.bf16.gmra.mxu0 %v2016_v4  ;;  %v931_v3 = vrot.slane %v929_v51, 5  ;;  %v1853_v4 = vor.u32 %v1852_v34, %v1849_v29  ;;  %v1884_v35 = vshrl.u32 %v1763_v13, 16  ;;  %v1068_v36 = vunpack.c.l.b16 %v922_v14  ;;  %v1764_v29 = vld [vmem:[#allocation2 + $0x44] sm:$0x1] }
  0xb5   : > { %v1298_v26 = vsel %vm4714_vm13, %v3768_v7, %v1297_v55  ;;  %3018 = vmatpush.bf16.msra.mxu3 %v4278_v18  ;;  %3316 = vmatpush.bf16.msra.mxu0 %v4286_v25  ;;  %v1869_v39 = vsel %vm4708_vm12, %v1864_v20, %v1868_v21  ;;  %v936_v40 = vrot.slane %v934_v22, 4  ;;  %v939_v41 = vrot.slane %v937_v23, 5  ;;  %v4269_v18 = vld [vmem:[%s5239_s1 + $0x190] sm:$0xff] }
  0xb6   : > { %v932_v15 = vsel %vm4708_vm12, %v927_v2, %v931_v3  ;;  %v1854_v16 = vrot.slane %v1853_v4, 4  ;;  %v1369_v42 = vunpack.c.l.b16 %v1298_v26  ;;  %v1370_v43 = vunpack.c.l.b16 %v1301_v27  ;;  %v825_v3 = vld [vmem:[#allocation2 + $0x3c] sm:$0xf]  ;;  %v4253_v20 = vld [vmem:[%s5239_s1 + $0x150] sm:$0xff]  ;;  %v1765_v26 = vld [vmem:[#allocation2 + $0x48] sm:$0xf] }
  0xb7   : > { %v1069_v37 = vunpack.c.l.b16 %v932_v15  ;;  %v4885_v45 = vrot.slane %v943_v28, 5  ;;  %v949_v46 = vrot.slane %v947_v30, 4  ;;  %v1873_v49 = vrot.slane %v1871_v31, 4  ;;  %v4285_v21 = vld [vmem:[%s5239_s1 + $0x210] sm:$0xff]  ;;  %2609 = vmatpush.bf16.msra.mxu2 %v4269_v18  ;;  %v1766_v27 = vld [vmem:[#allocation2 + $0x4c] sm:$0xf]  ;;  %2382 = vmatpush.bf16.msra.mxu1 %v4253_v20 }
  0xb8   : > { %v1859_v38 = vsel %vm4708_vm12, %v1854_v16, %v4856_v53  ;;  %v1876_v50 = vrot.slane %v1874_v32, 5  ;;  %v4887_v51 = vrot.slane %v1880_v33, 5  ;;  %v1886_v47 = vrot.slane %v1884_v35, 4  ;;  %v1769_v18 = vld [vmem:[#allocation2 + $0x58] sm:$0xf] }
  0xb9   : > { %v2005_v52 = vunpack.c.l.b16 %v1859_v38  ;;  %v2006_v24 = vunpack.c.l.b16 %v1869_v39  ;;  %v940_v34 = vor.u32 %v939_v41, %v936_v40  ;;  %v953_v53 = vshll.u32 %v824_v44, 16  ;;  %3019 = vmatpush.bf16.msra.mxu3 %v4277_v19  ;;  %3317 = vmatpush.bf16.msra.mxu0 %v4285_v21 }
  0xba   : > { %v1081_v54 = vpack.c.b16 %v1069_v37, %v1068_v36  ;;  %v950_v55 = vor.u32 %v949_v46, %v4885_v45  ;;  %v1304_v56 = vrot.slane %v1236_v48, 5  ;;  %v1877_v61 = vor.u32 %v1876_v50, %v1873_v49  ;;  %v827_v37 = vld [vmem:[#allocation2 + $0x44] sm:$0x1] }
  0xbb   : > { %v1887_v62 = vor.u32 %v1886_v47, %v4887_v51  ;;  %v2018_v2 = vpack.c.b16 %v2006_v24, %v2005_v52  ;;  %v941_v4 = vrot.slane %v940_v34, 4  ;;  %v955_v5 = vrot.slane %v953_v53, 5  ;;  %v1239_v47 = vld [vmem:[#allocation2 + $0x40] sm:$0xf]  ;;  %v1767_v53 = vld [vmem:[#allocation2 + $0x50] sm:$0x1] }
  0xbc   : > { %v951_v7 = vrot.slane %v950_v55, 4  ;;  %v1306_v9 = vrot.slane %v1304_v56, 4  ;;  %v1878_v11 = vrot.slane %v1877_v61, 4  ;;  %v958_v14 = vshrl.u32 %v825_v3, 16  ;;  %v1238_v61 = vld [vmem:[#allocation2 + $0x3c] sm:$0xe] }
  0xbd   : > { %v1888_v12 = vrot.slane %v1887_v62, 4  ;;  %v961_v15 = vshll.u32 %v825_v3, 16  ;;  %v967_v16 = vshll.u32 %v826_v6, 16  ;;  %v971_v17 = vshrl.u32 %v826_v6, 16  ;;  %v828_v6 = vld [vmem:[#allocation2 + $0x48] sm:$0xf] }
  0xbe   : > { %v946_v22 = vsel %vm4708_vm12, %v941_v4, %v4885_v45  ;;  %v956_v23 = vsel %vm4708_vm12, %v951_v7, %v955_v5  ;;  %v1883_v30 = vsel %vm4708_vm12, %v1878_v11, %v4887_v51  ;;  %v960_v32 = vrot.slane %v958_v14, 4  ;;  %v829_v7 = vld [vmem:[#allocation2 + $0x4c] sm:$0xf] }
  0xbf   : > { %v963_v33 = vrot.slane %v961_v15, 5  ;;  %v4917_v35 = vrot.slane %v967_v16, 5  ;;  %v973_v36 = vrot.slane %v971_v17, 4  ;;  %v1895_v38 = vshrl.u32 %v1765_v26, 16  ;;  %v4268_v11 = vld [vmem:[%s5239_s1 + $0x188] sm:$0xff] }
  0xc0   : > { %v1898_v39 = vshll.u32 %v1765_v26, 16  ;;  %v1904_v40 = vshll.u32 %v1766_v27, 16  ;;  %v1908_v41 = vshrl.u32 %v1766_v27, 16  ;;  %v2007_v46 = vunpack.c.l.b16 %v1883_v30  ;;  %2610 = vmatpush.bf16.msra.mxu2 %v4268_v11  ;;  %v4252_v26 = vld [vmem:[%s5239_s1 + $0x148] sm:$0xff]  ;;  %v4267_v11 = vld [vmem:[%s5239_s1 + $0x180] sm:$0xff] }
  0xc1   : > { %v964_v49 = vor.u32 %v963_v33, %v960_v32  ;;  %v974_v50 = vor.u32 %v973_v36, %v4917_v35  ;;  %v977_v51 = vshll.u32 %v827_v37, 16  ;;  %v1897_v52 = vrot.slane %v1895_v38, 4  ;;  %2383 = vmatpush.bf16.msra.mxu1 %v4252_v26  ;;  %v4284_v37 = vld [vmem:[%s5239_s1 + $0x208] sm:$0xff] }
  0xc2   : > { %1160 = vmatmul.bf16.gmra.mxu1 %v1080_v57  ;;  %1461 = vmatmul.bf16.gmra.mxu2 %v1381_v59  ;;  %v1382_v57 = vpack.c.b16 %v1370_v43, %v1369_v42  ;;  %v1235_v59 = vld [vmem:[#allocation2 + $0x30] sm:$0xe]  ;;  %v1070_v42 = vunpack.c.l.b16 %v946_v22  ;;  %v1071_v43 = vunpack.c.l.b16 %v956_v23  ;;  %v1900_v24 = vrot.slane %v1898_v39, 5 }
  0xc3   : > { %v3769_v8 = vrot.slane %v1235_v59, 9  ;;  %v1910_v34 = vrot.slane %v1908_v41, 4  ;;  %v965_v59 = vrot.slane %v964_v49, 4  ;;  %v1311_v62 = vrot.slane %v1239_v47, 5  ;;  %3318 = vmatpush.bf16.msra.mxu0 %v4284_v37 }
  0xc4   : > { %1687 = vmatmul.bf16.gmra.mxu3 %v4229_v1  ;;  %2097 = vmatmul.bf16.gmra.mxu0 %v2017_v60  ;;  %v1237_v60 = vld [vmem:[#allocation2 + $0x38] sm:$0x1]  ;;  %v1890_v1 = vshll.u32 %v1764_v29, 16  ;;  %v4920_v29 = vrot.slane %v1904_v40, 5  ;;  %v1914_v4 = vshll.u32 %v1767_v53, 16  ;;  %v3770_v5 = vrot.slane %v1238_v61, 9 }
  0xc5   : > { %v1307_v10 = vrot.slane %v1237_v60, 5  ;;  %v1305_v25 = vsel %vm4714_vm13, %v3769_v8, %v1304_v56  ;;  %v4231_v56 = vld [vmem:[#allocation2 + $0x3c] sm:$0xff]  ;;  %v979_v60 = vrot.slane %v977_v51, 5  ;;  %v970_v8 = vsel %vm4708_vm12, %v965_v59, %v4917_v35  ;;  %v1243_v61 = vld [vmem:[#allocation2 + $0x50] sm:$0x1]  ;;  %2611 = vmatpush.bf16.msra.mxu2 %v4267_v11 }
  0xc6   : > { %v1892_v13 = vrot.slane %v1890_v1, 5  ;;  %v1371_v44 = vunpack.c.l.b16 %v1305_v25  ;;  %v975_v1 = vrot.slane %v974_v50, 4  ;;  %v1911_v3 = vor.u32 %v1910_v34, %v4920_v29  ;;  %v1242_v50 = vld [vmem:[#allocation2 + $0x4c] sm:$0xf] }
  0xc7   : > { %v1308_v28 = vsel %vm4714_vm13, %v1306_v9, %v1307_v10  ;;  %v1313_v9 = vrot.slane %v1311_v62, 4  ;;  %v1916_v17 = vrot.slane %v1914_v4, 5  ;;  %v982_v19 = vshrl.u32 %v828_v6, 16 }
  0xc8   : > { %v1893_v31 = vsel %vm4708_vm12, %v1888_v12, %v1892_v13  ;;  %v1372_v45 = vunpack.c.l.b16 %v1308_v28  ;;  %v1768_v12 = vld [vmem:[#allocation2 + $0x54] sm:$0xf]  ;;  %v4276_v13 = vld [vmem:[%s5239_s1 + $0x1c8] sm:$0xff]  ;;  %v980_v14 = vsel %vm4708_vm12, %v975_v1, %v979_v60  ;;  %v1912_v16 = vrot.slane %v1911_v3, 4 }
  0xc9   : > { %v2008_v48 = vunpack.c.l.b16 %v1893_v31  ;;  %v985_v20 = vshll.u32 %v828_v6, 16  ;;  %v991_v21 = vshll.u32 %v829_v7, 16  ;;  %v995_v22 = vshrl.u32 %v829_v7, 16  ;;  %3020 = vmatpush.bf16.msra.mxu3 %v4276_v13  ;;  %v1241_v60 = vld [vmem:[#allocation2 + $0x48] sm:$0xe] }
  0xca   : > { %v1383_v55 = vpack.c.b16 %v1372_v45, %v1371_v44  ;;  %v1919_v23 = vshrl.u32 %v1768_v12, 16  ;;  %v1922_v25 = vshll.u32 %v1768_v12, 16  ;;  %v1312_v27 = vsel %vm4714_vm13, %v3770_v5, %v1311_v62  ;;  %v830_v44 = vld [vmem:[#allocation2 + $0x50] sm:$0x1]  ;;  %v4275_v12 = vld [vmem:[%s5239_s1 + $0x1c0] sm:$0xff] }
  0xcb   : > { %v1928_v30 = vshll.u32 %v1769_v18, 16  ;;  %v1932_v31 = vshrl.u32 %v1769_v18, 16  ;;  %v1072_v32 = vunpack.c.l.b16 %v970_v8  ;;  %v1073_v33 = vunpack.c.l.b16 %v980_v14  ;;  %v832_v13 = vld [vmem:[#allocation2 + $0x58] sm:$0xf] }
  0xcc   : > { %v1917_v36 = vsel %vm4708_vm12, %v1912_v16, %v1916_v17  ;;  %v984_v38 = vrot.slane %v982_v19, 4  ;;  %v987_v39 = vrot.slane %v985_v20, 5  ;;  %v4949_v40 = vrot.slane %v991_v21, 5  ;;  %v1771_v16 = vld [vmem:[#allocation2 + $0x60] sm:$0xf] }
  0xcd   : > { %v997_v41 = vrot.slane %v995_v22, 4  ;;  %v1921_v45 = vrot.slane %v1919_v23, 4  ;;  %v2010_v49 = vunpack.c.l.b16 %v1917_v36  ;;  %v1930_v51 = vrot.slane %v1928_v30, 5  ;;  %v1772_v17 = vld [vmem:[#allocation2 + $0x64] sm:$0xf]  ;;  %3021 = vmatpush.bf16.msra.mxu3 %v4275_v12 }
  0xce   : > { %v1934_v47 = vrot.slane %v1932_v31, 4  ;;  %v1001_v34 = vshll.u32 %v830_v44, 16  ;;  %v1083_v53 = vpack.c.b16 %v1073_v33, %v1072_v32  ;;  %v3771_v4 = vrot.slane %v1241_v60, 9  ;;  %v4251_v22 = vld [vmem:[%s5239_s1 + $0x140] sm:$0xff]  ;;  %v1244_v60 = vld [vmem:[#allocation2 + $0x54] sm:$0xe] }
  0xcf   : > { %v1321_v6 = vrot.slane %v1243_v61, 5  ;;  %v1015_v26 = vshll.u32 %v832_v13, 16  ;;  %v1946_v30 = vshll.u32 %v1771_v16, 16  ;;  %v1952_v31 = vshll.u32 %v1772_v17, 16  ;;  %2384 = vmatpush.bf16.msra.mxu1 %v4251_v22  ;;  %v4283_v33 = vld [vmem:[%s5239_s1 + $0x200] sm:$0xff] }
  0xd0   : > { %v1935_v62 = vor.u32 %v1934_v47, %v1930_v51  ;;  %v1003_v3 = vrot.slane %v1001_v34, 5  ;;  %v1956_v32 = vshrl.u32 %v1772_v17, 16  ;;  %3319 = vmatpush.bf16.msra.mxu0 %v4283_v33  ;;  %v1773_v47 = vld [vmem:[#allocation2 + $0x68] sm:$0x1]  ;;  %v1246_v61 = vld [vmem:[#allocation2 + $0x5c] sm:$0x1] }
  0xd1   : > { %v1017_v44 = vrot.slane %v1015_v26, 5 }
  0xd2   : > { %1165 = vmatmul.bf16.gmra.mxu1 %v1081_v54  ;;  %1466 = vmatmul.bf16.gmra.mxu2 %v1382_v57  ;;  %v1082_v54 = vpack.c.b16 %v1071_v43, %v1070_v42  ;;  %v2019_v57 = vpack.c.b16 %v2008_v48, %v2007_v46  ;;  %v1373_v42 = vunpack.c.l.b16 %v1312_v27  ;;  %v1924_v46 = vrot.slane %v1922_v25, 5 }
  0xd3   : > { %v1936_v8 = vrot.slane %v1935_v62, 4  ;;  %v1019_v27 = vshrl.u32 %v832_v13, 16 }
  0xd4   : > { %1692 = vmatmul.bf16.gmra.mxu3 %v4230_v0  ;;  %2102 = vmatmul.bf16.gmra.mxu0 %v2018_v2  ;;  %v1240_v0 = vld [vmem:[#allocation2 + $0x44] sm:$0x1]  ;;  %v1901_v2 = vor.u32 %v1900_v24, %v1897_v52  ;;  %v1770_v52 = vld [vmem:[#allocation2 + $0x5c] sm:$0x1]  ;;  %v988_v24 = vor.u32 %v987_v39, %v984_v38 }
  0xd5   : > { %v1314_v10 = vrot.slane %v1240_v0, 5  ;;  %v1938_v1 = vshll.u32 %v1770_v52, 16 }
  0xd6   : > { %v1902_v15 = vrot.slane %v1901_v2, 4  ;;  %v989_v0 = vrot.slane %v988_v24, 4 }
  0xd7   : > { %v1315_v28 = vsel %vm4714_vm13, %v1313_v9, %v1314_v10  ;;  %v1940_v9 = vrot.slane %v1938_v1, 5  ;;  %v831_v10 = vld [vmem:[#allocation2 + $0x54] sm:$0xf] }
  0xd8   : > { %v1907_v35 = vsel %vm4708_vm12, %v1902_v15, %v4920_v29  ;;  %v1374_v43 = vunpack.c.l.b16 %v1315_v28  ;;  %v998_v29 = vor.u32 %v997_v41, %v4949_v40  ;;  %v994_v14 = vsel %vm4708_vm12, %v989_v0, %v4949_v40 }
  0xd9   : > { %v2009_v48 = vunpack.c.l.b16 %v1907_v35  ;;  %v1006_v20 = vshrl.u32 %v831_v10, 16  ;;  %v1009_v21 = vshll.u32 %v831_v10, 16  ;;  %v1941_v25 = vsel %vm4708_vm12, %v1936_v8, %v1940_v9 }
  0xda   : > { %v999_v2 = vrot.slane %v998_v29, 4  ;;  %v1943_v28 = vshrl.u32 %v1771_v16, 16  ;;  %v1074_v35 = vunpack.c.l.b16 %v994_v14  ;;  %v1962_v0 = vshll.u32 %v1773_v47, 16  ;;  %v2162_v47 = vld [vmem:[#allocation2 + $0x14] sm:$0x1] }
  0xdb   : > { %v2020_v59 = vpack.c.b16 %v2010_v49, %v2009_v48  ;;  %v1008_v39 = vrot.slane %v1006_v20, 4  ;;  %v1011_v40 = vrot.slane %v1009_v21, 5  ;;  %v1948_v49 = vrot.slane %v1946_v30, 5 }
  0xdc   : > { %v1004_v15 = vsel %vm4708_vm12, %v999_v2, %v1003_v3  ;;  %v1945_v48 = vrot.slane %v1943_v28, 4  ;;  %v1328_v9 = vrot.slane %v1246_v61, 5  ;;  %v1964_v12 = vrot.slane %v1962_v0, 5 }
  0xdd   : > { %v1075_v36 = vunpack.c.l.b16 %v1004_v15  ;;  %v1012_v29 = vor.u32 %v1011_v40, %v1008_v39 }
  0xde   : > { %v1949_v62 = vor.u32 %v1948_v49, %v1945_v48 }
  0xdf   : > { %v1084_v52 = vpack.c.b16 %v1075_v36, %v1074_v35  ;;  %v1013_v2 = vrot.slane %v1012_v29, 4 }
  0xe0   : > { %v1950_v10 = vrot.slane %v1949_v62, 4  ;;  %v2213_v62 = vrot.slane %v2162_v47, 5 }
  0xe1   : > { %v1018_v20 = vsel %vm4708_vm12, %v1013_v2, %v1017_v44 }
  0xe2   : > { %1170 = vmatmul.bf16.gmra.mxu1 %v1082_v54  ;;  %1471 = vmatmul.bf16.gmra.mxu2 %v1383_v55  ;;  %v1384_v54 = vpack.c.b16 %v1374_v43, %v1373_v42  ;;  %v1318_v55 = vrot.slane %v1242_v50, 5  ;;  %v2012_v42 = vunpack.c.l.b16 %v1941_v25  ;;  %v833_v43 = vld [vmem:[#allocation2 + $0x5c] sm:$0x1]  ;;  %v1954_v50 = vrot.slane %v1952_v31, 5 }
  0xe3   : > { %v1025_v34 = vshll.u32 %v833_v43, 16  ;;  %v1076_v33 = vunpack.c.l.b16 %v1018_v20 }
  0xe4   : > { %1697 = vmatmul.bf16.gmra.mxu3 %v4231_v56  ;;  %2107 = vmatmul.bf16.gmra.mxu0 %v2019_v57  ;;  %v1925_v56 = vor.u32 %v1924_v46, %v1921_v45  ;;  %v4232_v57 = vld [vmem:[#allocation2 + $0x48] sm:$0xff]  ;;  %v1320_v5 = vrot.slane %v1318_v55, 4  ;;  %v1319_v18 = vsel %vm4714_vm13, %v3771_v4, %v1318_v55  ;;  %v1021_v45 = vrot.slane %v1019_v27, 4  ;;  %v1245_v46 = vld [vmem:[#allocation2 + $0x58] sm:$0xf] }
  0xe5   : > { %v1375_v37 = vunpack.c.l.b16 %v1319_v18  ;;  %v1027_v3 = vrot.slane %v1025_v34, 5  ;;  %v2685_v4 = vld [vmem:[#allocation2 + $0x18] sm:$0xf]  ;;  %v1955_v26 = vsel %vm4708_vm12, %v1950_v10, %v1954_v50  ;;  %v4234_v34 = vld [vmem:[#allocation2 + $0x60] sm:$0xff] }
  0xe6   : > { %v1926_v7 = vrot.slane %v1925_v56, 4  ;;  %v1322_v19 = vsel %vm4714_vm13, %v1320_v5, %v1321_v6  ;;  %v1022_v56 = vor.u32 %v1021_v45, %v1017_v44  ;;  %v2686_v5 = vld [vmem:[#allocation2 + $0x1c] sm:$0xf]  ;;  %v2710_v14 = vshrl.u32 %v2685_v4, 16  ;;  %v2160_v44 = vld [vmem:[#allocation2 + $0xc] sm:$0xe] }
  0xe7   : > { %v1376_v38 = vunpack.c.l.b16 %v1322_v19  ;;  %v2713_v15 = vshll.u32 %v2685_v4, 16  ;;  %v2719_v16 = vshll.u32 %v2686_v5, 16  ;;  %v2723_v17 = vshrl.u32 %v2686_v5, 16 }
  0xe8   : > { %v1931_v23 = vsel %vm4708_vm12, %v1926_v7, %v1930_v51  ;;  %v1958_v51 = vrot.slane %v1956_v32, 4  ;;  %v1023_v6 = vrot.slane %v1022_v56, 4  ;;  %v3772_v7 = vrot.slane %v1244_v60, 9  ;;  %v3097_v56 = vld [vmem:[#allocation2 + $0x20] sm:$0x1] }
  0xe9   : > { %v2011_v41 = vunpack.c.l.b16 %v1931_v23  ;;  %v1385_v24 = vpack.c.b16 %v1376_v38, %v1375_v37  ;;  %v2712_v28 = vrot.slane %v2710_v14, 4  ;;  %v2715_v30 = vrot.slane %v2713_v15, 5  ;;  %v2161_v38 = vld [vmem:[#allocation2 + $0x10] sm:$0xf] }
  0xea   : > { %v1959_v1 = vor.u32 %v1958_v51, %v1954_v50  ;;  %v1028_v21 = vsel %vm4708_vm12, %v1023_v6, %v1027_v3  ;;  %v2721_v31 = vrot.slane %v2719_v16, 5  ;;  %v2725_v32 = vrot.slane %v2723_v17, 4  ;;  %v2688_v6 = vld [vmem:[#allocation2 + $0x24] sm:$0xf] }
  0xeb   : > { %v2021_v55 = vpack.c.b16 %v2012_v42, %v2011_v41  ;;  %v1077_v35 = vunpack.c.l.b16 %v1028_v21  ;;  %v2013_v39 = vunpack.c.l.b16 %v1955_v26  ;;  %v2687_v41 = vld [vmem:[#allocation2 + $0x20] sm:$0x1]  ;;  %v3096_v42 = vld [vmem:[#allocation2 + $0x1c] sm:$0xf]  ;;  %v2210_v45 = vrot.slane %v2161_v38, 5 }
  0xec   : > { %v1960_v11 = vrot.slane %v1959_v1, 4  ;;  %v2726_v48 = vor.u32 %v2725_v32, %v2721_v31  ;;  %v3949_v60 = vrot.slane %v2160_v44, 9  ;;  %v3148_v5 = vrot.slane %v3097_v56, 5 }
  0xed   : > { %v1085_v50 = vpack.c.b16 %v1077_v35, %v1076_v33  ;;  %v2212_v61 = vrot.slane %v2210_v45, 4  ;;  %v2734_v20 = vshrl.u32 %v2688_v6, 16  ;;  %v2737_v21 = vshll.u32 %v2688_v6, 16  ;;  %v2164_v35 = vld [vmem:[#allocation2 + $0x1c] sm:$0xf] }
  0xee   : > { %v1965_v27 = vsel %vm4708_vm12, %v1960_v11, %v1964_v12  ;;  %v2727_v0 = vrot.slane %v2726_v48, 4 }
  0xef   : > { %v2014_v40 = vunpack.c.l.b16 %v1965_v27  ;;  %v2214_v10 = vsel %vm4714_vm13, %v2212_v61, %v2213_v62  ;;  %v3098_v62 = vld [vmem:[#allocation2 + $0x24] sm:$0xe] }
  0xf2   : > { %1175 = vmatmul.bf16.gmra.mxu1 %v1083_v53  ;;  %1476 = vmatmul.bf16.gmra.mxu2 %v1384_v54  ;;  %v4233_v54 = vld [vmem:[#allocation2 + $0x54] sm:$0xff] }
  0xf4   : > { %1702 = vmatmul.bf16.gmra.mxu3 %v4232_v57  ;;  %2112 = vmatmul.bf16.gmra.mxu0 %v2020_v59  ;;  %v1325_v57 = vrot.slane %v1245_v46, 5  ;;  %v2716_v46 = vor.u32 %v2715_v30, %v2712_v28  ;;  %v2298_v28 = vunpack.c.l.b16 %v2214_v10  ;;  %v4134_v10 = vrot.slane %v3098_v62, 9 }
  0xf6   : > { %v1327_v8 = vrot.slane %v1325_v57, 4  ;;  %v1326_v22 = vsel %vm4714_vm13, %v3772_v7, %v1325_v57  ;;  %v2717_v1 = vrot.slane %v2716_v46, 4  ;;  %v2689_v7 = vld [vmem:[#allocation2 + $0x28] sm:$0xf]  ;;  %v4259_v46 = vld [vmem:[#allocation2 + $0x18] sm:$0xff] }
  0xf7   : > { %v1377_v36 = vunpack.c.l.b16 %v1326_v22  ;;  %v2743_v22 = vshll.u32 %v2689_v7, 16 }
  0xf8   : > { %v1329_v23 = vsel %vm4714_vm13, %v1327_v8, %v1328_v9  ;;  %v2211_v9 = vsel %vm4714_vm13, %v3949_v60, %v2210_v45  ;;  %v2722_v12 = vsel %vm4708_vm12, %v2717_v1, %v2721_v31  ;;  %v2165_v60 = vld [vmem:[#allocation2 + $0x20] sm:$0x1]  ;;  %v3100_v1 = vld [vmem:[#allocation2 + $0x2c] sm:$0x1] }
  0xf9   : > { %v1378_v37 = vunpack.c.l.b16 %v1329_v23  ;;  %v2747_v23 = vshrl.u32 %v2689_v7, 16  ;;  %v2297_v27 = vunpack.c.l.b16 %v2211_v9  ;;  %v2934_v30 = vunpack.c.l.b16 %v2722_v12 }
  0xfa   : > { %v5029_v38 = vrot.slane %v2743_v22, 5 }
  0xfb   : > { %v1386_v51 = vpack.c.b16 %v1378_v37, %v1377_v36  ;;  %v2736_v36 = vrot.slane %v2734_v20, 4  ;;  %v2739_v37 = vrot.slane %v2737_v21, 5  ;;  %v2313_v45 = vpack.c.b16 %v2298_v28, %v2297_v27 }
  0xff   : > { %v4977_v53 = vpop.f32.mrf.mxu1 }
 0x101   : > { %v4979_v59 = vpop.f32.mrf.mxu0 }
 0x102   : > { %1180 = vmatmul.bf16.gmra.mxu1 %v1084_v52  ;;  %1481 = vmatmul.bf16.gmra.mxu2 %v1385_v24  ;;  %v2729_v52 = vshll.u32 %v2687_v41, 16  ;;  %v3145_v24 = vrot.slane %v3096_v42, 5  ;;  %v3099_v42 = vld [vmem:[#allocation2 + $0x28] sm:$0xf] }
 0x103   : > { %v3152_v61 = vrot.slane %v3099_v42, 5 }
 0x104   : > { %1707 = vmatmul.bf16.gmra.mxu3 %v4233_v54  ;;  %2117 = vmatmul.bf16.gmra.mxu0 %v2021_v55  ;;  %v2022_v54 = vpack.c.b16 %v2014_v40, %v2013_v39  ;;  %v3095_v55 = vld [vmem:[#allocation2 + $0x18] sm:$0xe]  ;;  %v2731_v2 = vrot.slane %v2729_v52, 5  ;;  %v3147_v4 = vrot.slane %v3145_v24, 4  ;;  %v2749_v39 = vrot.slane %v2747_v23, 4 }
 0x105   : > { %v4981_v13 = vpop.f32.mrf.mxu2  ;;  %v4133_v3 = vrot.slane %v3095_v55, 9  ;;  %v2690_v40 = vld [vmem:[#allocation2 + $0x2c] sm:$0x1]  ;;  %v2163_v52 = vld [vmem:[#allocation2 + $0x18] sm:$0xe]  ;;  %v3154_v12 = vrot.slane %v3152_v61, 4 }
 0x106   : > { %v2732_v14 = vsel %vm4708_vm12, %v2727_v0, %v2731_v2  ;;  %v3149_v16 = vsel %vm4714_vm13, %v3147_v4, %v3148_v5  ;;  %v3950_v0 = vrot.slane %v2163_v52, 9  ;;  %v2692_v4 = vld [vmem:[#allocation2 + $0x34] sm:$0xf]  ;;  %v2220_v5 = vrot.slane %v2165_v60, 5 }
 0x107   : > { %v4983_v18 = vpop.f32.mrf.mxu3  ;;  %v4985_v19 = vpop.f32.mrf.mxu1  ;;  %v3146_v15 = vsel %vm4714_vm13, %v4133_v3, %v3145_v24  ;;  %v2935_v31 = vunpack.c.l.b16 %v2732_v14  ;;  %v3233_v33 = vunpack.c.l.b16 %v3149_v16  ;;  %v2740_v24 = vor.u32 %v2739_v37, %v2736_v36  ;;  %v2691_v3 = vld [vmem:[#allocation2 + $0x30] sm:$0xf] }
 0x108   : > { %v3232_v32 = vunpack.c.l.b16 %v3146_v15  ;;  %v2758_v15 = vshrl.u32 %v2691_v3, 16  ;;  %v2761_v16 = vshll.u32 %v2691_v3, 16  ;;  %v2767_v20 = vshll.u32 %v2692_v4, 16 }
 0x109   : > { %v4995_v25 = vpop.f32.mrf.mxu0  ;;  %v2950_v48 = vpack.c.b16 %v2935_v31, %v2934_v30  ;;  %v2741_v6 = vrot.slane %v2740_v24, 4  ;;  %v2771_v21 = vshrl.u32 %v2692_v4, 16  ;;  %v3153_v37 = vsel %vm4714_vm13, %v4134_v10, %v3152_v61  ;;  %v2166_v61 = vld [vmem:[#allocation2 + $0x24] sm:$0xe] }
 0x10a   : > { %v3248_v47 = vpack.c.b16 %v3233_v33, %v3232_v32  ;;  %v2760_v42 = vrot.slane %v2758_v15, 4  ;;  %v3234_v24 = vunpack.c.l.b16 %v3153_v37  ;;  %v2695_v37 = vld [vmem:[#allocation2 + $0x40] sm:$0xf] }
 0x10b   : > { %v2746_v31 = vsel %vm4708_vm12, %v2741_v6, %v5029_v38  ;;  %v2168_v6 = vld [vmem:[#allocation2 + $0x2c] sm:$0x1] }
 0x10c   : > { %v2936_v52 = vunpack.c.l.b16 %v2746_v31 }
 0x10d   : > { %v5001_v43 = vpop.f32.mrf.mxu2 }
 0x10f   : > { %v5003_v49 = vpop.f32.mrf.mxu3  ;;  %v5005_v29 = vpop.f32.mrf.mxu1 }
 0x111   : > { %v5007_v57 = vpop.f32.mrf.mxu0 }
 0x112   : > { %1185 = vmatmul.bf16.gmra.mxu1 %v1085_v50  ;;  %1486 = vmatmul.bf16.gmra.mxu2 %v1386_v51  ;;  %v2217_v50 = vrot.slane %v2164_v35, 5 }
 0x114   : > { %1712 = vmatmul.bf16.gmra.mxu3 %v4234_v34  ;;  %2122 = vmatmul.bf16.gmra.mxu0 %v2022_v54  ;;  %v2750_v34 = vor.u32 %v2749_v39, %v5029_v38  ;;  %v2753_v54 = vshll.u32 %v2690_v40, 16  ;;  %v2219_v2 = vrot.slane %v2217_v50, 4  ;;  %v2218_v28 = vsel %vm4714_vm13, %v3950_v0, %v2217_v50  ;;  %v2167_v40 = vld [vmem:[#allocation2 + $0x28] sm:$0xf] }
 0x115   : > { %v5009_v8 = vpop.f32.mrf.mxu2  ;;  %v2299_v38 = vunpack.c.l.b16 %v2218_v28 }
 0x116   : > { %v2751_v7 = vrot.slane %v2750_v34, 4  ;;  %v2755_v9 = vrot.slane %v2753_v54, 5  ;;  %v2221_v30 = vsel %vm4714_vm13, %v2219_v2, %v2220_v5  ;;  %v3102_v54 = vld [vmem:[#allocation2 + $0x34] sm:$0xf]  ;;  %v4260_v5 = vld [vmem:[#allocation2 + $0x24] sm:$0xff] }
 0x117   : > { %v5015_v11 = vpop.f32.mrf.mxu3  ;;  %v5025_v17 = vpop.f32.mrf.mxu1  ;;  %v2300_v50 = vunpack.c.l.b16 %v2221_v30 }
 0x118   : > { %v2756_v32 = vsel %vm4708_vm12, %v2751_v7, %v2755_v9  ;;  %v3159_v7 = vrot.slane %v3102_v54, 5 }
 0x119   : > { %v5027_v26 = vpop.f32.mrf.mxu0  ;;  %v2314_v4 = vpack.c.b16 %v2300_v50, %v2299_v38 }
 0x11a   : > { %v3161_v31 = vrot.slane %v3159_v7, 4 }
 0x11d   : > { %v5031_v41 = vpop.f32.mrf.mxu2 }
 0x11f   : > { %v5033_v44 = vpop.f32.mrf.mxu3  ;;  %v1151_v51 = vpop.f32.mrf.mxu1 }
 0x120   : > { %v1191_v55 = vadd.f32 %v1151_v51, %v4979_v59  ;;  %v3155_v59 = vrot.slane %v3100_v1, 5  ;;  %v2693_v51 = vld [vmem:[#allocation2 + $0x38] sm:$0x1] }
 0x121   : > { %v2088_v56 = vpop.f32.mrf.mxu0  ;;  %v2777_v0 = vshll.u32 %v2693_v51, 16 }
 0x122   : > { %2385 = vmatmul.bf16.vlgmr.msra.gmra.mxu1 %v2313_v45  ;;  %2612 = vmatmul.bf16.vlgmr.msra.gmra.mxu2 %v4259_v46  ;;  %v3156_v39 = vsel %vm4714_vm13, %v3154_v12, %v3155_v59  ;;  %v2763_v45 = vrot.slane %v2761_v16, 5  ;;  %v5051_v46 = vrot.slane %v2767_v20, 5  ;;  %v3101_v12 = vld [vmem:[#allocation2 + $0x30] sm:$0xe]  ;;  %v3103_v59 = vld [vmem:[#allocation2 + $0x38] sm:$0x1] }
 0x123   : > { %v3235_v34 = vunpack.c.l.b16 %v3156_v39  ;;  %v3951_v20 = vrot.slane %v2166_v61, 9  ;;  %v2779_v28 = vrot.slane %v2777_v0, 5  ;;  %v4135_v30 = vrot.slane %v3101_v12, 9  ;;  %v3105_v12 = vld [vmem:[#allocation2 + $0x40] sm:$0xf] }
 0x124   : > { %3022 = vmatmul.bf16.vlgmr.msra.gmra.mxu3 %v2950_v48  ;;  %3320 = vmatmul.bf16.vlgmr.msra.gmra.mxu0 %v3248_v47  ;;  %v2773_v48 = vrot.slane %v2771_v21, 4  ;;  %v2764_v62 = vor.u32 %v2763_v45, %v2760_v42 }
 0x125   : > { %v1452_v14 = vpop.f32.mrf.mxu2  ;;  %v3249_v10 = vpack.c.b16 %v3235_v34, %v3234_v24  ;;  %v3160_v38 = vsel %vm4714_vm13, %v4135_v30, %v3159_v7  ;;  %v2791_v24 = vshll.u32 %v2695_v37, 16  ;;  %v2795_v34 = vshrl.u32 %v2695_v37, 16  ;;  %v2171_v37 = vld [vmem:[#allocation2 + $0x38] sm:$0x1] }
 0x126   : > { %v1492_v22 = vadd.f32 %v1452_v14, %v1191_v55  ;;  %v2224_v55 = vrot.slane %v2167_v40, 5  ;;  %v2774_v1 = vor.u32 %v2773_v48, %v5051_v46  ;;  %v3236_v0 = vunpack.c.l.b16 %v3160_v38 }
 0x127   : > { %v1678_v23 = vpop.f32.mrf.mxu3  ;;  %v1153_v27 = vpop.f32.mrf.mxu1  ;;  %v5075_v7 = vrot.slane %v2791_v24, 5 }
 0x128   : > { %v1718_v33 = vadd.f32 %v1678_v23, %v1492_v22  ;;  %v1192_v35 = vadd.f32 %v1153_v27, %v4995_v25  ;;  %v2937_v25 = vunpack.c.l.b16 %v2756_v32  ;;  %v2226_v21 = vrot.slane %v2224_v55, 4 }
 0x129   : > { %v2090_v36 = vpop.f32.mrf.mxu0  ;;  %v2227_v22 = vrot.slane %v2168_v6, 5  ;;  %v2765_v23 = vrot.slane %v2764_v62, 4  ;;  %v2775_v27 = vrot.slane %v2774_v1, 4  ;;  %v3162_v32 = vrot.slane %v3103_v59, 5 }
 0x12a   : > { %v5053_v47 = vadd.f32 %v2088_v56, %v1718_v33  ;;  %v2951_v9 = vpack.c.b16 %v2937_v25, %v2936_v52 }
 0x12b   : > { %v2228_v40 = vsel %vm4714_vm13, %v2226_v21, %v2227_v22  ;;  %v2770_v42 = vsel %vm4708_vm12, %v2765_v23, %v5051_v46  ;;  %v3163_v50 = vsel %vm4714_vm13, %v3161_v31, %v3162_v32 }
 0x12c   : > { %v2302_v61 = vunpack.c.l.b16 %v2228_v40  ;;  %v2938_v62 = vunpack.c.l.b16 %v2770_v42  ;;  %v3106_v40 = vld [vmem:[#allocation2 + $0x44] sm:$0x1] }
 0x12d   : > { %v1454_v60 = vpop.f32.mrf.mxu2 }
 0x12e   : > { %v1493_v2 = vadd.f32 %v1454_v60, %v1192_v35  ;;  %v2694_v35 = vld [vmem:[#allocation2 + $0x3c] sm:$0xf] }
 0x12f   : > { %v1680_v3 = vpop.f32.mrf.mxu3  ;;  %v1156_v56 = vpop.f32.mrf.mxu1  ;;  %v2782_v52 = vshrl.u32 %v2694_v35, 16  ;;  %v2785_v25 = vshll.u32 %v2694_v35, 16 }
 0x130   : > { %v1719_v14 = vadd.f32 %v1680_v3, %v1493_v2  ;;  %v1193_v15 = vadd.f32 %v1156_v56, %v5007_v57  ;;  %v2225_v57 = vsel %vm4714_vm13, %v3951_v20, %v2224_v55  ;;  %v3237_v2 = vunpack.c.l.b16 %v3163_v50 }
 0x131   : > { %v2093_v16 = vpop.f32.mrf.mxu0  ;;  %v2301_v60 = vunpack.c.l.b16 %v2225_v57  ;;  %v2787_v6 = vrot.slane %v2785_v25, 5  ;;  %v2797_v56 = vrot.slane %v2795_v34, 4  ;;  %v3104_v57 = vld [vmem:[#allocation2 + $0x3c] sm:$0xe]  ;;  %v2234_v50 = vrot.slane %v2171_v37, 5 }
 0x132   : > { %2390 = vmatmul.bf16.gmra.mxu1 %v2314_v4  ;;  %2617 = vmatmul.bf16.gmra.mxu2 %v4260_v5  ;;  %v5057_v33 = vadd.f32 %v2090_v36, %v1719_v14  ;;  %v2780_v36 = vsel %vm4708_vm12, %v2775_v27, %v2779_v28  ;;  %v2170_v4 = vld [vmem:[#allocation2 + $0x34] sm:$0xf]  ;;  %v2784_v5 = vrot.slane %v2782_v52, 4  ;;  %v3250_v23 = vpack.c.b16 %v3237_v2, %v3236_v0  ;;  %v2169_v27 = vld [vmem:[#allocation2 + $0x30] sm:$0xe] }
 0x133   : > { %v2939_v1 = vunpack.c.l.b16 %v2780_v36  ;;  %v2315_v14 = vpack.c.b16 %v2302_v61, %v2301_v60  ;;  %v2231_v21 = vrot.slane %v2170_v4, 5  ;;  %v2798_v28 = vor.u32 %v2797_v56, %v5075_v7  ;;  %v2698_v36 = vld [vmem:[#allocation2 + $0x4c] sm:$0xf] }
 0x134   : > { %3027 = vmatmul.bf16.gmra.mxu3 %v2951_v9  ;;  %3325 = vmatmul.bf16.gmra.mxu0 %v3249_v10  ;;  %v2696_v9 = vld [vmem:[#allocation2 + $0x44] sm:$0x1]  ;;  %v3952_v42 = vrot.slane %v2169_v27, 9  ;;  %v3169_v34 = vrot.slane %v3106_v40, 5  ;;  %v2815_v61 = vshll.u32 %v2698_v36, 16 }
 0x135   : > { %v1457_v39 = vpop.f32.mrf.mxu2  ;;  %v2952_v20 = vpack.c.b16 %v2939_v1, %v2938_v62  ;;  %v2801_v30 = vshll.u32 %v2696_v9, 16  ;;  %v2799_v52 = vrot.slane %v2798_v28, 4  ;;  %v2819_v62 = vshrl.u32 %v2698_v36, 16 }
 0x136   : > { %v1494_v45 = vadd.f32 %v1457_v39, %v1193_v15  ;;  %v4261_v15 = vld [vmem:[#allocation2 + $0x30] sm:$0xff]  ;;  %v3166_v39 = vrot.slane %v3105_v12, 5 }
 0x137   : > { %v1683_v48 = vpop.f32.mrf.mxu3  ;;  %v1158_v51 = vpop.f32.mrf.mxu1  ;;  %v2803_v25 = vrot.slane %v2801_v30, 5 }
 0x138   : > { %v1720_v54 = vadd.f32 %v1683_v48, %v1494_v45  ;;  %v1194_v55 = vadd.f32 %v1158_v51, %v5027_v26  ;;  %v2233_v45 = vrot.slane %v2231_v21, 4  ;;  %v2697_v48 = vld [vmem:[#allocation2 + $0x48] sm:$0xf]  ;;  %v3168_v24 = vrot.slane %v3166_v39, 4 }
 0x139   : > { %v2095_v46 = vpop.f32.mrf.mxu0  ;;  %v2809_v60 = vshll.u32 %v2697_v48, 16 }
 0x13a   : > { %v5073_v3 = vadd.f32 %v2093_v16, %v1720_v54  ;;  %v2788_v16 = vor.u32 %v2787_v6, %v2784_v5  ;;  %v2235_v4 = vsel %vm4714_vm13, %v2233_v45, %v2234_v50  ;;  %v2804_v6 = vsel %vm4708_vm12, %v2799_v52, %v2803_v25  ;;  %v4262_v50 = vld [vmem:[#allocation2 + $0x3c] sm:$0xff] }
 0x13c   : > { %v2789_v51 = vrot.slane %v2788_v16, 4 }
 0x13d   : > { %v1459_v10 = vpop.f32.mrf.mxu2 }
 0x13e   : > { %v1495_v59 = vadd.f32 %v1459_v10, %v1194_v55  ;;  %v2806_v55 = vshrl.u32 %v2697_v48, 16  ;;  %v2794_v5 = vsel %vm4708_vm12, %v2789_v51, %v5075_v7  ;;  %v2174_v51 = vld [vmem:[#allocation2 + $0x44] sm:$0x1] }
 0x13f   : > { %v1685_v26 = vpop.f32.mrf.mxu3  ;;  %v1161_v22 = vpop.f32.mrf.mxu1  ;;  %v2940_v16 = vunpack.c.l.b16 %v2794_v5 }
 0x140   : > { %v1721_v31 = vadd.f32 %v1685_v26, %v1495_v59  ;;  %v1195_v32 = vadd.f32 %v1161_v22, %v4977_v53  ;;  %v4136_v53 = vrot.slane %v3104_v57, 9  ;;  %v3170_v59 = vsel %vm4714_vm13, %v3168_v24, %v3169_v34  ;;  %v2173_v26 = vld [vmem:[#allocation2 + $0x40] sm:$0xf]  ;;  %v3107_v24 = vld [vmem:[#allocation2 + $0x48] sm:$0xe] }
 0x141   : > { %v2098_v35 = vpop.f32.mrf.mxu0  ;;  %v2304_v22 = vunpack.c.l.b16 %v2235_v4  ;;  %v3239_v30 = vunpack.c.l.b16 %v3170_v59  ;;  %v3109_v34 = vld [vmem:[#allocation2 + $0x50] sm:$0x1]  ;;  %v4137_v4 = vrot.slane %v3107_v24, 9  ;;  %v3111_v24 = vld [vmem:[#allocation2 + $0x58] sm:$0xf] }
 0x142   : > { %2395 = vmatmul.bf16.gmra.mxu1 %v2315_v14  ;;  %2622 = vmatmul.bf16.gmra.mxu2 %v4261_v15  ;;  %v5079_v38 = vadd.f32 %v2095_v46, %v1721_v31  ;;  %v2232_v46 = vsel %vm4714_vm13, %v3952_v42, %v2231_v21  ;;  %v3167_v12 = vsel %vm4714_vm13, %v4136_v53, %v3166_v39  ;;  %v2808_v14 = vrot.slane %v2806_v55, 4  ;;  %v3108_v31 = vld [vmem:[#allocation2 + $0x4c] sm:$0xf]  ;;  %v2172_v39 = vld [vmem:[#allocation2 + $0x3c] sm:$0xe] }
 0x143   : > { %v2811_v15 = vrot.slane %v2809_v60, 5  ;;  %v2821_v21 = vrot.slane %v2819_v62, 4  ;;  %v2303_v7 = vunpack.c.l.b16 %v2232_v46  ;;  %v3238_v28 = vunpack.c.l.b16 %v3167_v12  ;;  %v2701_v12 = vld [vmem:[#allocation2 + $0x58] sm:$0xf] }
 0x144   : > { %3032 = vmatmul.bf16.gmra.mxu3 %v2952_v20  ;;  %3330 = vmatmul.bf16.gmra.mxu0 %v3250_v23  ;;  %v5095_v20 = vrot.slane %v2815_v61, 5  ;;  %v2699_v23 = vld [vmem:[#allocation2 + $0x50] sm:$0x1]  ;;  %v3173_v52 = vrot.slane %v3108_v31, 5  ;;  %v3953_v61 = vrot.slane %v2172_v39, 9 }
 0x145   : > { %v1462_v54 = vpop.f32.mrf.mxu2  ;;  %v2812_v57 = vor.u32 %v2811_v15, %v2808_v14  ;;  %v2825_v42 = vshll.u32 %v2699_v23, 16  ;;  %v2316_v36 = vpack.c.b16 %v2304_v22, %v2303_v7  ;;  %v3251_v53 = vpack.c.b16 %v3239_v30, %v3238_v28 }
 0x146   : > { %v1496_v1 = vadd.f32 %v1462_v54, %v1195_v32  ;;  %v2238_v32 = vrot.slane %v2173_v26, 5  ;;  %v2822_v40 = vor.u32 %v2821_v21, %v5095_v20  ;;  %v3175_v5 = vrot.slane %v3173_v52, 4 }
 0x147   : > { %v1688_v0 = vpop.f32.mrf.mxu3  ;;  %v1163_v2 = vpop.f32.mrf.mxu1  ;;  %v2827_v46 = vrot.slane %v2825_v42, 5  ;;  %v3174_v7 = vsel %vm4714_vm13, %v4137_v4, %v3173_v52  ;;  %v2839_v28 = vshll.u32 %v2701_v12, 16  ;;  %v2843_v30 = vshrl.u32 %v2701_v12, 16 }
 0x148   : > { %v1722_v56 = vadd.f32 %v1688_v0, %v1496_v1  ;;  %v1196_v9 = vadd.f32 %v1163_v2, %v4985_v19  ;;  %v2941_v19 = vunpack.c.l.b16 %v2804_v6  ;;  %v2240_v62 = vrot.slane %v2238_v32, 4 }
 0x149   : > { %v2100_v10 = vpop.f32.mrf.mxu0  ;;  %v2241_v1 = vrot.slane %v2174_v51, 5  ;;  %v2813_v0 = vrot.slane %v2812_v57, 4  ;;  %v2823_v2 = vrot.slane %v2822_v40, 4  ;;  %v3176_v6 = vrot.slane %v3109_v34, 5 }
 0x14a   : > { %v5097_v27 = vadd.f32 %v2098_v35, %v1722_v56  ;;  %v2953_v25 = vpack.c.b16 %v2941_v19, %v2940_v16  ;;  %v3240_v42 = vunpack.c.l.b16 %v3174_v7  ;;  %v5119_v52 = vrot.slane %v2839_v28, 5 }
 0x14b   : > { %v2242_v26 = vsel %vm4714_vm13, %v2240_v62, %v2241_v1  ;;  %v2818_v14 = vsel %vm4708_vm12, %v2813_v0, %v5095_v20  ;;  %v3177_v22 = vsel %vm4714_vm13, %v3175_v5, %v3176_v6  ;;  %v3180_v12 = vrot.slane %v3111_v24, 5 }
 0x14c   : > { %v2306_v39 = vunpack.c.l.b16 %v2242_v26  ;;  %v2942_v57 = vunpack.c.l.b16 %v2818_v14 }
 0x14d   : > { %v1464_v37 = vpop.f32.mrf.mxu2 }
 0x14e   : > { %v1497_v45 = vadd.f32 %v1464_v37, %v1196_v9  ;;  %v2700_v9 = vld [vmem:[#allocation2 + $0x54] sm:$0xf] }
 0x14f   : > { %v1690_v48 = vpop.f32.mrf.mxu3  ;;  %v1166_v35 = vpop.f32.mrf.mxu1  ;;  %v2830_v16 = vshrl.u32 %v2700_v9, 16  ;;  %v2833_v19 = vshll.u32 %v2700_v9, 16  ;;  %v2177_v9 = vld [vmem:[#allocation2 + $0x50] sm:$0x1] }
 0x150   : > { %v1723_v54 = vadd.f32 %v1690_v48, %v1497_v45  ;;  %v1197_v55 = vadd.f32 %v1166_v35, %v5005_v29  ;;  %v2239_v29 = vsel %vm4714_vm13, %v3953_v61, %v2238_v32  ;;  %v3241_v45 = vunpack.c.l.b16 %v3177_v22 }
 0x151   : > { %v2103_v60 = vpop.f32.mrf.mxu0  ;;  %v2305_v37 = vunpack.c.l.b16 %v2239_v29  ;;  %v2835_v51 = vrot.slane %v2833_v19, 5  ;;  %v2845_v35 = vrot.slane %v2843_v30, 4  ;;  %v3112_v29 = vld [vmem:[#allocation2 + $0x5c] sm:$0x1]  ;;  %v2248_v7 = vrot.slane %v2177_v9, 5 }
 0x152   : > { %2400 = vmatmul.bf16.gmra.mxu1 %v2316_v36  ;;  %2627 = vmatmul.bf16.gmra.mxu2 %v4262_v50  ;;  %v5101_v56 = vadd.f32 %v2100_v10, %v1723_v54  ;;  %v2828_v10 = vsel %vm4708_vm12, %v2823_v2, %v2827_v46  ;;  %v2176_v36 = vld [vmem:[#allocation2 + $0x4c] sm:$0xf]  ;;  %v2832_v50 = vrot.slane %v2830_v16, 4  ;;  %v3252_v0 = vpack.c.b16 %v3241_v45, %v3240_v42  ;;  %v2175_v2 = vld [vmem:[#allocation2 + $0x48] sm:$0xe] }
 0x153   : > { %v2943_v40 = vunpack.c.l.b16 %v2828_v10  ;;  %v2317_v54 = vpack.c.b16 %v2306_v39, %v2305_v37  ;;  %v2245_v62 = vrot.slane %v2176_v36, 5  ;;  %v2846_v46 = vor.u32 %v2845_v35, %v5119_v52 }
 0x154   : > { %3037 = vmatmul.bf16.gmra.mxu3 %v2953_v25  ;;  %3335 = vmatmul.bf16.gmra.mxu0 %v3251_v53  ;;  %v2702_v25 = vld [vmem:[#allocation2 + $0x5c] sm:$0x1]  ;;  %v3954_v26 = vrot.slane %v2175_v2, 9  ;;  %v3182_v30 = vrot.slane %v3180_v12, 4 }
 0x155   : > { %v1467_v59 = vpop.f32.mrf.mxu2  ;;  %v2954_v61 = vpack.c.b16 %v2943_v40, %v2942_v57  ;;  %v2849_v4 = vshll.u32 %v2702_v25, 16  ;;  %v2247_v14 = vrot.slane %v2245_v62, 4 }
 0x156   : > { %v1498_v15 = vadd.f32 %v1467_v59, %v1197_v55  ;;  %v4263_v55 = vld [vmem:[#allocation2 + $0x48] sm:$0xff]  ;;  %v3110_v59 = vld [vmem:[#allocation2 + $0x54] sm:$0xe]  ;;  %v2246_v36 = vsel %vm4714_vm13, %v3954_v26, %v2245_v62 }
 0x157   : > { %v1693_v21 = vpop.f32.mrf.mxu3  ;;  %v1168_v23 = vpop.f32.mrf.mxu1  ;;  %v2851_v16 = vrot.slane %v2849_v4, 5  ;;  %v4138_v28 = vrot.slane %v3110_v59, 9  ;;  %v2307_v62 = vunpack.c.l.b16 %v2246_v36 }
 0x158   : > { %v1724_v31 = vadd.f32 %v1693_v21, %v1498_v15  ;;  %v1198_v32 = vadd.f32 %v1168_v23, %v5025_v17  ;;  %v2703_v15 = vld [vmem:[#allocation2 + $0x60] sm:$0xf]  ;;  %v2704_v21 = vld [vmem:[#allocation2 + $0x64] sm:$0xf]  ;;  %v2847_v23 = vrot.slane %v2846_v46, 4 }
 0x159   : > { %v2105_v20 = vpop.f32.mrf.mxu0  ;;  %v2854_v37 = vshrl.u32 %v2703_v15, 16  ;;  %v2857_v39 = vshll.u32 %v2703_v15, 16  ;;  %v2863_v57 = vshll.u32 %v2704_v21, 16  ;;  %v2867_v40 = vshrl.u32 %v2704_v21, 16 }
 0x15a   : > { %v5117_v48 = vadd.f32 %v2103_v60, %v1724_v31  ;;  %v2836_v60 = vor.u32 %v2835_v51, %v2832_v50  ;;  %v3183_v31 = vrot.slane %v3112_v29, 5  ;;  %v2249_v50 = vsel %vm4714_vm13, %v2247_v14, %v2248_v7  ;;  %v2178_v29 = vld [vmem:[#allocation2 + $0x54] sm:$0xe] }
 0x15b   : > { %v2852_v25 = vsel %vm4708_vm12, %v2847_v23, %v2851_v16  ;;  %v4264_v23 = vld [vmem:[#allocation2 + $0x54] sm:$0xff] }
 0x15c   : > { %v2837_v22 = vrot.slane %v2836_v60, 4  ;;  %v3184_v24 = vsel %vm4714_vm13, %v3182_v30, %v3183_v31  ;;  %v2945_v60 = vunpack.c.l.b16 %v2852_v25  ;;  %v3113_v31 = vld [vmem:[#allocation2 + $0x60] sm:$0xe] }
 0x15d   : > { %v1469_v53 = vpop.f32.mrf.mxu2  ;;  %v3243_v4 = vunpack.c.l.b16 %v3184_v24  ;;  %v4139_v36 = vrot.slane %v3113_v31, 9  ;;  %v2707_v24 = vld [vmem:[#allocation2 + $0x70] sm:$0xf] }
 0x15e   : > { %v1499_v34 = vadd.f32 %v1469_v53, %v1198_v32  ;;  %v3181_v53 = vsel %vm4714_vm13, %v4138_v28, %v3180_v12  ;;  %v3117_v31 = vld [vmem:[#allocation2 + $0x70] sm:$0xf] }
 0x15f   : > { %v1695_v17 = vpop.f32.mrf.mxu3  ;;  %v1171_v1 = vpop.f32.mrf.mxu1  ;;  %v3242_v46 = vunpack.c.l.b16 %v3181_v53  ;;  %v2706_v53 = vld [vmem:[#allocation2 + $0x6c] sm:$0xf] }
 0x160   : > { %v1725_v5 = vadd.f32 %v1695_v17, %v1499_v34  ;;  %v1199_v19 = vadd.f32 %v1171_v1, %v4981_v13  ;;  %v2842_v13 = vsel %vm4708_vm12, %v2837_v22, %v5119_v52  ;;  %v2179_v34 = vld [vmem:[#allocation2 + $0x58] sm:$0xf]  ;;  %v2856_v17 = vrot.slane %v2854_v37, 4  ;;  %v2705_v52 = vld [vmem:[#allocation2 + $0x68] sm:$0x1] }
 0x161   : > { %v2108_v6 = vpop.f32.mrf.mxu0  ;;  %v2308_v1 = vunpack.c.l.b16 %v2249_v50  ;;  %v2944_v2 = vunpack.c.l.b16 %v2842_v13  ;;  %v2252_v12 = vrot.slane %v2179_v34, 5  ;;  %v2873_v15 = vshll.u32 %v2705_v52, 16 }
 0x162   : > { %2405 = vmatmul.bf16.gmra.mxu1 %v2317_v54  ;;  %2632 = vmatmul.bf16.gmra.mxu2 %v4263_v55  ;;  %v5122_v10 = vadd.f32 %v2105_v20, %v1725_v5  ;;  %v2859_v54 = vrot.slane %v2857_v39, 5  ;;  %v5138_v55 = vrot.slane %v2863_v57, 5  ;;  %v3114_v5 = vld [vmem:[#allocation2 + $0x64] sm:$0xf]  ;;  %v3253_v30 = vpack.c.b16 %v3243_v4, %v3242_v46 }
 0x163   : > { %v2318_v22 = vpack.c.b16 %v2308_v1, %v2307_v62  ;;  %v3187_v16 = vrot.slane %v3114_v5, 5  ;;  %v2955_v28 = vpack.c.b16 %v2945_v60, %v2944_v2  ;;  %v3955_v39 = vrot.slane %v2178_v29, 9 }
 0x164   : > { %3042 = vmatmul.bf16.gmra.mxu3 %v2954_v61  ;;  %3340 = vmatmul.bf16.gmra.mxu0 %v3252_v0  ;;  %v2869_v61 = vrot.slane %v2867_v40, 4  ;;  %v2860_v26 = vor.u32 %v2859_v54, %v2856_v17  ;;  %v2254_v57 = vrot.slane %v2252_v12, 4  ;;  %v2878_v60 = vshrl.u32 %v2706_v53, 16 }
 0x165   : > { %v1472_v32 = vpop.f32.mrf.mxu2  ;;  %v3189_v50 = vrot.slane %v3187_v16, 4  ;;  %v2253_v17 = vsel %vm4714_vm13, %v3955_v39, %v2252_v12  ;;  %v2881_v46 = vshll.u32 %v2706_v53, 16  ;;  %v2887_v4 = vshll.u32 %v2707_v24, 16 }
 0x166   : > { %v1500_v42 = vadd.f32 %v1472_v32, %v1199_v19  ;;  %v2870_v14 = vor.u32 %v2869_v61, %v5138_v55  ;;  %v3115_v32 = vld [vmem:[#allocation2 + $0x68] sm:$0x1]  ;;  %v2891_v5 = vshrl.u32 %v2707_v24, 16 }
 0x167   : > { %v1698_v45 = vpop.f32.mrf.mxu3  ;;  %v1173_v20 = vpop.f32.mrf.mxu1  ;;  %v3190_v13 = vrot.slane %v3115_v32, 5  ;;  %v2183_v24 = vld [vmem:[#allocation2 + $0x68] sm:$0x1] }
 0x168   : > { %v1726_v51 = vadd.f32 %v1698_v45, %v1500_v42  ;;  %v1200_v9 = vadd.f32 %v1173_v20, %v5001_v43  ;;  %v2861_v42 = vrot.slane %v2860_v26, 4  ;;  %v2871_v45 = vrot.slane %v2870_v14, 4 }
 0x169   : > { %v2110_v35 = vpop.f32.mrf.mxu0  ;;  %v2875_v20 = vrot.slane %v2873_v15, 5  ;;  %v3191_v52 = vsel %vm4714_vm13, %v3189_v50, %v3190_v13 }
 0x16a   : > { %v5140_v0 = vadd.f32 %v2108_v6, %v1726_v51  ;;  %v2180_v6 = vld [vmem:[#allocation2 + $0x5c] sm:$0x1]  ;;  %v2866_v61 = vsel %vm4708_vm12, %v2861_v42, %v5138_v55  ;;  %v3245_v15 = vunpack.c.l.b16 %v3191_v52 }
 0x16b   : > { %v2255_v40 = vrot.slane %v2180_v6, 5  ;;  %v2876_v1 = vsel %vm4708_vm12, %v2871_v45, %v2875_v20  ;;  %v2946_v29 = vunpack.c.l.b16 %v2866_v61  ;;  %v2889_v6 = vrot.slane %v2887_v4, 5 }
 0x16c   : > { %v2947_v26 = vunpack.c.l.b16 %v2876_v1 }
 0x16d   : > { %v1474_v59 = vpop.f32.mrf.mxu2  ;;  %v2256_v54 = vsel %vm4714_vm13, %v2254_v57, %v2255_v40  ;;  %v4265_v57 = vld [vmem:[#allocation2 + $0x60] sm:$0xff] }
 0x16e   : > { %v1501_v21 = vadd.f32 %v1474_v59, %v1200_v9  ;;  %v2309_v59 = vunpack.c.l.b16 %v2253_v17  ;;  %v2310_v55 = vunpack.c.l.b16 %v2256_v54  ;;  %v2956_v40 = vpack.c.b16 %v2947_v26, %v2946_v29  ;;  %v3118_v17 = vld [vmem:[#allocation2 + $0x74] sm:$0x1] }
 0x16f   : > { %v1700_v7 = vpop.f32.mrf.mxu3  ;;  %v1176_v19 = vpop.f32.mrf.mxu1  ;;  %v3197_v4 = vrot.slane %v3118_v17, 5 }
 0x170   : > { %v1727_v37 = vadd.f32 %v1700_v7, %v1501_v21  ;;  %v1201_v25 = vadd.f32 %v1176_v19, %v5009_v8  ;;  %v3188_v8 = vsel %vm4714_vm13, %v4139_v36, %v3187_v16  ;;  %v2182_v7 = vld [vmem:[#allocation2 + $0x64] sm:$0xf]  ;;  %v2893_v16 = vrot.slane %v2891_v5, 4 }
 0x171   : > { %v2113_v43 = vpop.f32.mrf.mxu0  ;;  %v3244_v14 = vunpack.c.l.b16 %v3188_v8  ;;  %v2319_v39 = vpack.c.b16 %v2310_v55, %v2309_v59  ;;  %v2259_v42 = vrot.slane %v2182_v7, 5 }
 0x172   : > { %2410 = vmatmul.bf16.gmra.mxu1 %v2318_v22  ;;  %2637 = vmatmul.bf16.gmra.mxu2 %v4264_v23  ;;  %v5144_v51 = vadd.f32 %v2110_v35, %v1727_v37  ;;  %v2880_v22 = vrot.slane %v2878_v60, 4  ;;  %v2883_v23 = vrot.slane %v2881_v46, 5  ;;  %v2894_v50 = vor.u32 %v2893_v16, %v2889_v6 }
 0x173   : > { %v3254_v20 = vpack.c.b16 %v3245_v15, %v3244_v14  ;;  %v2261_v61 = vrot.slane %v2259_v42, 4 }
 0x174   : > { %3047 = vmatmul.bf16.gmra.mxu3 %v2955_v28  ;;  %3345 = vmatmul.bf16.gmra.mxu0 %v3253_v30  ;;  %v2708_v28 = vld [vmem:[#allocation2 + $0x74] sm:$0x1]  ;;  %v2884_v36 = vor.u32 %v2883_v23, %v2880_v22  ;;  %v2895_v8 = vrot.slane %v2894_v50, 4 }
 0x175   : > { %v1477_v34 = vpop.f32.mrf.mxu2  ;;  %v2897_v13 = vshll.u32 %v2708_v28, 16 }
 0x176   : > { %v1502_v62 = vadd.f32 %v1477_v34, %v1201_v25  ;;  %v3194_v34 = vrot.slane %v3117_v31, 5  ;;  %v2885_v1 = vrot.slane %v2884_v36, 4 }
 0x177   : > { %v1703_v35 = vpop.f32.mrf.mxu3  ;;  %v1178_v2 = vpop.f32.mrf.mxu1  ;;  %v2899_v52 = vrot.slane %v2897_v13, 5 }
 0x178   : > { %v1728_v9 = vadd.f32 %v1703_v35, %v1502_v62  ;;  %v1202_v19 = vadd.f32 %v1178_v2, %v5031_v41  ;;  %v3116_v41 = vld [vmem:[#allocation2 + $0x6c] sm:$0xe]  ;;  %v2262_v35 = vrot.slane %v2183_v24, 5  ;;  %v3196_v46 = vrot.slane %v3194_v34, 4 }
 0x179   : > { %v2115_v12 = vpop.f32.mrf.mxu0  ;;  %v4140_v60 = vrot.slane %v3116_v41, 9  ;;  %v2890_v26 = vsel %vm4708_vm12, %v2885_v1, %v2889_v6 }
 0x17a   : > { %v5160_v21 = vadd.f32 %v2113_v43, %v1728_v9  ;;  %v2181_v43 = vld [vmem:[#allocation2 + $0x60] sm:$0xe]  ;;  %v3198_v22 = vsel %vm4714_vm13, %v3196_v46, %v3197_v4  ;;  %v2948_v28 = vunpack.c.l.b16 %v2890_v26 }
 0x17b   : > { %v3956_v54 = vrot.slane %v2181_v43, 9  ;;  %v3195_v7 = vsel %vm4714_vm13, %v4140_v60, %v3194_v34 }
 0x17c   : > { %v3246_v31 = vunpack.c.l.b16 %v3195_v7 }
 0x17d   : > { %v1479_v30 = vpop.f32.mrf.mxu2  ;;  %v2260_v29 = vsel %vm4714_vm13, %v3956_v54, %v2259_v42 }
 0x17e   : > { %v1503_v32 = vadd.f32 %v1479_v30, %v1202_v19  ;;  %v2311_v23 = vunpack.c.l.b16 %v2260_v29 }
 0x17f   : > { %v1705_v37 = vpop.f32.mrf.mxu3  ;;  %v1181_v45 = vpop.f32.mrf.mxu1 }
 0x180   : > { %v1729_v25 = vadd.f32 %v1705_v37, %v1503_v32  ;;  %v1203_v2 = vadd.f32 %v1181_v45, %v4983_v18  ;;  %v2900_v18 = vsel %vm4708_vm12, %v2895_v8, %v2899_v52  ;;  %v3247_v32 = vunpack.c.l.b16 %v3198_v22 }
 0x181   : > { %v2118_v53 = vpop.f32.mrf.mxu0  ;;  %v2949_v30 = vunpack.c.l.b16 %v2900_v18 }
 0x182   : > { %2415 = vmatmul.bf16.gmra.mxu1 %v2319_v39  ;;  %2642 = vmatmul.bf16.gmra.mxu2 %v4265_v57  ;;  %v5163_v62 = vadd.f32 %v2115_v12, %v1729_v25  ;;  %v2263_v12 = vsel %vm4714_vm13, %v2261_v61, %v2262_v35 }
 0x183   : > { %v2312_v16 = vunpack.c.l.b16 %v2263_v12  ;;  %v2957_v45 = vpack.c.b16 %v2949_v30, %v2948_v28 }
 0x184   : > { %3052 = vmatmul.bf16.gmra.mxu3 %v2956_v40  ;;  %3350 = vmatmul.bf16.gmra.mxu0 %v3254_v20  ;;  %v4266_v40 = vld [vmem:[#allocation2 + $0x6c] sm:$0xff]  ;;  %v3255_v20 = vpack.c.b16 %v3247_v32, %v3246_v31 }
 0x185   : > { %v1482_v5 = vpop.f32.mrf.mxu2  ;;  %v2320_v57 = vpack.c.b16 %v2312_v16, %v2311_v23 }
 0x186   : > { %v1504_v9 = vadd.f32 %v1482_v5, %v1203_v2 }
 0x187   : > { %v1708_v59 = vpop.f32.mrf.mxu3  ;;  %v1183_v55 = vpop.f32.mrf.mxu1 }
 0x188   : > { %v1730_v14 = vadd.f32 %v1708_v59, %v1504_v9  ;;  %v1204_v6 = vadd.f32 %v1183_v55, %v5003_v49 }
 0x189   : > { %v2120_v15 = vpop.f32.mrf.mxu0 }
 0x18a   : > { %v5178_v19 = vadd.f32 %v2118_v53, %v1730_v14 }
 0x18d   : > { %v1484_v37 = vpop.f32.mrf.mxu2 }
 0x18e   : > { %v1505_v39 = vadd.f32 %v1484_v37, %v1204_v6 }
 0x18f   : > { %v1710_v58 = vpop.f32.mrf.mxu3  ;;  %v1186_v42 = vpop.f32.mrf.mxu1 }
 0x190   : > { %v1731_v63 = vadd.f32 %v1710_v58, %v1505_v39  ;;  %v1205_v50 = vadd.f32 %v1186_v42, %v5015_v11 }
 0x191   : > { %v2123_v43 = vpop.f32.mrf.mxu0 }
 0x192   : > { %2420 = vmatmul.bf16.gmra.mxu1 %v2320_v57  ;;  %2647 = vmatmul.bf16.gmra.mxu2 %v4266_v40  ;;  %v5181_v36 = vadd.f32 %v2120_v15, %v1731_v63 }
 0x194   : > { %3057 = vmatmul.bf16.gmra.mxu3 %v2957_v45  ;;  %3355 = vmatmul.bf16.gmra.mxu0 %v3255_v20 }
 0x195   : > { %v1487_v13 = vpop.f32.mrf.mxu2 }
 0x196   : > { %v1506_v49 = vadd.f32 %v1487_v13, %v1205_v50 }
 0x197   : > { %v1713_v25 = vpop.f32.mrf.mxu3  ;;  %v1188_v53 = vpop.f32.mrf.mxu1 }
 0x198   : > { %v1732_v24 = vadd.f32 %v1713_v25, %v1506_v49  ;;  %v1206_v17 = vadd.f32 %v1188_v53, %v5033_v44 }
 0x199   : > { %v2125_v34 = vpop.f32.mrf.mxu0 }
 0x19a   : > { %v5184_v41 = vadd.f32 %v2123_v43, %v1732_v24 }
 0x19d   : > { %v1489_v54 = vpop.f32.mrf.mxu2 }
 0x19e   : > { %v1507_v61 = vadd.f32 %v1489_v54, %v1206_v17 }
 0x19f   : > { %v1715_v35 = vpop.f32.mrf.mxu3  ;;  %v2386_v1 = vpop.f32.mrf.mxu1 }
 0x1a0   : > { %v1733_v8 = vadd.f32 %v1715_v35, %v1507_v61  ;;  %v2426_v11 = vadd.f32 %v2386_v1, %v5053_v47 }
 0x1a1   : > { %v3321_v52 = vpop.f32.mrf.mxu0 }
 0x1a2   : > { %v5187_v2 = vadd.f32 %v2125_v34, %v1733_v8 }
 0x1a5   : > { %v2613_v60 = vpop.f32.mrf.mxu2 }
 0x1a6   : > { %v2653_v46 = vadd.f32 %v2613_v60, %v2426_v11 }
 0x1a7   : > { %v3023_v4 = vpop.f32.mrf.mxu3  ;;  %v2388_v5 = vpop.f32.mrf.mxu1 }
 0x1a8   : > { %v3063_v9 = vadd.f32 %v3023_v4, %v2653_v46  ;;  %v2427_v44 = vadd.f32 %v2388_v5, %v5057_v33 }
 0x1a9   : > { %v3323_v59 = vpop.f32.mrf.mxu0 }
 0x1aa   : > { %v3361_v55 = vadd.f32 %v3321_v52, %v3063_v9 }
 0x1ac   : > { %3469 = vst [vmem:[%s4472_s6] sm:$0xff] %v3361_v55  ;;  %v3431_v47 = vmul.f32 %v3361_v55, %v3361_v55 }
 0x1ad   : > { %v2615_v29 = vpop.f32.mrf.mxu2 }
 0x1ae   : > { %v2654_v12 = vadd.f32 %v2615_v29, %v2427_v44 }
 0x1af   : > { %v3025_v26 = vpop.f32.mrf.mxu3  ;;  %v2391_v14 = vpop.f32.mrf.mxu1 }
 0x1b0   : > { %v3064_v15 = vadd.f32 %v3025_v26, %v2654_v12  ;;  %v2428_v16 = vadd.f32 %v2391_v14, %v5073_v3 }
 0x1b1   : > { %v3326_v18 = vpop.f32.mrf.mxu0 }
 0x1b2   : > { %v3362_v7 = vadd.f32 %v3323_v59, %v3064_v15 }
 0x1b4   : > { %v3409_v22 = vadd.f32 %v3362_v7, %v3361_v55  ;;  %v3432_v23 = vmul.f32 %v3362_v7, %v3362_v7  ;;  %3470 = vst [vmem:[%s4472_s6 + $0x8] sm:$0xff] %v3362_v7 }
 0x1b5   : > { %v2618_v28 = vpop.f32.mrf.mxu2 }
 0x1b6   : > { %v3447_v30 = vadd.f32 %v3432_v23, %v3431_v47  ;;  %v2655_v31 = vadd.f32 %v2618_v28, %v2428_v16 }
 0x1b7   : > { %v3028_v32 = vpop.f32.mrf.mxu3  ;;  %v2393_v6 = vpop.f32.mrf.mxu1 }
 0x1b8   : > { %v3065_v33 = vadd.f32 %v3028_v32, %v2655_v31  ;;  %v2429_v40 = vadd.f32 %v2393_v6, %v5079_v38 }
 0x1b9   : > { %v3328_v37 = vpop.f32.mrf.mxu0 }
 0x1ba   : > { %v3363_v39 = vadd.f32 %v3326_v18, %v3065_v33 }
 0x1bc   : > { %v3410_v58 = vadd.f32 %v3409_v22, %v3363_v39  ;;  %v3433_v57 = vmul.f32 %v3363_v39, %v3363_v39  ;;  %3471 = vst [vmem:[%s4472_s6 + $0x10] sm:$0xff] %v3363_v39 }
 0x1bd   : > { %v2620_v42 = vpop.f32.mrf.mxu2 }
 0x1be   : > { %v3448_v45 = vadd.f32 %v3447_v30, %v3433_v57  ;;  %v2656_v20 = vadd.f32 %v2620_v42, %v2429_v40 }
 0x1bf   : > { %v3030_v63 = vpop.f32.mrf.mxu3  ;;  %v2396_v43 = vpop.f32.mrf.mxu1 }
 0x1c0   : > { %v3066_v3 = vadd.f32 %v3030_v63, %v2656_v20  ;;  %v2430_v53 = vadd.f32 %v2396_v43, %v5097_v27 }
 0x1c1   : > { %v3331_v50 = vpop.f32.mrf.mxu0 }
 0x1c2   : > { %v3364_v13 = vadd.f32 %v3328_v37, %v3066_v3 }
 0x1c4   : > { %v3411_v49 = vadd.f32 %v3410_v58, %v3364_v13  ;;  %v3434_v25 = vmul.f32 %v3364_v13, %v3364_v13  ;;  %3472 = vst [vmem:[%s4472_s6 + $0x18] sm:$0xff] %v3364_v13 }
 0x1c5   : > { %v2623_v24 = vpop.f32.mrf.mxu2 }
 0x1c6   : > { %v3449_v34 = vadd.f32 %v3448_v45, %v3434_v25  ;;  %v2657_v17 = vadd.f32 %v2623_v24, %v2430_v53 }
 0x1c7   : > { %v3033_v54 = vpop.f32.mrf.mxu3  ;;  %v2398_v61 = vpop.f32.mrf.mxu1 }
 0x1c8   : > { %v3067_v38 = vadd.f32 %v3033_v54, %v2657_v17  ;;  %v2431_v11 = vadd.f32 %v2398_v61, %v5101_v56 }
 0x1c9   : > { %v3333_v35 = vpop.f32.mrf.mxu0 }
 0x1ca   : > { %v3365_v1 = vadd.f32 %v3331_v50, %v3067_v38 }
 0x1cc   : > { %v3412_v8 = vadd.f32 %v3411_v49, %v3365_v1  ;;  %v3435_v52 = vmul.f32 %v3365_v1, %v3365_v1  ;;  %3473 = vst [vmem:[%s4472_s6 + $0x20] sm:$0xff] %v3365_v1 }
 0x1cd   : > { %v2625_v60 = vpop.f32.mrf.mxu2 }
 0x1ce   : > { %v3450_v46 = vadd.f32 %v3449_v34, %v3435_v52  ;;  %v2658_v4 = vadd.f32 %v2625_v60, %v2431_v11 }
 0x1cf   : > { %v3035_v5 = vpop.f32.mrf.mxu3  ;;  %v2401_v9 = vpop.f32.mrf.mxu1 }
 0x1d0   : > { %v3068_v27 = vadd.f32 %v3035_v5, %v2658_v4  ;;  %v2432_v12 = vadd.f32 %v2401_v9, %v5117_v48 }
 0x1d1   : > { %v3336_v59 = vpop.f32.mrf.mxu0 }
 0x1d2   : > { %v3366_v55 = vadd.f32 %v3333_v35, %v3068_v27 }
 0x1d4   : > { %v3413_v44 = vadd.f32 %v3412_v8, %v3366_v55  ;;  %v3436_v29 = vmul.f32 %v3366_v55, %v3366_v55  ;;  %3474 = vst [vmem:[%s4472_s6 + $0x28] sm:$0xff] %v3366_v55 }
 0x1d5   : > { %v2628_v26 = vpop.f32.mrf.mxu2 }
 0x1d6   : > { %v3451_v14 = vadd.f32 %v3450_v46, %v3436_v29  ;;  %v2659_v15 = vadd.f32 %v2628_v26, %v2432_v12 }
 0x1d7   : > { %v3038_v18 = vpop.f32.mrf.mxu3  ;;  %v2403_v7 = vpop.f32.mrf.mxu1 }
 0x1d8   : > { %v3069_v56 = vadd.f32 %v3038_v18, %v2659_v15  ;;  %v2433_v28 = vadd.f32 %v2403_v7, %v5122_v10 }
 0x1d9   : > { %v3338_v47 = vpop.f32.mrf.mxu0 }
 0x1da   : > { %v3367_v22 = vadd.f32 %v3336_v59, %v3069_v56 }
 0x1dc   : > { %v3414_v23 = vadd.f32 %v3413_v44, %v3367_v22  ;;  %v3437_v16 = vmul.f32 %v3367_v22, %v3367_v22  ;;  %3475 = vst [vmem:[%s4472_s6 + $0x30] sm:$0xff] %v3367_v22 }
 0x1dd   : > { %v2630_v30 = vpop.f32.mrf.mxu2 }
 0x1de   : > { %v3452_v31 = vadd.f32 %v3451_v14, %v3437_v16  ;;  %v2660_v32 = vadd.f32 %v2630_v30, %v2433_v28 }
 0x1df   : > { %v3040_v6 = vpop.f32.mrf.mxu3  ;;  %v2406_v33 = vpop.f32.mrf.mxu1 }
 0x1e0   : > { %v3070_v48 = vadd.f32 %v3040_v6, %v2660_v32  ;;  %v2434_v40 = vadd.f32 %v2406_v33, %v5140_v0 }
 0x1e1   : > { %v3341_v37 = vpop.f32.mrf.mxu0 }
 0x1e2   : > { %v3368_v39 = vadd.f32 %v3338_v47, %v3070_v48 }
 0x1e4   : > { %v3415_v58 = vadd.f32 %v3414_v23, %v3368_v39  ;;  %v3438_v57 = vmul.f32 %v3368_v39, %v3368_v39  ;;  %3476 = vst [vmem:[%s4472_s6 + $0x38] sm:$0xff] %v3368_v39 }
 0x1e5   : > { %v2633_v42 = vpop.f32.mrf.mxu2 }
 0x1e6   : > { %v3453_v45 = vadd.f32 %v3452_v31, %v3438_v57  ;;  %v2661_v20 = vadd.f32 %v2633_v42, %v2434_v40 }
 0x1e7   : > { %v3043_v63 = vpop.f32.mrf.mxu3  ;;  %v2408_v43 = vpop.f32.mrf.mxu1 }
 0x1e8   : > { %v3071_v10 = vadd.f32 %v3043_v63, %v2661_v20  ;;  %v2435_v25 = vadd.f32 %v2408_v43, %v5144_v51 }
 0x1e9   : > { %v3343_v3 = vpop.f32.mrf.mxu0 }
 0x1ea   : > { %v3369_v50 = vadd.f32 %v3341_v37, %v3071_v10 }
 0x1ec   : > { %v3416_v13 = vadd.f32 %v3415_v58, %v3369_v50  ;;  %v3439_v49 = vmul.f32 %v3369_v50, %v3369_v50  ;;  %3477 = vst [vmem:[%s4472_s6 + $0x40] sm:$0xff] %v3369_v50 }
 0x1ed   : > { %v2635_v53 = vpop.f32.mrf.mxu2 }
 0x1ee   : > { %v3454_v24 = vadd.f32 %v3453_v45, %v3439_v49  ;;  %v2662_v34 = vadd.f32 %v2635_v53, %v2435_v25 }
 0x1ef   : > { %v3045_v17 = vpop.f32.mrf.mxu3  ;;  %v2411_v54 = vpop.f32.mrf.mxu1 }
 0x1f0   : > { %v3072_v0 = vadd.f32 %v3045_v17, %v2662_v34  ;;  %v2436_v8 = vadd.f32 %v2411_v54, %v5160_v21 }
 0x1f1   : > { %v3346_v61 = vpop.f32.mrf.mxu0 }
 0x1f2   : > { %v3370_v38 = vadd.f32 %v3343_v3, %v3072_v0 }
 0x1f4   : > { %v3417_v35 = vadd.f32 %v3416_v13, %v3370_v38  ;;  %v3440_v1 = vmul.f32 %v3370_v38, %v3370_v38  ;;  %3478 = vst [vmem:[%s4472_s6 + $0x48] sm:$0xff] %v3370_v38 }
 0x1f5   : > { %v2638_v52 = vpop.f32.mrf.mxu2 }
 0x1f6   : > { %v3455_v11 = vadd.f32 %v3454_v24, %v3440_v1  ;;  %v2663_v60 = vadd.f32 %v2638_v52, %v2436_v8 }
 0x1f7   : > { %v3048_v46 = vpop.f32.mrf.mxu3  ;;  %v2413_v4 = vpop.f32.mrf.mxu1 }
 0x1f8   : > { %v3073_v51 = vadd.f32 %v3048_v46, %v2663_v60  ;;  %v2437_v55 = vadd.f32 %v2413_v4, %v5163_v62 }
 0x1f9   : > { %v3348_v5 = vpop.f32.mrf.mxu0 }
 0x1fa   : > { %v3371_v9 = vadd.f32 %v3346_v61, %v3073_v51 }
 0x1fc   : > { %v3418_v27 = vadd.f32 %v3417_v35, %v3371_v9  ;;  %v3441_v59 = vmul.f32 %v3371_v9, %v3371_v9  ;;  %3479 = vst [vmem:[%s4472_s6 + $0x50] sm:$0xff] %v3371_v9 }
 0x1fd   : > { %v2640_v44 = vpop.f32.mrf.mxu2 }
 0x1fe   : > { %v3456_v29 = vadd.f32 %v3455_v11, %v3441_v59  ;;  %v2664_v12 = vadd.f32 %v2640_v44, %v2437_v55 }
 0x1ff   : > { %v3050_v26 = vpop.f32.mrf.mxu3  ;;  %v2416_v14 = vpop.f32.mrf.mxu1 }
 0x200   : > { %v3074_v21 = vadd.f32 %v3050_v26, %v2664_v12  ;;  %v2438_v47 = vadd.f32 %v2416_v14, %v5178_v19 }
 0x201   : > { %v3351_v18 = vpop.f32.mrf.mxu0 }
 0x202   : > { %v3372_v15 = vadd.f32 %v3348_v5, %v3074_v21 }
 0x204   : > { %v3419_v7 = vadd.f32 %v3418_v27, %v3372_v15  ;;  %v3442_v56 = vmul.f32 %v3372_v15, %v3372_v15  ;;  %3480 = vst [vmem:[%s4472_s6 + $0x58] sm:$0xff] %v3372_v15 }
 0x205   : > { %v2643_v22 = vpop.f32.mrf.mxu2 }
 0x206   : > { %v3457_v23 = vadd.f32 %v3456_v29, %v3442_v56  ;;  %v2665_v16 = vadd.f32 %v2643_v22, %v2438_v47 }
 0x207   : > { %v3053_v28 = vpop.f32.mrf.mxu3  ;;  %v2418_v30 = vpop.f32.mrf.mxu1 }
 0x208   : > { %v3075_v62 = vadd.f32 %v3053_v28, %v2665_v16  ;;  %v2439_v33 = vadd.f32 %v2418_v30, %v5181_v36 }
 0x209   : > { %v3353_v48 = vpop.f32.mrf.mxu0 }
 0x20a   : > { %v3373_v31 = vadd.f32 %v3351_v18, %v3075_v62 }
 0x20c   : > { %v3420_v32 = vadd.f32 %v3419_v7, %v3373_v31  ;;  %v3443_v6 = vmul.f32 %v3373_v31, %v3373_v31  ;;  %3481 = vst [vmem:[%s4472_s6 + $0x60] sm:$0xff] %v3373_v31 }
 0x20d   : > { %v2645_v37 = vpop.f32.mrf.mxu2 }
 0x20e   : > { %v3458_v39 = vadd.f32 %v3457_v23, %v3443_v6  ;;  %v2666_v58 = vadd.f32 %v2645_v37, %v2439_v33 }
 0x20f   : > { %v3055_v57 = vpop.f32.mrf.mxu3  ;;  %v2421_v40 = vpop.f32.mrf.mxu1 }
 0x210   : > { %v3076_v19 = vadd.f32 %v3055_v57, %v2666_v58  ;;  %v2440_v63 = vadd.f32 %v2421_v40, %v5184_v41 }
 0x211   : > { %v3356_v13 = vpop.f32.mrf.mxu0 }
 0x212   : > { %v3374_v42 = vadd.f32 %v3353_v48, %v3076_v19 }
 0x214   : > { %v3421_v45 = vadd.f32 %v3420_v32, %v3374_v42  ;;  %v3444_v20 = vmul.f32 %v3374_v42, %v3374_v42  ;;  %3482 = vst [vmem:[%s4472_s6 + $0x68] sm:$0xff] %v3374_v42 }
 0x215   : > { %v2648_v43 = vpop.f32.mrf.mxu2 }
 0x216   : > { %v3459_v10 = vadd.f32 %v3458_v39, %v3444_v20  ;;  %v2667_v3 = vadd.f32 %v2648_v43, %v2440_v63 }
 0x217   : > { %v3058_v50 = vpop.f32.mrf.mxu3  ;;  %v2423_v49 = vpop.f32.mrf.mxu1 }
 0x218   : > { %v3077_v36 = vadd.f32 %v3058_v50, %v2667_v3  ;;  %v2441_v34 = vadd.f32 %v2423_v49, %v5187_v2 }
 0x219   : > { %v3358_v41 = vpop.f32.mrf.mxu0 }
 0x21a   : > { %v3375_v25 = vadd.f32 %v3356_v13, %v3077_v36 }
 0x21c   : > { %v3422_v53 = vadd.f32 %v3421_v45, %v3375_v25  ;;  %v3445_v24 = vmul.f32 %v3375_v25, %v3375_v25  ;;  %3483 = vst [vmem:[%s4472_s6 + $0x70] sm:$0xff] %v3375_v25 }
 0x21d   : > { %v2650_v17 = vpop.f32.mrf.mxu2 }
 0x21e   : > { %v3460_v54 = vadd.f32 %v3459_v10, %v3445_v24  ;;  %v2668_v0 = vadd.f32 %v2650_v17, %v2441_v34 }
 0x21f   : > { %v3060_v61 = vpop.f32.mrf.mxu3 }
 0x220   : > { %v3078_v38 = vadd.f32 %v3060_v61, %v2668_v0 }
 0x222   : > { %v3376_v35 = vadd.f32 %v3358_v41, %v3078_v38 }
 0x224   : > { %v3423_v1 = vadd.f32 %v3422_v53, %v3376_v35  ;;  %v3446_v8 = vmul.f32 %v3376_v35, %v3376_v35  ;;  %3484 = vst [vmem:[%s4472_s6 + $0x78] sm:$0xff] %v3376_v35 }
 0x226   : > { %v3424_v52 = vrot.slane %v3423_v1, 4  ;;  %v3461_v11 = vadd.f32 %v3460_v54, %v3446_v8 }
 0x228   : > { %v3425_v60 = vadd.f32 %v3424_v52, %v3423_v1  ;;  %v3462_v46 = vrot.slane %v3461_v11, 4 }
 0x22a   : > { %v3426_v4 = vrot.slane %v3425_v60, 2  ;;  %v3463_v51 = vadd.f32 %v3462_v46, %v3461_v11 }
 0x22c   : > { %v3427_v5 = vadd.f32 %v3426_v4, %v3425_v60  ;;  %v3464_v2 = vrot.slane %v3463_v51, 2 }
 0x22e   : > { %v3428_v9 = vrot.slane %v3427_v5, 1  ;;  %v3465_v27 = vadd.f32 %v3464_v2, %v3463_v51 }
 0x230   : > { %v3429_v59 = vadd.f32 %v3428_v9, %v3427_v5  ;;  %v3466_v55 = vrot.slane %v3465_v27, 1 }
 0x232   : > { %3430 = vst [vmem:[%s4489_s20] sm:$0x1] %v3429_v59  ;;  %v3467_v44 = vadd.f32 %v3466_v55, %v3465_v27 }
 0x234   : > { %3468 = vst [vmem:[%s4489_s20 + $0x1] sm:$0x1] %v3467_v44 }
 0x235 PF: > { %s14_s16 = sadd.s32 1, %s4394_s16   ;;  %s5252_s12 = smov %s4386_s14 }
 0x236   : > { %p11_p10 = scmp.ge.s32.totalorder %s14_s16, 6   ;;  %s5253_s13 = smov %s4390_s15 }
 0x237   : > { %s5254_s14 = smov %s5257_s17  ;;  %s5255_s15 = smov %s5261_s18 }
 0x238   :  { %13 = sbr.rel (!%p11_p10) target bundleno = 3 (0x3), region = 92 }

// kernel: basic_block_forward.4
= control target key start
LH: loop header
LB: loop body
LE: loop exit
PB: predicated region body
PF: predicated region fallthrough
CT: control target
= control target key end

     0   :  { %s4723_s18 = smov 0   ;;  %s4725_s19 = smov 0   ;;  %s5614_s0 = inlined_call_operand.vmem [shape: f32[2,16,16,128], index: 0, kind: input, shape index: {}]   ;;  %s5615_s1 = inlined_call_operand.vmem [shape: bf16[3,3,128,128], index: 1, kind: input, shape index: {}]   ;;  %s5616_s2 = inlined_call_operand.vmem [shape: f32[2,128], index: 2, kind: input, shape index: {}]   ;;  %s5617_s3 = inlined_call_operand.vmem [shape: bf16[2,16,16,128], index: 3, kind: input, shape index: {}]   ;;  %s5618_s4 = inlined_call_operand.vmem [shape: f32[2,16,16,128], index: 4, kind: output, shape index: {0}]   ;;  %s5619_s5 = inlined_call_operand.vmem [shape: f32[2,2,2,128], index: 5, kind: output, shape index: {1}]  }
   0x1   :  { %s4727_s20 = smov 0   ;;  %s4729_s21 = smov 0  }
   0x2   :  { %s4731_s22 = smov 0  }
   0x3 LB: > { %s25_s23 = sadd.s32 1, %s4682_s20  ;;  %s28_s24 = sadd.s32 1, %s4686_s21  ;;  %s4690_s22 = sphi %s4731_s22, %s16_s22   ;;  %s4686_s21 = sphi %s4729_s21, %s5633_s21   ;;  %s4682_s20 = sphi %s4727_s20, %s5632_s20   ;;  %s4678_s19 = sphi %s4725_s19, %s5631_s19   ;;  %s4674_s18 = sphi %s4723_s18, %s5630_s18  }
   0x4   : > { %p26_p0 = scmp.ge.s32.totalorder %s25_s23, 2  ;;  %p3884_p1 = scmp.ge.s32.totalorder %s4690_s22, 1 }
   0x5   : > { %p224_p2 = scmp.lt.s32.totalorder %s4690_s22, 5 }
   0x6   : > { %s5635_s23 = smov (%p26_p0, %s25_s23), 0  ;;  %s5637_s24 = smov (!%p26_p0, %s28_s24), %s4686_s21 }
   0x7   : > { %p225_p3 = pnand %p3884_p1, %p224_p2  ;;  %p30_p4 = scmp.ge.s32.totalorder %s5637_s24, 2 }
   0x8   : > { %p275_p5 = scmp.lt.s32.totalorder (!%p225_p3), %s4678_s19, 1  ;;  %s4756_s25 = sshll.u32 (!%p225_p3), %s4674_s18, 3 }
   0x9   : > { %s5639_s24 = smov (%p30_p4, %s5637_s24), 0  ;;  %228 = sbr.rel (%p225_p3) target bundleno = 589 (0x24d), region = 36 }
   0xa   : > { %p283_p6 = scmp.lt.s32.totalorder (!%p225_p3), %s4756_s25, 15  ;;  %p304_p7 = scmp.lt.s32.totalorder (!%p225_p3), %s4674_s18, 1 }
   0xb   : > { %p3899_p8 = scmp.le.s32.totalorder (!%p225_p3), %s4674_s18, 0 }
   0xe   : > { %v4692_v0 = vmov 0   ;;  %s5641_s19 = smov (!%p275_p5, %s4678_s19), 1  ;;  %v4791_v1 = vld [vmem:[%s5616_s2] ss:$0 sm:$0xff]  ;;  %v4802_v2 = vld [vmem:[%s5616_s2 + $0x1] ss:$0 sm:$0xff] }
   0xf   : > { %314 = vst [vmem:[#allocation2 + $0xc] sm:$0xf] %v4692_v0  ;;  %s284_s26 = scalar_select %p283_p6, %s4756_s25, 15  ;;  %vm592_vm0 = vcmask 1043456   ;;  %vm593_vm1 = vsmask.f32 7938 }
  0x10   : > { %311 = vst [vmem:[#allocation2] sm:$0xf] %v4692_v0  ;;  %s4444_s27 = sshll.u32 %s5641_s19, 8  ;;  %s3889_s28 = sshll.u32 %s5641_s19, 5  ;;  %vm599_vm2 = vcmask 1040384   ;;  %vm4849_vm5 = vmand %vm592_vm0, %vm593_vm1 }
  0x11   : > { %312 = vst [vmem:[#allocation2 + $0x4] sm:$0xf] %v4692_v0  ;;  %s4769_s6 = scalar_lea.vmem %s5614_s0, %s4444_s27  ;;  %s3888_s7 = sshll.u32 %s284_s26, 1  ;;  %vm428_vm3 = vsmask.f32 256 }
  0x12   : > { %313 = vst [vmem:[#allocation2 + $0x8] sm:$0x1] %v4692_v0  ;;  %s287_s8 = sadd.s32 %s3889_s28, %s3888_s7  ;;  %s3895_s9 = sshll.u32 %s5641_s19, 1  ;;  %vm429_vm4 = vsmask.f32 4368  ;;  %vm4856_vm6 = vmand %vm599_vm2, %vm428_vm3 }
  0x13   : > { %315 = vst [vmem:[#allocation2 + $0x10] sm:$0xf] %v4692_v0  ;;  %s3890_s10 = sshll.u32 %s287_s8, 2  ;;  %s3894_s11 = sshll.u32 %s287_s8, 3  ;;  %vm4863_vm7 = vmor %vm428_vm3, %vm429_vm4 }
  0x14   : > { %316 = vst [vmem:[#allocation2 + $0x14] sm:$0x1] %v4692_v0  ;;  %s4777_s14 = scalar_lea.vmem %s5617_s3, %s3890_s10  ;;  %s4782_s17 = scalar_lea.vmem %s5618_s4, %s3894_s11 }
  0x15   : > { %317 = vst [vmem:[#allocation2 + $0x18] sm:$0xf] %v4692_v0  ;;  %s305_s19 = scalar_select %p304_p7, %s4674_s18, 1 }
  0x16   : > { %318 = vst [vmem:[#allocation2 + $0x1c] sm:$0xf] %v4692_v0  ;;  %s4445_s28 = sshll.u32 %s4674_s18, 7  ;;  %v595_v45 = vld [vmem:[#allocation2 + $0xc] sm:$0xf]  ;;  %s3900_s13 = sadd.s32 (!%p3899_p8), 4294967295, %s4756_s25 }
  0x17   : > { %319 = vst [vmem:[#allocation2 + $0x20] sm:$0x1] %v4692_v0  ;;  %s307_s29 = sadd.s32 %s3895_s9, %s305_s19  ;;  %s4797_s30 = scalar_lea.vmem %s4769_s6, %s4445_s28 }
  0x18   : > { %320 = vst [vmem:[#allocation2 + $0x24] sm:$0xf] %v4692_v0  ;;  %s3896_s10 = sshll.u32 %s307_s29, 1  ;;  %v344_v3 = vld [vmem:[%s4797_s30] sm:$0xff]  ;;  %v345_v4 = vld [vmem:[%s4797_s30 + $0x8] sm:$0xff]  ;;  %v346_v5 = vld [vmem:[%s4797_s30 + $0x10] sm:$0xff] }
  0x19   : > { %321 = vst [vmem:[#allocation2 + $0x28] sm:$0xf] %v4692_v0  ;;  %s4812_s12 = scalar_lea.vmem %s5619_s5, %s3896_s10  ;;  %v362_v6 = vmul.f32 %v4791_v1, %v344_v3  ;;  %v363_v7 = vmul.f32 %v4791_v1, %v345_v4  ;;  %v364_v8 = vmul.f32 %v4791_v1, %v346_v5  ;;  %v347_v9 = vld [vmem:[%s4797_s30 + $0x18] sm:$0xff]  ;;  %v348_v10 = vld [vmem:[%s4797_s30 + $0x20] sm:$0xff]  ;;  %v349_v13 = vld [vmem:[%s4797_s30 + $0x28] sm:$0xff]  ;;  %s3901_s19 = sshll.u32 (!%p3899_p8), %s3900_s13, 4 }
  0x1a   : > { %322 = vst [vmem:[#allocation2 + $0x2c] sm:$0x1] %v4692_v0  ;;  %v365_v11 = vmul.f32 %v4791_v1, %v347_v9  ;;  %v366_v12 = vmul.f32 %v4791_v1, %v348_v10  ;;  %v350_v14 = vld [vmem:[%s4797_s30 + $0x30] sm:$0xff]  ;;  %v367_v18 = vmul.f32 %v4791_v1, %v349_v13  ;;  %v351_v19 = vld [vmem:[%s4797_s30 + $0x38] sm:$0xff]  ;;  %s659_s26 = scalar_lea.vmem (!%p3899_p8), %s4769_s6, %s3901_s19 }
  0x1b   : > { %323 = vst [vmem:[#allocation2 + $0x30] sm:$0xf] %v4692_v0  ;;  %v380_v15 = vadd.f32 %v4802_v2, %v362_v6  ;;  %v381_v16 = vadd.f32 %v4802_v2, %v363_v7  ;;  %v382_v17 = vadd.f32 %v4802_v2, %v364_v8  ;;  %v368_v22 = vmul.f32 %v4791_v1, %v350_v14  ;;  %v601_v46 = vld [vmem:[#allocation2 + $0x14] sm:$0x1]  ;;  %v352_v14 = vld [vmem:[%s4797_s30 + $0x40] sm:$0xff] }
  0x1c   : > { %324 = vst [vmem:[#allocation2 + $0x34] sm:$0xf] %v4692_v0  ;;  %v383_v20 = vadd.f32 %v4802_v2, %v365_v11  ;;  %v384_v21 = vadd.f32 %v4802_v2, %v366_v12  ;;  %v369_v23 = vmul.f32 %v4791_v1, %v351_v19  ;;  %v385_v27 = vadd.f32 %v4802_v2, %v367_v18  ;;  %v604_v58 = vld [vmem:[#allocation2 + $0x18] sm:$0xf] }
  0x1d   : > { %325 = vst [vmem:[#allocation2 + $0x38] sm:$0x1] %v4692_v0  ;;  %v396_v24 = vmax.f32 %v380_v15, 0.0  ;;  %v397_v25 = vmax.f32 %v381_v16, 0.0  ;;  %v398_v26 = vmax.f32 %v382_v17, 0.0  ;;  %v386_v30 = vadd.f32 %v4802_v2, %v368_v22  ;;  %v353_v15 = vld [vmem:[%s4797_s30 + $0x48] sm:$0xff] }
  0x1e   : > { %326 = vst [vmem:[#allocation2 + $0x3c] sm:$0xf] %v4692_v0  ;;  %v399_v28 = vmax.f32 %v383_v20, 0.0  ;;  %v400_v29 = vmax.f32 %v384_v21, 0.0  ;;  %v4840_v31 = vadd.f32 %v4802_v2, %v369_v23  ;;  %v401_v35 = vmax.f32 %v385_v27, 0.0  ;;  %v354_v21 = vld [vmem:[%s4797_s30 + $0x50] sm:$0xff] }
  0x1f   : > { %327 = vst [vmem:[#allocation2 + $0x40] sm:$0xf] %v4692_v0  ;;  %v412_v32 = vpack.c.bf16 %v396_v24, %v396_v24  ;;  %v413_v33 = vpack.c.bf16 %v397_v25, %v397_v25  ;;  %v414_v34 = vpack.c.bf16 %v398_v26, %v398_v26  ;;  %v402_v38 = vmax.f32 %v386_v30, 0.0  ;;  %v608_v5 = vld [vmem:[#allocation2 + $0x20] sm:$0x1] }
  0x20   : > { %328 = vst [vmem:[#allocation2 + $0x44] sm:$0x1] %v4692_v0  ;;  %v415_v36 = vpack.c.bf16 %v399_v28, %v399_v28  ;;  %v416_v37 = vpack.c.bf16 %v400_v29, %v400_v29  ;;  %v403_v39 = vmax.f32 %v4840_v31, 0.0  ;;  %v417_v60 = vpack.c.bf16 %v401_v35, %v401_v35  ;;  %v611_v19 = vld [vmem:[#allocation2 + $0x24] sm:$0xf] }
  0x21   : > { %329 = vst [vmem:[#allocation2 + $0x48] sm:$0xf] %v4692_v0  ;;  %v432_v40 = vshrl.u32 %v412_v32, 16  ;;  %v435_v41 = vshll.u32 %v412_v32, 16  ;;  %v440_v42 = vshrl.u32 %v413_v33, 16  ;;  %v443_v43 = vshll.u32 %v413_v33, 16 }
  0x22   : > { %330 = vst [vmem:[#allocation2 + $0x4c] sm:$0xf] %v4692_v0  ;;  %v449_v47 = vshrl.u32 %v414_v34, 16  ;;  %v452_v48 = vshll.u32 %v414_v34, 16  ;;  %v457_v49 = vshrl.u32 %v415_v36, 16  ;;  %v460_v50 = vshll.u32 %v415_v36, 16 }
  0x23   : > { %331 = vst [vmem:[#allocation2 + $0x50] sm:$0x1] %v4692_v0  ;;  %v434_v51 = vrot.slane %v432_v40, 7  ;;  %v442_v52 = vrot.slane %v440_v42, 7  ;;  %v466_v54 = vshrl.u32 %v416_v37, 16  ;;  %v469_v55 = vshll.u32 %v416_v37, 16 }
  0x24   : > { %332 = vst [vmem:[#allocation2 + $0x54] sm:$0xf] %v4692_v0  ;;  %v451_v57 = vrot.slane %v449_v47, 7  ;;  %v459_v59 = vrot.slane %v457_v49, 7  ;;  %v418_v61 = vpack.c.bf16 %v402_v38, %v402_v38  ;;  %v474_v20 = vshrl.u32 %v417_v60, 16 }
  0x25   : > { %333 = vst [vmem:[#allocation2 + $0x58] sm:$0xf] %v4692_v0  ;;  %v437_v62 = vor.u32 %v435_v41, %v434_v51  ;;  %v438_v63 = vrot.slane %v434_v51, 4  ;;  %v445_v3 = vor.u32 %v443_v43, %v442_v52  ;;  %v447_v4 = vrot.slane %v442_v52, 4  ;;  %v615_v27 = vld [vmem:[#allocation2 + $0x2c] sm:$0x1] }
  0x26   : > { %334 = vst [vmem:[#allocation2 + $0x5c] sm:$0x1] %v4692_v0  ;;  %v454_v6 = vor.u32 %v452_v48, %v451_v57  ;;  %v455_v7 = vrot.slane %v451_v57, 4  ;;  %v462_v8 = vor.u32 %v460_v50, %v459_v59  ;;  %v464_v9 = vrot.slane %v459_v59, 4  ;;  %v618_v33 = vld [vmem:[#allocation2 + $0x30] sm:$0xf] }
  0x27   : > { %335 = vst [vmem:[#allocation2 + $0x60] sm:$0xf] %v4692_v0  ;;  %v596_v10 = vsel %vm4849_vm5, %v437_v62, %v595_v45  ;;  %v446_v11 = vsel %vm4863_vm7, %v438_v63, %v445_v3  ;;  %v602_v12 = vsel %vm4856_vm6, %v447_v4, %v601_v46  ;;  %v468_v13 = vrot.slane %v466_v54, 7  ;;  %v356_v45 = vld [vmem:[%s4797_s30 + $0x60] sm:$0xff]  ;;  %v357_v50 = vld [vmem:[%s4797_s30 + $0x68] sm:$0xff] }
  0x28   : > { %336 = vst [vmem:[#allocation2 + $0x64] sm:$0xf] %v4692_v0  ;;  %v605_v16 = vsel %vm4849_vm5, %v454_v6, %v604_v58  ;;  %v463_v17 = vsel %vm4863_vm7, %v455_v7, %v462_v8  ;;  %v609_v18 = vsel %vm4856_vm6, %v464_v9, %v608_v5  ;;  %v477_v24 = vshll.u32 %v417_v60, 16  ;;  %v622_v52 = vld [vmem:[#allocation2 + $0x38] sm:$0x1]  ;;  %v358_v9 = vld [vmem:[%s4797_s30 + $0x70] sm:$0xff] }
  0x29   : > { %337 = vst [vmem:[#allocation2 + $0x68] sm:$0x1] %v4692_v0  ;;  %v471_v22 = vor.u32 %v469_v55, %v468_v13  ;;  %v472_v23 = vrot.slane %v468_v13, 4  ;;  %v483_v25 = vshrl.u32 %v418_v61, 16  ;;  %v476_v26 = vrot.slane %v474_v20, 7 }
  0x2a   : > { %338 = vst [vmem:[#allocation2 + $0x6c] sm:$0xf] %v4692_v0  ;;  %v486_v28 = vshll.u32 %v418_v61, 16  ;;  %v419_v29 = vpack.c.bf16 %v403_v39, %v403_v39  ;;  %v370_v30 = vmul.f32 %v4791_v1, %v352_v14  ;;  %v371_v34 = vmul.f32 %v4791_v1, %v353_v15  ;;  %v355_v39 = vld [vmem:[%s4797_s30 + $0x58] sm:$0xff] }
  0x2b   : > { %339 = vst [vmem:[#allocation2 + $0x70] sm:$0xf] %v4692_v0  ;;  %v612_v31 = vsel %vm4849_vm5, %v471_v22, %v611_v19  ;;  %v485_v32 = vrot.slane %v483_v25, 7  ;;  %v372_v35 = vmul.f32 %v4791_v1, %v354_v21  ;;  %v481_v36 = vrot.slane %v476_v26, 4  ;;  %v625_v20 = vld [vmem:[#allocation2 + $0x3c] sm:$0xf] }
  0x2c   : > { %340 = vst [vmem:[#allocation2 + $0x74] sm:$0x1] %v4692_v0  ;;  %v479_v0 = vor.u32 %v477_v24, %v476_v26  ;;  %v491_v37 = vshrl.u32 %v419_v29, 16  ;;  %v494_v38 = vshll.u32 %v419_v29, 16  ;;  %v388_v42 = vadd.f32 %v4802_v2, %v370_v30  ;;  %v629_v24 = vld [vmem:[#allocation2 + $0x44] sm:$0x1] }
  0x2d   : > { %597 = vst [vmem:[#allocation2 + $0xc] sm:$0xf] %v596_v10  ;;  %v488_v40 = vor.u32 %v486_v28, %v485_v32  ;;  %v489_v41 = vrot.slane %v485_v32, 4  ;;  %v389_v43 = vadd.f32 %v4802_v2, %v371_v34  ;;  %v616_v47 = vsel %vm4856_vm6, %v481_v36, %v615_v27  ;;  %v359_v10 = vld [vmem:[%s4797_s30 + $0x78] sm:$0xff] }
  0x2e   : > { %598 = vst [vmem:[#allocation2 + $0x10] sm:$0xf] %v446_v11  ;;  %v480_v46 = vsel %vm4863_vm7, %v472_v23, %v479_v0  ;;  %v493_v48 = vrot.slane %v491_v37, 7  ;;  %v390_v49 = vadd.f32 %v4802_v2, %v372_v35  ;;  %v404_v54 = vmax.f32 %v388_v42, 0.0 }
  0x2f   : > { %603 = vst [vmem:[#allocation2 + $0x14] sm:$0x1] %v602_v12  ;;  %v619_v51 = vsel %vm4849_vm5, %v488_v40, %v618_v33  ;;  %v405_v55 = vmax.f32 %v389_v43, 0.0  ;;  %v373_v57 = vmul.f32 %v4791_v1, %v355_v39  ;;  %v374_v61 = vmul.f32 %v4791_v1, %v356_v45  ;;  %v632_v33 = vld [vmem:[#allocation2 + $0x48] sm:$0xf] }
  0x30   : > { %606 = vst [vmem:[#allocation2 + $0x18] sm:$0xf] %v605_v16  ;;  %v496_v58 = vor.u32 %v494_v38, %v493_v48  ;;  %v498_v59 = vrot.slane %v493_v48, 4  ;;  %v406_v60 = vmax.f32 %v390_v49, 0.0  ;;  %v420_v62 = vpack.c.bf16 %v404_v54, %v404_v54  ;;  %v636_v45 = vld [vmem:[#allocation2 + $0x50] sm:$0x1] }
  0x31   : > { %607 = vst [vmem:[#allocation2 + $0x1c] sm:$0xf] %v463_v17  ;;  %v421_v63 = vpack.c.bf16 %v405_v55, %v405_v55  ;;  %v391_v3 = vadd.f32 %v4802_v2, %v373_v57  ;;  %v375_v4 = vmul.f32 %v4791_v1, %v357_v50  ;;  %v392_v8 = vadd.f32 %v4802_v2, %v374_v61 }
  0x32   : > { %610 = vst [vmem:[#allocation2 + $0x20] sm:$0x1] %v609_v18  ;;  %v497_v5 = vsel %vm4863_vm7, %v489_v41, %v496_v58  ;;  %v623_v6 = vsel %vm4856_vm6, %v498_v59, %v622_v52  ;;  %v422_v7 = vpack.c.bf16 %v406_v60, %v406_v60  ;;  %v500_v11 = vshrl.u32 %v420_v62, 16 }
  0x33   : > { %613 = vst [vmem:[#allocation2 + $0x24] sm:$0xf] %v612_v31  ;;  %v503_v12 = vshll.u32 %v420_v62, 16  ;;  %v508_v13 = vshrl.u32 %v421_v63, 16  ;;  %v511_v14 = vshll.u32 %v421_v63, 16  ;;  %v407_v17 = vmax.f32 %v391_v3, 0.0 }
  0x34   : > { %614 = vst [vmem:[#allocation2 + $0x28] sm:$0xf] %v480_v46  ;;  %v517_v15 = vshrl.u32 %v422_v7, 16  ;;  %v520_v16 = vshll.u32 %v422_v7, 16  ;;  %v408_v18 = vmax.f32 %v392_v8, 0.0  ;;  %v502_v19 = vrot.slane %v500_v11, 7 }
  0x35   : > { %617 = vst [vmem:[#allocation2 + $0x2c] sm:$0x1] %v616_v47  ;;  %v510_v21 = vrot.slane %v508_v13, 7  ;;  %v393_v22 = vadd.f32 %v4802_v2, %v375_v4  ;;  %v376_v23 = vmul.f32 %v4791_v1, %v358_v9  ;;  %v423_v26 = vpack.c.bf16 %v407_v17, %v407_v17  ;;  %v650_v17 = vld [vmem:[#allocation2 + $0x68] sm:$0x1] }
  0x36   : > { %620 = vst [vmem:[#allocation2 + $0x30] sm:$0xf] %v619_v51  ;;  %v519_v25 = vrot.slane %v517_v15, 7  ;;  %v424_v27 = vpack.c.bf16 %v408_v18, %v408_v18  ;;  %v377_v28 = vmul.f32 %v4791_v1, %v359_v10  ;;  %v505_v29 = vor.u32 %v503_v12, %v502_v19  ;;  %v639_v51 = vld [vmem:[#allocation2 + $0x54] sm:$0xf] }
  0x37   : > { %621 = vst [vmem:[#allocation2 + $0x34] sm:$0xf] %v497_v5  ;;  %v506_v30 = vrot.slane %v502_v19, 4  ;;  %v513_v31 = vor.u32 %v511_v14, %v510_v21  ;;  %v515_v32 = vrot.slane %v510_v21, 4  ;;  %v525_v0 = vshrl.u32 %v423_v26, 16 }
  0x38   : > { %624 = vst [vmem:[#allocation2 + $0x38] sm:$0x1] %v623_v6  ;;  %v522_v34 = vor.u32 %v520_v16, %v519_v25  ;;  %v523_v35 = vrot.slane %v519_v25, 4  ;;  %v528_v36 = vshll.u32 %v423_v26, 16  ;;  %v626_v37 = vsel %vm4849_vm5, %v505_v29, %v625_v20  ;;  %v643_v5 = vld [vmem:[#allocation2 + $0x5c] sm:$0x1] }
  0x39   : > { %v514_v38 = vsel %vm4863_vm7, %v506_v30, %v513_v31  ;;  %v630_v39 = vsel %vm4856_vm6, %v515_v32, %v629_v24  ;;  %v534_v40 = vshrl.u32 %v424_v27, 16  ;;  %627 = vst [vmem:[#allocation2 + $0x3c] sm:$0xf] %v626_v37  ;;  %v527_v41 = vrot.slane %v525_v0, 7  ;;  %v646_v16 = vld [vmem:[#allocation2 + $0x60] sm:$0xf] }
  0x3a   : > { %v633_v1 = vsel %vm4849_vm5, %v522_v34, %v632_v33  ;;  %v537_v42 = vshll.u32 %v424_v27, 16  ;;  %v409_v43 = vmax.f32 %v393_v22, 0.0  ;;  %628 = vst [vmem:[#allocation2 + $0x40] sm:$0xf] %v514_v38  ;;  %v394_v47 = vadd.f32 %v4802_v2, %v376_v23 }
  0x3b   : > { %v536_v46 = vrot.slane %v534_v40, 7  ;;  %v395_v48 = vadd.f32 %v4802_v2, %v377_v28  ;;  %631 = vst [vmem:[#allocation2 + $0x44] sm:$0x1] %v630_v39  ;;  %v530_v49 = vor.u32 %v528_v36, %v527_v41  ;;  %v532_v50 = vrot.slane %v527_v41, 4 }
  0x3c   : > { %v425_v52 = vpack.c.bf16 %v409_v43, %v409_v43  ;;  %634 = vst [vmem:[#allocation2 + $0x48] sm:$0xf] %v633_v1  ;;  %v410_v55 = vmax.f32 %v394_v47, 0.0 }
  0x3d   : > { %v539_v54 = vor.u32 %v537_v42, %v536_v46  ;;  %v411_v57 = vmax.f32 %v395_v48, 0.0  ;;  %v531_v58 = vsel %vm4863_vm7, %v523_v35, %v530_v49  ;;  %v637_v59 = vsel %vm4856_vm6, %v532_v50, %v636_v45 }
  0x3e   : > { %v542_v60 = vshrl.u32 %v425_v52, 16  ;;  %v545_v61 = vshll.u32 %v425_v52, 16  ;;  %635 = vst [vmem:[#allocation2 + $0x4c] sm:$0xf] %v531_v58  ;;  %v426_v62 = vpack.c.bf16 %v410_v55, %v410_v55  ;;  %v540_v3 = vrot.slane %v536_v46, 4 }
  0x3f   : > { %v640_v2 = vsel %vm4849_vm5, %v539_v54, %v639_v51  ;;  %v427_v63 = vpack.c.bf16 %v411_v57, %v411_v57  ;;  %638 = vst [vmem:[#allocation2 + $0x50] sm:$0x1] %v637_v59 }
  0x40   : > { %v544_v4 = vrot.slane %v542_v60, 7  ;;  %641 = vst [vmem:[#allocation2 + $0x54] sm:$0xf] %v640_v2  ;;  %v551_v6 = vshrl.u32 %v426_v62, 16  ;;  %v554_v7 = vshll.u32 %v426_v62, 16 }
  0x41   : > { %v559_v8 = vshrl.u32 %v427_v63, 16  ;;  %v562_v9 = vshll.u32 %v427_v63, 16 }
  0x42   : > { %v547_v10 = vor.u32 %v545_v61, %v544_v4  ;;  %v549_v11 = vrot.slane %v544_v4, 4  ;;  %v553_v12 = vrot.slane %v551_v6, 7 }
  0x43   : > { %v561_v13 = vrot.slane %v559_v8, 7 }
  0x44   : > { %v548_v14 = vsel %vm4863_vm7, %v540_v3, %v547_v10  ;;  %v644_v15 = vsel %vm4856_vm6, %v549_v11, %v643_v5  ;;  %v556_v18 = vor.u32 %v554_v7, %v553_v12  ;;  %v557_v19 = vrot.slane %v553_v12, 4 }
  0x45   : > { %642 = vst [vmem:[#allocation2 + $0x58] sm:$0xf] %v548_v14  ;;  %v564_v20 = vor.u32 %v562_v9, %v561_v13  ;;  %v566_v21 = vrot.slane %v561_v13, 4  ;;  %656 = sbr.rel (%p3899_p8) target bundleno = 93 (0x5d), region = 40 }
  0x46   : > { %645 = vst [vmem:[#allocation2 + $0x5c] sm:$0x1] %v644_v15  ;;  %v647_v22 = vsel %vm4849_vm5, %v556_v18, %v646_v16 }
  0x47   : > { %v565_v23 = vsel %vm4863_vm7, %v557_v19, %v564_v20  ;;  %v651_v24 = vsel %vm4856_vm6, %v566_v21, %v650_v17  ;;  %648 = vst [vmem:[#allocation2 + $0x60] sm:$0xf] %v647_v22 }
  0x48   : > { %649 = vst [vmem:[#allocation2 + $0x64] sm:$0xf] %v565_v23 }
  0x49   : > { %652 = vst [vmem:[#allocation2 + $0x68] sm:$0x1] %v651_v24 }
  0x4a   : > { %v4648_v25 = vld [vmem:[%s5616_s2] ss:$0 sm:$0xff]  ;;  %v4649_v26 = vld [vmem:[%s5616_s2 + $0x1] ss:$0 sm:$0xff]  ;;  %v661_v28 = vld [vmem:[%s659_s26 + $0x8] sm:$0xff] }
  0x4b   : > { %v660_v27 = vld [vmem:[%s659_s26] sm:$0xff]  ;;  %v665_v30 = vmul.f32 %v4648_v25, %v661_v28  ;;  %v698_v42 = vld [vmem:[#allocation2 + $0x8] sm:$0x1] }
  0x4c   : > { %v664_v29 = vmul.f32 %v4648_v25, %v660_v27  ;;  %v694_v41 = vld [vmem:[#allocation2] sm:$0xf] }
  0x4d   : > { %v669_v32 = vadd.f32 %v4649_v26, %v665_v30 }
  0x4e   : > { %v668_v31 = vadd.f32 %v4649_v26, %v664_v29 }
  0x4f   : > { %v671_v34 = vmax.f32 %v669_v32, 0.0 }
  0x50   : > { %v670_v33 = vmax.f32 %v668_v31, 0.0 }
  0x51   : > { %v673_v0 = vpack.c.bf16 %v671_v34, %v671_v34 }
  0x52   : > { %v672_v35 = vpack.c.bf16 %v670_v33, %v670_v33 }
  0x53   : > { %v683_v38 = vshrl.u32 %v673_v0, 16  ;;  %v686_v39 = vshll.u32 %v673_v0, 16 }
  0x54   : > { %v675_v36 = vshrl.u32 %v672_v35, 16  ;;  %v678_v37 = vshll.u32 %v672_v35, 16 }
  0x55   : > { %v685_v1 = vrot.slane %v683_v38, 7 }
  0x56   : > { %v677_v40 = vrot.slane %v675_v36, 7 }
  0x57   : > { %v688_v46 = vor.u32 %v686_v39, %v685_v1  ;;  %v690_v47 = vrot.slane %v685_v1, 4 }
  0x58   : > { %v680_v43 = vor.u32 %v678_v37, %v677_v40  ;;  %v681_v45 = vrot.slane %v677_v40, 4 }
  0x59   : > { %v699_v50 = vsel %vm4856_vm6, %v690_v47, %v698_v42 }
  0x5a   : > { %v695_v48 = vsel %vm4849_vm5, %v680_v43, %v694_v41  ;;  %v689_v49 = vsel %vm4863_vm7, %v681_v45, %v688_v46  ;;  %700 = vst [vmem:[#allocation2 + $0x8] sm:$0x1] %v699_v50 }
  0x5b   : > { %696 = vst [vmem:[#allocation2] sm:$0xf] %v695_v48 }
  0x5c   : > { %697 = vst [vmem:[#allocation2 + $0x4] sm:$0xf] %v689_v49 }
  0x5d PF: > { %p3902_p9 = scmp.ge.s32.totalorder %s4674_s18, 1 }
  0x5f   : > { %704 = sbr.rel (%p3902_p9) target bundleno = 120 (0x78), region = 44 }
  0x64   : > { %v3904_v51 = vld [vmem:[%s4797_s30 + $0x80] sm:$0xff]  ;;  %v3905_v57 = vld [vmem:[%s4797_s30 + $0x88] sm:$0xff]  ;;  %v748_v12 = vld [vmem:[#allocation2 + $0x74] sm:$0x1] }
  0x65   : > { %v4650_v52 = vld [vmem:[%s5616_s2] ss:$0 sm:$0xff]  ;;  %v4651_v54 = vld [vmem:[%s5616_s2 + $0x1] ss:$0 sm:$0xff]  ;;  %v744_v8 = vld [vmem:[#allocation2 + $0x6c] sm:$0xf] }
  0x66   : > { %v713_v55 = vmul.f32 %v4650_v52, %v3904_v51  ;;  %v714_v58 = vmul.f32 %v4650_v52, %v3905_v57 }
  0x68   : > { %v717_v59 = vadd.f32 %v4651_v54, %v713_v55  ;;  %v718_v60 = vadd.f32 %v4651_v54, %v714_v58 }
  0x6a   : > { %v719_v61 = vmax.f32 %v717_v59, 0.0  ;;  %v720_v2 = vmax.f32 %v718_v60, 0.0 }
  0x6c   : > { %v721_v62 = vpack.c.bf16 %v719_v61, %v719_v61  ;;  %v722_v63 = vpack.c.bf16 %v720_v2, %v720_v2 }
  0x6e   : > { %v724_v3 = vshrl.u32 %v721_v62, 16  ;;  %v727_v4 = vshll.u32 %v721_v62, 16  ;;  %v732_v5 = vshrl.u32 %v722_v63, 16  ;;  %v735_v6 = vshll.u32 %v722_v63, 16 }
  0x70   : > { %v726_v7 = vrot.slane %v724_v3, 7  ;;  %v734_v9 = vrot.slane %v732_v5, 7 }
  0x72   : > { %v729_v10 = vor.u32 %v727_v4, %v726_v7  ;;  %v730_v11 = vrot.slane %v726_v7, 4  ;;  %v737_v13 = vor.u32 %v735_v6, %v734_v9  ;;  %v739_v14 = vrot.slane %v734_v9, 4 }
  0x74   : > { %v745_v15 = vsel %vm4849_vm5, %v729_v10, %v744_v8  ;;  %v738_v16 = vsel %vm4863_vm7, %v730_v11, %v737_v13  ;;  %v749_v17 = vsel %vm4856_vm6, %v739_v14, %v748_v12 }
  0x75   : > { %746 = vst [vmem:[#allocation2 + $0x6c] sm:$0xf] %v745_v15 }
  0x76   : > { %747 = vst [vmem:[#allocation2 + $0x70] sm:$0xf] %v738_v16 }
  0x77   : > { %750 = vst [vmem:[#allocation2 + $0x74] sm:$0x1] %v749_v17 }
  0x78 PF: > { %v4461_v18 = vld [vmem:[%s5615_s1 + $0x38] sm:$0xff]  ;;  %v4460_v44 = vld [vmem:[%s5615_s1 + $0x30] sm:$0xff]  ;;  %v4459_v53 = vld [vmem:[%s5615_s1 + $0x28] sm:$0xff]  ;;  %vm1016_vm8 = vsmask.f32 3328  ;;  %vm1453_vm10 = vcmask 1042432  }
  0x79   : > { %4581 = vmatpush.bf16.msra.mxu1 %v4461_v18  ;;  %4582 = vmatpush.bf16.msra.mxu2 %v4461_v18  ;;  %v4458_v56 = vld [vmem:[%s5615_s1 + $0x20] sm:$0xff]  ;;  %v4457_v19 = vld [vmem:[%s5615_s1 + $0x18] sm:$0xff]  ;;  %v4456_v20 = vld [vmem:[%s5615_s1 + $0x10] sm:$0xff]  ;;  %vm1017_vm9 = vsmask.f32 7440  ;;  %vm1454_vm11 = vcmask 1046532  }
  0x7a   : > { %4583 = vmatpush.bf16.msra.mxu3 %v4461_v18  ;;  %911 = vmatpush.bf16.msra.mxu0 %v4461_v18  ;;  %v4455_v21 = vld [vmem:[%s5615_s1 + $0x8] sm:$0xff]  ;;  %v4454_v22 = vld [vmem:[%s5615_s1] sm:$0xff]  ;;  %v4477_v23 = vld [vmem:[%s5615_s1 + $0xb8] sm:$0xff] }
  0x7b   : > { %v4469_v24 = vld [vmem:[%s5615_s1 + $0x78] sm:$0xff]  ;;  %v4450_v26 = vld [vmem:[#allocation2 + $0x30] sm:$0xff]  ;;  %v4452_v27 = vld [vmem:[#allocation2 + $0x48] sm:$0xff] }
  0x7c   : > { %v4448_v25 = vld [vmem:[#allocation2 + $0x18] sm:$0xff]  ;;  %v4446_v28 = vld [vmem:[#allocation2] sm:$0xff]  ;;  %v4476_v31 = vld [vmem:[%s5615_s1 + $0xb0] sm:$0xff] }
  0x7d   : > { %4584 = vmatpush.bf16.msra.mxu1 %v4460_v44  ;;  %4585 = vmatpush.bf16.msra.mxu2 %v4460_v44  ;;  %v4493_v29 = vld [vmem:[%s5615_s1 + $0xf8] sm:$0xff]  ;;  %v4468_v32 = vld [vmem:[%s5615_s1 + $0x70] sm:$0xff]  ;;  %v992_v33 = vld [vmem:[#allocation2] sm:$0xf] }
  0x7e   : > { %4586 = vmatpush.bf16.msra.mxu3 %v4460_v44  ;;  %912 = vmatpush.bf16.msra.mxu0 %v4460_v44  ;;  %v4501_v30 = vld [vmem:[%s5615_s1 + $0x138] sm:$0xff]  ;;  %v993_v34 = vld [vmem:[#allocation2 + $0x4] sm:$0xf]  ;;  %v1932_v35 = vld [vmem:[#allocation2 + $0xc] sm:$0xf]  ;;  %v1020_v37 = vshrl.u32 %v992_v33, 16 }
  0x7f   : > { %v4492_v0 = vld [vmem:[%s5615_s1 + $0xf0] sm:$0xff]  ;;  %v1023_v38 = vshll.u32 %v992_v33, 16  ;;  %v1029_v39 = vshll.u32 %v993_v34, 16  ;;  %v1033_v40 = vshrl.u32 %v993_v34, 16  ;;  %v4475_v41 = vld [vmem:[%s5615_s1 + $0xa8] sm:$0xff]  ;;  %v1957_v43 = vshrl.u32 %v1932_v35, 16  ;;  %vm5076_vm12 = vmor %vm1016_vm8, %vm1017_vm9 }
  0x80   : > { %v4500_v36 = vld [vmem:[%s5615_s1 + $0x130] sm:$0xff]  ;;  %v4467_v42 = vld [vmem:[%s5615_s1 + $0x68] sm:$0xff]  ;;  %v1960_v45 = vshll.u32 %v1932_v35, 16  ;;  %v1022_v50 = vrot.slane %v1020_v37, 4  ;;  %v4474_v55 = vld [vmem:[%s5615_s1 + $0xa0] sm:$0xff] }
  0x81   : > { %4587 = vmatpush.bf16.msra.mxu1 %v4459_v53  ;;  %4588 = vmatpush.bf16.msra.mxu2 %v4459_v53  ;;  %v1933_v1 = vld [vmem:[#allocation2 + $0x10] sm:$0xf]  ;;  %v4491_v48 = vld [vmem:[%s5615_s1 + $0xe8] sm:$0xff]  ;;  %v1025_v51 = vrot.slane %v1023_v38, 5  ;;  %v5035_v52 = vrot.slane %v1029_v39, 5  ;;  %v1035_v54 = vrot.slane %v1033_v40, 4  ;;  %vm5082_vm13 = vmor %vm1453_vm10, %vm1454_vm11 }
  0x82   : > { %4589 = vmatpush.bf16.msra.mxu3 %v4459_v53  ;;  %913 = vmatpush.bf16.msra.mxu0 %v4459_v53  ;;  %v1966_v46 = vshll.u32 %v1933_v1, 16  ;;  %v1970_v47 = vshrl.u32 %v1933_v1, 16  ;;  %v4499_v49 = vld [vmem:[%s5615_s1 + $0x128] sm:$0xff]  ;;  %v4466_v57 = vld [vmem:[%s5615_s1 + $0x60] sm:$0xff]  ;;  %v1959_v59 = vrot.slane %v1957_v43, 4  ;;  %v1962_v60 = vrot.slane %v1960_v45, 5 }
  0x83   : > { %v994_v58 = vld [vmem:[#allocation2 + $0x8] sm:$0x1]  ;;  %v5043_v61 = vld [vmem:[#allocation2 + $0x4] sm:$0xf]  ;;  %v4451_v5 = vld [vmem:[#allocation2 + $0x3c] sm:$0xff]  ;;  %v1026_v6 = vor.u32 %v1025_v51, %v1022_v50  ;;  %v1036_v7 = vor.u32 %v1035_v54, %v5035_v52 }
  0x84   : > { %v4490_v2 = vld [vmem:[%s5615_s1 + $0xe0] sm:$0xff]  ;;  %v5051_v63 = vrot.slane %v1966_v46, 5  ;;  %v1972_v3 = vrot.slane %v1970_v47, 4  ;;  %v1039_v8 = vshll.u32 %v994_v58, 16  ;;  %v1934_v9 = vld [vmem:[#allocation2 + $0x14] sm:$0x1]  ;;  %v1963_v14 = vor.u32 %v1962_v60, %v1959_v59 }
  0x85   : > { %4590 = vmatpush.bf16.msra.mxu1 %v4458_v56  ;;  %4591 = vmatpush.bf16.msra.mxu2 %v4458_v56  ;;  %v4498_v62 = vld [vmem:[%s5615_s1 + $0x120] sm:$0xff]  ;;  %v4473_v10 = vld [vmem:[%s5615_s1 + $0x98] sm:$0xff]  ;;  %v1458_v13 = vrot.slane %v5043_v61, 5  ;;  %v1407_v15 = vld [vmem:[#allocation2 + $0x8] sm:$0x1]  ;;  %v1976_v44 = vshll.u32 %v1934_v9, 16 }
  0x86   : > { %4592 = vmatpush.bf16.msra.mxu3 %v4458_v56  ;;  %914 = vmatpush.bf16.msra.mxu0 %v4458_v56  ;;  %v4449_v4 = vld [vmem:[#allocation2 + $0x24] sm:$0xff]  ;;  %v4465_v11 = vld [vmem:[%s5615_s1 + $0x58] sm:$0xff]  ;;  %v1405_v12 = vld [vmem:[#allocation2] sm:$0xe]  ;;  %v1973_v18 = vor.u32 %v1972_v3, %v5051_v63 }
  0x87   : > { %v4453_v16 = vld [vmem:[#allocation2 + $0x54] sm:$0xff]  ;;  %v4447_v17 = vld [vmem:[#allocation2 + $0xc] sm:$0xff]  ;;  %v1936_v38 = vld [vmem:[#allocation2 + $0x1c] sm:$0xf] }
  0x88   : > { %v4489_v53 = vld [vmem:[%s5615_s1 + $0xd8] sm:$0xff]  ;;  %v996_v33 = vld [vmem:[#allocation2 + $0x10] sm:$0xf]  ;;  %v4471_v39 = vld [vmem:[%s5615_s1 + $0x88] sm:$0xff]  ;;  %v1990_v51 = vshll.u32 %v1936_v38, 16 }
  0x89   : > { %4593 = vmatpush.bf16.msra.mxu1 %v4457_v19  ;;  %4594 = vmatpush.bf16.msra.mxu2 %v4457_v19  ;;  %v4497_v56 = vld [vmem:[%s5615_s1 + $0x118] sm:$0xff]  ;;  %v4488_v35 = vld [vmem:[%s5615_s1 + $0xd0] sm:$0xff]  ;;  %v4463_v40 = vld [vmem:[%s5615_s1 + $0x48] sm:$0xff]  ;;  %v1053_v46 = vshll.u32 %v996_v33, 16  ;;  %v1057_v47 = vshrl.u32 %v996_v33, 16 }
  0x8a   : > { %4595 = vmatpush.bf16.msra.mxu3 %v4457_v19  ;;  %915 = vmatpush.bf16.msra.mxu0 %v4457_v19  ;;  %v1027_v19 = vrot.slane %v1026_v6, 4  ;;  %v1935_v34 = vld [vmem:[#allocation2 + $0x18] sm:$0xf]  ;;  %v4487_v54 = vld [vmem:[%s5615_s1 + $0xc8] sm:$0xff]  ;;  %v4470_v59 = vld [vmem:[%s5615_s1 + $0x80] sm:$0xff] }
  0x8b   : > { %v1984_v50 = vshll.u32 %v1935_v34, 16  ;;  %v4462_v60 = vld [vmem:[%s5615_s1 + $0x40] sm:$0xff]  ;;  %v997_v6 = vld [vmem:[#allocation2 + $0x14] sm:$0x1]  ;;  %v1059_v9 = vrot.slane %v1057_v47, 4 }
  0x8c   : > { %v4532_v33 = vld [vmem:[%s5615_s1 + $0x1f0] sm:$0xff]  ;;  %v1939_v47 = vld [vmem:[#allocation2 + $0x28] sm:$0xf] }
  0x8d   : > { %4596 = vmatpush.bf16.msra.mxu1 %v4456_v20  ;;  %4597 = vmatpush.bf16.msra.mxu2 %v4456_v20 }
  0x8e   : > { %4598 = vmatpush.bf16.msra.mxu3 %v4456_v20  ;;  %916 = vmatpush.bf16.msra.mxu0 %v4456_v20  ;;  %v1037_v20 = vrot.slane %v1036_v7, 4 }
  0x91   : > { %4599 = vmatpush.bf16.msra.mxu1 %v4455_v21  ;;  %4600 = vmatpush.bf16.msra.mxu2 %v4455_v21 }
  0x92   : > { %4601 = vmatpush.bf16.msra.mxu3 %v4455_v21  ;;  %917 = vmatpush.bf16.msra.mxu0 %v4455_v21  ;;  %v1041_v21 = vrot.slane %v1039_v8, 5  ;;  %v5130_v8 = vrot.slane %v1053_v46, 5 }
  0x94   : > { %v1042_v37 = vsel %vm5076_vm12, %v1037_v20, %v1041_v21  ;;  %v1060_v21 = vor.u32 %v1059_v9, %v5130_v8 }
  0x95   : > { %4602 = vmatpush.bf16.msra.mxu1 %v4454_v22  ;;  %4603 = vmatpush.bf16.msra.mxu2 %v4454_v22  ;;  %v1245_v58 = vunpack.c.l.b16 %v1042_v37  ;;  %v999_v37 = vld [vmem:[#allocation2 + $0x1c] sm:$0xf] }
  0x96   : > { %4604 = vmatpush.bf16.msra.mxu3 %v4454_v22  ;;  %918 = vmatpush.bf16.msra.mxu0 %v4454_v22  ;;  %v4472_v22 = vld [vmem:[%s5615_s1 + $0x90] sm:$0xff] }
  0x98   : > { %929 = vmatmul.bf16.vlgmr.msra.gmra.mxu1 %v4448_v25  ;;  %939 = vmatmul.bf16.vlgmr.msra.gmra.mxu2 %v4450_v26  ;;  %v4018_v25 = vrot.slane %v1405_v12, 9  ;;  %v1460_v26 = vrot.slane %v1458_v13, 4  ;;  %v1986_v12 = vrot.slane %v1984_v50, 5  ;;  %v1077_v50 = vshll.u32 %v999_v37, 16 }
  0x99   : > { %1625 = vmatpush.bf16.msrb.mxu2 %v4477_v23  ;;  %1324 = vmatpush.bf16.msrb.mxu1 %v4469_v24  ;;  %v4464_v23 = vld [vmem:[%s5615_s1 + $0x50] sm:$0xff] }
  0x9a   : > { %949 = vmatmul.bf16.vlgmr.msra.gmra.mxu3 %v4452_v27  ;;  %919 = vmatmul.bf16.vlgmr.msra.gmra.mxu0 %v4446_v28  ;;  %v1461_v27 = vrot.slane %v1407_v15, 5  ;;  %v1964_v28 = vrot.slane %v1963_v14, 4  ;;  %v1459_v1 = vsel %vm5082_vm13, %v4018_v25, %v1458_v13  ;;  %v5134_v13 = vrot.slane %v1990_v51, 5  ;;  %v4486_v15 = vld [vmem:[%s5615_s1 + $0xc0] sm:$0xff] }
  0x9b   : > { %1851 = vmatpush.bf16.msrb.mxu3 %v4493_v29  ;;  %2261 = vmatpush.bf16.msrb.mxu0 %v4501_v30  ;;  %v995_v30 = vld [vmem:[#allocation2 + $0xc] sm:$0xf]  ;;  %v1545_v61 = vunpack.c.l.b16 %v1459_v1  ;;  %v1081_v51 = vshrl.u32 %v999_v37, 16 }
  0x9c   : > { %v1044_v43 = vshrl.u32 %v995_v30, 16  ;;  %v1047_v45 = vshll.u32 %v995_v30, 16 }
  0x9d   : > { %1626 = vmatpush.bf16.msrb.mxu2 %v4476_v31  ;;  %1325 = vmatpush.bf16.msrb.mxu1 %v4468_v32  ;;  %v1974_v31 = vrot.slane %v1973_v18, 4  ;;  %v1978_v32 = vrot.slane %v1976_v44, 5  ;;  %v4533_v44 = vld [vmem:[%s5615_s1 + $0x1f8] sm:$0xff]  ;;  %v1083_v9 = vrot.slane %v1081_v51, 4  ;;  %v4506_v51 = vld [vmem:[%s5615_s1 + $0x160] sm:$0xff] }
  0x9e   : > { %v1046_v3 = vrot.slane %v1044_v43, 4  ;;  %v1049_v7 = vrot.slane %v1047_v45, 5 }
  0x9f   : > { %1852 = vmatpush.bf16.msrb.mxu3 %v4492_v0  ;;  %2262 = vmatpush.bf16.msrb.mxu0 %v4500_v36  ;;  %v4496_v0 = vld [vmem:[%s5615_s1 + $0x110] sm:$0xff]  ;;  %v1032_v36 = vsel %vm5076_vm12, %v1027_v19, %v5035_v52  ;;  %v1994_v52 = vshrl.u32 %v1936_v38, 16 }
  0xa0   : > { %v1050_v20 = vor.u32 %v1049_v7, %v1046_v3 }
  0xa1   : > { %1627 = vmatpush.bf16.msrb.mxu2 %v4475_v41  ;;  %1326 = vmatpush.bf16.msrb.mxu1 %v4467_v42  ;;  %v1462_v41 = vsel %vm5082_vm13, %v1460_v26, %v1461_v27  ;;  %v1969_v42 = vsel %vm5076_vm12, %v1964_v28, %v5051_v63  ;;  %v1996_v14 = vrot.slane %v1994_v52, 4  ;;  %v1408_v26 = vld [vmem:[#allocation2 + $0xc] sm:$0xe]  ;;  %v1410_v27 = vld [vmem:[#allocation2 + $0x14] sm:$0x1] }
  0xa2   : > { %v2181_v63 = vunpack.c.l.b16 %v1969_v42  ;;  %v1051_v38 = vrot.slane %v1050_v20, 4  ;;  %v1468_v42 = vrot.slane %v1410_v27, 5  ;;  %v4523_v52 = vld [vmem:[%s5615_s1 + $0x1a8] sm:$0xff] }
  0xa3   : > { %1853 = vmatpush.bf16.msrb.mxu3 %v4491_v48  ;;  %2263 = vmatpush.bf16.msrb.mxu0 %v4499_v49  ;;  %v1981_v48 = vshrl.u32 %v1935_v34, 16  ;;  %v1979_v49 = vsel %vm5076_vm12, %v1974_v31, %v1978_v32  ;;  %v1997_v30 = vor.u32 %v1996_v14, %v5134_v13  ;;  %v4524_v32 = vld [vmem:[%s5615_s1 + $0x1b0] sm:$0xff] }
  0xa4   : > { %v4508_v34 = vld [vmem:[%s5615_s1 + $0x170] sm:$0xff] }
  0xa5   : > { %1628 = vmatpush.bf16.msrb.mxu2 %v4474_v55  ;;  %1327 = vmatpush.bf16.msrb.mxu1 %v4466_v57  ;;  %v4495_v55 = vld [vmem:[%s5615_s1 + $0x108] sm:$0xff]  ;;  %v1244_v57 = vunpack.c.l.b16 %v1032_v36  ;;  %v998_v36 = vld [vmem:[#allocation2 + $0x18] sm:$0xf]  ;;  %v1998_v45 = vrot.slane %v1997_v30, 4  ;;  %v1413_v30 = vld [vmem:[#allocation2 + $0x20] sm:$0x1] }
  0xa7   : > { %1854 = vmatpush.bf16.msrb.mxu3 %v4490_v2  ;;  %2264 = vmatpush.bf16.msrb.mxu0 %v4498_v62  ;;  %v1546_v2 = vunpack.c.l.b16 %v1462_v41  ;;  %v4525_v62 = vld [vmem:[%s5615_s1 + $0x1b8] sm:$0xff]  ;;  %v1260_v18 = vpack.c.b16 %v1245_v58, %v1244_v57  ;;  %v1938_v41 = vld [vmem:[#allocation2 + $0x24] sm:$0xf]  ;;  %v4531_v58 = vld [vmem:[%s5615_s1 + $0x1e8] sm:$0xff] }
  0xa8   : > { %934 = vmatmul.bf16.gmra.mxu1 %v4449_v4  ;;  %944 = vmatmul.bf16.gmra.mxu2 %v4451_v5  ;;  %v2182_v4 = vunpack.c.l.b16 %v1979_v49  ;;  %v4509_v5 = vld [vmem:[%s5615_s1 + $0x178] sm:$0xff]  ;;  %v1071_v49 = vshll.u32 %v998_v36, 16  ;;  %v2008_v57 = vshll.u32 %v1938_v41, 16 }
  0xa9   : > { %1629 = vmatpush.bf16.msrb.mxu2 %v4473_v10  ;;  %1328 = vmatpush.bf16.msrb.mxu1 %v4465_v11  ;;  %v5132_v10 = vld [vmem:[#allocation2 + $0x10] sm:$0xf]  ;;  %v1983_v11 = vrot.slane %v1981_v48, 4  ;;  %v1561_v19 = vpack.c.b16 %v1546_v2, %v1545_v61  ;;  %v1068_v48 = vshrl.u32 %v998_v36, 16  ;;  %v2014_v2 = vshll.u32 %v1939_v47, 16 }
  0xaa   : > { %954 = vmatmul.bf16.gmra.mxu3 %v4453_v16  ;;  %924 = vmatmul.bf16.gmra.mxu0 %v4447_v17  ;;  %v4494_v16 = vld [vmem:[%s5615_s1 + $0x100] sm:$0xff]  ;;  %v2197_v25 = vpack.c.b16 %v2182_v4, %v2181_v63  ;;  %v1073_v7 = vrot.slane %v1071_v49, 5 }
  0xab   : > { %1855 = vmatpush.bf16.msrb.mxu3 %v4489_v53  ;;  %2265 = vmatpush.bf16.msrb.mxu0 %v4497_v56  ;;  %v1937_v17 = vld [vmem:[#allocation2 + $0x20] sm:$0x1]  ;;  %v4541_v53 = vld [vmem:[%s5615_s1 + $0x238] sm:$0xff]  ;;  %v1063_v56 = vshll.u32 %v997_v6, 16  ;;  %v1987_v28 = vor.u32 %v1986_v12, %v1983_v11  ;;  %v1070_v6 = vrot.slane %v1068_v48, 4 }
  0xac   : > { %v2000_v31 = vshll.u32 %v1937_v17, 16  ;;  %v1000_v12 = vld [vmem:[#allocation2 + $0x20] sm:$0x1] }
  0xad   : > { %1630 = vmatpush.bf16.msrb.mxu2 %v4472_v22  ;;  %1329 = vmatpush.bf16.msrb.mxu1 %v4464_v23  ;;  %v1465_v22 = vrot.slane %v5132_v10, 5  ;;  %v4478_v23 = vld [vmem:[#allocation2 + $0xc] sm:$0xff]  ;;  %v1988_v43 = vrot.slane %v1987_v28, 4  ;;  %v1074_v20 = vor.u32 %v1073_v7, %v1070_v6  ;;  %v1411_v28 = vld [vmem:[#allocation2 + $0x18] sm:$0xe]  ;;  %v4522_v49 = vld [vmem:[%s5615_s1 + $0x1a0] sm:$0xff] }
  0xae   : > { %v2002_v46 = vrot.slane %v2000_v31, 5 }
  0xaf   : > { %1856 = vmatpush.bf16.msrb.mxu3 %v4488_v35  ;;  %2266 = vmatpush.bf16.msrb.mxu0 %v4496_v0  ;;  %v1065_v35 = vrot.slane %v1063_v56, 5  ;;  %v4540_v0 = vld [vmem:[%s5615_s1 + $0x230] sm:$0xff]  ;;  %v1467_v1 = vrot.slane %v1465_v22, 4  ;;  %v1993_v4 = vsel %vm5076_vm12, %v1988_v43, %v5134_v13  ;;  %v1412_v13 = vld [vmem:[#allocation2 + $0x1c] sm:$0xf] }
  0xb1   : > { %1631 = vmatpush.bf16.msrb.mxu2 %v4471_v39  ;;  %1330 = vmatpush.bf16.msrb.mxu1 %v4463_v40  ;;  %v1061_v39 = vrot.slane %v1060_v21, 4  ;;  %v4019_v40 = vrot.slane %v1408_v26, 9  ;;  %v1469_v3 = vsel %vm5082_vm13, %v1467_v1, %v1468_v42  ;;  %v1475_v1 = vrot.slane %v1413_v30, 5  ;;  %v4480_v30 = vld [vmem:[#allocation2 + $0x24] sm:$0xff] }
  0xb2   : > { %v1548_v17 = vunpack.c.l.b16 %v1469_v3  ;;  %v1003_v3 = vld [vmem:[#allocation2 + $0x2c] sm:$0x1] }
  0xb3   : > { %1857 = vmatpush.bf16.msrb.mxu3 %v4487_v54  ;;  %2267 = vmatpush.bf16.msrb.mxu0 %v4495_v55  ;;  %v4507_v54 = vld [vmem:[%s5615_s1 + $0x168] sm:$0xff]  ;;  %v2005_v55 = vshrl.u32 %v1938_v41, 16  ;;  %v1066_v61 = vsel %vm5076_vm12, %v1061_v39, %v1065_v35  ;;  %v1466_v63 = vsel %vm5082_vm13, %v4019_v40, %v1465_v22  ;;  %v1087_v22 = vshll.u32 %v1000_v12, 16  ;;  %v1001_v35 = vld [vmem:[#allocation2 + $0x24] sm:$0xf] }
  0xb4   : > { %v1247_v11 = vunpack.c.l.b16 %v1066_v61  ;;  %v4020_v39 = vrot.slane %v1411_v28, 9  ;;  %v1416_v28 = vld [vmem:[#allocation2 + $0x2c] sm:$0x1] }
  0xb5   : > { %1632 = vmatpush.bf16.msrb.mxu2 %v4470_v59  ;;  %1331 = vmatpush.bf16.msrb.mxu1 %v4462_v60  ;;  %v4539_v59 = vld [vmem:[%s5615_s1 + $0x228] sm:$0xff]  ;;  %v1056_v60 = vsel %vm5076_vm12, %v1051_v38, %v5130_v8  ;;  %v5189_v8 = vrot.slane %v1077_v50, 5  ;;  %v2007_v14 = vrot.slane %v2005_v55, 4  ;;  %v1089_v37 = vrot.slane %v1087_v22, 5  ;;  %v4530_v50 = vld [vmem:[%s5615_s1 + $0x1e0] sm:$0xff] }
  0xb6   : > { %v1246_v10 = vunpack.c.l.b16 %v1056_v60  ;;  %v1002_v38 = vld [vmem:[#allocation2 + $0x28] sm:$0xf]  ;;  %v4538_v55 = vld [vmem:[%s5615_s1 + $0x220] sm:$0xff]  ;;  %v1942_v60 = vld [vmem:[#allocation2 + $0x34] sm:$0xf] }
  0xb7   : > { %1858 = vmatpush.bf16.msrb.mxu3 %v4486_v15  ;;  %2268 = vmatpush.bf16.msrb.mxu0 %v4494_v16  ;;  %v2010_v15 = vrot.slane %v2008_v57, 5  ;;  %v1547_v16 = vunpack.c.l.b16 %v1466_v63  ;;  %v1084_v21 = vor.u32 %v1083_v9, %v5189_v8  ;;  %v1105_v48 = vshrl.u32 %v1002_v38, 16  ;;  %v1943_v22 = vld [vmem:[#allocation2 + $0x38] sm:$0x1] }
  0xb8   : > { %1332 = vmatmul.bf16.vlgmr.msrb.gmra.mxu1 %v1260_v18  ;;  %1633 = vmatmul.bf16.vlgmr.msrb.gmra.mxu2 %v1561_v19  ;;  %v5191_v18 = vrot.slane %v2014_v2, 5  ;;  %v1940_v19 = vld [vmem:[#allocation2 + $0x2c] sm:$0x1]  ;;  %v1261_v26 = vpack.c.b16 %v1247_v11, %v1246_v10  ;;  %v2042_v9 = vshrl.u32 %v1942_v60, 16 }
  0xb9   : > { %2786 = vmatpush.bf16.msra.mxu2 %v4525_v62  ;;  %2559 = vmatpush.bf16.msra.mxu1 %v4509_v5  ;;  %v2018_v62 = vshrl.u32 %v1939_v47, 16  ;;  %v2003_v5 = vsel %vm5076_vm12, %v1998_v45, %v2002_v46  ;;  %v1562_v27 = vpack.c.b16 %v1548_v17, %v1547_v16  ;;  %v1085_v36 = vrot.slane %v1084_v21, 4 }
  0xba   : > { %1859 = vmatmul.bf16.vlgmr.msrb.gmra.mxu3 %v4478_v23  ;;  %2269 = vmatmul.bf16.vlgmr.msrb.gmra.mxu0 %v2197_v25  ;;  %v2184_v56 = vunpack.c.l.b16 %v2003_v5  ;;  %v1472_v23 = vrot.slane %v1412_v13, 5  ;;  %v2011_v25 = vor.u32 %v2010_v15, %v2007_v14  ;;  %v1092_v45 = vshrl.u32 %v1001_v35, 16  ;;  %v1415_v13 = vld [vmem:[#allocation2 + $0x28] sm:$0xf] }
  0xbb   : > { %3196 = vmatpush.bf16.msra.mxu3 %v4533_v44  ;;  %3494 = vmatpush.bf16.msra.mxu0 %v4541_v53  ;;  %v2020_v44 = vrot.slane %v2018_v62, 4  ;;  %v2183_v53 = vunpack.c.l.b16 %v1993_v4  ;;  %v1095_v46 = vshll.u32 %v1001_v35, 16  ;;  %v1101_v47 = vshll.u32 %v1002_v38, 16 }
  0xbc   : > { %v1474_v40 = vrot.slane %v1472_v23, 4  ;;  %v2012_v41 = vrot.slane %v2011_v25, 4  ;;  %v1090_v57 = vsel %vm5076_vm12, %v1085_v36, %v1089_v37  ;;  %v1094_v62 = vrot.slane %v1092_v45, 4 }
  0xbd   : > { %2787 = vmatpush.bf16.msra.mxu2 %v4524_v32  ;;  %2560 = vmatpush.bf16.msra.mxu1 %v4508_v34  ;;  %v2021_v31 = vor.u32 %v2020_v44, %v5191_v18  ;;  %v2024_v32 = vshll.u32 %v1940_v19, 16  ;;  %v2198_v34 = vpack.c.b16 %v2184_v56, %v2183_v53  ;;  %v1097_v63 = vrot.slane %v1095_v46, 5  ;;  %v4521_v46 = vld [vmem:[%s5615_s1 + $0x198] sm:$0xff] }
  0xbe   : > { %v2017_v61 = vsel %vm5076_vm12, %v2012_v41, %v5191_v18  ;;  %v5221_v4 = vrot.slane %v1101_v47, 5  ;;  %v1107_v5 = vrot.slane %v1105_v48, 4  ;;  %v1249_v11 = vunpack.c.l.b16 %v1090_v57  ;;  %v1945_v41 = vld [vmem:[#allocation2 + $0x40] sm:$0xf]  ;;  %v4529_v47 = vld [vmem:[%s5615_s1 + $0x1d8] sm:$0xff] }
  0xbf   : > { %3197 = vmatpush.bf16.msra.mxu3 %v4532_v33  ;;  %3495 = vmatpush.bf16.msra.mxu0 %v4540_v0  ;;  %v4479_v33 = vld [vmem:[#allocation2 + $0x18] sm:$0xff]  ;;  %v1075_v0 = vrot.slane %v1074_v20, 4  ;;  %v2022_v42 = vrot.slane %v2021_v31, 4  ;;  %v2026_v43 = vrot.slane %v2024_v32, 5  ;;  %v2185_v15 = vunpack.c.l.b16 %v2017_v61 }
  0xc0   : > { %v1111_v17 = vshll.u32 %v1003_v3, 16  ;;  %v1098_v18 = vor.u32 %v1097_v63, %v1094_v62  ;;  %v1108_v44 = vor.u32 %v1107_v5, %v5221_v4  ;;  %v2044_v20 = vrot.slane %v2042_v9, 4  ;;  %v4505_v48 = vld [vmem:[%s5615_s1 + $0x158] sm:$0xff] }
  0xc1   : > { %2788 = vmatpush.bf16.msra.mxu2 %v4523_v52  ;;  %2561 = vmatpush.bf16.msra.mxu1 %v4507_v54  ;;  %v1080_v52 = vsel %vm5076_vm12, %v1075_v0, %v5189_v8  ;;  %v1941_v54 = vld [vmem:[#allocation2 + $0x30] sm:$0xf]  ;;  %v2027_v2 = vsel %vm5076_vm12, %v2022_v42, %v2026_v43  ;;  %v2038_v8 = vshll.u32 %v1942_v60, 16  ;;  %v1479_v21 = vrot.slane %v1415_v13, 5 }
  0xc2   : > { %v2029_v6 = vshrl.u32 %v1941_v54, 16  ;;  %v2032_v7 = vshll.u32 %v1941_v54, 16  ;;  %v1248_v10 = vunpack.c.l.b16 %v1080_v52  ;;  %v2186_v16 = vunpack.c.l.b16 %v2027_v2  ;;  %v4537_v54 = vld [vmem:[%s5615_s1 + $0x218] sm:$0xff] }
  0xc3   : > { %3198 = vmatpush.bf16.msra.mxu3 %v4531_v58  ;;  %3496 = vmatpush.bf16.msra.mxu0 %v4539_v59  ;;  %v1473_v58 = vsel %vm5082_vm13, %v4020_v39, %v1472_v23  ;;  %v1476_v59 = vsel %vm5082_vm13, %v1474_v40, %v1475_v1  ;;  %v5224_v19 = vrot.slane %v2038_v8, 5  ;;  %v1099_v31 = vrot.slane %v1098_v18, 4  ;;  %v1004_v39 = vld [vmem:[#allocation2 + $0x30] sm:$0xf]  ;;  %v1005_v40 = vld [vmem:[#allocation2 + $0x34] sm:$0xf] }
  0xc4   : > { %v1549_v12 = vunpack.c.l.b16 %v1473_v58  ;;  %v1550_v14 = vunpack.c.l.b16 %v1476_v59  ;;  %v2031_v53 = vrot.slane %v2029_v6, 4  ;;  %v2034_v56 = vrot.slane %v2032_v7, 5  ;;  %v1944_v1 = vld [vmem:[#allocation2 + $0x3c] sm:$0xf] }
  0xc5   : > { %2789 = vmatpush.bf16.msra.mxu2 %v4522_v49  ;;  %2562 = vmatpush.bf16.msra.mxu1 %v4506_v51  ;;  %v1262_v23 = vpack.c.b16 %v1249_v11, %v1248_v10  ;;  %v1109_v32 = vrot.slane %v1108_v44, 4  ;;  %v2045_v35 = vor.u32 %v2044_v20, %v5224_v19  ;;  %v2048_v0 = vshll.u32 %v1943_v22, 16  ;;  %v1006_v10 = vld [vmem:[#allocation2 + $0x38] sm:$0x1] }
  0xc6   : > { %v1563_v25 = vpack.c.b16 %v1550_v14, %v1549_v12  ;;  %v1481_v37 = vrot.slane %v1479_v21, 4  ;;  %v1482_v38 = vrot.slane %v1416_v28, 5  ;;  %v1104_v42 = vsel %vm5076_vm12, %v1099_v31, %v5221_v4  ;;  %v1418_v14 = vld [vmem:[#allocation2 + $0x34] sm:$0xf] }
  0xc7   : > { %3199 = vmatpush.bf16.msra.mxu3 %v4530_v50  ;;  %3497 = vmatpush.bf16.msra.mxu0 %v4538_v55  ;;  %v2046_v49 = vrot.slane %v2045_v35, 4  ;;  %v2050_v50 = vrot.slane %v2048_v0, 5  ;;  %v1116_v51 = vshrl.u32 %v1004_v39, 16  ;;  %v1119_v52 = vshll.u32 %v1004_v39, 16  ;;  %v4481_v31 = vld [vmem:[#allocation2 + $0x30] sm:$0xff] }
  0xc8   : > { %1337 = vmatmul.bf16.gmra.mxu1 %v1261_v26  ;;  %1638 = vmatmul.bf16.gmra.mxu2 %v1562_v27  ;;  %v2199_v26 = vpack.c.b16 %v2186_v16, %v2185_v15  ;;  %v1414_v27 = vld [vmem:[#allocation2 + $0x24] sm:$0xe]  ;;  %v1483_v57 = vsel %vm5082_vm13, %v1481_v37, %v1482_v38  ;;  %v1125_v58 = vshll.u32 %v1005_v40, 16  ;;  %v1129_v59 = vshrl.u32 %v1005_v40, 16  ;;  %v1008_v0 = vld [vmem:[#allocation2 + $0x40] sm:$0xf] }
  0xc9   : > { %v4021_v36 = vrot.slane %v1414_v27, 9  ;;  %2790 = vmatpush.bf16.msra.mxu2 %v4521_v46  ;;  %v2053_v60 = vshrl.u32 %v1944_v1, 16  ;;  %v2056_v61 = vshll.u32 %v1944_v1, 16  ;;  %v2062_v2 = vshll.u32 %v1945_v41, 16  ;;  %2563 = vmatpush.bf16.msra.mxu1 %v4505_v48  ;;  %v4528_v48 = vld [vmem:[%s5615_s1 + $0x1d0] sm:$0xff] }
  0xca   : > { %1864 = vmatmul.bf16.gmra.mxu3 %v4479_v33  ;;  %2274 = vmatmul.bf16.gmra.mxu0 %v2198_v34  ;;  %v1113_v33 = vrot.slane %v1111_v17, 5  ;;  %v2035_v34 = vor.u32 %v2034_v56, %v2031_v53  ;;  %v2066_v62 = vshrl.u32 %v1945_v41, 16  ;;  %v1250_v63 = vunpack.c.l.b16 %v1104_v42  ;;  %v1946_v53 = vld [vmem:[#allocation2 + $0x44] sm:$0x1] }
  0xcb   : > { %v1480_v55 = vsel %vm5082_vm13, %v4021_v36, %v1479_v21  ;;  %3200 = vmatpush.bf16.msra.mxu3 %v4529_v47  ;;  %3498 = vmatpush.bf16.msra.mxu0 %v4537_v54  ;;  %v2051_v5 = vsel %vm5076_vm12, %v2046_v49, %v2050_v50  ;;  %v1118_v6 = vrot.slane %v1116_v51, 4  ;;  %v1121_v7 = vrot.slane %v1119_v52, 5  ;;  %v4520_v47 = vld [vmem:[%s5615_s1 + $0x190] sm:$0xff] }
  0xcc   : > { %v1114_v43 = vsel %vm5076_vm12, %v1109_v32, %v1113_v33  ;;  %v2036_v45 = vrot.slane %v2035_v34, 4  ;;  %v1551_v8 = vunpack.c.l.b16 %v1480_v55  ;;  %v1552_v9 = vunpack.c.l.b16 %v1483_v57  ;;  %v1007_v33 = vld [vmem:[#allocation2 + $0x3c] sm:$0xf]  ;;  %v4504_v49 = vld [vmem:[%s5615_s1 + $0x150] sm:$0xff]  ;;  %v1947_v55 = vld [vmem:[#allocation2 + $0x48] sm:$0xf] }
  0xcd   : > { %v1251_v3 = vunpack.c.l.b16 %v1114_v43  ;;  %v5253_v11 = vrot.slane %v1125_v58, 5  ;;  %v1131_v12 = vrot.slane %v1129_v59, 4  ;;  %v2055_v15 = vrot.slane %v2053_v60, 4  ;;  %v4536_v50 = vld [vmem:[%s5615_s1 + $0x210] sm:$0xff]  ;;  %2791 = vmatpush.bf16.msra.mxu2 %v4520_v47  ;;  %v1948_v57 = vld [vmem:[#allocation2 + $0x4c] sm:$0xf]  ;;  %2564 = vmatpush.bf16.msra.mxu1 %v4504_v49 }
  0xce   : > { %v2041_v4 = vsel %vm5076_vm12, %v2036_v45, %v5224_v19  ;;  %v2058_v16 = vrot.slane %v2056_v61, 5  ;;  %v5255_v17 = vrot.slane %v2062_v2, 5  ;;  %v2068_v13 = vrot.slane %v2066_v62, 4  ;;  %v1951_v47 = vld [vmem:[#allocation2 + $0x58] sm:$0xf] }
  0xcf   : > { %v2187_v18 = vunpack.c.l.b16 %v2041_v4  ;;  %v2188_v44 = vunpack.c.l.b16 %v2051_v5  ;;  %v1122_v56 = vor.u32 %v1121_v7, %v1118_v6  ;;  %v1135_v19 = vshll.u32 %v1006_v10, 16  ;;  %3201 = vmatpush.bf16.msra.mxu3 %v4528_v48  ;;  %3499 = vmatpush.bf16.msra.mxu0 %v4536_v50 }
  0xd0   : > { %v1263_v20 = vpack.c.b16 %v1251_v3, %v1250_v63  ;;  %v1132_v21 = vor.u32 %v1131_v12, %v5253_v11  ;;  %v1486_v22 = vrot.slane %v1418_v14, 5  ;;  %v2059_v27 = vor.u32 %v2058_v16, %v2055_v15  ;;  %v1009_v3 = vld [vmem:[#allocation2 + $0x44] sm:$0x1] }
  0xd1   : > { %v2069_v28 = vor.u32 %v2068_v13, %v5255_v17  ;;  %v2200_v32 = vpack.c.b16 %v2188_v44, %v2187_v18  ;;  %v1123_v34 = vrot.slane %v1122_v56, 4  ;;  %v1137_v35 = vrot.slane %v1135_v19, 5  ;;  %v1421_v13 = vld [vmem:[#allocation2 + $0x40] sm:$0xf]  ;;  %v1949_v19 = vld [vmem:[#allocation2 + $0x50] sm:$0x1] }
  0xd2   : > { %v1133_v36 = vrot.slane %v1132_v21, 4  ;;  %v1488_v38 = vrot.slane %v1486_v22, 4  ;;  %v2060_v40 = vrot.slane %v2059_v27, 4  ;;  %v1140_v42 = vshrl.u32 %v1007_v33, 16  ;;  %v1420_v27 = vld [vmem:[#allocation2 + $0x3c] sm:$0xe] }
  0xd3   : > { %v2070_v1 = vrot.slane %v2069_v28, 4  ;;  %v1143_v43 = vshll.u32 %v1007_v33, 16  ;;  %v1149_v45 = vshll.u32 %v1008_v0, 16  ;;  %v1153_v46 = vshrl.u32 %v1008_v0, 16  ;;  %v1010_v0 = vld [vmem:[#allocation2 + $0x48] sm:$0xf] }
  0xd4   : > { %v1128_v51 = vsel %vm5076_vm12, %v1123_v34, %v5253_v11  ;;  %v1138_v52 = vsel %vm5076_vm12, %v1133_v36, %v1137_v35  ;;  %v2065_v59 = vsel %vm5076_vm12, %v2060_v40, %v5255_v17  ;;  %v1142_v61 = vrot.slane %v1140_v42, 4  ;;  %v1011_v36 = vld [vmem:[#allocation2 + $0x4c] sm:$0xf] }
  0xd5   : > { %v1145_v2 = vrot.slane %v1143_v43, 5  ;;  %v5285_v62 = vrot.slane %v1149_v45, 5  ;;  %v1155_v63 = vrot.slane %v1153_v46, 4  ;;  %v2077_v4 = vshrl.u32 %v1947_v55, 16  ;;  %v4519_v40 = vld [vmem:[%s5615_s1 + $0x188] sm:$0xff] }
  0xd6   : > { %v2080_v5 = vshll.u32 %v1947_v55, 16  ;;  %v2086_v6 = vshll.u32 %v1948_v57, 16  ;;  %v2090_v7 = vshrl.u32 %v1948_v57, 16  ;;  %v2189_v12 = vunpack.c.l.b16 %v2065_v59  ;;  %2792 = vmatpush.bf16.msra.mxu2 %v4519_v40  ;;  %v4503_v55 = vld [vmem:[%s5615_s1 + $0x148] sm:$0xff]  ;;  %v4518_v40 = vld [vmem:[%s5615_s1 + $0x180] sm:$0xff] }
  0xd7   : > { %v1146_v15 = vor.u32 %v1145_v2, %v1142_v61  ;;  %v1156_v16 = vor.u32 %v1155_v63, %v5285_v62  ;;  %v1159_v17 = vshll.u32 %v1009_v3, 16  ;;  %v2079_v18 = vrot.slane %v2077_v4, 4  ;;  %2565 = vmatpush.bf16.msra.mxu1 %v4503_v55  ;;  %v4535_v3 = vld [vmem:[%s5615_s1 + $0x208] sm:$0xff] }
  0xd8   : > { %1342 = vmatmul.bf16.gmra.mxu1 %v1262_v23  ;;  %1643 = vmatmul.bf16.gmra.mxu2 %v1563_v25  ;;  %v1564_v23 = vpack.c.b16 %v1552_v9, %v1551_v8  ;;  %v1417_v25 = vld [vmem:[#allocation2 + $0x30] sm:$0xe]  ;;  %v1252_v8 = vunpack.c.l.b16 %v1128_v51  ;;  %v1253_v9 = vunpack.c.l.b16 %v1138_v52  ;;  %v2082_v44 = vrot.slane %v2080_v5, 5 }
  0xd9   : > { %v4022_v37 = vrot.slane %v1417_v25, 9  ;;  %v2092_v56 = vrot.slane %v2090_v7, 4  ;;  %v1147_v25 = vrot.slane %v1146_v15, 4  ;;  %v1493_v28 = vrot.slane %v1421_v13, 5  ;;  %3500 = vmatpush.bf16.msra.mxu0 %v4535_v3 }
  0xda   : > { %1869 = vmatmul.bf16.gmra.mxu3 %v4480_v30  ;;  %2279 = vmatmul.bf16.gmra.mxu0 %v2199_v26  ;;  %v1419_v26 = vld [vmem:[#allocation2 + $0x38] sm:$0x1]  ;;  %v2072_v30 = vshll.u32 %v1946_v53, 16  ;;  %v5288_v53 = vrot.slane %v2086_v6, 5  ;;  %v2096_v34 = vshll.u32 %v1949_v19, 16  ;;  %v4023_v35 = vrot.slane %v1420_v27, 9 }
  0xdb   : > { %v1489_v39 = vrot.slane %v1419_v26, 5  ;;  %v1487_v54 = vsel %vm5082_vm13, %v4022_v37, %v1486_v22  ;;  %v4482_v22 = vld [vmem:[#allocation2 + $0x3c] sm:$0xff]  ;;  %v1161_v26 = vrot.slane %v1159_v17, 5  ;;  %v1152_v37 = vsel %vm5076_vm12, %v1147_v25, %v5285_v62  ;;  %v1425_v27 = vld [vmem:[#allocation2 + $0x50] sm:$0x1]  ;;  %2793 = vmatpush.bf16.msra.mxu2 %v4518_v40 }
  0xdc   : > { %v2074_v41 = vrot.slane %v2072_v30, 5  ;;  %v1553_v10 = vunpack.c.l.b16 %v1487_v54  ;;  %v1157_v30 = vrot.slane %v1156_v16, 4  ;;  %v2093_v33 = vor.u32 %v2092_v56, %v5288_v53  ;;  %v1424_v16 = vld [vmem:[#allocation2 + $0x4c] sm:$0xf] }
  0xdd   : > { %v1490_v58 = vsel %vm5082_vm13, %v1488_v38, %v1489_v39  ;;  %v1495_v38 = vrot.slane %v1493_v28, 4  ;;  %v2098_v46 = vrot.slane %v2096_v34, 5  ;;  %v1164_v48 = vshrl.u32 %v1010_v0, 16 }
  0xde   : > { %v2075_v60 = vsel %vm5076_vm12, %v2070_v1, %v2074_v41  ;;  %v1554_v11 = vunpack.c.l.b16 %v1490_v58  ;;  %v1950_v1 = vld [vmem:[#allocation2 + $0x54] sm:$0xf]  ;;  %v4527_v41 = vld [vmem:[%s5615_s1 + $0x1c8] sm:$0xff]  ;;  %v1162_v42 = vsel %vm5076_vm12, %v1157_v30, %v1161_v26  ;;  %v2094_v45 = vrot.slane %v2093_v33, 4 }
  0xdf   : > { %v2190_v14 = vunpack.c.l.b16 %v2075_v60  ;;  %v1167_v49 = vshll.u32 %v1010_v0, 16  ;;  %v1173_v50 = vshll.u32 %v1011_v36, 16  ;;  %v1177_v51 = vshrl.u32 %v1011_v36, 16  ;;  %3202 = vmatpush.bf16.msra.mxu3 %v4527_v41  ;;  %v1423_v26 = vld [vmem:[#allocation2 + $0x48] sm:$0xe] }
  0xe0   : > { %v1565_v21 = vpack.c.b16 %v1554_v11, %v1553_v10  ;;  %v2101_v52 = vshrl.u32 %v1950_v1, 16  ;;  %v2104_v54 = vshll.u32 %v1950_v1, 16  ;;  %v1494_v57 = vsel %vm5082_vm13, %v4023_v35, %v1493_v28  ;;  %v1012_v10 = vld [vmem:[#allocation2 + $0x50] sm:$0x1]  ;;  %v4526_v1 = vld [vmem:[%s5615_s1 + $0x1c0] sm:$0xff] }
  0xe1   : > { %v2110_v59 = vshll.u32 %v1951_v47, 16  ;;  %v2114_v60 = vshrl.u32 %v1951_v47, 16  ;;  %v1254_v61 = vunpack.c.l.b16 %v1152_v37  ;;  %v1255_v2 = vunpack.c.l.b16 %v1162_v42  ;;  %v1014_v41 = vld [vmem:[#allocation2 + $0x58] sm:$0xf] }
  0xe2   : > { %v2099_v63 = vsel %vm5076_vm12, %v2094_v45, %v2098_v46  ;;  %v1166_v4 = vrot.slane %v1164_v48, 4  ;;  %v1169_v5 = vrot.slane %v1167_v49, 5  ;;  %v5317_v6 = vrot.slane %v1173_v50, 5  ;;  %v1953_v45 = vld [vmem:[#allocation2 + $0x60] sm:$0xf] }
  0xe3   : > { %v1179_v7 = vrot.slane %v1177_v51, 4  ;;  %v2103_v11 = vrot.slane %v2101_v52, 4  ;;  %v2192_v15 = vunpack.c.l.b16 %v2099_v63  ;;  %v2112_v17 = vrot.slane %v2110_v59, 5  ;;  %v1954_v46 = vld [vmem:[#allocation2 + $0x64] sm:$0xf]  ;;  %3203 = vmatpush.bf16.msra.mxu3 %v4526_v1 }
  0xe4   : > { %v2116_v13 = vrot.slane %v2114_v60, 4  ;;  %v1183_v56 = vshll.u32 %v1012_v10, 16  ;;  %v1265_v19 = vpack.c.b16 %v1255_v2, %v1254_v61  ;;  %v4024_v34 = vrot.slane %v1423_v26, 9  ;;  %v4502_v51 = vld [vmem:[%s5615_s1 + $0x140] sm:$0xff]  ;;  %v1426_v26 = vld [vmem:[#allocation2 + $0x54] sm:$0xe] }
  0xe5   : > { %v1503_v0 = vrot.slane %v1425_v27, 5  ;;  %v1197_v55 = vshll.u32 %v1014_v41, 16  ;;  %v2128_v59 = vshll.u32 %v1953_v45, 16  ;;  %v2134_v60 = vshll.u32 %v1954_v46, 16  ;;  %2566 = vmatpush.bf16.msra.mxu1 %v4502_v51  ;;  %v4534_v2 = vld [vmem:[%s5615_s1 + $0x200] sm:$0xff] }
  0xe6   : > { %v2117_v28 = vor.u32 %v2116_v13, %v2112_v17  ;;  %v1185_v33 = vrot.slane %v1183_v56, 5  ;;  %v2138_v61 = vshrl.u32 %v1954_v46, 16  ;;  %3501 = vmatpush.bf16.msra.mxu0 %v4534_v2  ;;  %v1955_v13 = vld [vmem:[#allocation2 + $0x68] sm:$0x1]  ;;  %v1428_v27 = vld [vmem:[#allocation2 + $0x5c] sm:$0x1] }
  0xe7   : > { %v1199_v10 = vrot.slane %v1197_v55, 5 }
  0xe8   : > { %1347 = vmatmul.bf16.gmra.mxu1 %v1263_v20  ;;  %1648 = vmatmul.bf16.gmra.mxu2 %v1564_v23  ;;  %v1264_v20 = vpack.c.b16 %v1253_v9, %v1252_v8  ;;  %v2201_v23 = vpack.c.b16 %v2190_v14, %v2189_v12  ;;  %v1555_v8 = vunpack.c.l.b16 %v1494_v57  ;;  %v2106_v12 = vrot.slane %v2104_v54, 5 }
  0xe9   : > { %v2118_v37 = vrot.slane %v2117_v28, 4  ;;  %v1201_v57 = vshrl.u32 %v1014_v41, 16 }
  0xea   : > { %1874 = vmatmul.bf16.gmra.mxu3 %v4481_v31  ;;  %2284 = vmatmul.bf16.gmra.mxu0 %v2200_v32  ;;  %v1422_v31 = vld [vmem:[#allocation2 + $0x44] sm:$0x1]  ;;  %v2083_v32 = vor.u32 %v2082_v44, %v2079_v18  ;;  %v1952_v18 = vld [vmem:[#allocation2 + $0x5c] sm:$0x1]  ;;  %v1170_v44 = vor.u32 %v1169_v5, %v1166_v4 }
  0xeb   : > { %v1496_v39 = vrot.slane %v1422_v31, 5  ;;  %v2120_v30 = vshll.u32 %v1952_v18, 16 }
  0xec   : > { %v2084_v43 = vrot.slane %v2083_v32, 4  ;;  %v1171_v31 = vrot.slane %v1170_v44, 4 }
  0xed   : > { %v1497_v58 = vsel %vm5082_vm13, %v1495_v38, %v1496_v39  ;;  %v2122_v38 = vrot.slane %v2120_v30, 5  ;;  %v1013_v39 = vld [vmem:[#allocation2 + $0x54] sm:$0xf] }
  0xee   : > { %v2089_v62 = vsel %vm5076_vm12, %v2084_v43, %v5288_v53  ;;  %v1556_v9 = vunpack.c.l.b16 %v1497_v58  ;;  %v1180_v53 = vor.u32 %v1179_v7, %v5317_v6  ;;  %v1176_v42 = vsel %vm5076_vm12, %v1171_v31, %v5317_v6 }
  0xef   : > { %v2191_v14 = vunpack.c.l.b16 %v2089_v62  ;;  %v1188_v49 = vshrl.u32 %v1013_v39, 16  ;;  %v1191_v50 = vshll.u32 %v1013_v39, 16  ;;  %v2123_v54 = vsel %vm5076_vm12, %v2118_v37, %v2122_v38 }
  0xf0   : > { %v1181_v32 = vrot.slane %v1180_v53, 4  ;;  %v2125_v58 = vshrl.u32 %v1953_v45, 16  ;;  %v1256_v62 = vunpack.c.l.b16 %v1176_v42  ;;  %v2144_v31 = vshll.u32 %v1955_v13, 16  ;;  %v2344_v13 = vld [vmem:[#allocation2 + $0x14] sm:$0x1] }
  0xf1   : > { %v2202_v25 = vpack.c.b16 %v2192_v15, %v2191_v14  ;;  %v1190_v5 = vrot.slane %v1188_v49, 4  ;;  %v1193_v6 = vrot.slane %v1191_v50, 5  ;;  %v2130_v15 = vrot.slane %v2128_v59, 5 }
  0xf2   : > { %v1186_v43 = vsel %vm5076_vm12, %v1181_v32, %v1185_v33  ;;  %v2127_v14 = vrot.slane %v2125_v58, 4  ;;  %v1510_v38 = vrot.slane %v1428_v27, 5  ;;  %v2146_v1 = vrot.slane %v2144_v31, 5 }
  0xf3   : > { %v1257_v63 = vunpack.c.l.b16 %v1186_v43  ;;  %v1194_v53 = vor.u32 %v1193_v6, %v1190_v5 }
  0xf4   : > { %v2131_v28 = vor.u32 %v2130_v15, %v2127_v14 }
  0xf5   : > { %v1266_v18 = vpack.c.b16 %v1257_v63, %v1256_v62  ;;  %v1195_v32 = vrot.slane %v1194_v53, 4 }
  0xf6   : > { %v2132_v39 = vrot.slane %v2131_v28, 4  ;;  %v2395_v28 = vrot.slane %v2344_v13, 5 }
  0xf7   : > { %v1200_v49 = vsel %vm5076_vm12, %v1195_v32, %v1199_v10 }
  0xf8   : > { %1352 = vmatmul.bf16.gmra.mxu1 %v1264_v20  ;;  %1653 = vmatmul.bf16.gmra.mxu2 %v1565_v21  ;;  %v1566_v20 = vpack.c.b16 %v1556_v9, %v1555_v8  ;;  %v1500_v21 = vrot.slane %v1424_v16, 5  ;;  %v2194_v8 = vunpack.c.l.b16 %v2123_v54  ;;  %v1015_v9 = vld [vmem:[#allocation2 + $0x5c] sm:$0x1]  ;;  %v2136_v16 = vrot.slane %v2134_v60, 5 }
  0xf9   : > { %v1207_v56 = vshll.u32 %v1015_v9, 16  ;;  %v1258_v2 = vunpack.c.l.b16 %v1200_v49 }
  0xfa   : > { %1879 = vmatmul.bf16.gmra.mxu3 %v4482_v22  ;;  %2289 = vmatmul.bf16.gmra.mxu0 %v2201_v23  ;;  %v2107_v22 = vor.u32 %v2106_v12, %v2103_v11  ;;  %v4483_v23 = vld [vmem:[#allocation2 + $0x48] sm:$0xff]  ;;  %v1502_v35 = vrot.slane %v1500_v21, 4  ;;  %v1501_v47 = vsel %vm5082_vm13, %v4024_v34, %v1500_v21  ;;  %v1203_v11 = vrot.slane %v1201_v57, 4  ;;  %v1427_v12 = vld [vmem:[#allocation2 + $0x58] sm:$0xf] }
  0xfb   : > { %v1557_v3 = vunpack.c.l.b16 %v1501_v47  ;;  %v1209_v33 = vrot.slane %v1207_v56, 5  ;;  %v2867_v34 = vld [vmem:[#allocation2 + $0x18] sm:$0xf]  ;;  %v2137_v55 = vsel %vm5076_vm12, %v2132_v39, %v2136_v16  ;;  %v4485_v56 = vld [vmem:[#allocation2 + $0x60] sm:$0xff] }
  0xfc   : > { %v2108_v36 = vrot.slane %v2107_v22, 4  ;;  %v1504_v48 = vsel %vm5082_vm13, %v1502_v35, %v1503_v0  ;;  %v1204_v22 = vor.u32 %v1203_v11, %v1199_v10  ;;  %v2868_v35 = vld [vmem:[#allocation2 + $0x1c] sm:$0xf]  ;;  %v2892_v42 = vshrl.u32 %v2867_v34, 16  ;;  %v2342_v10 = vld [vmem:[#allocation2 + $0xc] sm:$0xe] }
  0xfd   : > { %v1558_v4 = vunpack.c.l.b16 %v1504_v48  ;;  %v2895_v43 = vshll.u32 %v2867_v34, 16  ;;  %v2901_v45 = vshll.u32 %v2868_v35, 16  ;;  %v2905_v46 = vshrl.u32 %v2868_v35, 16 }
  0xfe   : > { %v2113_v52 = vsel %vm5076_vm12, %v2108_v36, %v2112_v17  ;;  %v2140_v17 = vrot.slane %v2138_v61, 4  ;;  %v1205_v0 = vrot.slane %v1204_v22, 4  ;;  %v4025_v36 = vrot.slane %v1426_v26, 9  ;;  %v3279_v22 = vld [vmem:[#allocation2 + $0x20] sm:$0x1] }
  0xff   : > { %v2193_v7 = vunpack.c.l.b16 %v2113_v52  ;;  %v1567_v44 = vpack.c.b16 %v1558_v4, %v1557_v3  ;;  %v2894_v58 = vrot.slane %v2892_v42, 4  ;;  %v2897_v59 = vrot.slane %v2895_v43, 5  ;;  %v2343_v4 = vld [vmem:[#allocation2 + $0x10] sm:$0xf] }
 0x100   : > { %v2141_v30 = vor.u32 %v2140_v17, %v2136_v16  ;;  %v1210_v50 = vsel %vm5076_vm12, %v1205_v0, %v1209_v33  ;;  %v2903_v60 = vrot.slane %v2901_v45, 5  ;;  %v2907_v61 = vrot.slane %v2905_v46, 4  ;;  %v2870_v0 = vld [vmem:[#allocation2 + $0x24] sm:$0xf] }
 0x101   : > { %v2203_v21 = vpack.c.b16 %v2194_v8, %v2193_v7  ;;  %v1259_v62 = vunpack.c.l.b16 %v1210_v50  ;;  %v2195_v5 = vunpack.c.l.b16 %v2137_v55  ;;  %v2869_v7 = vld [vmem:[#allocation2 + $0x20] sm:$0x1]  ;;  %v3278_v8 = vld [vmem:[#allocation2 + $0x1c] sm:$0xf]  ;;  %v2392_v11 = vrot.slane %v2343_v4, 5 }
 0x102   : > { %v2142_v40 = vrot.slane %v2141_v30, 4  ;;  %v2908_v14 = vor.u32 %v2907_v61, %v2903_v60  ;;  %v4202_v26 = vrot.slane %v2342_v10, 9  ;;  %v3330_v35 = vrot.slane %v3279_v22, 5 }
 0x103   : > { %v1267_v16 = vpack.c.b16 %v1259_v62, %v1258_v2  ;;  %v2394_v27 = vrot.slane %v2392_v11, 4  ;;  %v2916_v49 = vshrl.u32 %v2870_v0, 16  ;;  %v2919_v50 = vshll.u32 %v2870_v0, 16  ;;  %v2346_v62 = vld [vmem:[#allocation2 + $0x1c] sm:$0xf] }
 0x104   : > { %v2147_v57 = vsel %vm5076_vm12, %v2142_v40, %v2146_v1  ;;  %v2909_v31 = vrot.slane %v2908_v14, 4 }
 0x105   : > { %v2196_v6 = vunpack.c.l.b16 %v2147_v57  ;;  %v2396_v39 = vsel %vm5082_vm13, %v2394_v27, %v2395_v28  ;;  %v3280_v28 = vld [vmem:[#allocation2 + $0x24] sm:$0xe] }
 0x108   : > { %1357 = vmatmul.bf16.gmra.mxu1 %v1265_v19  ;;  %1658 = vmatmul.bf16.gmra.mxu2 %v1566_v20  ;;  %v4484_v20 = vld [vmem:[#allocation2 + $0x54] sm:$0xff] }
 0x10a   : > { %1884 = vmatmul.bf16.gmra.mxu3 %v4483_v23  ;;  %2294 = vmatmul.bf16.gmra.mxu0 %v2202_v25  ;;  %v1507_v23 = vrot.slane %v1427_v12, 5  ;;  %v2898_v12 = vor.u32 %v2897_v59, %v2894_v58  ;;  %v2480_v58 = vunpack.c.l.b16 %v2396_v39  ;;  %v4387_v39 = vrot.slane %v3280_v28, 9 }
 0x10c   : > { %v1509_v37 = vrot.slane %v1507_v23, 4  ;;  %v1508_v51 = vsel %vm5082_vm13, %v4025_v36, %v1507_v23  ;;  %v2899_v30 = vrot.slane %v2898_v12, 4  ;;  %v2871_v36 = vld [vmem:[#allocation2 + $0x28] sm:$0xf]  ;;  %v4510_v12 = vld [vmem:[#allocation2 + $0x18] sm:$0xff] }
 0x10d   : > { %v1559_v63 = vunpack.c.l.b16 %v1508_v51  ;;  %v2925_v51 = vshll.u32 %v2871_v36, 16 }
 0x10e   : > { %v1511_v52 = vsel %vm5082_vm13, %v1509_v37, %v1510_v38  ;;  %v2393_v38 = vsel %vm5082_vm13, %v4202_v26, %v2392_v11  ;;  %v2904_v1 = vsel %vm5076_vm12, %v2899_v30, %v2903_v60  ;;  %v2347_v26 = vld [vmem:[#allocation2 + $0x20] sm:$0x1]  ;;  %v3282_v30 = vld [vmem:[#allocation2 + $0x2c] sm:$0x1] }
 0x10f   : > { %v1560_v3 = vunpack.c.l.b16 %v1511_v52  ;;  %v2929_v52 = vshrl.u32 %v2871_v36, 16  ;;  %v2479_v57 = vunpack.c.l.b16 %v2393_v38  ;;  %v3116_v59 = vunpack.c.l.b16 %v2904_v1 }
 0x110   : > { %v5397_v4 = vrot.slane %v2925_v51, 5 }
 0x111   : > { %v1568_v17 = vpack.c.b16 %v1560_v3, %v1559_v63  ;;  %v2918_v63 = vrot.slane %v2916_v49, 4  ;;  %v2921_v3 = vrot.slane %v2919_v50, 5  ;;  %v2495_v11 = vpack.c.b16 %v2480_v58, %v2479_v57 }
 0x115   : > { %v5345_v19 = vpop.f32.mrf.mxu1 }
 0x117   : > { %v5347_v25 = vpop.f32.mrf.mxu0 }
 0x118   : > { %1362 = vmatmul.bf16.gmra.mxu1 %v1266_v18  ;;  %1663 = vmatmul.bf16.gmra.mxu2 %v1567_v44  ;;  %v2911_v18 = vshll.u32 %v2869_v7, 16  ;;  %v3327_v44 = vrot.slane %v3278_v8, 5  ;;  %v3281_v8 = vld [vmem:[#allocation2 + $0x28] sm:$0xf] }
 0x119   : > { %v3334_v27 = vrot.slane %v3281_v8, 5 }
 0x11a   : > { %1889 = vmatmul.bf16.gmra.mxu3 %v4484_v20  ;;  %2299 = vmatmul.bf16.gmra.mxu0 %v2203_v21  ;;  %v2204_v20 = vpack.c.b16 %v2196_v6, %v2195_v5  ;;  %v3277_v21 = vld [vmem:[#allocation2 + $0x18] sm:$0xe]  ;;  %v2913_v32 = vrot.slane %v2911_v18, 5  ;;  %v3329_v34 = vrot.slane %v3327_v44, 4  ;;  %v2931_v5 = vrot.slane %v2929_v52, 4 }
 0x11b   : > { %v5349_v41 = vpop.f32.mrf.mxu2  ;;  %v4386_v33 = vrot.slane %v3277_v21, 9  ;;  %v2872_v6 = vld [vmem:[#allocation2 + $0x2c] sm:$0x1]  ;;  %v2345_v18 = vld [vmem:[#allocation2 + $0x18] sm:$0xe]  ;;  %v3336_v1 = vrot.slane %v3334_v27, 4 }
 0x11c   : > { %v2914_v42 = vsel %vm5076_vm12, %v2909_v31, %v2913_v32  ;;  %v3331_v45 = vsel %vm5082_vm13, %v3329_v34, %v3330_v35  ;;  %v4203_v31 = vrot.slane %v2345_v18, 9  ;;  %v2874_v34 = vld [vmem:[#allocation2 + $0x34] sm:$0xf]  ;;  %v2402_v35 = vrot.slane %v2347_v26, 5 }
 0x11d   : > { %v5351_v47 = vpop.f32.mrf.mxu3  ;;  %v5353_v48 = vpop.f32.mrf.mxu1  ;;  %v3328_v43 = vsel %vm5082_vm13, %v4386_v33, %v3327_v44  ;;  %v3117_v60 = vunpack.c.l.b16 %v2914_v42  ;;  %v3415_v2 = vunpack.c.l.b16 %v3331_v45  ;;  %v2922_v44 = vor.u32 %v2921_v3, %v2918_v63  ;;  %v2873_v33 = vld [vmem:[#allocation2 + $0x30] sm:$0xf] }
 0x11e   : > { %v3414_v61 = vunpack.c.l.b16 %v3328_v43  ;;  %v2940_v43 = vshrl.u32 %v2873_v33, 16  ;;  %v2943_v45 = vshll.u32 %v2873_v33, 16  ;;  %v2949_v49 = vshll.u32 %v2874_v34, 16 }
 0x11f   : > { %v5363_v54 = vpop.f32.mrf.mxu0  ;;  %v3132_v14 = vpack.c.b16 %v3117_v60, %v3116_v59  ;;  %v2923_v0 = vrot.slane %v2922_v44, 4  ;;  %v2953_v50 = vshrl.u32 %v2874_v34, 16  ;;  %v3335_v3 = vsel %vm5082_vm13, %v4387_v39, %v3334_v27  ;;  %v2348_v27 = vld [vmem:[#allocation2 + $0x24] sm:$0xe] }
 0x120   : > { %v3430_v13 = vpack.c.b16 %v3415_v2, %v3414_v61  ;;  %v2942_v8 = vrot.slane %v2940_v43, 4  ;;  %v3416_v44 = vunpack.c.l.b16 %v3335_v3  ;;  %v2877_v3 = vld [vmem:[#allocation2 + $0x40] sm:$0xf] }
 0x121   : > { %v2928_v60 = vsel %vm5076_vm12, %v2923_v0, %v5397_v4  ;;  %v2350_v0 = vld [vmem:[#allocation2 + $0x2c] sm:$0x1] }
 0x122   : > { %v3118_v18 = vunpack.c.l.b16 %v2928_v60 }
 0x123   : > { %v5369_v9 = vpop.f32.mrf.mxu2 }
 0x125   : > { %v5371_v15 = vpop.f32.mrf.mxu3  ;;  %v5373_v53 = vpop.f32.mrf.mxu1 }
 0x127   : > { %v5375_v23 = vpop.f32.mrf.mxu0 }
 0x128   : > { %1367 = vmatmul.bf16.gmra.mxu1 %v1267_v16  ;;  %1668 = vmatmul.bf16.gmra.mxu2 %v1568_v17  ;;  %v2399_v16 = vrot.slane %v2346_v62, 5 }
 0x12a   : > { %1894 = vmatmul.bf16.gmra.mxu3 %v4485_v56  ;;  %2304 = vmatmul.bf16.gmra.mxu0 %v2204_v20  ;;  %v2932_v56 = vor.u32 %v2931_v5, %v5397_v4  ;;  %v2935_v20 = vshll.u32 %v2872_v6, 16  ;;  %v2401_v32 = vrot.slane %v2399_v16, 4  ;;  %v2400_v58 = vsel %vm5082_vm13, %v4203_v31, %v2399_v16  ;;  %v2349_v6 = vld [vmem:[#allocation2 + $0x28] sm:$0xf] }
 0x12b   : > { %v5377_v37 = vpop.f32.mrf.mxu2  ;;  %v2481_v4 = vunpack.c.l.b16 %v2400_v58 }
 0x12c   : > { %v2933_v36 = vrot.slane %v2932_v56, 4  ;;  %v2937_v38 = vrot.slane %v2935_v20, 5  ;;  %v2403_v59 = vsel %vm5082_vm13, %v2401_v32, %v2402_v35  ;;  %v3284_v20 = vld [vmem:[#allocation2 + $0x34] sm:$0xf]  ;;  %v4511_v35 = vld [vmem:[#allocation2 + $0x24] sm:$0xff] }
 0x12d   : > { %v5383_v40 = vpop.f32.mrf.mxu3  ;;  %v5393_v46 = vpop.f32.mrf.mxu1  ;;  %v2482_v16 = vunpack.c.l.b16 %v2403_v59 }
 0x12e   : > { %v2938_v61 = vsel %vm5076_vm12, %v2933_v36, %v2937_v38  ;;  %v3341_v36 = vrot.slane %v3284_v20, 5 }
 0x12f   : > { %v5395_v55 = vpop.f32.mrf.mxu0  ;;  %v2496_v34 = vpack.c.b16 %v2482_v16, %v2481_v4 }
 0x130   : > { %v3343_v60 = vrot.slane %v3341_v36, 4 }
 0x133   : > { %v5399_v7 = vpop.f32.mrf.mxu2 }
 0x135   : > { %v5401_v10 = vpop.f32.mrf.mxu3  ;;  %v1333_v17 = vpop.f32.mrf.mxu1 }
 0x136   : > { %v1373_v21 = vadd.f32 %v1333_v17, %v5347_v25  ;;  %v3337_v25 = vrot.slane %v3282_v30, 5  ;;  %v2875_v17 = vld [vmem:[#allocation2 + $0x38] sm:$0x1] }
 0x137   : > { %v2270_v22 = vpop.f32.mrf.mxu0  ;;  %v2959_v31 = vshll.u32 %v2875_v17, 16 }
 0x138   : > { %2567 = vmatmul.bf16.vlgmr.msra.gmra.mxu1 %v2495_v11  ;;  %2794 = vmatmul.bf16.vlgmr.msra.gmra.mxu2 %v4510_v12  ;;  %v3338_v5 = vsel %vm5082_vm13, %v3336_v1, %v3337_v25  ;;  %v2945_v11 = vrot.slane %v2943_v45, 5  ;;  %v5419_v12 = vrot.slane %v2949_v49, 5  ;;  %v3283_v1 = vld [vmem:[#allocation2 + $0x30] sm:$0xe]  ;;  %v3285_v25 = vld [vmem:[#allocation2 + $0x38] sm:$0x1] }
 0x139   : > { %v3417_v56 = vunpack.c.l.b16 %v3338_v5  ;;  %v4204_v49 = vrot.slane %v2348_v27, 9  ;;  %v2961_v58 = vrot.slane %v2959_v31, 5  ;;  %v4388_v59 = vrot.slane %v3283_v1, 9  ;;  %v3287_v1 = vld [vmem:[#allocation2 + $0x40] sm:$0xf] }
 0x13a   : > { %3204 = vmatmul.bf16.vlgmr.msra.gmra.mxu3 %v3132_v14  ;;  %3502 = vmatmul.bf16.vlgmr.msra.gmra.mxu0 %v3430_v13  ;;  %v2955_v14 = vrot.slane %v2953_v50, 4  ;;  %v2946_v28 = vor.u32 %v2945_v11, %v2942_v8 }
 0x13b   : > { %v1634_v42 = vpop.f32.mrf.mxu2  ;;  %v3431_v39 = vpack.c.b16 %v3417_v56, %v3416_v44  ;;  %v3342_v4 = vsel %vm5082_vm13, %v4388_v59, %v3341_v36  ;;  %v2973_v44 = vshll.u32 %v2877_v3, 16  ;;  %v2977_v56 = vshrl.u32 %v2877_v3, 16  ;;  %v2353_v3 = vld [vmem:[#allocation2 + $0x38] sm:$0x1] }
 0x13c   : > { %v1674_v51 = vadd.f32 %v1634_v42, %v1373_v21  ;;  %v2406_v21 = vrot.slane %v2349_v6, 5  ;;  %v2956_v30 = vor.u32 %v2955_v14, %v5419_v12  ;;  %v3418_v31 = vunpack.c.l.b16 %v3342_v4 }
 0x13d   : > { %v1860_v52 = vpop.f32.mrf.mxu3  ;;  %v1335_v57 = vpop.f32.mrf.mxu1  ;;  %v5443_v36 = vrot.slane %v2973_v44, 5 }
 0x13e   : > { %v1900_v2 = vadd.f32 %v1860_v52, %v1674_v51  ;;  %v1374_v62 = vadd.f32 %v1335_v57, %v5363_v54  ;;  %v3119_v54 = vunpack.c.l.b16 %v2938_v61  ;;  %v2408_v50 = vrot.slane %v2406_v21, 4 }
 0x13f   : > { %v2272_v63 = vpop.f32.mrf.mxu0  ;;  %v2409_v51 = vrot.slane %v2350_v0, 5  ;;  %v2947_v52 = vrot.slane %v2946_v28, 4  ;;  %v2957_v57 = vrot.slane %v2956_v30, 4  ;;  %v3344_v61 = vrot.slane %v3285_v25, 5 }
 0x140   : > { %v5421_v13 = vadd.f32 %v2270_v22, %v1900_v2  ;;  %v3133_v38 = vpack.c.b16 %v3119_v54, %v3118_v18 }
 0x141   : > { %v2410_v6 = vsel %vm5082_vm13, %v2408_v50, %v2409_v51  ;;  %v2952_v8 = vsel %vm5076_vm12, %v2947_v52, %v5419_v12  ;;  %v3345_v16 = vsel %vm5082_vm13, %v3343_v60, %v3344_v61 }
 0x142   : > { %v2484_v27 = vunpack.c.l.b16 %v2410_v6  ;;  %v3120_v28 = vunpack.c.l.b16 %v2952_v8  ;;  %v3288_v6 = vld [vmem:[#allocation2 + $0x44] sm:$0x1] }
 0x143   : > { %v1636_v26 = vpop.f32.mrf.mxu2 }
 0x144   : > { %v1675_v32 = vadd.f32 %v1636_v26, %v1374_v62  ;;  %v2876_v62 = vld [vmem:[#allocation2 + $0x3c] sm:$0xf] }
 0x145   : > { %v1862_v33 = vpop.f32.mrf.mxu3  ;;  %v1338_v22 = vpop.f32.mrf.mxu1  ;;  %v2964_v18 = vshrl.u32 %v2876_v62, 16  ;;  %v2967_v54 = vshll.u32 %v2876_v62, 16 }
 0x146   : > { %v1901_v42 = vadd.f32 %v1862_v33, %v1675_v32  ;;  %v1375_v43 = vadd.f32 %v1338_v22, %v5375_v23  ;;  %v2407_v23 = vsel %vm5082_vm13, %v4204_v49, %v2406_v21  ;;  %v3419_v32 = vunpack.c.l.b16 %v3345_v16 }
 0x147   : > { %v2275_v45 = vpop.f32.mrf.mxu0  ;;  %v2483_v26 = vunpack.c.l.b16 %v2407_v23  ;;  %v2969_v0 = vrot.slane %v2967_v54, 5  ;;  %v2979_v22 = vrot.slane %v2977_v56, 4  ;;  %v3286_v23 = vld [vmem:[#allocation2 + $0x3c] sm:$0xe]  ;;  %v2416_v16 = vrot.slane %v2353_v3, 5 }
 0x148   : > { %2572 = vmatmul.bf16.gmra.mxu1 %v2496_v34  ;;  %2799 = vmatmul.bf16.gmra.mxu2 %v4511_v35  ;;  %v5425_v2 = vadd.f32 %v2272_v63, %v1901_v42  ;;  %v2962_v63 = vsel %vm5076_vm12, %v2957_v57, %v2961_v58  ;;  %v2352_v34 = vld [vmem:[#allocation2 + $0x34] sm:$0xf]  ;;  %v2966_v35 = vrot.slane %v2964_v18, 4  ;;  %v3432_v52 = vpack.c.b16 %v3419_v32, %v3418_v31  ;;  %v2351_v57 = vld [vmem:[#allocation2 + $0x30] sm:$0xe] }
 0x149   : > { %v3121_v30 = vunpack.c.l.b16 %v2962_v63  ;;  %v2497_v42 = vpack.c.b16 %v2484_v27, %v2483_v26  ;;  %v2413_v50 = vrot.slane %v2352_v34, 5  ;;  %v2980_v58 = vor.u32 %v2979_v22, %v5443_v36  ;;  %v2880_v63 = vld [vmem:[#allocation2 + $0x4c] sm:$0xf] }
 0x14a   : > { %3209 = vmatmul.bf16.gmra.mxu3 %v3133_v38  ;;  %3507 = vmatmul.bf16.gmra.mxu0 %v3431_v39  ;;  %v2878_v38 = vld [vmem:[#allocation2 + $0x44] sm:$0x1]  ;;  %v4205_v8 = vrot.slane %v2351_v57, 9  ;;  %v3351_v56 = vrot.slane %v3288_v6, 5  ;;  %v2997_v27 = vshll.u32 %v2880_v63, 16 }
 0x14b   : > { %v1639_v5 = vpop.f32.mrf.mxu2  ;;  %v3134_v49 = vpack.c.b16 %v3121_v30, %v3120_v28  ;;  %v2983_v59 = vshll.u32 %v2878_v38, 16  ;;  %v2981_v18 = vrot.slane %v2980_v58, 4  ;;  %v3001_v28 = vshrl.u32 %v2880_v63, 16 }
 0x14c   : > { %v1676_v11 = vadd.f32 %v1639_v5, %v1375_v43  ;;  %v4512_v43 = vld [vmem:[#allocation2 + $0x30] sm:$0xff]  ;;  %v3348_v5 = vrot.slane %v3287_v1, 5 }
 0x14d   : > { %v1865_v14 = vpop.f32.mrf.mxu3  ;;  %v1340_v17 = vpop.f32.mrf.mxu1  ;;  %v2985_v54 = vrot.slane %v2983_v59, 5 }
 0x14e   : > { %v1902_v20 = vadd.f32 %v1865_v14, %v1676_v11  ;;  %v1376_v21 = vadd.f32 %v1340_v17, %v5395_v55  ;;  %v2415_v11 = vrot.slane %v2413_v50, 4  ;;  %v2879_v14 = vld [vmem:[#allocation2 + $0x48] sm:$0xf]  ;;  %v3350_v44 = vrot.slane %v3348_v5, 4 }
 0x14f   : > { %v2277_v12 = vpop.f32.mrf.mxu0  ;;  %v2991_v26 = vshll.u32 %v2879_v14, 16 }
 0x150   : > { %v5441_v33 = vadd.f32 %v2275_v45, %v1902_v20  ;;  %v2970_v45 = vor.u32 %v2969_v0, %v2966_v35  ;;  %v2417_v34 = vsel %vm5082_vm13, %v2415_v11, %v2416_v16  ;;  %v2986_v0 = vsel %vm5076_vm12, %v2981_v18, %v2985_v54  ;;  %v4513_v16 = vld [vmem:[#allocation2 + $0x3c] sm:$0xff] }
 0x152   : > { %v2971_v17 = vrot.slane %v2970_v45, 4 }
 0x153   : > { %v1641_v39 = vpop.f32.mrf.mxu2 }
 0x154   : > { %v1677_v25 = vadd.f32 %v1641_v39, %v1376_v21  ;;  %v2988_v21 = vshrl.u32 %v2879_v14, 16  ;;  %v2976_v35 = vsel %vm5076_vm12, %v2971_v17, %v5443_v36  ;;  %v2356_v17 = vld [vmem:[#allocation2 + $0x44] sm:$0x1] }
 0x155   : > { %v1867_v55 = vpop.f32.mrf.mxu3  ;;  %v1343_v51 = vpop.f32.mrf.mxu1  ;;  %v3122_v45 = vunpack.c.l.b16 %v2976_v35 }
 0x156   : > { %v1903_v60 = vadd.f32 %v1867_v55, %v1677_v25  ;;  %v1377_v61 = vadd.f32 %v1343_v51, %v5345_v19  ;;  %v4389_v19 = vrot.slane %v3286_v23, 9  ;;  %v3352_v25 = vsel %vm5082_vm13, %v3350_v44, %v3351_v56  ;;  %v2355_v55 = vld [vmem:[#allocation2 + $0x40] sm:$0xf]  ;;  %v3289_v44 = vld [vmem:[#allocation2 + $0x48] sm:$0xe] }
 0x157   : > { %v2280_v62 = vpop.f32.mrf.mxu0  ;;  %v2486_v51 = vunpack.c.l.b16 %v2417_v34  ;;  %v3421_v59 = vunpack.c.l.b16 %v3352_v25  ;;  %v3291_v56 = vld [vmem:[#allocation2 + $0x50] sm:$0x1]  ;;  %v4390_v34 = vrot.slane %v3289_v44, 9  ;;  %v3293_v44 = vld [vmem:[#allocation2 + $0x58] sm:$0xf] }
 0x158   : > { %2577 = vmatmul.bf16.gmra.mxu1 %v2497_v42  ;;  %2804 = vmatmul.bf16.gmra.mxu2 %v4512_v43  ;;  %v5447_v4 = vadd.f32 %v2277_v12, %v1903_v60  ;;  %v2414_v12 = vsel %vm5082_vm13, %v4205_v8, %v2413_v50  ;;  %v3349_v1 = vsel %vm5082_vm13, %v4389_v19, %v3348_v5  ;;  %v2990_v42 = vrot.slane %v2988_v21, 4  ;;  %v3290_v60 = vld [vmem:[#allocation2 + $0x4c] sm:$0xf]  ;;  %v2354_v5 = vld [vmem:[#allocation2 + $0x3c] sm:$0xe] }
 0x159   : > { %v2993_v43 = vrot.slane %v2991_v26, 5  ;;  %v3003_v50 = vrot.slane %v3001_v28, 4  ;;  %v2485_v36 = vunpack.c.l.b16 %v2414_v12  ;;  %v3420_v58 = vunpack.c.l.b16 %v3349_v1  ;;  %v2883_v1 = vld [vmem:[#allocation2 + $0x58] sm:$0xf] }
 0x15a   : > { %3214 = vmatmul.bf16.gmra.mxu3 %v3134_v49  ;;  %3512 = vmatmul.bf16.gmra.mxu0 %v3432_v52  ;;  %v5463_v49 = vrot.slane %v2997_v27, 5  ;;  %v2881_v52 = vld [vmem:[#allocation2 + $0x50] sm:$0x1]  ;;  %v3355_v18 = vrot.slane %v3290_v60, 5  ;;  %v4206_v27 = vrot.slane %v2354_v5, 9 }
 0x15b   : > { %v1644_v20 = vpop.f32.mrf.mxu2  ;;  %v2994_v23 = vor.u32 %v2993_v43, %v2990_v42  ;;  %v3007_v8 = vshll.u32 %v2881_v52, 16  ;;  %v2498_v63 = vpack.c.b16 %v2486_v51, %v2485_v36  ;;  %v3433_v19 = vpack.c.b16 %v3421_v59, %v3420_v58 }
 0x15c   : > { %v1678_v30 = vadd.f32 %v1644_v20, %v1377_v61  ;;  %v2420_v61 = vrot.slane %v2355_v55, 5  ;;  %v3004_v6 = vor.u32 %v3003_v50, %v5463_v49  ;;  %v3357_v35 = vrot.slane %v3355_v18, 4 }
 0x15d   : > { %v1870_v31 = vpop.f32.mrf.mxu3  ;;  %v1345_v32 = vpop.f32.mrf.mxu1  ;;  %v3009_v12 = vrot.slane %v3007_v8, 5  ;;  %v3356_v36 = vsel %vm5082_vm13, %v4390_v34, %v3355_v18  ;;  %v3021_v58 = vshll.u32 %v2883_v1, 16  ;;  %v3025_v59 = vshrl.u32 %v2883_v1, 16 }
 0x15e   : > { %v1904_v22 = vadd.f32 %v1870_v31, %v1678_v30  ;;  %v1378_v38 = vadd.f32 %v1345_v32, %v5353_v48  ;;  %v3123_v48 = vunpack.c.l.b16 %v2986_v0  ;;  %v2422_v28 = vrot.slane %v2420_v61, 4 }
 0x15f   : > { %v2282_v39 = vpop.f32.mrf.mxu0  ;;  %v2423_v30 = vrot.slane %v2356_v17, 5  ;;  %v2995_v31 = vrot.slane %v2994_v23, 4  ;;  %v3005_v32 = vrot.slane %v3004_v6, 4  ;;  %v3358_v0 = vrot.slane %v3291_v56, 5 }
 0x160   : > { %v5465_v57 = vadd.f32 %v2280_v62, %v1904_v22  ;;  %v3135_v54 = vpack.c.b16 %v3123_v48, %v3122_v45  ;;  %v3422_v8 = vunpack.c.l.b16 %v3356_v36  ;;  %v5487_v18 = vrot.slane %v3021_v58, 5 }
 0x161   : > { %v2424_v55 = vsel %vm5082_vm13, %v2422_v28, %v2423_v30  ;;  %v3000_v42 = vsel %vm5076_vm12, %v2995_v31, %v5463_v49  ;;  %v3359_v51 = vsel %vm5082_vm13, %v3357_v35, %v3358_v0  ;;  %v3362_v1 = vrot.slane %v3293_v44, 5 }
 0x162   : > { %v2488_v5 = vunpack.c.l.b16 %v2424_v55  ;;  %v3124_v23 = vunpack.c.l.b16 %v3000_v42 }
 0x163   : > { %v1646_v3 = vpop.f32.mrf.mxu2 }
 0x164   : > { %v1679_v11 = vadd.f32 %v1646_v3, %v1378_v38  ;;  %v2882_v38 = vld [vmem:[#allocation2 + $0x54] sm:$0xf] }
 0x165   : > { %v1872_v14 = vpop.f32.mrf.mxu3  ;;  %v1348_v62 = vpop.f32.mrf.mxu1  ;;  %v3012_v45 = vshrl.u32 %v2882_v38, 16  ;;  %v3015_v48 = vshll.u32 %v2882_v38, 16  ;;  %v2359_v38 = vld [vmem:[#allocation2 + $0x50] sm:$0x1] }
 0x166   : > { %v1905_v20 = vadd.f32 %v1872_v14, %v1679_v11  ;;  %v1379_v21 = vadd.f32 %v1348_v62, %v5373_v53  ;;  %v2421_v53 = vsel %vm5082_vm13, %v4206_v27, %v2420_v61  ;;  %v3423_v11 = vunpack.c.l.b16 %v3359_v51 }
 0x167   : > { %v2285_v26 = vpop.f32.mrf.mxu0  ;;  %v2487_v3 = vunpack.c.l.b16 %v2421_v53  ;;  %v3017_v17 = vrot.slane %v3015_v48, 5  ;;  %v3027_v62 = vrot.slane %v3025_v59, 4  ;;  %v3294_v53 = vld [vmem:[#allocation2 + $0x5c] sm:$0x1]  ;;  %v2430_v36 = vrot.slane %v2359_v38, 5 }
 0x168   : > { %2582 = vmatmul.bf16.gmra.mxu1 %v2498_v63  ;;  %2809 = vmatmul.bf16.gmra.mxu2 %v4513_v16  ;;  %v5469_v22 = vadd.f32 %v2282_v39, %v1905_v20  ;;  %v3010_v39 = vsel %vm5076_vm12, %v3005_v32, %v3009_v12  ;;  %v2358_v63 = vld [vmem:[#allocation2 + $0x4c] sm:$0xf]  ;;  %v3014_v16 = vrot.slane %v3012_v45, 4  ;;  %v3434_v31 = vpack.c.b16 %v3423_v11, %v3422_v8  ;;  %v2357_v32 = vld [vmem:[#allocation2 + $0x48] sm:$0xe] }
 0x169   : > { %v3125_v6 = vunpack.c.l.b16 %v3010_v39  ;;  %v2499_v20 = vpack.c.b16 %v2488_v5, %v2487_v3  ;;  %v2427_v28 = vrot.slane %v2358_v63, 5  ;;  %v3028_v12 = vor.u32 %v3027_v62, %v5487_v18 }
 0x16a   : > { %3219 = vmatmul.bf16.gmra.mxu3 %v3135_v54  ;;  %3517 = vmatmul.bf16.gmra.mxu0 %v3433_v19  ;;  %v2884_v54 = vld [vmem:[#allocation2 + $0x5c] sm:$0x1]  ;;  %v4207_v55 = vrot.slane %v2357_v32, 9  ;;  %v3364_v59 = vrot.slane %v3362_v1, 4 }
 0x16b   : > { %v1649_v25 = vpop.f32.mrf.mxu2  ;;  %v3136_v27 = vpack.c.b16 %v3125_v6, %v3124_v23  ;;  %v3031_v34 = vshll.u32 %v2884_v54, 16  ;;  %v2429_v42 = vrot.slane %v2427_v28, 4 }
 0x16c   : > { %v1680_v43 = vadd.f32 %v1649_v25, %v1379_v21  ;;  %v4514_v21 = vld [vmem:[#allocation2 + $0x48] sm:$0xff]  ;;  %v3292_v25 = vld [vmem:[#allocation2 + $0x54] sm:$0xe]  ;;  %v2428_v63 = vsel %vm5082_vm13, %v4207_v55, %v2427_v28 }
 0x16d   : > { %v1875_v50 = vpop.f32.mrf.mxu3  ;;  %v1350_v52 = vpop.f32.mrf.mxu1  ;;  %v3033_v45 = vrot.slane %v3031_v34, 5  ;;  %v4391_v58 = vrot.slane %v3292_v25, 9  ;;  %v2489_v28 = vunpack.c.l.b16 %v2428_v63 }
 0x16e   : > { %v1906_v60 = vadd.f32 %v1875_v50, %v1680_v43  ;;  %v1380_v61 = vadd.f32 %v1350_v52, %v5393_v46  ;;  %v2885_v43 = vld [vmem:[#allocation2 + $0x60] sm:$0xf]  ;;  %v2886_v50 = vld [vmem:[#allocation2 + $0x64] sm:$0xf]  ;;  %v3029_v52 = vrot.slane %v3028_v12, 4 }
 0x16f   : > { %v2287_v49 = vpop.f32.mrf.mxu0  ;;  %v3036_v3 = vshrl.u32 %v2885_v43, 16  ;;  %v3039_v5 = vshll.u32 %v2885_v43, 16  ;;  %v3045_v23 = vshll.u32 %v2886_v50, 16  ;;  %v3049_v6 = vshrl.u32 %v2886_v50, 16 }
 0x170   : > { %v5485_v14 = vadd.f32 %v2285_v26, %v1906_v60  ;;  %v3018_v26 = vor.u32 %v3017_v17, %v3014_v16  ;;  %v3365_v60 = vrot.slane %v3294_v53, 5  ;;  %v2431_v16 = vsel %vm5082_vm13, %v2429_v42, %v2430_v36  ;;  %v2360_v53 = vld [vmem:[#allocation2 + $0x54] sm:$0xe] }
 0x171   : > { %v3034_v54 = vsel %vm5076_vm12, %v3029_v52, %v3033_v45  ;;  %v4515_v52 = vld [vmem:[#allocation2 + $0x54] sm:$0xff] }
 0x172   : > { %v3019_v51 = vrot.slane %v3018_v26, 4  ;;  %v3366_v44 = vsel %vm5082_vm13, %v3364_v59, %v3365_v60  ;;  %v3127_v26 = vunpack.c.l.b16 %v3034_v54  ;;  %v3295_v60 = vld [vmem:[#allocation2 + $0x60] sm:$0xe] }
 0x173   : > { %v1651_v19 = vpop.f32.mrf.mxu2  ;;  %v3425_v34 = vunpack.c.l.b16 %v3366_v44  ;;  %v4392_v63 = vrot.slane %v3295_v60, 9  ;;  %v2889_v44 = vld [vmem:[#allocation2 + $0x70] sm:$0xf] }
 0x174   : > { %v1681_v56 = vadd.f32 %v1651_v19, %v1380_v61  ;;  %v3363_v19 = vsel %vm5082_vm13, %v4391_v58, %v3362_v1  ;;  %v3299_v60 = vld [vmem:[#allocation2 + $0x70] sm:$0xf] }
 0x175   : > { %v1877_v46 = vpop.f32.mrf.mxu3  ;;  %v1353_v30 = vpop.f32.mrf.mxu1  ;;  %v3424_v12 = vunpack.c.l.b16 %v3363_v19  ;;  %v2888_v19 = vld [vmem:[#allocation2 + $0x6c] sm:$0xf] }
 0x176   : > { %v1907_v35 = vadd.f32 %v1877_v46, %v1681_v56  ;;  %v1381_v48 = vadd.f32 %v1353_v30, %v5349_v41  ;;  %v3024_v41 = vsel %vm5076_vm12, %v3019_v51, %v5487_v18  ;;  %v2361_v56 = vld [vmem:[#allocation2 + $0x58] sm:$0xf]  ;;  %v3038_v46 = vrot.slane %v3036_v3, 4  ;;  %v2887_v18 = vld [vmem:[#allocation2 + $0x68] sm:$0x1] }
 0x177   : > { %v2290_v0 = vpop.f32.mrf.mxu0  ;;  %v2490_v30 = vunpack.c.l.b16 %v2431_v16  ;;  %v3126_v32 = vunpack.c.l.b16 %v3024_v41  ;;  %v2434_v1 = vrot.slane %v2361_v56, 5  ;;  %v3055_v43 = vshll.u32 %v2887_v18, 16 }
 0x178   : > { %2587 = vmatmul.bf16.gmra.mxu1 %v2499_v20  ;;  %2814 = vmatmul.bf16.gmra.mxu2 %v4514_v21  ;;  %v5490_v39 = vadd.f32 %v2287_v49, %v1907_v35  ;;  %v3041_v20 = vrot.slane %v3039_v5, 5  ;;  %v5506_v21 = vrot.slane %v3045_v23, 5  ;;  %v3296_v35 = vld [vmem:[#allocation2 + $0x64] sm:$0xf]  ;;  %v3435_v59 = vpack.c.b16 %v3425_v34, %v3424_v12 }
 0x179   : > { %v2500_v51 = vpack.c.b16 %v2490_v30, %v2489_v28  ;;  %v3369_v45 = vrot.slane %v3296_v35, 5  ;;  %v3137_v58 = vpack.c.b16 %v3127_v26, %v3126_v32  ;;  %v4208_v5 = vrot.slane %v2360_v53, 9 }
 0x17a   : > { %3224 = vmatmul.bf16.gmra.mxu3 %v3136_v27  ;;  %3522 = vmatmul.bf16.gmra.mxu0 %v3434_v31  ;;  %v3051_v27 = vrot.slane %v3049_v6, 4  ;;  %v3042_v55 = vor.u32 %v3041_v20, %v3038_v46  ;;  %v2436_v23 = vrot.slane %v2434_v1, 4  ;;  %v3060_v26 = vshrl.u32 %v2888_v19, 16 }
 0x17b   : > { %v1654_v61 = vpop.f32.mrf.mxu2  ;;  %v3371_v16 = vrot.slane %v3369_v45, 4  ;;  %v2435_v46 = vsel %vm5082_vm13, %v4208_v5, %v2434_v1  ;;  %v3063_v12 = vshll.u32 %v2888_v19, 16  ;;  %v3069_v34 = vshll.u32 %v2889_v44, 16 }
 0x17c   : > { %v1682_v8 = vadd.f32 %v1654_v61, %v1381_v48  ;;  %v3052_v42 = vor.u32 %v3051_v27, %v5506_v21  ;;  %v3297_v61 = vld [vmem:[#allocation2 + $0x68] sm:$0x1]  ;;  %v3073_v35 = vshrl.u32 %v2889_v44, 16 }
 0x17d   : > { %v1880_v11 = vpop.f32.mrf.mxu3  ;;  %v1355_v49 = vpop.f32.mrf.mxu1  ;;  %v3372_v41 = vrot.slane %v3297_v61, 5  ;;  %v2365_v44 = vld [vmem:[#allocation2 + $0x68] sm:$0x1] }
 0x17e   : > { %v1908_v17 = vadd.f32 %v1880_v11, %v1682_v8  ;;  %v1382_v38 = vadd.f32 %v1355_v49, %v5369_v9  ;;  %v3043_v8 = vrot.slane %v3042_v55, 4  ;;  %v3053_v11 = vrot.slane %v3052_v42, 4 }
 0x17f   : > { %v2292_v62 = vpop.f32.mrf.mxu0  ;;  %v3057_v49 = vrot.slane %v3055_v43, 5  ;;  %v3373_v18 = vsel %vm5082_vm13, %v3371_v16, %v3372_v41 }
 0x180   : > { %v5508_v31 = vadd.f32 %v2290_v0, %v1908_v17  ;;  %v2362_v0 = vld [vmem:[#allocation2 + $0x5c] sm:$0x1]  ;;  %v3048_v27 = vsel %vm5076_vm12, %v3043_v8, %v5506_v21  ;;  %v3427_v43 = vunpack.c.l.b16 %v3373_v18 }
 0x181   : > { %v2437_v6 = vrot.slane %v2362_v0, 5  ;;  %v3058_v30 = vsel %vm5076_vm12, %v3053_v11, %v3057_v49  ;;  %v3128_v53 = vunpack.c.l.b16 %v3048_v27  ;;  %v3071_v0 = vrot.slane %v3069_v34, 5 }
 0x182   : > { %v3129_v55 = vunpack.c.l.b16 %v3058_v30 }
 0x183   : > { %v1656_v25 = vpop.f32.mrf.mxu2  ;;  %v2438_v20 = vsel %vm5082_vm13, %v2436_v23, %v2437_v6  ;;  %v4516_v23 = vld [vmem:[#allocation2 + $0x60] sm:$0xff] }
 0x184   : > { %v1683_v50 = vadd.f32 %v1656_v25, %v1382_v38  ;;  %v2491_v25 = vunpack.c.l.b16 %v2435_v46  ;;  %v2492_v21 = vunpack.c.l.b16 %v2438_v20  ;;  %v3138_v6 = vpack.c.b16 %v3129_v55, %v3128_v53  ;;  %v3300_v46 = vld [vmem:[#allocation2 + $0x74] sm:$0x1] }
 0x185   : > { %v1882_v36 = vpop.f32.mrf.mxu3  ;;  %v1358_v48 = vpop.f32.mrf.mxu1  ;;  %v3379_v34 = vrot.slane %v3300_v46, 5 }
 0x186   : > { %v1909_v3 = vadd.f32 %v1882_v36, %v1683_v50  ;;  %v1383_v54 = vadd.f32 %v1358_v48, %v5377_v37  ;;  %v3370_v37 = vsel %vm5082_vm13, %v4392_v63, %v3369_v45  ;;  %v2364_v36 = vld [vmem:[#allocation2 + $0x64] sm:$0xf]  ;;  %v3075_v45 = vrot.slane %v3073_v35, 4 }
 0x187   : > { %v2295_v9 = vpop.f32.mrf.mxu0  ;;  %v3426_v42 = vunpack.c.l.b16 %v3370_v37  ;;  %v2501_v5 = vpack.c.b16 %v2492_v21, %v2491_v25  ;;  %v2441_v8 = vrot.slane %v2364_v36, 5 }
 0x188   : > { %2592 = vmatmul.bf16.gmra.mxu1 %v2500_v51  ;;  %2819 = vmatmul.bf16.gmra.mxu2 %v4515_v52  ;;  %v5512_v17 = vadd.f32 %v2292_v62, %v1909_v3  ;;  %v3062_v51 = vrot.slane %v3060_v26, 4  ;;  %v3065_v52 = vrot.slane %v3063_v12, 5  ;;  %v3076_v16 = vor.u32 %v3075_v45, %v3071_v0 }
 0x189   : > { %v3436_v49 = vpack.c.b16 %v3427_v43, %v3426_v42  ;;  %v2443_v27 = vrot.slane %v2441_v8, 4 }
 0x18a   : > { %3229 = vmatmul.bf16.gmra.mxu3 %v3137_v58  ;;  %3527 = vmatmul.bf16.gmra.mxu0 %v3435_v59  ;;  %v2890_v58 = vld [vmem:[#allocation2 + $0x74] sm:$0x1]  ;;  %v3066_v63 = vor.u32 %v3065_v52, %v3062_v51  ;;  %v3077_v37 = vrot.slane %v3076_v16, 4 }
 0x18b   : > { %v1659_v56 = vpop.f32.mrf.mxu2  ;;  %v3079_v41 = vshll.u32 %v2890_v58, 16 }
 0x18c   : > { %v1684_v28 = vadd.f32 %v1659_v56, %v1383_v54  ;;  %v3376_v56 = vrot.slane %v3299_v60, 5  ;;  %v3067_v30 = vrot.slane %v3066_v63, 4 }
 0x18d   : > { %v1885_v62 = vpop.f32.mrf.mxu3  ;;  %v1360_v32 = vpop.f32.mrf.mxu1  ;;  %v3081_v18 = vrot.slane %v3079_v41, 5 }
 0x18e   : > { %v1910_v38 = vadd.f32 %v1885_v62, %v1684_v28  ;;  %v1384_v48 = vadd.f32 %v1360_v32, %v5399_v7  ;;  %v3298_v7 = vld [vmem:[#allocation2 + $0x6c] sm:$0xe]  ;;  %v2444_v62 = vrot.slane %v2365_v44, 5  ;;  %v3378_v12 = vrot.slane %v3376_v56, 4 }
 0x18f   : > { %v2297_v1 = vpop.f32.mrf.mxu0  ;;  %v4393_v26 = vrot.slane %v3298_v7, 9  ;;  %v3072_v55 = vsel %vm5076_vm12, %v3067_v30, %v3071_v0 }
 0x190   : > { %v5528_v50 = vadd.f32 %v2295_v9, %v1910_v38  ;;  %v2363_v9 = vld [vmem:[#allocation2 + $0x60] sm:$0xe]  ;;  %v3380_v51 = vsel %vm5082_vm13, %v3378_v12, %v3379_v34  ;;  %v3130_v58 = vunpack.c.l.b16 %v3072_v55 }
 0x191   : > { %v4209_v20 = vrot.slane %v2363_v9, 9  ;;  %v3377_v36 = vsel %vm5082_vm13, %v4393_v26, %v3376_v56  ;;  %v4543_v12 = vld [vmem:[%s4777_s14] sm:$0xff]  }
 0x192   : > { %v3428_v60 = vunpack.c.l.b16 %v3377_v36 }
 0x193   : > { %v1661_v59 = vpop.f32.mrf.mxu2  ;;  %v2442_v53 = vsel %vm5082_vm13, %v4209_v20, %v2441_v8 }
 0x194   : > { %v1685_v61 = vadd.f32 %v1661_v59, %v1384_v48  ;;  %v2493_v52 = vunpack.c.l.b16 %v2442_v53 }
 0x195   : > { %v1887_v3 = vpop.f32.mrf.mxu3  ;;  %v1363_v11 = vpop.f32.mrf.mxu1 }
 0x196   : > { %v1911_v54 = vadd.f32 %v1887_v3, %v1685_v61  ;;  %v1385_v32 = vadd.f32 %v1363_v11, %v5351_v47  ;;  %v3082_v47 = vsel %vm5076_vm12, %v3077_v37, %v3081_v18  ;;  %v3429_v61 = vunpack.c.l.b16 %v3380_v51 }
 0x197   : > { %v2300_v19 = vpop.f32.mrf.mxu0  ;;  %v3131_v59 = vunpack.c.l.b16 %v3082_v47  ;;  %v4545_v51 = vunpack.c.h.bf16 %v4543_v12 }
 0x198   : > { %2597 = vmatmul.bf16.gmra.mxu1 %v2501_v5  ;;  %2824 = vmatmul.bf16.gmra.mxu2 %v4516_v23  ;;  %v5531_v28 = vadd.f32 %v2297_v1, %v1911_v54  ;;  %v2445_v1 = vsel %vm5082_vm13, %v2443_v27, %v2444_v62 }
 0x199   : > { %v2494_v45 = vunpack.c.l.b16 %v2445_v1  ;;  %v3139_v11 = vpack.c.b16 %v3131_v59, %v3130_v58 }
 0x19a   : > { %3234 = vmatmul.bf16.gmra.mxu3 %v3138_v6  ;;  %3532 = vmatmul.bf16.gmra.mxu0 %v3436_v49  ;;  %v4517_v6 = vld [vmem:[#allocation2 + $0x6c] sm:$0xff]  ;;  %v3437_v49 = vpack.c.b16 %v3429_v61, %v3428_v60 }
 0x19b   : > { %v1664_v35 = vpop.f32.mrf.mxu2  ;;  %v2502_v23 = vpack.c.b16 %v2494_v45, %v2493_v52  ;;  %v4574_v61 = vld [vmem:[%s4777_s14 + $0x8] sm:$0xff]  }
 0x19c   : > { %v1686_v38 = vadd.f32 %v1664_v35, %v1385_v32 }
 0x19d   : > { %v1890_v25 = vpop.f32.mrf.mxu3  ;;  %v1365_v21 = vpop.f32.mrf.mxu1 }
 0x19e   : > { %v1912_v42 = vadd.f32 %v1890_v25, %v1686_v38  ;;  %v1386_v0 = vadd.f32 %v1365_v21, %v5371_v15  ;;  %v4544_v21 = vunpack.c.l.bf16 %v4543_v12 }
 0x19f   : > { %v2302_v43 = vpop.f32.mrf.mxu0 }
 0x1a0   : > { %v5546_v48 = vadd.f32 %v2300_v19, %v1912_v42 }
 0x1a3   : > { %v1666_v3 = vpop.f32.mrf.mxu2 }
 0x1a4   : > { %v1687_v5 = vadd.f32 %v1666_v3, %v1386_v0 }
 0x1a5   : > { %v1892_v24 = vpop.f32.mrf.mxu3  ;;  %v1368_v8 = vpop.f32.mrf.mxu1 }
 0x1a6   : > { %v1913_v29 = vadd.f32 %v1892_v24, %v1687_v5  ;;  %v1387_v16 = vadd.f32 %v1368_v8, %v5383_v40 }
 0x1a7   : > { %v2305_v9 = vpop.f32.mrf.mxu0 }
 0x1a8   : > { %2602 = vmatmul.bf16.gmra.mxu1 %v2502_v23  ;;  %2829 = vmatmul.bf16.gmra.mxu2 %v4517_v6  ;;  %v5549_v63 = vadd.f32 %v2302_v43, %v1913_v29 }
 0x1aa   : > { %3239 = vmatmul.bf16.gmra.mxu3 %v3139_v11  ;;  %3537 = vmatmul.bf16.gmra.mxu0 %v3437_v49  ;;  %v4548_v11 = vunpack.c.l.bf16 %v4574_v61 }
 0x1ab   : > { %v1669_v41 = vpop.f32.mrf.mxu2 }
 0x1ac   : > { %v1688_v15 = vadd.f32 %v1669_v41, %v1387_v16 }
 0x1ad   : > { %v1895_v54 = vpop.f32.mrf.mxu3  ;;  %v1370_v19 = vpop.f32.mrf.mxu1 }
 0x1ae   : > { %v1914_v44 = vadd.f32 %v1895_v54, %v1688_v15  ;;  %v1388_v46 = vadd.f32 %v1370_v19, %v5401_v10 }
 0x1af   : > { %v2307_v56 = vpop.f32.mrf.mxu0 }
 0x1b0   : > { %v5552_v7 = vadd.f32 %v2305_v9, %v1914_v44 }
 0x1b3   : > { %v1671_v20 = vpop.f32.mrf.mxu2 }
 0x1b4   : > { %v1689_v27 = vadd.f32 %v1671_v20, %v1388_v46  ;;  %v4549_v20 = vunpack.c.h.bf16 %v4574_v61 }
 0x1b5   : > { %v1897_v62 = vpop.f32.mrf.mxu3  ;;  %v2568_v30 = vpop.f32.mrf.mxu1 }
 0x1b6   : > { %v1915_v37 = vadd.f32 %v1897_v62, %v1689_v27  ;;  %v2608_v40 = vadd.f32 %v2568_v30, %v5421_v13 }
 0x1b7   : > { %v3503_v18 = vpop.f32.mrf.mxu0 }
 0x1b8   : > { %v5555_v32 = vadd.f32 %v2307_v56, %v1915_v37 }
 0x1bb   : > { %v2795_v26 = vpop.f32.mrf.mxu2 }
 0x1bc   : > { %v2835_v34 = vadd.f32 %v2795_v26, %v2608_v40  ;;  %v4575_v40 = vld [vmem:[%s4777_s14 + $0x10] sm:$0xff]  }
 0x1bd   : > { %v3205_v35 = vpop.f32.mrf.mxu3  ;;  %v2570_v38 = vpop.f32.mrf.mxu1 }
 0x1be   : > { %v3245_v25 = vadd.f32 %v3205_v35, %v2835_v34  ;;  %v2609_v55 = vadd.f32 %v2570_v38, %v5425_v2 }
 0x1bf   : > { %v3505_v53 = vpop.f32.mrf.mxu0 }
 0x1c0   : > { %v3543_v10 = vadd.f32 %v3503_v18, %v3245_v25 }
 0x1c2   : > { %v3623_v1 = vadd.f32 %v4544_v21, %v3543_v10  ;;  %v4552_v21 = vunpack.c.l.bf16 %v4575_v40 }
 0x1c3   : > { %v2797_v42 = vpop.f32.mrf.mxu2 }
 0x1c4   : > { %3699 = vst [vmem:[%s4782_s17] sm:$0xff] %v3623_v1  ;;  %v2836_v43 = vadd.f32 %v2797_v42, %v2609_v55  ;;  %v3661_v0 = vmul.f32 %v3623_v1, %v3623_v1 }
 0x1c5   : > { %v3207_v47 = vpop.f32.mrf.mxu3  ;;  %v2573_v36 = vpop.f32.mrf.mxu1 }
 0x1c6   : > { %v3246_v13 = vadd.f32 %v3207_v47, %v2836_v43  ;;  %v2610_v59 = vadd.f32 %v2573_v36, %v5441_v33 }
 0x1c7   : > { %v3508_v52 = vpop.f32.mrf.mxu0 }
 0x1c8   : > { %v3544_v45 = vadd.f32 %v3505_v53, %v3246_v13 }
 0x1ca   : > { %v3624_v58 = vadd.f32 %v4545_v51, %v3544_v45  ;;  %v4553_v45 = vunpack.c.h.bf16 %v4575_v40 }
 0x1cb   : > { %v2800_v60 = vpop.f32.mrf.mxu2 }
 0x1cc   : > { %v3639_v3 = vadd.f32 %v3624_v58, %v3623_v1  ;;  %v3662_v5 = vmul.f32 %v3624_v58, %v3624_v58  ;;  %3700 = vst [vmem:[%s4782_s17 + $0x8] sm:$0xff] %v3624_v58  ;;  %v2837_v2 = vadd.f32 %v2800_v60, %v2610_v59 }
 0x1cd   : > { %v3210_v24 = vpop.f32.mrf.mxu3  ;;  %v2575_v23 = vpop.f32.mrf.mxu1 }
 0x1ce   : > { %v3677_v6 = vadd.f32 %v3662_v5, %v3661_v0  ;;  %v3247_v8 = vadd.f32 %v3210_v24, %v2837_v2  ;;  %v2611_v16 = vadd.f32 %v2575_v23, %v5447_v4 }
 0x1cf   : > { %v3510_v49 = vpop.f32.mrf.mxu0 }
 0x1d0   : > { %v3545_v29 = vadd.f32 %v3508_v52, %v3247_v8 }
 0x1d2   : > { %v3625_v9 = vadd.f32 %v4548_v11, %v3545_v29 }
 0x1d3   : > { %v2802_v33 = vpop.f32.mrf.mxu2 }
 0x1d4   : > { %v3640_v41 = vadd.f32 %v3639_v3, %v3625_v9  ;;  %v3663_v15 = vmul.f32 %v3625_v9, %v3625_v9  ;;  %3701 = vst [vmem:[%s4782_s17 + $0x10] sm:$0xff] %v3625_v9  ;;  %v2838_v54 = vadd.f32 %v2802_v33, %v2611_v16  ;;  %v4576_v3 = vld [vmem:[%s4777_s14 + $0x18] sm:$0xff]  }
 0x1d5   : > { %v3212_v19 = vpop.f32.mrf.mxu3  ;;  %v2578_v44 = vpop.f32.mrf.mxu1  ;;  %v4556_v11 = vunpack.c.l.bf16 %v4576_v3 }
 0x1d6   : > { %v3678_v56 = vadd.f32 %v3677_v6, %v3663_v15  ;;  %v3248_v46 = vadd.f32 %v3212_v19, %v2838_v54  ;;  %v2612_v37 = vadd.f32 %v2578_v44, %v5465_v57 }
 0x1d7   : > { %v3513_v27 = vpop.f32.mrf.mxu0 }
 0x1d8   : > { %v3546_v62 = vadd.f32 %v3510_v49, %v3248_v46  ;;  %v4557_v46 = vunpack.c.h.bf16 %v4576_v3 }
 0x1da   : > { %v3626_v30 = vadd.f32 %v4549_v20, %v3546_v62 }
 0x1db   : > { %v2805_v18 = vpop.f32.mrf.mxu2 }
 0x1dc   : > { %v3641_v4 = vadd.f32 %v3640_v41, %v3626_v30  ;;  %v3664_v26 = vmul.f32 %v3626_v30, %v3626_v30  ;;  %3702 = vst [vmem:[%s4782_s17 + $0x18] sm:$0xff] %v3626_v30  ;;  %v2839_v12 = vadd.f32 %v2805_v18, %v2612_v37  ;;  %v4577_v18 = vld [vmem:[%s4777_s14 + $0x20] sm:$0xff]  }
 0x1dd   : > { %v3215_v34 = vpop.f32.mrf.mxu3  ;;  %v2580_v35 = vpop.f32.mrf.mxu1 }
 0x1de   : > { %v3679_v38 = vadd.f32 %v3678_v56, %v3664_v26  ;;  %v3249_v25 = vadd.f32 %v3215_v34, %v2839_v12  ;;  %v2613_v55 = vadd.f32 %v2580_v35, %v5469_v22 }
 0x1df   : > { %v3515_v53 = vpop.f32.mrf.mxu0 }
 0x1e0   : > { %v3547_v10 = vadd.f32 %v3513_v27, %v3249_v25 }
 0x1e2   : > { %v3627_v1 = vadd.f32 %v4552_v21, %v3547_v10 }
 0x1e3   : > { %v2807_v42 = vpop.f32.mrf.mxu2 }
 0x1e4   : > { %v3642_v57 = vadd.f32 %v3641_v4, %v3627_v1  ;;  %v3665_v43 = vmul.f32 %v3627_v1, %v3627_v1  ;;  %3703 = vst [vmem:[%s4782_s17 + $0x20] sm:$0xff] %v3627_v1  ;;  %v2840_v47 = vadd.f32 %v2807_v42, %v2613_v55 }
 0x1e5   : > { %v3217_v36 = vpop.f32.mrf.mxu3  ;;  %v2583_v13 = vpop.f32.mrf.mxu1 }
 0x1e6   : > { %v3680_v51 = vadd.f32 %v3679_v38, %v3665_v43  ;;  %v3250_v52 = vadd.f32 %v3217_v36, %v2840_v47  ;;  %v2614_v61 = vadd.f32 %v2583_v13, %v5485_v14  ;;  %v4560_v38 = vunpack.c.l.bf16 %v4577_v18 }
 0x1e7   : > { %v3518_v58 = vpop.f32.mrf.mxu0  ;;  %v4561_v13 = vunpack.c.h.bf16 %v4577_v18 }
 0x1e8   : > { %v3548_v59 = vadd.f32 %v3515_v53, %v3250_v52 }
 0x1ea   : > { %v3628_v60 = vadd.f32 %v4553_v45, %v3548_v59 }
 0x1eb   : > { %v2810_v0 = vpop.f32.mrf.mxu2 }
 0x1ec   : > { %v3643_v22 = vadd.f32 %v3642_v57, %v3628_v60  ;;  %v3666_v5 = vmul.f32 %v3628_v60, %v3628_v60  ;;  %3704 = vst [vmem:[%s4782_s17 + $0x28] sm:$0xff] %v3628_v60  ;;  %v2841_v2 = vadd.f32 %v2810_v0, %v2614_v61  ;;  %v4578_v60 = vld [vmem:[%s4777_s14 + $0x28] sm:$0xff]  }
 0x1ed   : > { %v3220_v24 = vpop.f32.mrf.mxu3  ;;  %v2585_v23 = vpop.f32.mrf.mxu1 }
 0x1ee   : > { %v3681_v6 = vadd.f32 %v3680_v51, %v3666_v5  ;;  %v3251_v8 = vadd.f32 %v3220_v24, %v2841_v2  ;;  %v2615_v16 = vadd.f32 %v2585_v23, %v5490_v39  ;;  %v4564_v24 = vunpack.c.l.bf16 %v4578_v60 }
 0x1ef   : > { %v3520_v49 = vpop.f32.mrf.mxu0 }
 0x1f0   : > { %v3549_v29 = vadd.f32 %v3518_v58, %v3251_v8 }
 0x1f2   : > { %v3629_v9 = vadd.f32 %v4556_v11, %v3549_v29 }
 0x1f3   : > { %v2812_v33 = vpop.f32.mrf.mxu2 }
 0x1f4   : > { %v3644_v14 = vadd.f32 %v3643_v22, %v3629_v9  ;;  %v3667_v41 = vmul.f32 %v3629_v9, %v3629_v9  ;;  %3705 = vst [vmem:[%s4782_s17 + $0x30] sm:$0xff] %v3629_v9  ;;  %v2842_v15 = vadd.f32 %v2812_v33, %v2615_v16 }
 0x1f5   : > { %v3222_v54 = vpop.f32.mrf.mxu3  ;;  %v2588_v19 = vpop.f32.mrf.mxu1 }
 0x1f6   : > { %v3682_v44 = vadd.f32 %v3681_v6, %v3667_v41  ;;  %v3252_v56 = vadd.f32 %v3222_v54, %v2842_v15  ;;  %v2616_v30 = vadd.f32 %v2588_v19, %v5508_v31  ;;  %v4565_v15 = vunpack.c.h.bf16 %v4578_v60 }
 0x1f7   : > { %v3523_v20 = vpop.f32.mrf.mxu0 }
 0x1f8   : > { %v3550_v27 = vadd.f32 %v3520_v49, %v3252_v56 }
 0x1fa   : > { %v3630_v62 = vadd.f32 %v4557_v46, %v3550_v27 }
 0x1fb   : > { %v2815_v37 = vpop.f32.mrf.mxu2 }
 0x1fc   : > { %v3645_v39 = vadd.f32 %v3644_v14, %v3630_v62  ;;  %v3668_v40 = vmul.f32 %v3630_v62, %v3630_v62  ;;  %3706 = vst [vmem:[%s4782_s17 + $0x38] sm:$0xff] %v3630_v62  ;;  %v2843_v4 = vadd.f32 %v2815_v37, %v2616_v30 }
 0x1fd   : > { %v3225_v26 = vpop.f32.mrf.mxu3  ;;  %v2590_v12 = vpop.f32.mrf.mxu1 }
 0x1fe   : > { %v3683_v34 = vadd.f32 %v3682_v44, %v3668_v40  ;;  %v3253_v35 = vadd.f32 %v3225_v26, %v2843_v4  ;;  %v2617_v10 = vadd.f32 %v2590_v12, %v5512_v17 }
 0x1ff   : > { %v3525_v25 = vpop.f32.mrf.mxu0 }
 0x200   : > { %v3551_v21 = vadd.f32 %v3523_v20, %v3253_v35  ;;  %v4579_v20 = vld [vmem:[%s4777_s14 + $0x30] sm:$0xff]  }
 0x201   : > { %v4568_v40 = vunpack.c.l.bf16 %v4579_v20 }
 0x202   : > { %v3631_v53 = vadd.f32 %v4560_v38, %v3551_v21 }
 0x203   : > { %v2817_v1 = vpop.f32.mrf.mxu2 }
 0x204   : > { %v3646_v31 = vadd.f32 %v3645_v39, %v3631_v53  ;;  %v3669_v55 = vmul.f32 %v3631_v53, %v3631_v53  ;;  %3707 = vst [vmem:[%s4782_s17 + $0x40] sm:$0xff] %v3631_v53  ;;  %v2844_v42 = vadd.f32 %v2817_v1, %v2617_v10 }
 0x205   : > { %v3227_v57 = vpop.f32.mrf.mxu3  ;;  %v2593_v43 = vpop.f32.mrf.mxu1 }
 0x206   : > { %v3684_v47 = vadd.f32 %v3683_v34, %v3669_v55  ;;  %v3254_v36 = vadd.f32 %v3227_v57, %v2844_v42  ;;  %v2618_v58 = vadd.f32 %v2593_v43, %v5528_v50 }
 0x207   : > { %v3528_v51 = vpop.f32.mrf.mxu0 }
 0x208   : > { %v3552_v52 = vadd.f32 %v3525_v25, %v3254_v36 }
 0x20a   : > { %v3632_v45 = vadd.f32 %v4561_v13, %v3552_v52 }
 0x20b   : > { %v2820_v59 = vpop.f32.mrf.mxu2 }
 0x20c   : > { %v3647_v17 = vadd.f32 %v3646_v31, %v3632_v45  ;;  %v3670_v61 = vmul.f32 %v3632_v45, %v3632_v45  ;;  %3708 = vst [vmem:[%s4782_s17 + $0x48] sm:$0xff] %v3632_v45  ;;  %v2845_v0 = vadd.f32 %v2820_v59, %v2618_v58  ;;  %v4569_v31 = vunpack.c.h.bf16 %v4579_v20 }
 0x20d   : > { %v3230_v3 = vpop.f32.mrf.mxu3  ;;  %v2595_v22 = vpop.f32.mrf.mxu1 }
 0x20e   : > { %v3685_v5 = vadd.f32 %v3684_v47, %v3670_v61  ;;  %v3255_v2 = vadd.f32 %v3230_v3, %v2845_v0  ;;  %v2619_v11 = vadd.f32 %v2595_v22, %v5531_v28  ;;  %v4580_v47 = vld [vmem:[%s4777_s14 + $0x38] sm:$0xff]  }
 0x20f   : > { %v3530_v23 = vpop.f32.mrf.mxu0  ;;  %v4572_v59 = vunpack.c.l.bf16 %v4580_v47 }
 0x210   : > { %v3553_v6 = vadd.f32 %v3528_v51, %v3255_v2 }
 0x212   : > { %v3633_v8 = vadd.f32 %v4564_v24, %v3553_v6  ;;  %v4573_v6 = vunpack.c.h.bf16 %v4580_v47 }
 0x213   : > { %v2822_v49 = vpop.f32.mrf.mxu2 }
 0x214   : > { %v3648_v50 = vadd.f32 %v3647_v17, %v3633_v8  ;;  %v3671_v29 = vmul.f32 %v3633_v8, %v3633_v8  ;;  %3709 = vst [vmem:[%s4782_s17 + $0x50] sm:$0xff] %v3633_v8  ;;  %v2846_v9 = vadd.f32 %v2822_v49, %v2619_v11 }
 0x215   : > { %v3232_v16 = vpop.f32.mrf.mxu3  ;;  %v2598_v33 = vpop.f32.mrf.mxu1 }
 0x216   : > { %v3686_v14 = vadd.f32 %v3685_v5, %v3671_v29  ;;  %v3256_v41 = vadd.f32 %v3232_v16, %v2846_v9  ;;  %v2620_v56 = vadd.f32 %v2598_v33, %v5546_v48 }
 0x217   : > { %v3533_v19 = vpop.f32.mrf.mxu0 }
 0x218   : > { %v3554_v54 = vadd.f32 %v3530_v23, %v3256_v41 }
 0x21a   : > { %v3634_v44 = vadd.f32 %v4565_v15, %v3554_v54 }
 0x21b   : > { %v2825_v46 = vpop.f32.mrf.mxu2 }
 0x21c   : > { %v3649_v28 = vadd.f32 %v3648_v50, %v3634_v44  ;;  %v3672_v27 = vmul.f32 %v3634_v44, %v3634_v44  ;;  %3710 = vst [vmem:[%s4782_s17 + $0x58] sm:$0xff] %v3634_v44  ;;  %v2847_v62 = vadd.f32 %v2825_v46, %v2620_v56 }
 0x21d   : > { %v3235_v30 = vpop.f32.mrf.mxu3  ;;  %v2600_v37 = vpop.f32.mrf.mxu1 }
 0x21e   : > { %v3687_v18 = vadd.f32 %v3686_v14, %v3672_v27  ;;  %v3257_v39 = vadd.f32 %v3235_v30, %v2847_v62  ;;  %v2621_v12 = vadd.f32 %v2600_v37, %v5549_v63 }
 0x21f   : > { %v3535_v34 = vpop.f32.mrf.mxu0 }
 0x220   : > { %v3555_v4 = vadd.f32 %v3533_v19, %v3257_v39 }
 0x222   : > { %v3635_v26 = vadd.f32 %v4568_v40, %v3555_v4 }
 0x223   : > { %v2827_v35 = vpop.f32.mrf.mxu2 }
 0x224   : > { %v3650_v48 = vadd.f32 %v3649_v28, %v3635_v26  ;;  %v3673_v38 = vmul.f32 %v3635_v26, %v3635_v26  ;;  %3711 = vst [vmem:[%s4782_s17 + $0x60] sm:$0xff] %v3635_v26  ;;  %v2848_v25 = vadd.f32 %v2827_v35, %v2621_v12 }
 0x225   : > { %v3237_v21 = vpop.f32.mrf.mxu3  ;;  %v2603_v53 = vpop.f32.mrf.mxu1 }
 0x226   : > { %v3688_v10 = vadd.f32 %v3687_v18, %v3673_v38  ;;  %v3258_v1 = vadd.f32 %v3237_v21, %v2848_v25  ;;  %v2622_v57 = vadd.f32 %v2603_v53, %v5552_v7 }
 0x227   : > { %v3538_v52 = vpop.f32.mrf.mxu0 }
 0x228   : > { %v3556_v55 = vadd.f32 %v3535_v34, %v3258_v1 }
 0x22a   : > { %v3636_v42 = vadd.f32 %v4569_v31, %v3556_v55 }
 0x22b   : > { %v2830_v43 = vpop.f32.mrf.mxu2 }
 0x22c   : > { %v3651_v63 = vadd.f32 %v3650_v48, %v3636_v42  ;;  %v3674_v36 = vmul.f32 %v3636_v42, %v3636_v42  ;;  %3712 = vst [vmem:[%s4782_s17 + $0x68] sm:$0xff] %v3636_v42  ;;  %v2849_v13 = vadd.f32 %v2830_v43, %v2622_v57 }
 0x22d   : > { %v3240_v51 = vpop.f32.mrf.mxu3  ;;  %v2605_v60 = vpop.f32.mrf.mxu1 }
 0x22e   : > { %v3689_v45 = vadd.f32 %v3688_v10, %v3674_v36  ;;  %v3259_v58 = vadd.f32 %v3240_v51, %v2849_v13  ;;  %v2623_v0 = vadd.f32 %v2605_v60, %v5555_v32 }
 0x22f   : > { %v3540_v8 = vpop.f32.mrf.mxu0 }
 0x230   : > { %v3557_v17 = vadd.f32 %v3538_v52, %v3259_v58 }
 0x232   : > { %v3637_v61 = vadd.f32 %v4572_v59, %v3557_v17 }
 0x233   : > { %v2832_v3 = vpop.f32.mrf.mxu2 }
 0x234   : > { %v3652_v7 = vadd.f32 %v3651_v63, %v3637_v61  ;;  %v3675_v22 = vmul.f32 %v3637_v61, %v3637_v61  ;;  %3713 = vst [vmem:[%s4782_s17 + $0x70] sm:$0xff] %v3637_v61  ;;  %v2850_v5 = vadd.f32 %v2832_v3, %v2623_v0 }
 0x235   : > { %v3242_v2 = vpop.f32.mrf.mxu3 }
 0x236   : > { %v3690_v24 = vadd.f32 %v3689_v45, %v3675_v22  ;;  %v3260_v23 = vadd.f32 %v3242_v2, %v2850_v5 }
 0x238   : > { %v3558_v11 = vadd.f32 %v3540_v8, %v3260_v23 }
 0x23a   : > { %v3638_v49 = vadd.f32 %v4573_v6, %v3558_v11 }
 0x23c   : > { %v3653_v50 = vadd.f32 %v3652_v7, %v3638_v49  ;;  %v3676_v29 = vmul.f32 %v3638_v49, %v3638_v49  ;;  %3714 = vst [vmem:[%s4782_s17 + $0x78] sm:$0xff] %v3638_v49 }
 0x23e   : > { %v3654_v9 = vrot.slane %v3653_v50, 4  ;;  %v3691_v16 = vadd.f32 %v3690_v24, %v3676_v29 }
 0x240   : > { %v3655_v32 = vadd.f32 %v3654_v9, %v3653_v50  ;;  %v3692_v33 = vrot.slane %v3691_v16, 4 }
 0x242   : > { %v3656_v14 = vrot.slane %v3655_v32, 2  ;;  %v3693_v41 = vadd.f32 %v3692_v33, %v3691_v16 }
 0x244   : > { %v3657_v15 = vadd.f32 %v3656_v14, %v3655_v32  ;;  %v3694_v54 = vrot.slane %v3693_v41, 2 }
 0x246   : > { %v3658_v19 = vrot.slane %v3657_v15, 1  ;;  %v3695_v44 = vadd.f32 %v3694_v54, %v3693_v41 }
 0x248   : > { %v3659_v56 = vadd.f32 %v3658_v19, %v3657_v15  ;;  %v3696_v46 = vrot.slane %v3695_v44, 1 }
 0x24a   : > { %3660 = vst [vmem:[%s4812_s12] sm:$0x1] %v3659_v56  ;;  %v3697_v20 = vadd.f32 %v3696_v46, %v3695_v44 }
 0x24c   : > { %3698 = vst [vmem:[%s4812_s12 + $0x1] sm:$0x1] %v3697_v20 }
 0x24d PF: > { %s16_s22 = sadd.s32 1, %s4690_s22   ;;  %s5630_s18 = smov %s4682_s20 }
 0x24e   : > { %p13_p10 = scmp.ge.s32.totalorder %s16_s22, 6   ;;  %s5631_s19 = smov %s4686_s21 }
 0x24f   : > { %s5632_s20 = smov %s5635_s23  ;;  %s5633_s21 = smov %s5639_s24 }
 0x250   :  { %15 = sbr.rel (!%p13_p10) target bundleno = 3 (0x3), region = 103 }

</bundles_post_ra>
